<compile_context>
chip_gen: v7x
topology: tpu7x:2x2x1
jax: 0.10.0
libtpu: 0.0.40
codegen_flags: <defaults>
</compile_context>

<pallas_src>
import functools

import jax
import jax.numpy as jnp
from jax.experimental import pallas as pl
from jax.experimental.pallas import tpu as pltpu


def _round_up(x, m):
    return (x + m - 1) // m * m


# ----------------------------------------------------------------------------
# Single-invocation Pallas kernel:
#   1) build both im2col slabs in VMEM scratch via static lane-shifted copies,
#   2) one MXU matmul per branch (kept adjacent so the drains overlap),
#   3) folded-BN bias + ReLU epilogue, lane-dense per-batch stores.
# ----------------------------------------------------------------------------
def _syn_conv_kernel(hx_ref, hw_ref, hb_ref, sx_ref, sw_ref, sb_ref,
                     ho_ref, so_ref, hp_ref, sp_ref,
                     *, h_shifts, s_shifts, cin_h, cin_s, m_h, m_s, batch):
    # hx_ref: (B, cin_h, L_h) f32    hw_ref: (C_h, K_h) f32    hb_ref: (C_h, 1)
    # sx_ref: (B, cin_s, L_s) f32    sw_ref: (C_s, K_s) f32    sb_ref: (C_s, 1)
    # ho_ref: (B, C_h, m_h) f32      so_ref: (B, C_s, m_s) f32
    # hp_ref: (K_h, B*m_h) f32 scr   sp_ref: (K_s, B*m_s) f32 scr

    # ---- in-VMEM im2col: one static lane-shifted copy per (batch, offset) ----
    for b in range(batch):
        for off, shift in enumerate(h_shifts):
            hp_ref[off * cin_h:(off + 1) * cin_h, b * m_h:(b + 1) * m_h] = (
                hx_ref[b, :, shift:shift + m_h])
        for off, shift in enumerate(s_shifts):
            sp_ref[off * cin_s:(off + 1) * cin_s, b * m_s:(b + 1) * m_s] = (
                sx_ref[b, :, shift:shift + m_s])

    # ---- MXU matmuls (f32 accumulate), kept adjacent ----
    h_acc = jnp.dot(hw_ref[...], hp_ref[...], preferred_element_type=jnp.float32)
    s_acc = jnp.dot(sw_ref[...], sp_ref[...], preferred_element_type=jnp.float32)

    # ---- folded-BN bias + ReLU epilogue ----
    h_out = jnp.maximum(h_acc + hb_ref[...], 0.0).astype(ho_ref.dtype)
    s_out = jnp.maximum(s_acc + sb_ref[...], 0.0).astype(so_ref.dtype)

    # Lane-dense stores; per-batch slices start at 128-aligned lane offsets.
    for b in range(batch):
        ho_ref[b] = h_out[:, b * m_h:(b + 1) * m_h]
        so_ref[b] = s_out[:, b * m_s:(b + 1) * m_s]


def _fold_bn(conv_bias, gamma, beta, mean, var, eps=1e-5):
    """PyTorch eval-mode BN folded into a per-channel scale/bias."""
    scale = gamma / jnp.sqrt(var + eps)
    bias = beta + (conv_bias - mean) * scale
    return scale, bias


# ----------------------------------------------------------------------------
# Fused Conv(3d/2d)+BN+ReLU for both branches with a single pallas_call.
# ----------------------------------------------------------------------------
def syn_conv_bn_relu(params, hsi, sar):
    B, cin_h, D, H, W = hsi.shape
    _, cin_s, Hs, Ws = sar.shape

    hw = params["hsi_w"]                           # (C_h, cin_h, kd, kh, kw)
    C_h, _, kd, kh, kw = hw.shape
    sw = params["sar_w"]                           # (C_s, cin_s, skh, skw)
    C_s, _, skh, skw = sw.shape

    Do, Ho, Wo = D - kd + 1, H - kh + 1, W - kw + 1
    sHo, sWo = Hs - skh + 1, Ws - skw + 1

    # ---- flat-index im2col geometry (output indexed on the full (z,y,x) grid)
    m_h = _round_up(Do * H * W, 128)               # 1536 here (lane-dense)
    h_shifts = tuple(dz * H * W + dy * W + dx
                     for dz in range(kd) for dy in range(kh) for dx in range(kw))
    L_h = _round_up(max(D * H * W, h_shifts[-1] + m_h), 128)

    m_s = _round_up(sHo * Ws, 128)                 # 224 -> 256
    s_shifts = tuple(dy * Ws + dx for dy in range(skh) for dx in range(skw))
    L_s = _round_up(max(Hs * Ws, s_shifts[-1] + m_s), 128)

    # ---- flatten + zero-pad the raw inputs (one tiny fused pad per branch);
    #      the patch expansion itself happens only in VMEM inside the kernel.
    hx = jnp.pad(hsi.reshape(B, cin_h, D * H * W),
                 ((0, 0), (0, 0), (0, L_h - D * H * W)))
    sx = jnp.pad(sar.reshape(B, cin_s, Hs * Ws),
                 ((0, 0), (0, 0), (0, L_s - Hs * Ws)))

    # ---- fold eval-mode BatchNorm into conv weight / bias at trace time
    h_scale, h_bias = _fold_bn(params["hsi_b"], params["hsi_gamma"],
                               params["hsi_beta"], params["hsi_mean"],
                               params["hsi_var"])
    s_scale, s_bias = _fold_bn(params["sar_b"], params["sar_gamma"],
                               params["sar_beta"], params["sar_mean"],
                               params["sar_var"])
    # Offset-major / channel-minor K ordering — must match the slab build above.
    hwT = (jnp.transpose(hw, (0, 2, 3, 4, 1)).reshape(C_h, -1)
           * h_scale[:, None]).astype(jnp.float32)
    swT = (jnp.transpose(sw, (0, 2, 3, 1)).reshape(C_s, -1)
           * s_scale[:, None]).astype(jnp.float32)
    h_bias = h_bias.reshape(C_h, 1).astype(jnp.float32)
    s_bias = s_bias.reshape(C_s, 1).astype(jnp.float32)

    K_h = hwT.shape[1]
    K_s = swT.shape[1]

    kernel = functools.partial(
        _syn_conv_kernel,
        h_shifts=h_shifts, s_shifts=s_shifts,
        cin_h=cin_h, cin_s=cin_s, m_h=m_h, m_s=m_s, batch=B)

    out_h, out_s = pl.pallas_call(
        kernel,
        out_shape=(jax.ShapeDtypeStruct((B, C_h, m_h), jnp.float32),
                   jax.ShapeDtypeStruct((B, C_s, m_s), jnp.float32)),
        grid=(1,),                                  # single step: B folded into M
        in_specs=[
            pl.BlockSpec((B, cin_h, L_h), lambda i: (0, 0, 0)),
            pl.BlockSpec((C_h, K_h), lambda i: (0, 0)),
            pl.BlockSpec((C_h, 1), lambda i: (0, 0)),
            pl.BlockSpec((B, cin_s, L_s), lambda i: (0, 0, 0)),
            pl.BlockSpec((C_s, K_s), lambda i: (0, 0)),
            pl.BlockSpec((C_s, 1), lambda i: (0, 0)),
        ],
        out_specs=(
            pl.BlockSpec((B, C_h, m_h), lambda i: (0, 0, 0)),
            pl.BlockSpec((B, C_s, m_s), lambda i: (0, 0, 0)),
        ),
        scratch_shapes=[
            pltpu.VMEM((K_h, B * m_h), jnp.float32),   # HSI im2col slab (VMEM only)
            pltpu.VMEM((K_s, B * m_s), jnp.float32),   # SAR im2col slab (VMEM only)
        ],
        compiler_params=pltpu.CompilerParams(
            dimension_semantics=("arbitrary",),
            vmem_limit_bytes=32 * 1024 * 1024,
        ),
    )(hx, hwT, h_bias, sx, swT, s_bias)

    # Valid output positions live at flat index zo*H*W + yo*W + xo; reshape on
    # the full (z,y,x) grid and crop the junk columns/rows.
    hsi_feat = (out_h[:, :, :Do * H * W]
                .reshape(B, C_h, Do, H, W)[:, :, :, :Ho, :Wo])
    sar_feat = (out_s[:, :, :sHo * Ws]
                .reshape(B, C_s, sHo, Ws)[:, :, :, :sWo])
    return hsi_feat, sar_feat


# ----------------------------------------------------------------------------
# Syn_layer forward
# ----------------------------------------------------------------------------
def syn_layer_forward(params, hsi, sar):
    hsi_feat, sar_feat = syn_conv_bn_relu(params, hsi, sar)
    # TODO(synk): MSBlock, SpecMambaBlock and FSSBlock are used by Syn_layer but
    # their definitions were not provided with the module source; they are left
    # as identity pass-throughs here instead of faking their semantics.
    out_hsi = hsi_feat
    out_sar = sar_feat
    return out_hsi, out_sar


# ----------------------------------------------------------------------------
# Pure-JAX reference (Conv + eval-mode BN + ReLU) for a numerical sanity check.
# ----------------------------------------------------------------------------
def _reference_forward(params, hsi, sar, eps=1e-5):
    def bn_relu(x, gamma, beta, mean, var):
        shp = [1] * x.ndim
        shp[1] = -1
        y = (x - mean.reshape(shp)) / jnp.sqrt(var.reshape(shp) + eps)
        y = y * gamma.reshape(shp) + beta.reshape(shp)
        return jnp.maximum(y, 0.0)

    h = jax.lax.conv_general_dilated(
        hsi, params["hsi_w"], window_strides=(1, 1, 1), padding="VALID",
        dimension_numbers=("NCDHW", "OIDHW", "NCDHW"))
    h = h + params["hsi_b"].reshape(1, -1, 1, 1, 1)
    h = bn_relu(h, params["hsi_gamma"], params["hsi_beta"],
                params["hsi_mean"], params["hsi_var"])

    s = jax.lax.conv_general_dilated(
        sar, params["sar_w"], window_strides=(1, 1), padding="VALID",
        dimension_numbers=("NCHW", "OIHW", "NCHW"))
    s = s + params["sar_b"].reshape(1, -1, 1, 1)
    s = bn_relu(s, params["sar_gamma"], params["sar_beta"],
                params["sar_mean"], params["sar_var"])
    return h, s


def init_params(key, hc1, hc2, sc1, sc2, N):
    ks = jax.random.split(key, 12)
    return {
        "hsi_w": 0.05 * jax.random.normal(ks[0], (hc2, hc1, N, 3, 3), jnp.float32),
        "hsi_b": 0.02 * jax.random.normal(ks[1], (hc2,), jnp.float32),
        "hsi_gamma": 1.0 + 0.1 * jax.random.normal(ks[2], (hc2,), jnp.float32),
        "hsi_beta": 0.1 * jax.random.normal(ks[3], (hc2,), jnp.float32),
        "hsi_mean": 0.05 * jax.random.normal(ks[4], (hc2,), jnp.float32),
        "hsi_var": 1.0 + 0.1 * jnp.abs(jax.random.normal(ks[5], (hc2,), jnp.float32)),
        "sar_w": 0.05 * jax.random.normal(ks[6], (sc2, sc1, 3, 3), jnp.float32),
        "sar_b": 0.02 * jax.random.normal(ks[7], (sc2,), jnp.float32),
        "sar_gamma": 1.0 + 0.1 * jax.random.normal(ks[8], (sc2,), jnp.float32),
        "sar_beta": 0.1 * jax.random.normal(ks[9], (sc2,), jnp.float32),
        "sar_mean": 0.05 * jax.random.normal(ks[10], (sc2,), jnp.float32),
        "sar_var": 1.0 + 0.1 * jnp.abs(jax.random.normal(ks[11], (sc2,), jnp.float32)),
    }


if __name__ == "__main__":
    # Module hyper-parameters (small, consistent with Syn_layer.__init__)
    B = 2
    hc1, hc2 = 2, 8          # hsi conv in/out channels
    sc1, sc2 = 4, 8          # sar conv in/out channels
    hsi_N = 8                # number of spectral bands
    img_size = 16
    lay_n = 3                # -> N = 9 - 2*lay_n = 3 ; N1 = hsi_N - N + 1 = 6
    N = 9 - lay_n * 2

    key = jax.random.PRNGKey(0)
    k_hsi, k_sar, k_par = jax.random.split(key, 3)

    hsi = jax.random.normal(k_hsi, (B, hc1, hsi_N, img_size, img_size), jnp.float32)
    sar = jax.random.normal(k_sar, (B, sc1, img_size, img_size), jnp.float32)
    params = init_params(k_par, hc1, hc2, sc1, sc2, N)

    fwd = jax.jit(functools.partial(syn_layer_forward, params))
    out_hsi, out_sar = fwd(hsi, sar)
    jax.block_until_ready((out_hsi, out_sar))

    # Shape sanity: (B, hc2, hsi_N-N+1, img_size-2, img_size-2) / (B, sc2, 14, 14)
    assert out_hsi.shape == (B, hc2, hsi_N - N + 1, img_size - 2, img_size - 2)
    assert out_sar.shape == (B, sc2, img_size - 2, img_size - 2)

    # Numerical sanity vs. pure-JAX reference (f32 path -> tight agreement;
    # tolerance left loose enough for any MXU pass-splitting differences).
    ref_h, ref_s = _reference_forward(params, hsi, sar)
    err_h = float(jnp.max(jnp.abs(out_hsi - ref_h)))
    err_s = float(jnp.max(jnp.abs(out_sar - ref_s)))
    assert err_h < 5e-2 and err_s < 5e-2, (err_h, err_s)

    print("KERNEL_OK")
</pallas_src>

<mosaic_0001>
module attributes {stable_mosaic.version = 11 : i64} {
  func.func @_syn_conv_kernel(%arg0: i32, %arg1: memref<2x2x2176xf32, #tpu.memory_space<vmem>>, %arg2: memref<8x54xf32, #tpu.memory_space<vmem>>, %arg3: memref<8x1xf32, #tpu.memory_space<vmem>>, %arg4: memref<2x4x384xf32, #tpu.memory_space<vmem>>, %arg5: memref<8x36xf32, #tpu.memory_space<vmem>>, %arg6: memref<8x1xf32, #tpu.memory_space<vmem>>, %arg7: memref<2x8x1536xf32, #tpu.memory_space<vmem>>, %arg8: memref<2x8x256xf32, #tpu.memory_space<vmem>>, %arg9: memref<54x3072xf32, #tpu.memory_space<vmem>>, %arg10: memref<36x512xf32, #tpu.memory_space<vmem>>) attributes {dimension_semantics = [#tpu.dimension_semantics<arbitrary>], iteration_bounds = array<i64: 1>, scalar_prefetch = 0 : i64, scratch_operands = 2 : i64, tpu.core_type = #tpu.core_type<tc>, window_params = [{pipeline_mode = #tpu.pipeline_mode<synchronous>, transform_indices = @transform_0, window_bounds = array<i64: 2, 2, 2176>}, {pipeline_mode = #tpu.pipeline_mode<synchronous>, transform_indices = @transform_1, window_bounds = array<i64: 8, 54>}, {pipeline_mode = #tpu.pipeline_mode<synchronous>, transform_indices = @transform_2, window_bounds = array<i64: 8, 1>}, {pipeline_mode = #tpu.pipeline_mode<synchronous>, transform_indices = @transform_3, window_bounds = array<i64: 2, 4, 384>}, {pipeline_mode = #tpu.pipeline_mode<synchronous>, transform_indices = @transform_4, window_bounds = array<i64: 8, 36>}, {pipeline_mode = #tpu.pipeline_mode<synchronous>, transform_indices = @transform_5, window_bounds = array<i64: 8, 1>}, {pipeline_mode = #tpu.pipeline_mode<synchronous>, transform_indices = @transform_6, window_bounds = array<i64: 2, 8, 1536>}, {pipeline_mode = #tpu.pipeline_mode<synchronous>, transform_indices = @transform_7, window_bounds = array<i64: 2, 8, 256>}]} {
    %c0 = arith.constant 0 : index
    %c0_0 = arith.constant 0 : index
    %c0_1 = arith.constant 0 : index
    %0 = vector.load %arg1[%c0, %c0_0, %c0_1] : memref<2x2x2176xf32, #tpu.memory_space<vmem>>, vector<1x2x1536xf32>
    %1 = vector.shape_cast %0 : vector<1x2x1536xf32> to vector<2x1536xf32>
    %c0_2 = arith.constant 0 : index
    %c0_3 = arith.constant 0 : index
    %2 = vector.load %arg9[%c0_2, %c0_3] : memref<54x3072xf32, #tpu.memory_space<vmem>>, vector<2x1536xf32>
    tpu.vector_store %arg9[%c0_2, %c0_3], %1 {strides = array<i32>} : memref<54x3072xf32, #tpu.memory_space<vmem>>, vector<2x1536xf32>,
    %c0_4 = arith.constant 0 : index
    %c0_5 = arith.constant 0 : index
    %c1 = arith.constant 1 : index
    %3 = vector.load %arg1[%c0_4, %c0_5, %c1] : memref<2x2x2176xf32, #tpu.memory_space<vmem>>, vector<1x2x1536xf32>
    %4 = vector.shape_cast %3 : vector<1x2x1536xf32> to vector<2x1536xf32>
    %c2 = arith.constant 2 : index
    %c0_6 = arith.constant 0 : index
    %5 = vector.load %arg9[%c2, %c0_6] : memref<54x3072xf32, #tpu.memory_space<vmem>>, vector<2x1536xf32>
    tpu.vector_store %arg9[%c2, %c0_6], %4 {strides = array<i32>} : memref<54x3072xf32, #tpu.memory_space<vmem>>, vector<2x1536xf32>,
    %c0_7 = arith.constant 0 : index
    %c0_8 = arith.constant 0 : index
    %c2_9 = arith.constant 2 : index
    %6 = vector.load %arg1[%c0_7, %c0_8, %c2_9] : memref<2x2x2176xf32, #tpu.memory_space<vmem>>, vector<1x2x1536xf32>
    %7 = vector.shape_cast %6 : vector<1x2x1536xf32> to vector<2x1536xf32>
    %c4 = arith.constant 4 : index
    %c0_10 = arith.constant 0 : index
    %8 = vector.load %arg9[%c4, %c0_10] : memref<54x3072xf32, #tpu.memory_space<vmem>>, vector<2x1536xf32>
    tpu.vector_store %arg9[%c4, %c0_10], %7 {strides = array<i32>} : memref<54x3072xf32, #tpu.memory_space<vmem>>, vector<2x1536xf32>,
    %c0_11 = arith.constant 0 : index
    %c0_12 = arith.constant 0 : index
    %c16 = arith.constant 16 : index
    %9 = vector.load %arg1[%c0_11, %c0_12, %c16] : memref<2x2x2176xf32, #tpu.memory_space<vmem>>, vector<1x2x1536xf32>
    %10 = vector.shape_cast %9 : vector<1x2x1536xf32> to vector<2x1536xf32>
    %c6 = arith.constant 6 : index
    %c0_13 = arith.constant 0 : index
    %11 = vector.load %arg9[%c6, %c0_13] : memref<54x3072xf32, #tpu.memory_space<vmem>>, vector<2x1536xf32>
    tpu.vector_store %arg9[%c6, %c0_13], %10 {strides = array<i32>} : memref<54x3072xf32, #tpu.memory_space<vmem>>, vector<2x1536xf32>,
    %c0_14 = arith.constant 0 : index
    %c0_15 = arith.constant 0 : index
    %c17 = arith.constant 17 : index
    %12 = vector.load %arg1[%c0_14, %c0_15, %c17] : memref<2x2x2176xf32, #tpu.memory_space<vmem>>, vector<1x2x1536xf32>
    %13 = vector.shape_cast %12 : vector<1x2x1536xf32> to vector<2x1536xf32>
    %c8 = arith.constant 8 : index
    %c0_16 = arith.constant 0 : index
    %14 = vector.load %arg9[%c8, %c0_16] : memref<54x3072xf32, #tpu.memory_space<vmem>>, vector<2x1536xf32>
    tpu.vector_store %arg9[%c8, %c0_16], %13 {strides = array<i32>} : memref<54x3072xf32, #tpu.memory_space<vmem>>, vector<2x1536xf32>,
    %c0_17 = arith.constant 0 : index
    %c0_18 = arith.constant 0 : index
    %c18 = arith.constant 18 : index
    %15 = vector.load %arg1[%c0_17, %c0_18, %c18] : memref<2x2x2176xf32, #tpu.memory_space<vmem>>, vector<1x2x1536xf32>
    %16 = vector.shape_cast %15 : vector<1x2x1536xf32> to vector<2x1536xf32>
    %c10 = arith.constant 10 : index
    %c0_19 = arith.constant 0 : index
    %17 = vector.load %arg9[%c10, %c0_19] : memref<54x3072xf32, #tpu.memory_space<vmem>>, vector<2x1536xf32>
    tpu.vector_store %arg9[%c10, %c0_19], %16 {strides = array<i32>} : memref<54x3072xf32, #tpu.memory_space<vmem>>, vector<2x1536xf32>,
    %c0_20 = arith.constant 0 : index
    %c0_21 = arith.constant 0 : index
    %c32 = arith.constant 32 : index
    %18 = vector.load %arg1[%c0_20, %c0_21, %c32] : memref<2x2x2176xf32, #tpu.memory_space<vmem>>, vector<1x2x1536xf32>
    %19 = vector.shape_cast %18 : vector<1x2x1536xf32> to vector<2x1536xf32>
    %c12 = arith.constant 12 : index
    %c0_22 = arith.constant 0 : index
    %20 = vector.load %arg9[%c12, %c0_22] : memref<54x3072xf32, #tpu.memory_space<vmem>>, vector<2x1536xf32>
    tpu.vector_store %arg9[%c12, %c0_22], %19 {strides = array<i32>} : memref<54x3072xf32, #tpu.memory_space<vmem>>, vector<2x1536xf32>,
    %c0_23 = arith.constant 0 : index
    %c0_24 = arith.constant 0 : index
    %c33 = arith.constant 33 : index
    %21 = vector.load %arg1[%c0_23, %c0_24, %c33] : memref<2x2x2176xf32, #tpu.memory_space<vmem>>, vector<1x2x1536xf32>
    %22 = vector.shape_cast %21 : vector<1x2x1536xf32> to vector<2x1536xf32>
    %c14 = arith.constant 14 : index
    %c0_25 = arith.constant 0 : index
    %23 = vector.load %arg9[%c14, %c0_25] : memref<54x3072xf32, #tpu.memory_space<vmem>>, vector<2x1536xf32>
    tpu.vector_store %arg9[%c14, %c0_25], %22 {strides = array<i32>} : memref<54x3072xf32, #tpu.memory_space<vmem>>, vector<2x1536xf32>,
    %c0_26 = arith.constant 0 : index
    %c0_27 = arith.constant 0 : index
    %c34 = arith.constant 34 : index
    %24 = vector.load %arg1[%c0_26, %c0_27, %c34] : memref<2x2x2176xf32, #tpu.memory_space<vmem>>, vector<1x2x1536xf32>
    %25 = vector.shape_cast %24 : vector<1x2x1536xf32> to vector<2x1536xf32>
    %c16_28 = arith.constant 16 : index
    %c0_29 = arith.constant 0 : index
    %26 = vector.load %arg9[%c16_28, %c0_29] : memref<54x3072xf32, #tpu.memory_space<vmem>>, vector<2x1536xf32>
    tpu.vector_store %arg9[%c16_28, %c0_29], %25 {strides = array<i32>} : memref<54x3072xf32, #tpu.memory_space<vmem>>, vector<2x1536xf32>,
    %c0_30 = arith.constant 0 : index
    %c0_31 = arith.constant 0 : index
    %c256 = arith.constant 256 : index
    %27 = vector.load %arg1[%c0_30, %c0_31, %c256] : memref<2x2x2176xf32, #tpu.memory_space<vmem>>, vector<1x2x1536xf32>
    %28 = vector.shape_cast %27 : vector<1x2x1536xf32> to vector<2x1536xf32>
    %c18_32 = arith.constant 18 : index
    %c0_33 = arith.constant 0 : index
    %29 = vector.load %arg9[%c18_32, %c0_33] : memref<54x3072xf32, #tpu.memory_space<vmem>>, vector<2x1536xf32>
    tpu.vector_store %arg9[%c18_32, %c0_33], %28 {strides = array<i32>} : memref<54x3072xf32, #tpu.memory_space<vmem>>, vector<2x1536xf32>,
    %c0_34 = arith.constant 0 : index
    %c0_35 = arith.constant 0 : index
    %c257 = arith.constant 257 : index
    %30 = vector.load %arg1[%c0_34, %c0_35, %c257] : memref<2x2x2176xf32, #tpu.memory_space<vmem>>, vector<1x2x1536xf32>
    %31 = vector.shape_cast %30 : vector<1x2x1536xf32> to vector<2x1536xf32>
    %c20 = arith.constant 20 : index
    %c0_36 = arith.constant 0 : index
    %32 = vector.load %arg9[%c20, %c0_36] : memref<54x3072xf32, #tpu.memory_space<vmem>>, vector<2x1536xf32>
    tpu.vector_store %arg9[%c20, %c0_36], %31 {strides = array<i32>} : memref<54x3072xf32, #tpu.memory_space<vmem>>, vector<2x1536xf32>,
    %c0_37 = arith.constant 0 : index
    %c0_38 = arith.constant 0 : index
    %c258 = arith.constant 258 : index
    %33 = vector.load %arg1[%c0_37, %c0_38, %c258] : memref<2x2x2176xf32, #tpu.memory_space<vmem>>, vector<1x2x1536xf32>
    %34 = vector.shape_cast %33 : vector<1x2x1536xf32> to vector<2x1536xf32>
    %c22 = arith.constant 22 : index
    %c0_39 = arith.constant 0 : index
    %35 = vector.load %arg9[%c22, %c0_39] : memref<54x3072xf32, #tpu.memory_space<vmem>>, vector<2x1536xf32>
    tpu.vector_store %arg9[%c22, %c0_39], %34 {strides = array<i32>} : memref<54x3072xf32, #tpu.memory_space<vmem>>, vector<2x1536xf32>,
    %c0_40 = arith.constant 0 : index
    %c0_41 = arith.constant 0 : index
    %c272 = arith.constant 272 : index
    %36 = vector.load %arg1[%c0_40, %c0_41, %c272] : memref<2x2x2176xf32, #tpu.memory_space<vmem>>, vector<1x2x1536xf32>
    %37 = vector.shape_cast %36 : vector<1x2x1536xf32> to vector<2x1536xf32>
    %c24 = arith.constant 24 : index
    %c0_42 = arith.constant 0 : index
    %38 = vector.load %arg9[%c24, %c0_42] : memref<54x3072xf32, #tpu.memory_space<vmem>>, vector<2x1536xf32>
    tpu.vector_store %arg9[%c24, %c0_42], %37 {strides = array<i32>} : memref<54x3072xf32, #tpu.memory_space<vmem>>, vector<2x1536xf32>,
    %c0_43 = arith.constant 0 : index
    %c0_44 = arith.constant 0 : index
    %c273 = arith.constant 273 : index
    %39 = vector.load %arg1[%c0_43, %c0_44, %c273] : memref<2x2x2176xf32, #tpu.memory_space<vmem>>, vector<1x2x1536xf32>
    %40 = vector.shape_cast %39 : vector<1x2x1536xf32> to vector<2x1536xf32>
    %c26 = arith.constant 26 : index
    %c0_45 = arith.constant 0 : index
    %41 = vector.load %arg9[%c26, %c0_45] : memref<54x3072xf32, #tpu.memory_space<vmem>>, vector<2x1536xf32>
    tpu.vector_store %arg9[%c26, %c0_45], %40 {strides = array<i32>} : memref<54x3072xf32, #tpu.memory_space<vmem>>, vector<2x1536xf32>,
    %c0_46 = arith.constant 0 : index
    %c0_47 = arith.constant 0 : index
    %c274 = arith.constant 274 : index
    %42 = vector.load %arg1[%c0_46, %c0_47, %c274] : memref<2x2x2176xf32, #tpu.memory_space<vmem>>, vector<1x2x1536xf32>
    %43 = vector.shape_cast %42 : vector<1x2x1536xf32> to vector<2x1536xf32>
    %c28 = arith.constant 28 : index
    %c0_48 = arith.constant 0 : index
    %44 = vector.load %arg9[%c28, %c0_48] : memref<54x3072xf32, #tpu.memory_space<vmem>>, vector<2x1536xf32>
    tpu.vector_store %arg9[%c28, %c0_48], %43 {strides = array<i32>} : memref<54x3072xf32, #tpu.memory_space<vmem>>, vector<2x1536xf32>,
    %c0_49 = arith.constant 0 : index
    %c0_50 = arith.constant 0 : index
    %c288 = arith.constant 288 : index
    %45 = vector.load %arg1[%c0_49, %c0_50, %c288] : memref<2x2x2176xf32, #tpu.memory_space<vmem>>, vector<1x2x1536xf32>
    %46 = vector.shape_cast %45 : vector<1x2x1536xf32> to vector<2x1536xf32>
    %c30 = arith.constant 30 : index
    %c0_51 = arith.constant 0 : index
    %47 = vector.load %arg9[%c30, %c0_51] : memref<54x3072xf32, #tpu.memory_space<vmem>>, vector<2x1536xf32>
    tpu.vector_store %arg9[%c30, %c0_51], %46 {strides = array<i32>} : memref<54x3072xf32, #tpu.memory_space<vmem>>, vector<2x1536xf32>,
    %c0_52 = arith.constant 0 : index
    %c0_53 = arith.constant 0 : index
    %c289 = arith.constant 289 : index
    %48 = vector.load %arg1[%c0_52, %c0_53, %c289] : memref<2x2x2176xf32, #tpu.memory_space<vmem>>, vector<1x2x1536xf32>
    %49 = vector.shape_cast %48 : vector<1x2x1536xf32> to vector<2x1536xf32>
    %c32_54 = arith.constant 32 : index
    %c0_55 = arith.constant 0 : index
    %50 = vector.load %arg9[%c32_54, %c0_55] : memref<54x3072xf32, #tpu.memory_space<vmem>>, vector<2x1536xf32>
    tpu.vector_store %arg9[%c32_54, %c0_55], %49 {strides = array<i32>} : memref<54x3072xf32, #tpu.memory_space<vmem>>, vector<2x1536xf32>,
    %c0_56 = arith.constant 0 : index
    %c0_57 = arith.constant 0 : index
    %c290 = arith.constant 290 : index
    %51 = vector.load %arg1[%c0_56, %c0_57, %c290] : memref<2x2x2176xf32, #tpu.memory_space<vmem>>, vector<1x2x1536xf32>
    %52 = vector.shape_cast %51 : vector<1x2x1536xf32> to vector<2x1536xf32>
    %c34_58 = arith.constant 34 : index
    %c0_59 = arith.constant 0 : index
    %53 = vector.load %arg9[%c34_58, %c0_59] : memref<54x3072xf32, #tpu.memory_space<vmem>>, vector<2x1536xf32>
    tpu.vector_store %arg9[%c34_58, %c0_59], %52 {strides = array<i32>} : memref<54x3072xf32, #tpu.memory_space<vmem>>, vector<2x1536xf32>,
    %c0_60 = arith.constant 0 : index
    %c0_61 = arith.constant 0 : index
    %c512 = arith.constant 512 : index
    %54 = vector.load %arg1[%c0_60, %c0_61, %c512] : memref<2x2x2176xf32, #tpu.memory_space<vmem>>, vector<1x2x1536xf32>
    %55 = vector.shape_cast %54 : vector<1x2x1536xf32> to vector<2x1536xf32>
    %c36 = arith.constant 36 : index
    %c0_62 = arith.constant 0 : index
    %56 = vector.load %arg9[%c36, %c0_62] : memref<54x3072xf32, #tpu.memory_space<vmem>>, vector<2x1536xf32>
    tpu.vector_store %arg9[%c36, %c0_62], %55 {strides = array<i32>} : memref<54x3072xf32, #tpu.memory_space<vmem>>, vector<2x1536xf32>,
    %c0_63 = arith.constant 0 : index
    %c0_64 = arith.constant 0 : index
    %c513 = arith.constant 513 : index
    %57 = vector.load %arg1[%c0_63, %c0_64, %c513] : memref<2x2x2176xf32, #tpu.memory_space<vmem>>, vector<1x2x1536xf32>
    %58 = vector.shape_cast %57 : vector<1x2x1536xf32> to vector<2x1536xf32>
    %c38 = arith.constant 38 : index
    %c0_65 = arith.constant 0 : index
    %59 = vector.load %arg9[%c38, %c0_65] : memref<54x3072xf32, #tpu.memory_space<vmem>>, vector<2x1536xf32>
    tpu.vector_store %arg9[%c38, %c0_65], %58 {strides = array<i32>} : memref<54x3072xf32, #tpu.memory_space<vmem>>, vector<2x1536xf32>,
    %c0_66 = arith.constant 0 : index
    %c0_67 = arith.constant 0 : index
    %c514 = arith.constant 514 : index
    %60 = vector.load %arg1[%c0_66, %c0_67, %c514] : memref<2x2x2176xf32, #tpu.memory_space<vmem>>, vector<1x2x1536xf32>
    %61 = vector.shape_cast %60 : vector<1x2x1536xf32> to vector<2x1536xf32>
    %c40 = arith.constant 40 : index
    %c0_68 = arith.constant 0 : index
    %62 = vector.load %arg9[%c40, %c0_68] : memref<54x3072xf32, #tpu.memory_space<vmem>>, vector<2x1536xf32>
    tpu.vector_store %arg9[%c40, %c0_68], %61 {strides = array<i32>} : memref<54x3072xf32, #tpu.memory_space<vmem>>, vector<2x1536xf32>,
    %c0_69 = arith.constant 0 : index
    %c0_70 = arith.constant 0 : index
    %c528 = arith.constant 528 : index
    %63 = vector.load %arg1[%c0_69, %c0_70, %c528] : memref<2x2x2176xf32, #tpu.memory_space<vmem>>, vector<1x2x1536xf32>
    %64 = vector.shape_cast %63 : vector<1x2x1536xf32> to vector<2x1536xf32>
    %c42 = arith.constant 42 : index
    %c0_71 = arith.constant 0 : index
    %65 = vector.load %arg9[%c42, %c0_71] : memref<54x3072xf32, #tpu.memory_space<vmem>>, vector<2x1536xf32>
    tpu.vector_store %arg9[%c42, %c0_71], %64 {strides = array<i32>} : memref<54x3072xf32, #tpu.memory_space<vmem>>, vector<2x1536xf32>,
    %c0_72 = arith.constant 0 : index
    %c0_73 = arith.constant 0 : index
    %c529 = arith.constant 529 : index
    %66 = vector.load %arg1[%c0_72, %c0_73, %c529] : memref<2x2x2176xf32, #tpu.memory_space<vmem>>, vector<1x2x1536xf32>
    %67 = vector.shape_cast %66 : vector<1x2x1536xf32> to vector<2x1536xf32>
    %c44 = arith.constant 44 : index
    %c0_74 = arith.constant 0 : index
    %68 = vector.load %arg9[%c44, %c0_74] : memref<54x3072xf32, #tpu.memory_space<vmem>>, vector<2x1536xf32>
    tpu.vector_store %arg9[%c44, %c0_74], %67 {strides = array<i32>} : memref<54x3072xf32, #tpu.memory_space<vmem>>, vector<2x1536xf32>,
    %c0_75 = arith.constant 0 : index
    %c0_76 = arith.constant 0 : index
    %c530 = arith.constant 530 : index
    %69 = vector.load %arg1[%c0_75, %c0_76, %c530] : memref<2x2x2176xf32, #tpu.memory_space<vmem>>, vector<1x2x1536xf32>
    %70 = vector.shape_cast %69 : vector<1x2x1536xf32> to vector<2x1536xf32>
    %c46 = arith.constant 46 : index
    %c0_77 = arith.constant 0 : index
    %71 = vector.load %arg9[%c46, %c0_77] : memref<54x3072xf32, #tpu.memory_space<vmem>>, vector<2x1536xf32>
    tpu.vector_store %arg9[%c46, %c0_77], %70 {strides = array<i32>} : memref<54x3072xf32, #tpu.memory_space<vmem>>, vector<2x1536xf32>,
    %c0_78 = arith.constant 0 : index
    %c0_79 = arith.constant 0 : index
    %c544 = arith.constant 544 : index
    %72 = vector.load %arg1[%c0_78, %c0_79, %c544] : memref<2x2x2176xf32, #tpu.memory_space<vmem>>, vector<1x2x1536xf32>
    %73 = vector.shape_cast %72 : vector<1x2x1536xf32> to vector<2x1536xf32>
    %c48 = arith.constant 48 : index
    %c0_80 = arith.constant 0 : index
    %74 = vector.load %arg9[%c48, %c0_80] : memref<54x3072xf32, #tpu.memory_space<vmem>>, vector<2x1536xf32>
    tpu.vector_store %arg9[%c48, %c0_80], %73 {strides = array<i32>} : memref<54x3072xf32, #tpu.memory_space<vmem>>, vector<2x1536xf32>,
    %c0_81 = arith.constant 0 : index
    %c0_82 = arith.constant 0 : index
    %c545 = arith.constant 545 : index
    %75 = vector.load %arg1[%c0_81, %c0_82, %c545] : memref<2x2x2176xf32, #tpu.memory_space<vmem>>, vector<1x2x1536xf32>
    %76 = vector.shape_cast %75 : vector<1x2x1536xf32> to vector<2x1536xf32>
    %c50 = arith.constant 50 : index
    %c0_83 = arith.constant 0 : index
    %77 = vector.load %arg9[%c50, %c0_83] : memref<54x3072xf32, #tpu.memory_space<vmem>>, vector<2x1536xf32>
    tpu.vector_store %arg9[%c50, %c0_83], %76 {strides = array<i32>} : memref<54x3072xf32, #tpu.memory_space<vmem>>, vector<2x1536xf32>,
    %c0_84 = arith.constant 0 : index
    %c0_85 = arith.constant 0 : index
    %c546 = arith.constant 546 : index
    %78 = vector.load %arg1[%c0_84, %c0_85, %c546] : memref<2x2x2176xf32, #tpu.memory_space<vmem>>, vector<1x2x1536xf32>
    %79 = vector.shape_cast %78 : vector<1x2x1536xf32> to vector<2x1536xf32>
    %c52 = arith.constant 52 : index
    %c0_86 = arith.constant 0 : index
    %80 = vector.load %arg9[%c52, %c0_86] : memref<54x3072xf32, #tpu.memory_space<vmem>>, vector<2x1536xf32>
    tpu.vector_store %arg9[%c52, %c0_86], %79 {strides = array<i32>} : memref<54x3072xf32, #tpu.memory_space<vmem>>, vector<2x1536xf32>,
    %c0_87 = arith.constant 0 : index
    %c0_88 = arith.constant 0 : index
    %c0_89 = arith.constant 0 : index
    %81 = vector.load %arg4[%c0_87, %c0_88, %c0_89] : memref<2x4x384xf32, #tpu.memory_space<vmem>>, vector<1x4x256xf32>
    %82 = vector.shape_cast %81 : vector<1x4x256xf32> to vector<4x256xf32>
    %c0_90 = arith.constant 0 : index
    %c0_91 = arith.constant 0 : index
    %83 = vector.load %arg10[%c0_90, %c0_91] : memref<36x512xf32, #tpu.memory_space<vmem>>, vector<4x256xf32>
    tpu.vector_store %arg10[%c0_90, %c0_91], %82 {strides = array<i32>} : memref<36x512xf32, #tpu.memory_space<vmem>>, vector<4x256xf32>,
    %c0_92 = arith.constant 0 : index
    %c0_93 = arith.constant 0 : index
    %c1_94 = arith.constant 1 : index
    %84 = vector.load %arg4[%c0_92, %c0_93, %c1_94] : memref<2x4x384xf32, #tpu.memory_space<vmem>>, vector<1x4x256xf32>
    %85 = vector.shape_cast %84 : vector<1x4x256xf32> to vector<4x256xf32>
    %c4_95 = arith.constant 4 : index
    %c0_96 = arith.constant 0 : index
    %86 = vector.load %arg10[%c4_95, %c0_96] : memref<36x512xf32, #tpu.memory_space<vmem>>, vector<4x256xf32>
    tpu.vector_store %arg10[%c4_95, %c0_96], %85 {strides = array<i32>} : memref<36x512xf32, #tpu.memory_space<vmem>>, vector<4x256xf32>,
    %c0_97 = arith.constant 0 : index
    %c0_98 = arith.constant 0 : index
    %c2_99 = arith.constant 2 : index
    %87 = vector.load %arg4[%c0_97, %c0_98, %c2_99] : memref<2x4x384xf32, #tpu.memory_space<vmem>>, vector<1x4x256xf32>
    %88 = vector.shape_cast %87 : vector<1x4x256xf32> to vector<4x256xf32>
    %c8_100 = arith.constant 8 : index
    %c0_101 = arith.constant 0 : index
    %89 = vector.load %arg10[%c8_100, %c0_101] : memref<36x512xf32, #tpu.memory_space<vmem>>, vector<4x256xf32>
    tpu.vector_store %arg10[%c8_100, %c0_101], %88 {strides = array<i32>} : memref<36x512xf32, #tpu.memory_space<vmem>>, vector<4x256xf32>,
    %c0_102 = arith.constant 0 : index
    %c0_103 = arith.constant 0 : index
    %c16_104 = arith.constant 16 : index
    %90 = vector.load %arg4[%c0_102, %c0_103, %c16_104] : memref<2x4x384xf32, #tpu.memory_space<vmem>>, vector<1x4x256xf32>
    %91 = vector.shape_cast %90 : vector<1x4x256xf32> to vector<4x256xf32>
    %c12_105 = arith.constant 12 : index
    %c0_106 = arith.constant 0 : index
    %92 = vector.load %arg10[%c12_105, %c0_106] : memref<36x512xf32, #tpu.memory_space<vmem>>, vector<4x256xf32>
    tpu.vector_store %arg10[%c12_105, %c0_106], %91 {strides = array<i32>} : memref<36x512xf32, #tpu.memory_space<vmem>>, vector<4x256xf32>,
    %c0_107 = arith.constant 0 : index
    %c0_108 = arith.constant 0 : index
    %c17_109 = arith.constant 17 : index
    %93 = vector.load %arg4[%c0_107, %c0_108, %c17_109] : memref<2x4x384xf32, #tpu.memory_space<vmem>>, vector<1x4x256xf32>
    %94 = vector.shape_cast %93 : vector<1x4x256xf32> to vector<4x256xf32>
    %c16_110 = arith.constant 16 : index
    %c0_111 = arith.constant 0 : index
    %95 = vector.load %arg10[%c16_110, %c0_111] : memref<36x512xf32, #tpu.memory_space<vmem>>, vector<4x256xf32>
    tpu.vector_store %arg10[%c16_110, %c0_111], %94 {strides = array<i32>} : memref<36x512xf32, #tpu.memory_space<vmem>>, vector<4x256xf32>,
    %c0_112 = arith.constant 0 : index
    %c0_113 = arith.constant 0 : index
    %c18_114 = arith.constant 18 : index
    %96 = vector.load %arg4[%c0_112, %c0_113, %c18_114] : memref<2x4x384xf32, #tpu.memory_space<vmem>>, vector<1x4x256xf32>
    %97 = vector.shape_cast %96 : vector<1x4x256xf32> to vector<4x256xf32>
    %c20_115 = arith.constant 20 : index
    %c0_116 = arith.constant 0 : index
    %98 = vector.load %arg10[%c20_115, %c0_116] : memref<36x512xf32, #tpu.memory_space<vmem>>, vector<4x256xf32>
    tpu.vector_store %arg10[%c20_115, %c0_116], %97 {strides = array<i32>} : memref<36x512xf32, #tpu.memory_space<vmem>>, vector<4x256xf32>,
    %c0_117 = arith.constant 0 : index
    %c0_118 = arith.constant 0 : index
    %c32_119 = arith.constant 32 : index
    %99 = vector.load %arg4[%c0_117, %c0_118, %c32_119] : memref<2x4x384xf32, #tpu.memory_space<vmem>>, vector<1x4x256xf32>
    %100 = vector.shape_cast %99 : vector<1x4x256xf32> to vector<4x256xf32>
    %c24_120 = arith.constant 24 : index
    %c0_121 = arith.constant 0 : index
    %101 = vector.load %arg10[%c24_120, %c0_121] : memref<36x512xf32, #tpu.memory_space<vmem>>, vector<4x256xf32>
    tpu.vector_store %arg10[%c24_120, %c0_121], %100 {strides = array<i32>} : memref<36x512xf32, #tpu.memory_space<vmem>>, vector<4x256xf32>,
    %c0_122 = arith.constant 0 : index
    %c0_123 = arith.constant 0 : index
    %c33_124 = arith.constant 33 : index
    %102 = vector.load %arg4[%c0_122, %c0_123, %c33_124] : memref<2x4x384xf32, #tpu.memory_space<vmem>>, vector<1x4x256xf32>
    %103 = vector.shape_cast %102 : vector<1x4x256xf32> to vector<4x256xf32>
    %c28_125 = arith.constant 28 : index
    %c0_126 = arith.constant 0 : index
    %104 = vector.load %arg10[%c28_125, %c0_126] : memref<36x512xf32, #tpu.memory_space<vmem>>, vector<4x256xf32>
    tpu.vector_store %arg10[%c28_125, %c0_126], %103 {strides = array<i32>} : memref<36x512xf32, #tpu.memory_space<vmem>>, vector<4x256xf32>,
    %c0_127 = arith.constant 0 : index
    %c0_128 = arith.constant 0 : index
    %c34_129 = arith.constant 34 : index
    %105 = vector.load %arg4[%c0_127, %c0_128, %c34_129] : memref<2x4x384xf32, #tpu.memory_space<vmem>>, vector<1x4x256xf32>
    %106 = vector.shape_cast %105 : vector<1x4x256xf32> to vector<4x256xf32>
    %c32_130 = arith.constant 32 : index
    %c0_131 = arith.constant 0 : index
    %107 = vector.load %arg10[%c32_130, %c0_131] : memref<36x512xf32, #tpu.memory_space<vmem>>, vector<4x256xf32>
    tpu.vector_store %arg10[%c32_130, %c0_131], %106 {strides = array<i32>} : memref<36x512xf32, #tpu.memory_space<vmem>>, vector<4x256xf32>,
    %c1_132 = arith.constant 1 : index
    %c0_133 = arith.constant 0 : index
    %c0_134 = arith.constant 0 : index
    %108 = vector.load %arg1[%c1_132, %c0_133, %c0_134] : memref<2x2x2176xf32, #tpu.memory_space<vmem>>, vector<1x2x1536xf32>
    %109 = vector.shape_cast %108 : vector<1x2x1536xf32> to vector<2x1536xf32>
    %c0_135 = arith.constant 0 : index
    %c1536 = arith.constant 1536 : index
    %110 = vector.load %arg9[%c0_135, %c1536] : memref<54x3072xf32, #tpu.memory_space<vmem>>, vector<2x1536xf32>
    tpu.vector_store %arg9[%c0_135, %c1536], %109 {strides = array<i32>} : memref<54x3072xf32, #tpu.memory_space<vmem>>, vector<2x1536xf32>,
    %c1_136 = arith.constant 1 : index
    %c0_137 = arith.constant 0 : index
    %c1_138 = arith.constant 1 : index
    %111 = vector.load %arg1[%c1_136, %c0_137, %c1_138] : memref<2x2x2176xf32, #tpu.memory_space<vmem>>, vector<1x2x1536xf32>
    %112 = vector.shape_cast %111 : vector<1x2x1536xf32> to vector<2x1536xf32>
    %c2_139 = arith.constant 2 : index
    %c1536_140 = arith.constant 1536 : index
    %113 = vector.load %arg9[%c2_139, %c1536_140] : memref<54x3072xf32, #tpu.memory_space<vmem>>, vector<2x1536xf32>
    tpu.vector_store %arg9[%c2_139, %c1536_140], %112 {strides = array<i32>} : memref<54x3072xf32, #tpu.memory_space<vmem>>, vector<2x1536xf32>,
    %c1_141 = arith.constant 1 : index
    %c0_142 = arith.constant 0 : index
    %c2_143 = arith.constant 2 : index
    %114 = vector.load %arg1[%c1_141, %c0_142, %c2_143] : memref<2x2x2176xf32, #tpu.memory_space<vmem>>, vector<1x2x1536xf32>
    %115 = vector.shape_cast %114 : vector<1x2x1536xf32> to vector<2x1536xf32>
    %c4_144 = arith.constant 4 : index
    %c1536_145 = arith.constant 1536 : index
    %116 = vector.load %arg9[%c4_144, %c1536_145] : memref<54x3072xf32, #tpu.memory_space<vmem>>, vector<2x1536xf32>
    tpu.vector_store %arg9[%c4_144, %c1536_145], %115 {strides = array<i32>} : memref<54x3072xf32, #tpu.memory_space<vmem>>, vector<2x1536xf32>,
    %c1_146 = arith.constant 1 : index
    %c0_147 = arith.constant 0 : index
    %c16_148 = arith.constant 16 : index
    %117 = vector.load %arg1[%c1_146, %c0_147, %c16_148] : memref<2x2x2176xf32, #tpu.memory_space<vmem>>, vector<1x2x1536xf32>
    %118 = vector.shape_cast %117 : vector<1x2x1536xf32> to vector<2x1536xf32>
    %c6_149 = arith.constant 6 : index
    %c1536_150 = arith.constant 1536 : index
    %119 = vector.load %arg9[%c6_149, %c1536_150] : memref<54x3072xf32, #tpu.memory_space<vmem>>, vector<2x1536xf32>
    tpu.vector_store %arg9[%c6_149, %c1536_150], %118 {strides = array<i32>} : memref<54x3072xf32, #tpu.memory_space<vmem>>, vector<2x1536xf32>,
    %c1_151 = arith.constant 1 : index
    %c0_152 = arith.constant 0 : index
    %c17_153 = arith.constant 17 : index
    %120 = vector.load %arg1[%c1_151, %c0_152, %c17_153] : memref<2x2x2176xf32, #tpu.memory_space<vmem>>, vector<1x2x1536xf32>
    %121 = vector.shape_cast %120 : vector<1x2x1536xf32> to vector<2x1536xf32>
    %c8_154 = arith.constant 8 : index
    %c1536_155 = arith.constant 1536 : index
    %122 = vector.load %arg9[%c8_154, %c1536_155] : memref<54x3072xf32, #tpu.memory_space<vmem>>, vector<2x1536xf32>
    tpu.vector_store %arg9[%c8_154, %c1536_155], %121 {strides = array<i32>} : memref<54x3072xf32, #tpu.memory_space<vmem>>, vector<2x1536xf32>,
    %c1_156 = arith.constant 1 : index
    %c0_157 = arith.constant 0 : index
    %c18_158 = arith.constant 18 : index
    %123 = vector.load %arg1[%c1_156, %c0_157, %c18_158] : memref<2x2x2176xf32, #tpu.memory_space<vmem>>, vector<1x2x1536xf32>
    %124 = vector.shape_cast %123 : vector<1x2x1536xf32> to vector<2x1536xf32>
    %c10_159 = arith.constant 10 : index
    %c1536_160 = arith.constant 1536 : index
    %125 = vector.load %arg9[%c10_159, %c1536_160] : memref<54x3072xf32, #tpu.memory_space<vmem>>, vector<2x1536xf32>
    tpu.vector_store %arg9[%c10_159, %c1536_160], %124 {strides = array<i32>} : memref<54x3072xf32, #tpu.memory_space<vmem>>, vector<2x1536xf32>,
    %c1_161 = arith.constant 1 : index
    %c0_162 = arith.constant 0 : index
    %c32_163 = arith.constant 32 : index
    %126 = vector.load %arg1[%c1_161, %c0_162, %c32_163] : memref<2x2x2176xf32, #tpu.memory_space<vmem>>, vector<1x2x1536xf32>
    %127 = vector.shape_cast %126 : vector<1x2x1536xf32> to vector<2x1536xf32>
    %c12_164 = arith.constant 12 : index
    %c1536_165 = arith.constant 1536 : index
    %128 = vector.load %arg9[%c12_164, %c1536_165] : memref<54x3072xf32, #tpu.memory_space<vmem>>, vector<2x1536xf32>
    tpu.vector_store %arg9[%c12_164, %c1536_165], %127 {strides = array<i32>} : memref<54x3072xf32, #tpu.memory_space<vmem>>, vector<2x1536xf32>,
    %c1_166 = arith.constant 1 : index
    %c0_167 = arith.constant 0 : index
    %c33_168 = arith.constant 33 : index
    %129 = vector.load %arg1[%c1_166, %c0_167, %c33_168] : memref<2x2x2176xf32, #tpu.memory_space<vmem>>, vector<1x2x1536xf32>
    %130 = vector.shape_cast %129 : vector<1x2x1536xf32> to vector<2x1536xf32>
    %c14_169 = arith.constant 14 : index
    %c1536_170 = arith.constant 1536 : index
    %131 = vector.load %arg9[%c14_169, %c1536_170] : memref<54x3072xf32, #tpu.memory_space<vmem>>, vector<2x1536xf32>
    tpu.vector_store %arg9[%c14_169, %c1536_170], %130 {strides = array<i32>} : memref<54x3072xf32, #tpu.memory_space<vmem>>, vector<2x1536xf32>,
    %c1_171 = arith.constant 1 : index
    %c0_172 = arith.constant 0 : index
    %c34_173 = arith.constant 34 : index
    %132 = vector.load %arg1[%c1_171, %c0_172, %c34_173] : memref<2x2x2176xf32, #tpu.memory_space<vmem>>, vector<1x2x1536xf32>
    %133 = vector.shape_cast %132 : vector<1x2x1536xf32> to vector<2x1536xf32>
    %c16_174 = arith.constant 16 : index
    %c1536_175 = arith.constant 1536 : index
    %134 = vector.load %arg9[%c16_174, %c1536_175] : memref<54x3072xf32, #tpu.memory_space<vmem>>, vector<2x1536xf32>
    tpu.vector_store %arg9[%c16_174, %c1536_175], %133 {strides = array<i32>} : memref<54x3072xf32, #tpu.memory_space<vmem>>, vector<2x1536xf32>,
    %c1_176 = arith.constant 1 : index
    %c0_177 = arith.constant 0 : index
    %c256_178 = arith.constant 256 : index
    %135 = vector.load %arg1[%c1_176, %c0_177, %c256_178] : memref<2x2x2176xf32, #tpu.memory_space<vmem>>, vector<1x2x1536xf32>
    %136 = vector.shape_cast %135 : vector<1x2x1536xf32> to vector<2x1536xf32>
    %c18_179 = arith.constant 18 : index
    %c1536_180 = arith.constant 1536 : index
    %137 = vector.load %arg9[%c18_179, %c1536_180] : memref<54x3072xf32, #tpu.memory_space<vmem>>, vector<2x1536xf32>
    tpu.vector_store %arg9[%c18_179, %c1536_180], %136 {strides = array<i32>} : memref<54x3072xf32, #tpu.memory_space<vmem>>, vector<2x1536xf32>,
    %c1_181 = arith.constant 1 : index
    %c0_182 = arith.constant 0 : index
    %c257_183 = arith.constant 257 : index
    %138 = vector.load %arg1[%c1_181, %c0_182, %c257_183] : memref<2x2x2176xf32, #tpu.memory_space<vmem>>, vector<1x2x1536xf32>
    %139 = vector.shape_cast %138 : vector<1x2x1536xf32> to vector<2x1536xf32>
    %c20_184 = arith.constant 20 : index
    %c1536_185 = arith.constant 1536 : index
    %140 = vector.load %arg9[%c20_184, %c1536_185] : memref<54x3072xf32, #tpu.memory_space<vmem>>, vector<2x1536xf32>
    tpu.vector_store %arg9[%c20_184, %c1536_185], %139 {strides = array<i32>} : memref<54x3072xf32, #tpu.memory_space<vmem>>, vector<2x1536xf32>,
    %c1_186 = arith.constant 1 : index
    %c0_187 = arith.constant 0 : index
    %c258_188 = arith.constant 258 : index
    %141 = vector.load %arg1[%c1_186, %c0_187, %c258_188] : memref<2x2x2176xf32, #tpu.memory_space<vmem>>, vector<1x2x1536xf32>
    %142 = vector.shape_cast %141 : vector<1x2x1536xf32> to vector<2x1536xf32>
    %c22_189 = arith.constant 22 : index
    %c1536_190 = arith.constant 1536 : index
    %143 = vector.load %arg9[%c22_189, %c1536_190] : memref<54x3072xf32, #tpu.memory_space<vmem>>, vector<2x1536xf32>
    tpu.vector_store %arg9[%c22_189, %c1536_190], %142 {strides = array<i32>} : memref<54x3072xf32, #tpu.memory_space<vmem>>, vector<2x1536xf32>,
    %c1_191 = arith.constant 1 : index
    %c0_192 = arith.constant 0 : index
    %c272_193 = arith.constant 272 : index
    %144 = vector.load %arg1[%c1_191, %c0_192, %c272_193] : memref<2x2x2176xf32, #tpu.memory_space<vmem>>, vector<1x2x1536xf32>
    %145 = vector.shape_cast %144 : vector<1x2x1536xf32> to vector<2x1536xf32>
    %c24_194 = arith.constant 24 : index
    %c1536_195 = arith.constant 1536 : index
    %146 = vector.load %arg9[%c24_194, %c1536_195] : memref<54x3072xf32, #tpu.memory_space<vmem>>, vector<2x1536xf32>
    tpu.vector_store %arg9[%c24_194, %c1536_195], %145 {strides = array<i32>} : memref<54x3072xf32, #tpu.memory_space<vmem>>, vector<2x1536xf32>,
    %c1_196 = arith.constant 1 : index
    %c0_197 = arith.constant 0 : index
    %c273_198 = arith.constant 273 : index
    %147 = vector.load %arg1[%c1_196, %c0_197, %c273_198] : memref<2x2x2176xf32, #tpu.memory_space<vmem>>, vector<1x2x1536xf32>
    %148 = vector.shape_cast %147 : vector<1x2x1536xf32> to vector<2x1536xf32>
    %c26_199 = arith.constant 26 : index
    %c1536_200 = arith.constant 1536 : index
    %149 = vector.load %arg9[%c26_199, %c1536_200] : memref<54x3072xf32, #tpu.memory_space<vmem>>, vector<2x1536xf32>
    tpu.vector_store %arg9[%c26_199, %c1536_200], %148 {strides = array<i32>} : memref<54x3072xf32, #tpu.memory_space<vmem>>, vector<2x1536xf32>,
    %c1_201 = arith.constant 1 : index
    %c0_202 = arith.constant 0 : index
    %c274_203 = arith.constant 274 : index
    %150 = vector.load %arg1[%c1_201, %c0_202, %c274_203] : memref<2x2x2176xf32, #tpu.memory_space<vmem>>, vector<1x2x1536xf32>
    %151 = vector.shape_cast %150 : vector<1x2x1536xf32> to vector<2x1536xf32>
    %c28_204 = arith.constant 28 : index
    %c1536_205 = arith.constant 1536 : index
    %152 = vector.load %arg9[%c28_204, %c1536_205] : memref<54x3072xf32, #tpu.memory_space<vmem>>, vector<2x1536xf32>
    tpu.vector_store %arg9[%c28_204, %c1536_205], %151 {strides = array<i32>} : memref<54x3072xf32, #tpu.memory_space<vmem>>, vector<2x1536xf32>,
    %c1_206 = arith.constant 1 : index
    %c0_207 = arith.constant 0 : index
    %c288_208 = arith.constant 288 : index
    %153 = vector.load %arg1[%c1_206, %c0_207, %c288_208] : memref<2x2x2176xf32, #tpu.memory_space<vmem>>, vector<1x2x1536xf32>
    %154 = vector.shape_cast %153 : vector<1x2x1536xf32> to vector<2x1536xf32>
    %c30_209 = arith.constant 30 : index
    %c1536_210 = arith.constant 1536 : index
    %155 = vector.load %arg9[%c30_209, %c1536_210] : memref<54x3072xf32, #tpu.memory_space<vmem>>, vector<2x1536xf32>
    tpu.vector_store %arg9[%c30_209, %c1536_210], %154 {strides = array<i32>} : memref<54x3072xf32, #tpu.memory_space<vmem>>, vector<2x1536xf32>,
    %c1_211 = arith.constant 1 : index
    %c0_212 = arith.constant 0 : index
    %c289_213 = arith.constant 289 : index
    %156 = vector.load %arg1[%c1_211, %c0_212, %c289_213] : memref<2x2x2176xf32, #tpu.memory_space<vmem>>, vector<1x2x1536xf32>
    %157 = vector.shape_cast %156 : vector<1x2x1536xf32> to vector<2x1536xf32>
    %c32_214 = arith.constant 32 : index
    %c1536_215 = arith.constant 1536 : index
    %158 = vector.load %arg9[%c32_214, %c1536_215] : memref<54x3072xf32, #tpu.memory_space<vmem>>, vector<2x1536xf32>
    tpu.vector_store %arg9[%c32_214, %c1536_215], %157 {strides = array<i32>} : memref<54x3072xf32, #tpu.memory_space<vmem>>, vector<2x1536xf32>,
    %c1_216 = arith.constant 1 : index
    %c0_217 = arith.constant 0 : index
    %c290_218 = arith.constant 290 : index
    %159 = vector.load %arg1[%c1_216, %c0_217, %c290_218] : memref<2x2x2176xf32, #tpu.memory_space<vmem>>, vector<1x2x1536xf32>
    %160 = vector.shape_cast %159 : vector<1x2x1536xf32> to vector<2x1536xf32>
    %c34_219 = arith.constant 34 : index
    %c1536_220 = arith.constant 1536 : index
    %161 = vector.load %arg9[%c34_219, %c1536_220] : memref<54x3072xf32, #tpu.memory_space<vmem>>, vector<2x1536xf32>
    tpu.vector_store %arg9[%c34_219, %c1536_220], %160 {strides = array<i32>} : memref<54x3072xf32, #tpu.memory_space<vmem>>, vector<2x1536xf32>,
    %c1_221 = arith.constant 1 : index
    %c0_222 = arith.constant 0 : index
    %c512_223 = arith.constant 512 : index
    %162 = vector.load %arg1[%c1_221, %c0_222, %c512_223] : memref<2x2x2176xf32, #tpu.memory_space<vmem>>, vector<1x2x1536xf32>
    %163 = vector.shape_cast %162 : vector<1x2x1536xf32> to vector<2x1536xf32>
    %c36_224 = arith.constant 36 : index
    %c1536_225 = arith.constant 1536 : index
    %164 = vector.load %arg9[%c36_224, %c1536_225] : memref<54x3072xf32, #tpu.memory_space<vmem>>, vector<2x1536xf32>
    tpu.vector_store %arg9[%c36_224, %c1536_225], %163 {strides = array<i32>} : memref<54x3072xf32, #tpu.memory_space<vmem>>, vector<2x1536xf32>,
    %c1_226 = arith.constant 1 : index
    %c0_227 = arith.constant 0 : index
    %c513_228 = arith.constant 513 : index
    %165 = vector.load %arg1[%c1_226, %c0_227, %c513_228] : memref<2x2x2176xf32, #tpu.memory_space<vmem>>, vector<1x2x1536xf32>
    %166 = vector.shape_cast %165 : vector<1x2x1536xf32> to vector<2x1536xf32>
    %c38_229 = arith.constant 38 : index
    %c1536_230 = arith.constant 1536 : index
    %167 = vector.load %arg9[%c38_229, %c1536_230] : memref<54x3072xf32, #tpu.memory_space<vmem>>, vector<2x1536xf32>
    tpu.vector_store %arg9[%c38_229, %c1536_230], %166 {strides = array<i32>} : memref<54x3072xf32, #tpu.memory_space<vmem>>, vector<2x1536xf32>,
    %c1_231 = arith.constant 1 : index
    %c0_232 = arith.constant 0 : index
    %c514_233 = arith.constant 514 : index
    %168 = vector.load %arg1[%c1_231, %c0_232, %c514_233] : memref<2x2x2176xf32, #tpu.memory_space<vmem>>, vector<1x2x1536xf32>
    %169 = vector.shape_cast %168 : vector<1x2x1536xf32> to vector<2x1536xf32>
    %c40_234 = arith.constant 40 : index
    %c1536_235 = arith.constant 1536 : index
    %170 = vector.load %arg9[%c40_234, %c1536_235] : memref<54x3072xf32, #tpu.memory_space<vmem>>, vector<2x1536xf32>
    tpu.vector_store %arg9[%c40_234, %c1536_235], %169 {strides = array<i32>} : memref<54x3072xf32, #tpu.memory_space<vmem>>, vector<2x1536xf32>,
    %c1_236 = arith.constant 1 : index
    %c0_237 = arith.constant 0 : index
    %c528_238 = arith.constant 528 : index
    %171 = vector.load %arg1[%c1_236, %c0_237, %c528_238] : memref<2x2x2176xf32, #tpu.memory_space<vmem>>, vector<1x2x1536xf32>
    %172 = vector.shape_cast %171 : vector<1x2x1536xf32> to vector<2x1536xf32>
    %c42_239 = arith.constant 42 : index
    %c1536_240 = arith.constant 1536 : index
    %173 = vector.load %arg9[%c42_239, %c1536_240] : memref<54x3072xf32, #tpu.memory_space<vmem>>, vector<2x1536xf32>
    tpu.vector_store %arg9[%c42_239, %c1536_240], %172 {strides = array<i32>} : memref<54x3072xf32, #tpu.memory_space<vmem>>, vector<2x1536xf32>,
    %c1_241 = arith.constant 1 : index
    %c0_242 = arith.constant 0 : index
    %c529_243 = arith.constant 529 : index
    %174 = vector.load %arg1[%c1_241, %c0_242, %c529_243] : memref<2x2x2176xf32, #tpu.memory_space<vmem>>, vector<1x2x1536xf32>
    %175 = vector.shape_cast %174 : vector<1x2x1536xf32> to vector<2x1536xf32>
    %c44_244 = arith.constant 44 : index
    %c1536_245 = arith.constant 1536 : index
    %176 = vector.load %arg9[%c44_244, %c1536_245] : memref<54x3072xf32, #tpu.memory_space<vmem>>, vector<2x1536xf32>
    tpu.vector_store %arg9[%c44_244, %c1536_245], %175 {strides = array<i32>} : memref<54x3072xf32, #tpu.memory_space<vmem>>, vector<2x1536xf32>,
    %c1_246 = arith.constant 1 : index
    %c0_247 = arith.constant 0 : index
    %c530_248 = arith.constant 530 : index
    %177 = vector.load %arg1[%c1_246, %c0_247, %c530_248] : memref<2x2x2176xf32, #tpu.memory_space<vmem>>, vector<1x2x1536xf32>
    %178 = vector.shape_cast %177 : vector<1x2x1536xf32> to vector<2x1536xf32>
    %c46_249 = arith.constant 46 : index
    %c1536_250 = arith.constant 1536 : index
    %179 = vector.load %arg9[%c46_249, %c1536_250] : memref<54x3072xf32, #tpu.memory_space<vmem>>, vector<2x1536xf32>
    tpu.vector_store %arg9[%c46_249, %c1536_250], %178 {strides = array<i32>} : memref<54x3072xf32, #tpu.memory_space<vmem>>, vector<2x1536xf32>,
    %c1_251 = arith.constant 1 : index
    %c0_252 = arith.constant 0 : index
    %c544_253 = arith.constant 544 : index
    %180 = vector.load %arg1[%c1_251, %c0_252, %c544_253] : memref<2x2x2176xf32, #tpu.memory_space<vmem>>, vector<1x2x1536xf32>
    %181 = vector.shape_cast %180 : vector<1x2x1536xf32> to vector<2x1536xf32>
    %c48_254 = arith.constant 48 : index
    %c1536_255 = arith.constant 1536 : index
    %182 = vector.load %arg9[%c48_254, %c1536_255] : memref<54x3072xf32, #tpu.memory_space<vmem>>, vector<2x1536xf32>
    tpu.vector_store %arg9[%c48_254, %c1536_255], %181 {strides = array<i32>} : memref<54x3072xf32, #tpu.memory_space<vmem>>, vector<2x1536xf32>,
    %c1_256 = arith.constant 1 : index
    %c0_257 = arith.constant 0 : index
    %c545_258 = arith.constant 545 : index
    %183 = vector.load %arg1[%c1_256, %c0_257, %c545_258] : memref<2x2x2176xf32, #tpu.memory_space<vmem>>, vector<1x2x1536xf32>
    %184 = vector.shape_cast %183 : vector<1x2x1536xf32> to vector<2x1536xf32>
    %c50_259 = arith.constant 50 : index
    %c1536_260 = arith.constant 1536 : index
    %185 = vector.load %arg9[%c50_259, %c1536_260] : memref<54x3072xf32, #tpu.memory_space<vmem>>, vector<2x1536xf32>
    tpu.vector_store %arg9[%c50_259, %c1536_260], %184 {strides = array<i32>} : memref<54x3072xf32, #tpu.memory_space<vmem>>, vector<2x1536xf32>,
    %c1_261 = arith.constant 1 : index
    %c0_262 = arith.constant 0 : index
    %c546_263 = arith.constant 546 : index
    %186 = vector.load %arg1[%c1_261, %c0_262, %c546_263] : memref<2x2x2176xf32, #tpu.memory_space<vmem>>, vector<1x2x1536xf32>
    %187 = vector.shape_cast %186 : vector<1x2x1536xf32> to vector<2x1536xf32>
    %c52_264 = arith.constant 52 : index
    %c1536_265 = arith.constant 1536 : index
    %188 = vector.load %arg9[%c52_264, %c1536_265] : memref<54x3072xf32, #tpu.memory_space<vmem>>, vector<2x1536xf32>
    tpu.vector_store %arg9[%c52_264, %c1536_265], %187 {strides = array<i32>} : memref<54x3072xf32, #tpu.memory_space<vmem>>, vector<2x1536xf32>,
    %c1_266 = arith.constant 1 : index
    %c0_267 = arith.constant 0 : index
    %c0_268 = arith.constant 0 : index
    %189 = vector.load %arg4[%c1_266, %c0_267, %c0_268] : memref<2x4x384xf32, #tpu.memory_space<vmem>>, vector<1x4x256xf32>
    %190 = vector.shape_cast %189 : vector<1x4x256xf32> to vector<4x256xf32>
    %c0_269 = arith.constant 0 : index
    %c256_270 = arith.constant 256 : index
    %191 = vector.load %arg10[%c0_269, %c256_270] : memref<36x512xf32, #tpu.memory_space<vmem>>, vector<4x256xf32>
    tpu.vector_store %arg10[%c0_269, %c256_270], %190 {strides = array<i32>} : memref<36x512xf32, #tpu.memory_space<vmem>>, vector<4x256xf32>,
    %c1_271 = arith.constant 1 : index
    %c0_272 = arith.constant 0 : index
    %c1_273 = arith.constant 1 : index
    %192 = vector.load %arg4[%c1_271, %c0_272, %c1_273] : memref<2x4x384xf32, #tpu.memory_space<vmem>>, vector<1x4x256xf32>
    %193 = vector.shape_cast %192 : vector<1x4x256xf32> to vector<4x256xf32>
    %c4_274 = arith.constant 4 : index
    %c256_275 = arith.constant 256 : index
    %194 = vector.load %arg10[%c4_274, %c256_275] : memref<36x512xf32, #tpu.memory_space<vmem>>, vector<4x256xf32>
    tpu.vector_store %arg10[%c4_274, %c256_275], %193 {strides = array<i32>} : memref<36x512xf32, #tpu.memory_space<vmem>>, vector<4x256xf32>,
    %c1_276 = arith.constant 1 : index
    %c0_277 = arith.constant 0 : index
    %c2_278 = arith.constant 2 : index
    %195 = vector.load %arg4[%c1_276, %c0_277, %c2_278] : memref<2x4x384xf32, #tpu.memory_space<vmem>>, vector<1x4x256xf32>
    %196 = vector.shape_cast %195 : vector<1x4x256xf32> to vector<4x256xf32>
    %c8_279 = arith.constant 8 : index
    %c256_280 = arith.constant 256 : index
    %197 = vector.load %arg10[%c8_279, %c256_280] : memref<36x512xf32, #tpu.memory_space<vmem>>, vector<4x256xf32>
    tpu.vector_store %arg10[%c8_279, %c256_280], %196 {strides = array<i32>} : memref<36x512xf32, #tpu.memory_space<vmem>>, vector<4x256xf32>,
    %c1_281 = arith.constant 1 : index
    %c0_282 = arith.constant 0 : index
    %c16_283 = arith.constant 16 : index
    %198 = vector.load %arg4[%c1_281, %c0_282, %c16_283] : memref<2x4x384xf32, #tpu.memory_space<vmem>>, vector<1x4x256xf32>
    %199 = vector.shape_cast %198 : vector<1x4x256xf32> to vector<4x256xf32>
    %c12_284 = arith.constant 12 : index
    %c256_285 = arith.constant 256 : index
    %200 = vector.load %arg10[%c12_284, %c256_285] : memref<36x512xf32, #tpu.memory_space<vmem>>, vector<4x256xf32>
    tpu.vector_store %arg10[%c12_284, %c256_285], %199 {strides = array<i32>} : memref<36x512xf32, #tpu.memory_space<vmem>>, vector<4x256xf32>,
    %c1_286 = arith.constant 1 : index
    %c0_287 = arith.constant 0 : index
    %c17_288 = arith.constant 17 : index
    %201 = vector.load %arg4[%c1_286, %c0_287, %c17_288] : memref<2x4x384xf32, #tpu.memory_space<vmem>>, vector<1x4x256xf32>
    %202 = vector.shape_cast %201 : vector<1x4x256xf32> to vector<4x256xf32>
    %c16_289 = arith.constant 16 : index
    %c256_290 = arith.constant 256 : index
    %203 = vector.load %arg10[%c16_289, %c256_290] : memref<36x512xf32, #tpu.memory_space<vmem>>, vector<4x256xf32>
    tpu.vector_store %arg10[%c16_289, %c256_290], %202 {strides = array<i32>} : memref<36x512xf32, #tpu.memory_space<vmem>>, vector<4x256xf32>,
    %c1_291 = arith.constant 1 : index
    %c0_292 = arith.constant 0 : index
    %c18_293 = arith.constant 18 : index
    %204 = vector.load %arg4[%c1_291, %c0_292, %c18_293] : memref<2x4x384xf32, #tpu.memory_space<vmem>>, vector<1x4x256xf32>
    %205 = vector.shape_cast %204 : vector<1x4x256xf32> to vector<4x256xf32>
    %c20_294 = arith.constant 20 : index
    %c256_295 = arith.constant 256 : index
    %206 = vector.load %arg10[%c20_294, %c256_295] : memref<36x512xf32, #tpu.memory_space<vmem>>, vector<4x256xf32>
    tpu.vector_store %arg10[%c20_294, %c256_295], %205 {strides = array<i32>} : memref<36x512xf32, #tpu.memory_space<vmem>>, vector<4x256xf32>,
    %c1_296 = arith.constant 1 : index
    %c0_297 = arith.constant 0 : index
    %c32_298 = arith.constant 32 : index
    %207 = vector.load %arg4[%c1_296, %c0_297, %c32_298] : memref<2x4x384xf32, #tpu.memory_space<vmem>>, vector<1x4x256xf32>
    %208 = vector.shape_cast %207 : vector<1x4x256xf32> to vector<4x256xf32>
    %c24_299 = arith.constant 24 : index
    %c256_300 = arith.constant 256 : index
    %209 = vector.load %arg10[%c24_299, %c256_300] : memref<36x512xf32, #tpu.memory_space<vmem>>, vector<4x256xf32>
    tpu.vector_store %arg10[%c24_299, %c256_300], %208 {strides = array<i32>} : memref<36x512xf32, #tpu.memory_space<vmem>>, vector<4x256xf32>,
    %c1_301 = arith.constant 1 : index
    %c0_302 = arith.constant 0 : index
    %c33_303 = arith.constant 33 : index
    %210 = vector.load %arg4[%c1_301, %c0_302, %c33_303] : memref<2x4x384xf32, #tpu.memory_space<vmem>>, vector<1x4x256xf32>
    %211 = vector.shape_cast %210 : vector<1x4x256xf32> to vector<4x256xf32>
    %c28_304 = arith.constant 28 : index
    %c256_305 = arith.constant 256 : index
    %212 = vector.load %arg10[%c28_304, %c256_305] : memref<36x512xf32, #tpu.memory_space<vmem>>, vector<4x256xf32>
    tpu.vector_store %arg10[%c28_304, %c256_305], %211 {strides = array<i32>} : memref<36x512xf32, #tpu.memory_space<vmem>>, vector<4x256xf32>,
    %c1_306 = arith.constant 1 : index
    %c0_307 = arith.constant 0 : index
    %c34_308 = arith.constant 34 : index
    %213 = vector.load %arg4[%c1_306, %c0_307, %c34_308] : memref<2x4x384xf32, #tpu.memory_space<vmem>>, vector<1x4x256xf32>
    %214 = vector.shape_cast %213 : vector<1x4x256xf32> to vector<4x256xf32>
    %c32_309 = arith.constant 32 : index
    %c256_310 = arith.constant 256 : index
    %215 = vector.load %arg10[%c32_309, %c256_310] : memref<36x512xf32, #tpu.memory_space<vmem>>, vector<4x256xf32>
    tpu.vector_store %arg10[%c32_309, %c256_310], %214 {strides = array<i32>} : memref<36x512xf32, #tpu.memory_space<vmem>>, vector<4x256xf32>,
    %c0_311 = arith.constant 0 : index
    %c0_312 = arith.constant 0 : index
    %216 = vector.load %arg2[%c0_311, %c0_312] : memref<8x54xf32, #tpu.memory_space<vmem>>, vector<8x54xf32>
    %c0_313 = arith.constant 0 : index
    %c0_314 = arith.constant 0 : index
    %217 = vector.load %arg9[%c0_313, %c0_314] : memref<54x3072xf32, #tpu.memory_space<vmem>>, vector<54x3072xf32>
    %cst = arith.constant dense<0.000000e+00> : vector<8x3072xf32>
    %218 = tpu.matmul %216, %217, %cst {dimension_numbers = #tpu.dot_dimension_numbers<[1], [0], [0], [1], [0, 0, 1, 1], [], []>} : vector<8x54xf32>, vector<54x3072xf32>, vector<8x3072xf32> -> vector<8x3072xf32>
    %c0_315 = arith.constant 0 : index
    %c0_316 = arith.constant 0 : index
    %219 = vector.load %arg5[%c0_315, %c0_316] : memref<8x36xf32, #tpu.memory_space<vmem>>, vector<8x36xf32>
    %c0_317 = arith.constant 0 : index
    %c0_318 = arith.constant 0 : index
    %220 = vector.load %arg10[%c0_317, %c0_318] : memref<36x512xf32, #tpu.memory_space<vmem>>, vector<36x512xf32>
    %cst_319 = arith.constant dense<0.000000e+00> : vector<8x512xf32>
    %221 = tpu.matmul %219, %220, %cst_319 {dimension_numbers = #tpu.dot_dimension_numbers<[1], [0], [0], [1], [0, 0, 1, 1], [], []>} : vector<8x36xf32>, vector<36x512xf32>, vector<8x512xf32> -> vector<8x512xf32>
    %c0_320 = arith.constant 0 : index
    %c0_321 = arith.constant 0 : index
    %222 = vector.load %arg3[%c0_320, %c0_321] : memref<8x1xf32, #tpu.memory_space<vmem>>, vector<8x1xf32>
    %223 = vector.broadcast %222 : vector<8x1xf32> to vector<8x3072xf32>
    %224 = arith.addf %218, %223 : vector<8x3072xf32>
    %cst_322 = arith.constant 0.000000e+00 : f32
    %225 = vector.broadcast %cst_322 : f32 to vector<8x3072xf32>
    %226 = arith.maximumf %224, %225 : vector<8x3072xf32>
    %c0_323 = arith.constant 0 : index
    %c0_324 = arith.constant 0 : index
    %227 = vector.load %arg6[%c0_323, %c0_324] : memref<8x1xf32, #tpu.memory_space<vmem>>, vector<8x1xf32>
    %228 = vector.broadcast %227 : vector<8x1xf32> to vector<8x512xf32>
    %229 = arith.addf %221, %228 : vector<8x512xf32>
    %cst_325 = arith.constant 0.000000e+00 : f32
    %230 = vector.broadcast %cst_325 : f32 to vector<8x512xf32>
    %231 = arith.maximumf %229, %230 : vector<8x512xf32>
    %232 = vector.extract_strided_slice %226 {offsets = [0, 0], sizes = [8, 1536], strides = [1, 1]} : vector<8x3072xf32> to vector<8x1536xf32>
    %c0_326 = arith.constant 0 : index
    %c0_327 = arith.constant 0 : index
    %c0_328 = arith.constant 0 : index
    %233 = vector.load %arg7[%c0_326, %c0_327, %c0_328] : memref<2x8x1536xf32, #tpu.memory_space<vmem>>, vector<1x8x1536xf32>
    %234 = vector.shape_cast %233 : vector<1x8x1536xf32> to vector<8x1536xf32>
    %235 = vector.shape_cast %232 : vector<8x1536xf32> to vector<1x8x1536xf32>
    tpu.vector_store %arg7[%c0_326, %c0_327, %c0_328], %235 {strides = array<i32>} : memref<2x8x1536xf32, #tpu.memory_space<vmem>>, vector<1x8x1536xf32>,
    %236 = vector.extract_strided_slice %231 {offsets = [0, 0], sizes = [8, 256], strides = [1, 1]} : vector<8x512xf32> to vector<8x256xf32>
    %c0_329 = arith.constant 0 : index
    %c0_330 = arith.constant 0 : index
    %c0_331 = arith.constant 0 : index
    %237 = vector.load %arg8[%c0_329, %c0_330, %c0_331] : memref<2x8x256xf32, #tpu.memory_space<vmem>>, vector<1x8x256xf32>
    %238 = vector.shape_cast %237 : vector<1x8x256xf32> to vector<8x256xf32>
    %239 = vector.shape_cast %236 : vector<8x256xf32> to vector<1x8x256xf32>
    tpu.vector_store %arg8[%c0_329, %c0_330, %c0_331], %239 {strides = array<i32>} : memref<2x8x256xf32, #tpu.memory_space<vmem>>, vector<1x8x256xf32>,
    %240 = vector.extract_strided_slice %226 {offsets = [0, 1536], sizes = [8, 1536], strides = [1, 1]} : vector<8x3072xf32> to vector<8x1536xf32>
    %c1_332 = arith.constant 1 : index
    %c0_333 = arith.constant 0 : index
    %c0_334 = arith.constant 0 : index
    %241 = vector.load %arg7[%c1_332, %c0_333, %c0_334] : memref<2x8x1536xf32, #tpu.memory_space<vmem>>, vector<1x8x1536xf32>
    %242 = vector.shape_cast %241 : vector<1x8x1536xf32> to vector<8x1536xf32>
    %243 = vector.shape_cast %240 : vector<8x1536xf32> to vector<1x8x1536xf32>
    tpu.vector_store %arg7[%c1_332, %c0_333, %c0_334], %243 {strides = array<i32>} : memref<2x8x1536xf32, #tpu.memory_space<vmem>>, vector<1x8x1536xf32>,
    %244 = vector.extract_strided_slice %231 {offsets = [0, 256], sizes = [8, 256], strides = [1, 1]} : vector<8x512xf32> to vector<8x256xf32>
    %c1_335 = arith.constant 1 : index
    %c0_336 = arith.constant 0 : index
    %c0_337 = arith.constant 0 : index
    %245 = vector.load %arg8[%c1_335, %c0_336, %c0_337] : memref<2x8x256xf32, #tpu.memory_space<vmem>>, vector<1x8x256xf32>
    %246 = vector.shape_cast %245 : vector<1x8x256xf32> to vector<8x256xf32>
    %247 = vector.shape_cast %244 : vector<8x256xf32> to vector<1x8x256xf32>
    tpu.vector_store %arg8[%c1_335, %c0_336, %c0_337], %247 {strides = array<i32>} : memref<2x8x256xf32, #tpu.memory_space<vmem>>, vector<1x8x256xf32>,
    return
  }
  func.func @transform_0(%arg0: i32) -> (i32, i32, i32) {
    %c0_i32 = arith.constant 0 : i32
    %c0_i32_0 = arith.constant 0 : i32
    %c0_i32_1 = arith.constant 0 : i32
    %c0_i32_2 = arith.constant 0 : i32
    return %c0_i32, %c0_i32_0, %c0_i32_1 : i32, i32, i32
  }
  func.func @transform_1(%arg0: i32) -> (i32, i32) {
    %c0_i32 = arith.constant 0 : i32
    %c0_i32_0 = arith.constant 0 : i32
    %c0_i32_1 = arith.constant 0 : i32
    return %c0_i32, %c0_i32_0 : i32, i32
  }
  func.func @transform_2(%arg0: i32) -> (i32, i32) {
    %c0_i32 = arith.constant 0 : i32
    %c0_i32_0 = arith.constant 0 : i32
    %c0_i32_1 = arith.constant 0 : i32
    return %c0_i32, %c0_i32_0 : i32, i32
  }
  func.func @transform_3(%arg0: i32) -> (i32, i32, i32) {
    %c0_i32 = arith.constant 0 : i32
    %c0_i32_0 = arith.constant 0 : i32
    %c0_i32_1 = arith.constant 0 : i32
    %c0_i32_2 = arith.constant 0 : i32
    return %c0_i32, %c0_i32_0, %c0_i32_1 : i32, i32, i32
  }
  func.func @transform_4(%arg0: i32) -> (i32, i32) {
    %c0_i32 = arith.constant 0 : i32
    %c0_i32_0 = arith.constant 0 : i32
    %c0_i32_1 = arith.constant 0 : i32
    return %c0_i32, %c0_i32_0 : i32, i32
  }
  func.func @transform_5(%arg0: i32) -> (i32, i32) {
    %c0_i32 = arith.constant 0 : i32
    %c0_i32_0 = arith.constant 0 : i32
    %c0_i32_1 = arith.constant 0 : i32
    return %c0_i32, %c0_i32_0 : i32, i32
  }
  func.func @transform_6(%arg0: i32) -> (i32, i32, i32) {
    %c0_i32 = arith.constant 0 : i32
    %c0_i32_0 = arith.constant 0 : i32
    %c0_i32_1 = arith.constant 0 : i32
    %c0_i32_2 = arith.constant 0 : i32
    return %c0_i32, %c0_i32_0, %c0_i32_1 : i32, i32, i32
  }
  func.func @transform_7(%arg0: i32) -> (i32, i32, i32) {
    %c0_i32 = arith.constant 0 : i32
    %c0_i32_0 = arith.constant 0 : i32
    %c0_i32_1 = arith.constant 0 : i32
    %c0_i32_2 = arith.constant 0 : i32
    return %c0_i32, %c0_i32_0, %c0_i32_1 : i32, i32, i32
  }
}

</mosaic_0001>

<bundles_post_ra>
// kernel: syn_layer_forward.1
= control target key start
LH: loop header
LB: loop body
LE: loop exit
PB: predicated region body
PF: predicated region fallthrough
CT: control target
= control target key end

     0   :  { %v35_v0 = vlaneseq  ;;  %v8864_v1 = vmov 1983009808   ;;  %s8865_s30 = smov 127   ;;  %s8866_s10 = smov 126   ;;  %vm199_vm0 = vcmask 1039360   ;;  %vm329_vm1 = vcmask 1031168   ;;  %s12353_s0 = inlined_call_operand.vmem [shape: f32[2,2,2176], index: 0, kind: input, shape index: {}]   ;;  %s12354_s3 = inlined_call_operand.vmem [shape: f32[2,4,384], index: 3, kind: input, shape index: {}]   ;;  %s12355_s1 = inlined_call_operand.vmem [shape: f32[8,54], index: 1, kind: input, shape index: {}]   ;;  %s12356_s2 = inlined_call_operand.vmem [shape: f32[8,1], index: 2, kind: input, shape index: {}]   ;;  %s12357_s5 = inlined_call_operand.vmem [shape: f32[8,1], index: 5, kind: input, shape index: {}]   ;;  %s12358_s4 = inlined_call_operand.vmem [shape: f32[8,36], index: 4, kind: input, shape index: {}]   ;;  %s12359_s6 = inlined_call_operand.vmem [shape: f32[2,8,1536], index: 6, kind: output, shape index: {0}]   ;;  %s12360_s7 = inlined_call_operand.vmem [shape: f32[2,8,256], index: 7, kind: output, shape index: {1}]  }
   0x1   :  { %v33_v2 = vunpack.c.l.s4 %v8864_v1  ;;  %v106_v3 = vld [vmem:[%s12353_s0] sm:$0xff]  ;;  %v107_v5 = vld [vmem:[%s12353_s0 + $0x8] sm:$0xff]  ;;  %v108_v12 = vld [vmem:[%s12353_s0 + $0x10] sm:$0xff]  ;;  %s8867_s17 = smov 112   ;;  %s8868_s22 = smov 111   ;;  %vm460_vm2 = vcmask 916480  }
   0x2   :  { %v36_v4 = vshrl.u32 %v35_v0, 7  ;;  %v114_v7 = vcombine.low %v106_v3, %v106_v3  ;;  %v131_v9 = vcombine.low %v107_v5, %v107_v5  ;;  %v148_v15 = vcombine.low %v108_v12, %v108_v12  ;;  %v8775_v24 = vld [vmem:[%s12353_s0 + $0x18] ss:$0 sps:$4 sm:$0x33]   ;;  %v25_v37 = vld [vmem:[%s12353_s0] sm:$0xff]  ;;  %v3243_v46 = vld [vmem:[%s12353_s0 + $0x8] sm:$0xff] }
   0x3   :  { %v34_v6 = vunpack.c.0.s8 %v33_v2  ;;  %v244_v25 = vcombine.high %v106_v3, %v106_v3  ;;  %v261_v30 = vcombine.high %v107_v5, %v107_v5  ;;  %v278_v34 = vcombine.high %v108_v12, %v108_v12  ;;  %8361 = vst.sshfl [vmem:[#allocation2] sm:$0x3 pattern:$0x76325410] %v25_v37  ;;  %v3244_v52 = vld [vmem:[%s12353_s0 + $0x10] sm:$0xff]  ;;  %s8869_s23 = smov 110  }
   0x4   :  { %v9055_v40 = vld.sshfl [vmem:[%s12353_s0 + $0x18] sm:$0x3 pattern:$0x76325410]  ;;  %v31_v42 = vcombine.high %v25_v37, %v25_v37  ;;  %v3251_v49 = vcombine.high %v3243_v46, %v3243_v46  ;;  %v9111_v57 = vcombine.high %v3244_v52, %v3244_v52  ;;  %s8870_s26 = smov 96   ;;  %s8871_s27 = smov 95  }
   0x5   :  { %v8921_v8 = vsub.s32 %v34_v6, %v36_v4  ;;  %v9063_v43 = vcombine.low %v9055_v40, %v9055_v40  ;;  %8381 = vst.sshfl [vmem:[#allocation2 + $0x308] sm:$0xc pattern:$0x76325410] %v3243_v46  ;;  %s8872_s8 = smov 94   ;;  %vm589_vm3 = vcmask 908288  }
   0x6   :  { %8362 = vst.sshfl [vmem:[#allocation2 + $0x10] sm:$0x3 pattern:$0x76325410] %v31_v42  ;;  %vm719_vm4 = vcmask 900096   ;;  %vm849_vm5 = vcmask 785408  }
   0x7   :  { %v8924_v10 = vrot.slane %v106_v3, %v8921_v8  ;;  %v8927_v11 = vrot.slane %v114_v7, %v8921_v8  ;;  %v8941_v14 = vrot.slane %v131_v9, %v8921_v8  ;;  %v8956_v18 = vrot.slane %v107_v5, %v8921_v8  ;;  %8363 = vst.sshfl [vmem:[#allocation2 + $0x20] sm:$0x3 pattern:$0x76325410] %v3243_v46 }
   0x8   :  { %v8967_v20 = vrot.slane %v148_v15, %v8921_v8  ;;  %v8978_v22 = vrot.slane %v108_v12, %v8921_v8  ;;  %v172_v27 = vrot.slane %v8775_v24, %v8921_v8  ;;  %v9001_v28 = vrot.slane %v244_v25, %v8921_v8  ;;  %8382 = vst.sshfl [vmem:[#allocation2 + $0x318] sm:$0xc pattern:$0x76325410] %v3251_v49 }
   0x9   :  { %177 = vrot.lane.b32.xlu1 %v8924_v10, %s8865_s30  ;;  %v8936_v13 = vcombine.high %v8924_v10, %v8924_v10  ;;  %173 = vrot.lane.b32.xlu0 %v8927_v11, %s8865_s30  ;;  %v8945_v16 = vcombine.high %v8927_v11, %v8927_v11  ;;  %v8953_v17 = vcombine.high %v8941_v14, %v8941_v14  ;;  %v8779_v60 = vld [vmem:[%s12353_s0 + $0x18] ss:$0 sps:$4 sm:$0x33]   ;;  %vm980_vm6 = vcmask 777216  }
   0xa   :  { %v8964_v19 = vcombine.high %v8956_v18, %v8956_v18  ;;  %v8975_v21 = vcombine.high %v8967_v20, %v8967_v20  ;;  %v8986_v23 = vcombine.high %v8978_v22, %v8978_v22  ;;  %v8997_v26 = vcombine.low %v8924_v10, %v8924_v10  ;;  %8364 = vst.sshfl [vmem:[#allocation2 + $0x30] sm:$0x3 pattern:$0x76325410] %v3251_v49 }
   0xb   :  { %v9008_v29 = vcombine.low %v9001_v28, %v9001_v28  ;;  %v9016_v31 = vcombine.low %v8956_v18, %v8956_v18  ;;  %v9019_v32 = vrot.slane %v261_v30, %v8921_v8  ;;  %v9035_v35 = vcombine.low %v8978_v22, %v8978_v22  ;;  %8383 = vst.sshfl [vmem:[#allocation2 + $0x328] sm:$0xc pattern:$0x76325410] %v3244_v52 }
   0xc   :  { %v9038_v36 = vrot.slane %v278_v34, %v8921_v8  ;;  %v38_v39 = vrot.slane %v25_v37, %v8921_v8  ;;  %v45_v44 = vrot.slane %v31_v42, %v8921_v8  ;;  %v9075_v47 = vcombine.low %v8927_v11, %v8927_v11  ;;  %8365 = vst.sshfl [vmem:[#allocation2 + $0x40] sm:$0x3 pattern:$0x76325410] %v3244_v52 }
   0xd   :  { %179 = vrot.lane.b32.xlu1 %v8936_v13, %s8865_s30  ;;  %181 = vrot.lane.b32.xlu0 %v8941_v14, %s8865_s30  ;;  %v9027_v33 = vcombine.low %v9019_v32, %v9019_v32  ;;  %v9078_v48 = vrot.slane %v3243_v46, %v8921_v8  ;;  %v9087_v51 = vrot.slane %v3251_v49, %v8921_v8  ;;  %v8780_v12 = vld [vmem:[%s12353_s0 + $0x18] ss:$0 sps:$4 sm:$0x33]   ;;  %vm1109_vm7 = vcmask 769024  }
   0xe   :  { %v9049_v38 = vcombine.low %v9038_v36, %v9038_v36  ;;  %v46_v41 = vcombine.high %v38_v39, %v38_v39  ;;  %v47_v45 = vcombine.high %v45_v44, %v45_v44  ;;  %v9098_v53 = vcombine.low %v8941_v14, %v8941_v14  ;;  %8366 = vst.sshfl [vmem:[#allocation2 + $0x50] sm:$0x3 pattern:$0x76325410] %v9111_v57 }
   0xf   :  { %v63_v50 = vcombine.high %v9078_v48, %v9078_v48  ;;  %v9101_v54 = vrot.slane %v3244_v52, %v8921_v8  ;;  %v64_v55 = vcombine.high %v9087_v51, %v9087_v51  ;;  %v9115_v58 = vrot.slane %v9111_v57, %v8921_v8  ;;  %8384 = vst.sshfl [vmem:[#allocation2 + $0x338] sm:$0xc pattern:$0x76325410] %v9111_v57 }
  0x10   :  { %95 = vst [vmem:[#allocation2 + $0x8] sm:$0x3] %v46_v41  ;;  %97 = vst [vmem:[#allocation2 + $0x18] sm:$0x3] %v47_v45  ;;  %v9124_v59 = vcombine.low %v8967_v20, %v8967_v20  ;;  %v432_v62 = vrot.slane %v8779_v60, %v8921_v8  ;;  %v9149_v0 = vcombine.high %v9001_v28, %v9001_v28  ;;  %vm7205_vm8 = vcmask 1045504  }
  0x11   :  { %183 = vrot.lane.b32.xlu1 %v8953_v17, %s8865_s30  ;;  %175 = vrot.lane.b32.xlu0 %v8945_v16, %s8865_s30  ;;  %99 = vst [vmem:[#allocation2 + $0x28] sm:$0x3] %v63_v50  ;;  %101 = vst [vmem:[#allocation2 + $0x38] sm:$0x3] %v64_v55  ;;  %v80_v56 = vcombine.high %v9101_v54, %v9101_v54  ;;  %v81_v61 = vcombine.high %v9115_v58, %v9115_v58  ;;  %vm7201_vm9 = vcmask 441344   ;;  %vm8164_vm10 = vcmask 1043456  }
  0x12   :  { %v433_v63 = vcombine.low %v432_v62, %v432_v62  ;;  %v9161_v1 = vcombine.high %v9019_v32, %v9019_v32  ;;  %v9173_v2 = vcombine.high %v9038_v36, %v9038_v36  ;;  %vm8160_vm11 = vcmask 293888  }
  0x13   :  { %103 = vst [vmem:[#allocation2 + $0x48] sm:$0x3] %v80_v56  ;;  %105 = vst [vmem:[#allocation2 + $0x58] sm:$0x3] %v81_v61 }
  0x15   :  { %187 = vrot.lane.b32.xlu1 %v8964_v19, %s8865_s30  ;;  %185 = vrot.lane.b32.xlu0 %v8956_v18, %s8865_s30 }
  0x19   :  { %191 = vrot.lane.b32.xlu1 %v8975_v21, %s8865_s30  ;;  %189 = vrot.lane.b32.xlu0 %v8967_v20, %s8865_s30 }
  0x1d   :  { %195 = vrot.lane.b32.xlu1 %v8986_v23, %s8865_s30  ;;  %193 = vrot.lane.b32.xlu0 %v8978_v22, %s8865_s30 }
  0x21   :  { %303 = vrot.lane.b32.xlu1 %v8997_v26, %s8866_s10  ;;  %197 = vrot.lane.b32.xlu0 %v172_v27, %s8865_s30 }
  0x25   :  { %307 = vrot.lane.b32.xlu1 %v9008_v29, %s8866_s10  ;;  %305 = vrot.lane.b32.xlu0 %v8924_v10, %s8866_s10 }
  0x29   :  { %311 = vrot.lane.b32.xlu1 %v9016_v31, %s8866_s10  ;;  %309 = vrot.lane.b32.xlu0 %v9001_v28, %s8866_s10 }
  0x2d   :  { %315 = vrot.lane.b32.xlu1 %v9027_v33, %s8866_s10  ;;  %313 = vrot.lane.b32.xlu0 %v8956_v18, %s8866_s10 }
  0x31   :  { %319 = vrot.lane.b32.xlu1 %v9035_v35, %s8866_s10  ;;  %317 = vrot.lane.b32.xlu0 %v9019_v32, %s8866_s10 }
  0x35   :  { %323 = vrot.lane.b32.xlu1 %v9049_v38, %s8866_s10  ;;  %321 = vrot.lane.b32.xlu0 %v8978_v22, %s8866_s10 }
  0x39   :  { %327 = vrot.lane.b32.xlu1 %v9063_v43, %s8866_s10  ;;  %325 = vrot.lane.b32.xlu0 %v9038_v36, %s8866_s10 }
  0x3d   :  { %436 = vrot.lane.b32.xlu1 %v8927_v11, %s8867_s17  ;;  %434 = vrot.lane.b32.xlu0 %v9075_v47, %s8867_s17 }
  0x41   :  { %440 = vrot.lane.b32.xlu1 %v8924_v10, %s8867_s17  ;;  %438 = vrot.lane.b32.xlu0 %v8997_v26, %s8867_s17 }
  0x45   :  { %444 = vrot.lane.b32.xlu1 %v8941_v14, %s8867_s17  ;;  %442 = vrot.lane.b32.xlu0 %v9098_v53, %s8867_s17 }
  0x49   :  { %448 = vrot.lane.b32.xlu1 %v8956_v18, %s8867_s17  ;;  %446 = vrot.lane.b32.xlu0 %v9016_v31, %s8867_s17 }
  0x4d   :  { %452 = vrot.lane.b32.xlu1 %v8967_v20, %s8867_s17  ;;  %450 = vrot.lane.b32.xlu0 %v9124_v59, %s8867_s17 }
  0x51   :  { %456 = vrot.lane.b32.xlu1 %v8978_v22, %s8867_s17  ;;  %454 = vrot.lane.b32.xlu0 %v9035_v35, %s8867_s17 }
  0x55   :  { %563 = vrot.lane.b32.xlu1 %v8924_v10, %s8868_s22  ;;  %458 = vrot.lane.b32.xlu0 %v433_v63, %s8867_s17 }
  0x59   :  { %567 = vrot.lane.b32.xlu1 %v9001_v28, %s8868_s22  ;;  %565 = vrot.lane.b32.xlu0 %v8936_v13, %s8868_s22 }
  0x5d   :  { %571 = vrot.lane.b32.xlu1 %v8956_v18, %s8868_s22  ;;  %569 = vrot.lane.b32.xlu0 %v9149_v0, %s8868_s22 }
  0x61   :  { %575 = vrot.lane.b32.xlu1 %v9019_v32, %s8868_s22  ;;  %573 = vrot.lane.b32.xlu0 %v8964_v19, %s8868_s22 }
  0x65   :  { %579 = vrot.lane.b32.xlu1 %v8978_v22, %s8868_s22  ;;  %577 = vrot.lane.b32.xlu0 %v9161_v1, %s8868_s22 }
  0x69   :  { %583 = vrot.lane.b32.xlu1 %v9038_v36, %s8868_s22  ;;  %581 = vrot.lane.b32.xlu0 %v8986_v23, %s8868_s22 }
  0x6d   :  { %587 = vrot.lane.b32.xlu1 %v9055_v40, %s8868_s22  ;;  %585 = vrot.lane.b32.xlu0 %v9173_v2, %s8868_s22 }
  0x71   :  { %695 = vrot.lane.b32.xlu1 %v8945_v16, %s8869_s23  ;;  %693 = vrot.lane.b32.xlu0 %v8927_v11, %s8869_s23 }
  0x75   :  { %699 = vrot.lane.b32.xlu1 %v8936_v13, %s8869_s23  ;;  %697 = vrot.lane.b32.xlu0 %v8924_v10, %s8869_s23 }
  0x79   :  { %703 = vrot.lane.b32.xlu1 %v8953_v17, %s8869_s23  ;;  %701 = vrot.lane.b32.xlu0 %v8941_v14, %s8869_s23 }
  0x7b   :  { %v178_v3 = vpop.permute.xlu1 %177  ;;  %v174_v4 = vpop.permute.xlu0 %173 }
  0x7d   :  { %707 = vrot.lane.b32.xlu1 %v8964_v19, %s8869_s23  ;;  %705 = vrot.lane.b32.xlu0 %v8956_v18, %s8869_s23 }
  0x7f   :  { %v180_v5 = vpop.permute.xlu1 %179  ;;  %v182_v6 = vpop.permute.xlu0 %181 }
  0x80   :  { %v202_v7 = vsel %vm199_vm0, %v178_v3, %v180_v5  ;;  %v203_v9 = vsel %vm199_vm0, %v180_v5, %v182_v6 }
  0x81   :  { %226 = vst [vmem:[#allocation2 + $0x10] sm:$0xc] %v202_v7  ;;  %227 = vst [vmem:[#allocation2 + $0x18] sm:$0xc] %v203_v9  ;;  %711 = vrot.lane.b32.xlu1 %v8975_v21, %s8869_s23  ;;  %709 = vrot.lane.b32.xlu0 %v8967_v20, %s8869_s23  ;;  %v692_v21 = vrot.slane %v8780_v12, %v8921_v8 }
  0x83   :  { %v184_v15 = vpop.permute.xlu1 %183  ;;  %v176_v16 = vpop.permute.xlu0 %175 }
  0x84   :  { %v204_v17 = vsel %vm199_vm0, %v182_v6, %v184_v15  ;;  %v200_v24 = vsel %vm199_vm0, %v174_v4, %v176_v16  ;;  %v201_v25 = vsel %vm199_vm0, %v176_v16, %v178_v3 }
  0x85   :  { %228 = vst [vmem:[#allocation2 + $0x20] sm:$0xc] %v204_v17  ;;  %224 = vst [vmem:[#allocation2] sm:$0xc] %v200_v24  ;;  %715 = vrot.lane.b32.xlu1 %v8986_v23, %s8869_s23  ;;  %713 = vrot.lane.b32.xlu0 %v8978_v22, %s8869_s23 }
  0x86   :  { %225 = vst [vmem:[#allocation2 + $0x8] sm:$0xc] %v201_v25 }
  0x87   :  { %v188_v27 = vpop.permute.xlu1 %187  ;;  %v186_v30 = vpop.permute.xlu0 %185 }
  0x88   :  { %v205_v34 = vsel %vm199_vm0, %v184_v15, %v186_v30  ;;  %v206_v37 = vsel %vm199_vm0, %v186_v30, %v188_v27 }
  0x89   :  { %229 = vst [vmem:[#allocation2 + $0x28] sm:$0xc] %v205_v34  ;;  %230 = vst [vmem:[#allocation2 + $0x30] sm:$0xc] %v206_v37  ;;  %823 = vrot.lane.b32.xlu1 %v8997_v26, %s8870_s26  ;;  %717 = vrot.lane.b32.xlu0 %v692_v21, %s8869_s23 }
  0x8b   :  { %v192_v39 = vpop.permute.xlu1 %191  ;;  %v190_v41 = vpop.permute.xlu0 %189 }
  0x8c   :  { %v207_v42 = vsel %vm199_vm0, %v188_v27, %v190_v41  ;;  %v208_v44 = vsel %vm199_vm0, %v190_v41, %v192_v39 }
  0x8d   :  { %231 = vst [vmem:[#allocation2 + $0x38] sm:$0xc] %v207_v42  ;;  %232 = vst [vmem:[#allocation2 + $0x40] sm:$0xc] %v208_v44  ;;  %827 = vrot.lane.b32.xlu1 %v9008_v29, %s8870_s26  ;;  %825 = vrot.lane.b32.xlu0 %v8924_v10, %s8870_s26 }
  0x8f   :  { %v196_v45 = vpop.permute.xlu1 %195  ;;  %v194_v46 = vpop.permute.xlu0 %193 }
  0x90   :  { %v209_v49 = vsel %vm199_vm0, %v192_v39, %v194_v46  ;;  %v210_v50 = vsel %vm199_vm0, %v194_v46, %v196_v45 }
  0x91   :  { %233 = vst [vmem:[#allocation2 + $0x48] sm:$0xc] %v209_v49  ;;  %234 = vst [vmem:[#allocation2 + $0x50] sm:$0xc] %v210_v50  ;;  %831 = vrot.lane.b32.xlu1 %v9016_v31, %s8870_s26  ;;  %829 = vrot.lane.b32.xlu0 %v9001_v28, %s8870_s26 }
  0x93   :  { %v304_v52 = vpop.permute.xlu1 %303  ;;  %v198_v55 = vpop.permute.xlu0 %197 }
  0x94   :  { %v211_v29 = vsel %vm199_vm0, %v196_v45, %v198_v55 }
  0x95   :  { %235 = vst [vmem:[#allocation2 + $0x58] sm:$0xc] %v211_v29  ;;  %835 = vrot.lane.b32.xlu1 %v9027_v33, %s8870_s26  ;;  %833 = vrot.lane.b32.xlu0 %v8956_v18, %s8870_s26 }
  0x97   :  { %v308_v56 = vpop.permute.xlu1 %307  ;;  %v306_v60 = vpop.permute.xlu0 %305 }
  0x98   :  { %v330_v61 = vsel %vm329_vm1, %v304_v52, %v306_v60  ;;  %v331_v62 = vsel %vm329_vm1, %v306_v60, %v308_v56 }
  0x99   :  { %354 = vst [vmem:[#allocation2] sm:$0x30] %v330_v61  ;;  %355 = vst [vmem:[#allocation2 + $0x8] sm:$0x30] %v331_v62  ;;  %839 = vrot.lane.b32.xlu1 %v9035_v35, %s8870_s26  ;;  %837 = vrot.lane.b32.xlu0 %v9019_v32, %s8870_s26 }
  0x9b   :  { %v312_v63 = vpop.permute.xlu1 %311  ;;  %v310_v33 = vpop.permute.xlu0 %309 }
  0x9c   :  { %v332_v3 = vsel %vm329_vm1, %v308_v56, %v310_v33  ;;  %v333_v4 = vsel %vm329_vm1, %v310_v33, %v312_v63 }
  0x9d   :  { %356 = vst [vmem:[#allocation2 + $0x10] sm:$0x30] %v332_v3  ;;  %357 = vst [vmem:[#allocation2 + $0x18] sm:$0x30] %v333_v4  ;;  %843 = vrot.lane.b32.xlu1 %v9049_v38, %s8870_s26  ;;  %841 = vrot.lane.b32.xlu0 %v8978_v22, %s8870_s26 }
  0x9f   :  { %v316_v5 = vpop.permute.xlu1 %315  ;;  %v314_v6 = vpop.permute.xlu0 %313 }
  0xa0   :  { %v334_v7 = vsel %vm329_vm1, %v312_v63, %v314_v6  ;;  %v335_v9 = vsel %vm329_vm1, %v314_v6, %v316_v5 }
  0xa1   :  { %358 = vst [vmem:[#allocation2 + $0x20] sm:$0x30] %v334_v7  ;;  %359 = vst [vmem:[#allocation2 + $0x28] sm:$0x30] %v335_v9  ;;  %847 = vrot.lane.b32.xlu1 %v9063_v43, %s8870_s26  ;;  %845 = vrot.lane.b32.xlu0 %v9038_v36, %s8870_s26 }
  0xa3   :  { %v320_v12 = vpop.permute.xlu1 %319  ;;  %v318_v15 = vpop.permute.xlu0 %317 }
  0xa4   :  { %v336_v38 = vsel %vm329_vm1, %v316_v5, %v318_v15  ;;  %v337_v16 = vsel %vm329_vm1, %v318_v15, %v320_v12 }
  0xa5   :  { %360 = vst [vmem:[#allocation2 + $0x30] sm:$0x30] %v336_v38  ;;  %361 = vst [vmem:[#allocation2 + $0x38] sm:$0x30] %v337_v16  ;;  %956 = vrot.lane.b32.xlu1 %v8927_v11, %s8871_s27  ;;  %954 = vrot.lane.b32.xlu0 %v9075_v47, %s8871_s27  ;;  %v9352_v38 = vld [vmem:[%s12353_s0 + $0xc] sm:$0xff] }
  0xa7   :  { %v324_v17 = vpop.permute.xlu1 %323  ;;  %v322_v43 = vpop.permute.xlu0 %321 }
  0xa8   :  { %v338_v24 = vsel %vm329_vm1, %v320_v12, %v322_v43  ;;  %v339_v25 = vsel %vm329_vm1, %v322_v43, %v324_v17 }
  0xa9   :  { %362 = vst [vmem:[#allocation2 + $0x40] sm:$0x30] %v338_v24  ;;  %363 = vst [vmem:[#allocation2 + $0x48] sm:$0x30] %v339_v25  ;;  %960 = vrot.lane.b32.xlu1 %v8924_v10, %s8871_s27  ;;  %958 = vrot.lane.b32.xlu0 %v8997_v26, %s8871_s27  ;;  %v9366_v24 = vrot.slane %v9352_v38, %v8921_v8  ;;  %v1252_v25 = vcombine.high %v9352_v38, %v9352_v38 }
  0xaa   :  { %v8781_v26 = vld [vmem:[%s12353_s0 + $0x18] ss:$0 sps:$4 sm:$0x33]  }
  0xab   :  { %v328_v21 = vpop.permute.xlu1 %327  ;;  %v326_v27 = vpop.permute.xlu0 %325 }
  0xac   :  { %v340_v11 = vsel %vm329_vm1, %v324_v17, %v326_v27  ;;  %v341_v47 = vsel %vm329_vm1, %v326_v27, %v328_v21 }
  0xad   :  { %364 = vst [vmem:[#allocation2 + $0x50] sm:$0x30] %v340_v11  ;;  %365 = vst [vmem:[#allocation2 + $0x58] sm:$0x30] %v341_v47  ;;  %964 = vrot.lane.b32.xlu1 %v8941_v14, %s8871_s27  ;;  %962 = vrot.lane.b32.xlu0 %v9098_v53, %s8871_s27 }
  0xaf   :  { %v437_v30 = vpop.permute.xlu1 %436  ;;  %v435_v34 = vpop.permute.xlu0 %434 }
  0xb0   :  { %v461_v37 = vsel %vm460_vm2, %v435_v34, %v437_v30  ;;  %v9381_v34 = vrot.slane %v1252_v25, %v8921_v8 }
  0xb1   :  { %485 = vst [vmem:[#allocation2] sm:$0xc0] %v461_v37  ;;  %968 = vrot.lane.b32.xlu1 %v8956_v18, %s8871_s27  ;;  %966 = vrot.lane.b32.xlu0 %v9016_v31, %s8871_s27  ;;  %v952_v31 = vrot.slane %v8781_v26, %v8921_v8  ;;  %v9386_v37 = vld [vmem:[%s12353_s0 + $0x14] sm:$0xff] }
  0xb3   :  { %v441_v14 = vpop.permute.xlu1 %440  ;;  %v439_v39 = vpop.permute.xlu0 %438 }
  0xb4   :  { %v462_v53 = vsel %vm460_vm2, %v437_v30, %v439_v39  ;;  %v463_v41 = vsel %vm460_vm2, %v439_v39, %v441_v14  ;;  %v9378_v30 = vcombine.low %v9366_v24, %v9366_v24 }
  0xb5   :  { %486 = vst [vmem:[#allocation2 + $0x8] sm:$0xc0] %v462_v53  ;;  %487 = vst [vmem:[#allocation2 + $0x10] sm:$0xc0] %v463_v41  ;;  %972 = vrot.lane.b32.xlu1 %v8967_v20, %s8871_s27  ;;  %970 = vrot.lane.b32.xlu0 %v9124_v59, %s8871_s27  ;;  %v953_v20 = vcombine.low %v952_v31, %v952_v31  ;;  %v9392_v41 = vrot.slane %v9386_v37, %v8921_v8 }
  0xb6   :  { %v9400_v31 = vcombine.low %v9381_v34, %v9381_v34 }
  0xb7   :  { %v445_v42 = vpop.permute.xlu1 %444  ;;  %v443_v44 = vpop.permute.xlu0 %442 }
  0xb8   :  { %v464_v45 = vsel %vm460_vm2, %v441_v14, %v443_v44  ;;  %v465_v46 = vsel %vm460_vm2, %v443_v44, %v445_v42  ;;  %v2130_v44 = vld [vmem:[%s12353_s0 + $0x4] sm:$0xff] }
  0xb9   :  { %488 = vst [vmem:[#allocation2 + $0x18] sm:$0xc0] %v464_v45  ;;  %489 = vst [vmem:[#allocation2 + $0x20] sm:$0xc0] %v465_v46  ;;  %976 = vrot.lane.b32.xlu1 %v8978_v22, %s8871_s27  ;;  %974 = vrot.lane.b32.xlu0 %v9035_v35, %s8871_s27 }
  0xba   :  { %8372 = vst.sshfl [vmem:[#allocation2 + $0x190] sm:$0x30 pattern:$0x76325410] %v2130_v44 }
  0xbb   :  { %v449_v49 = vpop.permute.xlu1 %448  ;;  %v447_v50 = vpop.permute.xlu0 %446 }
  0xbc   :  { %v466_v59 = vsel %vm460_vm2, %v445_v42, %v447_v50  ;;  %v467_v52 = vsel %vm460_vm2, %v447_v50, %v449_v49  ;;  %v1269_v42 = vcombine.high %v9386_v37, %v9386_v37  ;;  %v9410_v50 = vcombine.low %v9392_v41, %v9392_v41 }
  0xbd   :  { %490 = vst [vmem:[#allocation2 + $0x28] sm:$0xc0] %v466_v59  ;;  %491 = vst [vmem:[#allocation2 + $0x30] sm:$0xc0] %v467_v52  ;;  %1083 = vrot.lane.b32.xlu1 %v8924_v10, %s8872_s8  ;;  %978 = vrot.lane.b32.xlu0 %v953_v20, %s8871_s27  ;;  %v2138_v20 = vcombine.low %v2130_v44, %v2130_v44 }
  0xbe   :  { %v9417_v59 = vrot.slane %v1269_v42, %v8921_v8 }
  0xbf   :  { %v453_v55 = vpop.permute.xlu1 %452  ;;  %v451_v29 = vpop.permute.xlu0 %450  ;;  %8371 = vst.sshfl [vmem:[#allocation2 + $0x180] sm:$0x30 pattern:$0x76325410] %v2138_v20 }
  0xc0   :  { %v468_v56 = vsel %vm460_vm2, %v449_v49, %v451_v29  ;;  %v469_v35 = vsel %vm460_vm2, %v451_v29, %v453_v55 }
  0xc1   :  { %492 = vst [vmem:[#allocation2 + $0x38] sm:$0xc0] %v468_v56  ;;  %493 = vst [vmem:[#allocation2 + $0x40] sm:$0xc0] %v469_v35  ;;  %1087 = vrot.lane.b32.xlu1 %v9001_v28, %s8872_s8  ;;  %1085 = vrot.lane.b32.xlu0 %v8936_v13, %s8872_s8 }
  0xc3   :  { %v457_v60 = vpop.permute.xlu1 %456  ;;  %v455_v61 = vpop.permute.xlu0 %454 }
  0xc4   :  { %v470_v10 = vsel %vm460_vm2, %v453_v55, %v455_v61  ;;  %v471_v62 = vsel %vm460_vm2, %v455_v61, %v457_v60  ;;  %v9422_v55 = vrot.slane %v2138_v20, %v8921_v8 }
  0xc5   :  { %494 = vst [vmem:[#allocation2 + $0x48] sm:$0xc0] %v470_v10  ;;  %495 = vst [vmem:[#allocation2 + $0x50] sm:$0xc0] %v471_v62  ;;  %1091 = vrot.lane.b32.xlu1 %v8956_v18, %s8872_s8  ;;  %1089 = vrot.lane.b32.xlu0 %v9149_v0, %s8872_s8  ;;  %v9436_v10 = vcombine.low %v9417_v59, %v9417_v59 }
  0xc6   :  { %v9426_v35 = vcombine.high %v9422_v55, %v9422_v55 }
  0xc7   :  { %v564_v63 = vpop.permute.xlu1 %563  ;;  %v459_v33 = vpop.permute.xlu0 %458 }
  0xc8   :  { %v472_v28 = vsel %vm460_vm2, %v457_v60, %v459_v33  ;;  %1216 = vst [vmem:[#allocation2 + $0x188] sm:$0xc] %v9426_v35  ;;  %v9448_v33 = vld.sshfl [vmem:[%s12353_s0 + $0x1c] sm:$0x3 pattern:$0x76325410] }
  0xc9   :  { %496 = vst [vmem:[#allocation2 + $0x58] sm:$0xc0] %v472_v28  ;;  %1095 = vrot.lane.b32.xlu1 %v9019_v32, %s8872_s8  ;;  %1093 = vrot.lane.b32.xlu0 %v8964_v19, %s8872_s8  ;;  %v9322_v32 = vld [vmem:[%s12353_s0 + $0x4] sm:$0xff] }
  0xca   :  { %v1364_v52 = vcombine.low %v9322_v32, %v9322_v32 }
  0xcb   :  { %v568_v13 = vpop.permute.xlu1 %567  ;;  %v566_v3 = vpop.permute.xlu0 %565 }
  0xcc   :  { %v590_v4 = vsel %vm589_vm3, %v564_v63, %v566_v3  ;;  %v591_v18 = vsel %vm589_vm3, %v566_v3, %v568_v13  ;;  %v9439_v62 = vrot.slane %v1364_v52, %v8921_v8  ;;  %v9442_v63 = vrot.slane %v2130_v44, %v8921_v8 }
  0xcd   :  { %614 = vst [vmem:[#allocation2 + $0xc0] sm:$0x3] %v590_v4  ;;  %615 = vst [vmem:[#allocation2 + $0xc8] sm:$0x3] %v591_v18  ;;  %1099 = vrot.lane.b32.xlu1 %v8978_v22, %s8872_s8  ;;  %1097 = vrot.lane.b32.xlu0 %v9161_v1, %s8872_s8  ;;  %v9332_v22 = vrot.slane %v9322_v32, %v8921_v8  ;;  %v1235_v1 = vcombine.high %v9322_v32, %v9322_v32  ;;  %v1147_v4 = vld [vmem:[%s12353_s0 + $0xc] sm:$0xff] }
  0xce   :  { %v9452_v3 = vcombine.high %v9442_v63, %v9442_v63  ;;  %8374 = vst.sshfl [vmem:[#allocation2 + $0x1b0] sm:$0x30 pattern:$0x76325410] %v1147_v4 }
  0xcf   :  { %v572_v19 = vpop.permute.xlu1 %571  ;;  %v570_v0 = vpop.permute.xlu0 %569 }
  0xd0   :  { %v592_v5 = vsel %vm589_vm3, %v568_v13, %v570_v0  ;;  %v593_v6 = vsel %vm589_vm3, %v570_v0, %v572_v19  ;;  %v9465_v0 = vcombine.low %v9439_v62, %v9439_v62  ;;  %1218 = vst [vmem:[#allocation2 + $0x198] sm:$0xc] %v9452_v3 }
  0xd1   :  { %616 = vst [vmem:[#allocation2 + $0xd0] sm:$0x3] %v592_v5  ;;  %617 = vst [vmem:[#allocation2 + $0xd8] sm:$0x3] %v593_v6  ;;  %1103 = vrot.lane.b32.xlu1 %v9038_v36, %s8872_s8  ;;  %1101 = vrot.lane.b32.xlu0 %v8986_v23, %s8872_s8  ;;  %v9344_v23 = vcombine.low %v9332_v22, %v9332_v22  ;;  %v9347_v36 = vrot.slane %v1235_v1, %v8921_v8 }
  0xd2   :  { %v9469_v5 = vcombine.low %v9448_v33, %v9448_v33  ;;  %v1381_v6 = vcombine.low %v9352_v38, %v9352_v38 }
  0xd3   :  { %v576_v7 = vpop.permute.xlu1 %575  ;;  %v574_v9 = vpop.permute.xlu0 %573 }
  0xd4   :  { %v594_v12 = vsel %vm589_vm3, %v572_v19, %v574_v9  ;;  %v595_v15 = vsel %vm589_vm3, %v574_v9, %v576_v7  ;;  %v1169_v19 = vcombine.low %v1147_v4, %v1147_v4  ;;  %v9482_v38 = vrot.slane %v1381_v6, %v8921_v8 }
  0xd5   :  { %618 = vst [vmem:[#allocation2 + $0xe0] sm:$0x3] %v594_v12  ;;  %619 = vst [vmem:[#allocation2 + $0xe8] sm:$0x3] %v595_v15  ;;  %1107 = vrot.lane.b32.xlu1 %v9055_v40, %s8872_s8  ;;  %1105 = vrot.lane.b32.xlu0 %v9173_v2, %s8872_s8  ;;  %v9362_v2 = vcombine.low %v9347_v36, %v9347_v36 }
  0xd6   :  { %v1176_v1 = vrot.slane %v1169_v19, %v8921_v8  ;;  %8373 = vst.sshfl [vmem:[#allocation2 + $0x1a0] sm:$0x30 pattern:$0x76325410] %v1169_v19 }
  0xd7   :  { %v580_v16 = vpop.permute.xlu1 %579  ;;  %v578_v17 = vpop.permute.xlu0 %577 }
  0xd8   :  { %v596_v43 = vsel %vm589_vm3, %v576_v7, %v578_v17  ;;  %v597_v40 = vsel %vm589_vm3, %v578_v17, %v580_v16 }
  0xd9   :  { %620 = vst [vmem:[#allocation2 + $0xf0] sm:$0x3] %v596_v43  ;;  %621 = vst [vmem:[#allocation2 + $0xf8] sm:$0x3] %v597_v40  ;;  %1296 = vrot.lane.b32.xlu1 %v9332_v22, %s8865_s30  ;;  %1294 = vrot.lane.b32.xlu0 %v9344_v23, %s8865_s30  ;;  %v1183_v40 = vrot.slane %v1147_v4, %v8921_v8 }
  0xdb   :  { %v584_v21 = vpop.permute.xlu1 %583  ;;  %v582_v27 = vpop.permute.xlu0 %581 }
  0xdc   :  { %v598_v11 = vsel %vm589_vm3, %v580_v16, %v582_v27  ;;  %v599_v47 = vsel %vm589_vm3, %v582_v27, %v584_v21  ;;  %v1184_v16 = vcombine.high %v1176_v1, %v1176_v1  ;;  %v9493_v27 = vcombine.low %v9482_v38, %v9482_v38 }
  0xdd   :  { %622 = vst [vmem:[#allocation2 + $0x100] sm:$0x3] %v598_v11  ;;  %623 = vst [vmem:[#allocation2 + $0x108] sm:$0x3] %v599_v47  ;;  %1300 = vrot.lane.b32.xlu1 %v9347_v36, %s8865_s30  ;;  %1298 = vrot.lane.b32.xlu0 %v9362_v2, %s8865_s30  ;;  %v1398_v11 = vcombine.low %v9386_v37, %v9386_v37  ;;  %v1185_v47 = vcombine.high %v1183_v40, %v1183_v40 }
  0xde   :  { %1220 = vst [vmem:[#allocation2 + $0x1a8] sm:$0xc] %v1184_v16 }
  0xdf   :  { %v588_v26 = vpop.permute.xlu1 %587  ;;  %v586_v14 = vpop.permute.xlu0 %585  ;;  %1222 = vst [vmem:[#allocation2 + $0x1b8] sm:$0xc] %v1185_v47  ;;  %v9508_v37 = vrot.slane %v1398_v11, %v8921_v8  ;;  %v9553_v47 = vcombine.high %v9347_v36, %v9347_v36 }
  0xe0   :  { %v600_v39 = vsel %vm589_vm3, %v584_v21, %v586_v14  ;;  %v601_v53 = vsel %vm589_vm3, %v586_v14, %v588_v26  ;;  %v1148_v26 = vld [vmem:[%s12353_s0 + $0x14] sm:$0xff] }
  0xe1   :  { %624 = vst [vmem:[#allocation2 + $0x110] sm:$0x3] %v600_v39  ;;  %625 = vst [vmem:[#allocation2 + $0x118] sm:$0x3] %v601_v53  ;;  %1304 = vrot.lane.b32.xlu1 %v9366_v24, %s8865_s30  ;;  %1302 = vrot.lane.b32.xlu0 %v9378_v30, %s8865_s30  ;;  %v1186_v14 = vcombine.low %v1148_v26, %v1148_v26 }
  0xe2   :  { %8376 = vst.sshfl [vmem:[#allocation2 + $0x1d0] sm:$0x30 pattern:$0x76325410] %v1148_v26 }
  0xe3   :  { %v696_v45 = vpop.permute.xlu1 %695  ;;  %v694_v46 = vpop.permute.xlu0 %693  ;;  %8375 = vst.sshfl [vmem:[#allocation2 + $0x1c0] sm:$0x30 pattern:$0x76325410] %v1186_v14 }
  0xe4   :  { %v720_v49 = vsel %vm719_vm4, %v694_v46, %v696_v45 }
  0xe5   :  { %744 = vst [vmem:[#allocation2 + $0xc0] sm:$0xc] %v720_v49  ;;  %1308 = vrot.lane.b32.xlu1 %v9381_v34, %s8865_s30  ;;  %1306 = vrot.lane.b32.xlu0 %v9400_v31, %s8865_s30 }
  0xe7   :  { %v700_v29 = vpop.permute.xlu1 %699  ;;  %v698_v56 = vpop.permute.xlu0 %697 }
  0xe8   :  { %v721_v60 = vsel %vm719_vm4, %v696_v45, %v698_v56  ;;  %v722_v61 = vsel %vm719_vm4, %v698_v56, %v700_v29  ;;  %v1193_v45 = vrot.slane %v1186_v14, %v8921_v8  ;;  %v9518_v56 = vcombine.low %v9508_v37, %v9508_v37 }
  0xe9   :  { %745 = vst [vmem:[#allocation2 + $0xc8] sm:$0xc] %v721_v60  ;;  %746 = vst [vmem:[#allocation2 + $0xd0] sm:$0xc] %v722_v61  ;;  %1312 = vrot.lane.b32.xlu1 %v9392_v41, %s8865_s30  ;;  %1310 = vrot.lane.b32.xlu0 %v9410_v50, %s8865_s30 }
  0xea   :  { %v1201_v46 = vcombine.high %v1193_v45, %v1193_v45  ;;  %v8788_v60 = vld [vmem:[%s12353_s0 + $0x1c] ss:$0 sps:$4 sm:$0x33]  }
  0xeb   :  { %v704_v28 = vpop.permute.xlu1 %703  ;;  %v702_v13 = vpop.permute.xlu0 %701 }
  0xec   :  { %v723_v18 = vsel %vm719_vm4, %v700_v29, %v702_v13  ;;  %v724_v32 = vsel %vm719_vm4, %v702_v13, %v704_v28  ;;  %1224 = vst [vmem:[#allocation2 + $0x1c8] sm:$0xc] %v1201_v46  ;;  %v1200_v29 = vrot.slane %v1148_v26, %v8921_v8 }
  0xed   :  { %747 = vst [vmem:[#allocation2 + $0xd8] sm:$0xc] %v723_v18  ;;  %748 = vst [vmem:[#allocation2 + $0xe0] sm:$0xc] %v724_v32  ;;  %1316 = vrot.lane.b32.xlu1 %v9417_v59, %s8865_s30  ;;  %1314 = vrot.lane.b32.xlu0 %v9436_v10, %s8865_s30  ;;  %v1422_v32 = vrot.slane %v8788_v60, %v8921_v8 }
  0xee   :  { %v1202_v61 = vcombine.high %v1200_v29, %v1200_v29 }
  0xef   :  { %v708_v7 = vpop.permute.xlu1 %707  ;;  %v706_v9 = vpop.permute.xlu0 %705 }
  0xf0   :  { %v725_v12 = vsel %vm719_vm4, %v704_v28, %v706_v9  ;;  %v726_v15 = vsel %vm719_vm4, %v706_v9, %v708_v7  ;;  %1226 = vst [vmem:[#allocation2 + $0x1d8] sm:$0xc] %v1202_v61  ;;  %v1423_v9 = vcombine.low %v1422_v32, %v1422_v32  ;;  %v9582_v61 = vcombine.high %v9392_v41, %v9392_v41 }
  0xf1   :  { %749 = vst [vmem:[#allocation2 + $0xe8] sm:$0xc] %v725_v12  ;;  %750 = vst [vmem:[#allocation2 + $0xf0] sm:$0xc] %v726_v15  ;;  %1424 = vrot.lane.b32.xlu1 %v9465_v0, %s8866_s10  ;;  %1318 = vrot.lane.b32.xlu0 %v9469_v5, %s8865_s30  ;;  %v9592_v32 = vcombine.high %v9417_v59, %v9417_v59 }
  0xf3   :  { %v712_v17 = vpop.permute.xlu1 %711  ;;  %v710_v43 = vpop.permute.xlu0 %709 }
  0xf4   :  { %v727_v25 = vsel %vm719_vm4, %v708_v7, %v710_v43  ;;  %v728_v21 = vsel %vm719_vm4, %v710_v43, %v712_v17  ;;  %v9543_v43 = vcombine.high %v9332_v22, %v9332_v22 }
  0xf5   :  { %751 = vst [vmem:[#allocation2 + $0xf8] sm:$0xc] %v727_v25  ;;  %752 = vst [vmem:[#allocation2 + $0x100] sm:$0xc] %v728_v21  ;;  %1428 = vrot.lane.b32.xlu1 %v9344_v23, %s8866_s10  ;;  %1426 = vrot.lane.b32.xlu0 %v9439_v62, %s8866_s10 }
  0xf7   :  { %v716_v39 = vpop.permute.xlu1 %715  ;;  %v714_v53 = vpop.permute.xlu0 %713 }
  0xf8   :  { %v729_v42 = vsel %vm719_vm4, %v712_v17, %v714_v53  ;;  %v730_v44 = vsel %vm719_vm4, %v714_v53, %v716_v39 }
  0xf9   :  { %753 = vst [vmem:[#allocation2 + $0x108] sm:$0xc] %v729_v42  ;;  %754 = vst [vmem:[#allocation2 + $0x110] sm:$0xc] %v730_v44  ;;  %1432 = vrot.lane.b32.xlu1 %v9493_v27, %s8866_s10  ;;  %1430 = vrot.lane.b32.xlu0 %v9332_v22, %s8866_s10  ;;  %v9563_v42 = vcombine.high %v9366_v24, %v9366_v24 }
  0xfb   :  { %v824_v20 = vpop.permute.xlu1 %823  ;;  %v718_v49 = vpop.permute.xlu0 %717 }
  0xfc   :  { %v731_v52 = vsel %vm719_vm4, %v716_v39, %v718_v49  ;;  %v9573_v49 = vcombine.high %v9381_v34, %v9381_v34 }
  0xfd   :  { %755 = vst [vmem:[#allocation2 + $0x118] sm:$0xc] %v731_v52  ;;  %1436 = vrot.lane.b32.xlu1 %v9378_v30, %s8866_s10  ;;  %1434 = vrot.lane.b32.xlu0 %v9482_v38, %s8866_s10 }
  0xff   :  { %v828_v28 = vpop.permute.xlu1 %827  ;;  %v826_v13 = vpop.permute.xlu0 %825 }
 0x100   :  { %v850_v4 = vsel %vm849_vm5, %v824_v20, %v826_v13  ;;  %v851_v18 = vsel %vm849_vm5, %v826_v13, %v828_v28 }
 0x101   :  { %874 = vst [vmem:[#allocation2 + $0xc0] sm:$0x30] %v850_v4  ;;  %875 = vst [vmem:[#allocation2 + $0xc8] sm:$0x30] %v851_v18  ;;  %1440 = vrot.lane.b32.xlu1 %v9518_v56, %s8866_s10  ;;  %1438 = vrot.lane.b32.xlu0 %v9366_v24, %s8866_s10 }
 0x103   :  { %v832_v19 = vpop.permute.xlu1 %831  ;;  %v830_v6 = vpop.permute.xlu0 %829 }
 0x104   :  { %v852_v1 = vsel %vm849_vm5, %v828_v28, %v830_v6  ;;  %v853_v7 = vsel %vm849_vm5, %v830_v6, %v832_v19 }
 0x105   :  { %876 = vst [vmem:[#allocation2 + $0xd0] sm:$0x30] %v852_v1  ;;  %877 = vst [vmem:[#allocation2 + $0xd8] sm:$0x30] %v853_v7  ;;  %1444 = vrot.lane.b32.xlu1 %v9410_v50, %s8866_s10  ;;  %1442 = vrot.lane.b32.xlu0 %v9508_v37, %s8866_s10 }
 0x107   :  { %v836_v12 = vpop.permute.xlu1 %835  ;;  %v834_v15 = vpop.permute.xlu0 %833 }
 0x108   :  { %v854_v16 = vsel %vm849_vm5, %v832_v19, %v834_v15  ;;  %v855_v17 = vsel %vm849_vm5, %v834_v15, %v836_v12 }
 0x109   :  { %878 = vst [vmem:[#allocation2 + $0xe0] sm:$0x30] %v854_v16  ;;  %879 = vst [vmem:[#allocation2 + $0xe8] sm:$0x30] %v855_v17  ;;  %1448 = vrot.lane.b32.xlu1 %v1423_v9, %s8866_s10  ;;  %1446 = vrot.lane.b32.xlu0 %v9392_v41, %s8866_s10 }
 0x10b   :  { %v840_v40 = vpop.permute.xlu1 %839  ;;  %v838_v25 = vpop.permute.xlu0 %837 }
 0x10c   :  { %v856_v21 = vsel %vm849_vm5, %v836_v12, %v838_v25  ;;  %v857_v11 = vsel %vm849_vm5, %v838_v25, %v840_v40 }
 0x10d   :  { %880 = vst [vmem:[#allocation2 + $0xf0] sm:$0x30] %v856_v21  ;;  %881 = vst [vmem:[#allocation2 + $0xf8] sm:$0x30] %v857_v11  ;;  %1554 = vrot.lane.b32.xlu1 %v9543_v43, %s8867_s17  ;;  %1552 = vrot.lane.b32.xlu0 %v9332_v22, %s8867_s17  ;;  %v7006_v11 = vld [vmem:[#allocation2] sm:$0xff] }
 0x10f   :  { %v844_v26 = vpop.permute.xlu1 %843  ;;  %v842_v14 = vpop.permute.xlu0 %841 }
 0x110   :  { %v858_v39 = vsel %vm849_vm5, %v840_v40, %v842_v14  ;;  %v859_v53 = vsel %vm849_vm5, %v842_v14, %v844_v26  ;;  %v7007_v40 = vld [vmem:[#allocation2 + $0x8] sm:$0xff] }
 0x111   :  { %882 = vst [vmem:[#allocation2 + $0x100] sm:$0x30] %v858_v39  ;;  %883 = vst [vmem:[#allocation2 + $0x108] sm:$0x30] %v859_v53  ;;  %1558 = vrot.lane.b32.xlu1 %v9553_v47, %s8867_s17  ;;  %1556 = vrot.lane.b32.xlu0 %v9347_v36, %s8867_s17 }
 0x113   :  { %v848_v44 = vpop.permute.xlu1 %847  ;;  %v846_v45 = vpop.permute.xlu0 %845 }
 0x114   :  { %v860_v46 = vsel %vm849_vm5, %v844_v26, %v846_v45  ;;  %v861_v20 = vsel %vm849_vm5, %v846_v45, %v848_v44  ;;  %v1637_v26 = vcombine.high %v9439_v62, %v9439_v62 }
 0x115   :  { %884 = vst [vmem:[#allocation2 + $0x110] sm:$0x30] %v860_v46  ;;  %885 = vst [vmem:[#allocation2 + $0x118] sm:$0x30] %v861_v20  ;;  %1562 = vrot.lane.b32.xlu1 %v9563_v42, %s8867_s17  ;;  %1560 = vrot.lane.b32.xlu0 %v9366_v24, %s8867_s17  ;;  %v7009_v20 = vld [vmem:[#allocation2 + $0x18] sm:$0xff] }
 0x117   :  { %v957_v52 = vpop.permute.xlu1 %956  ;;  %v955_v29 = vpop.permute.xlu0 %954 }
 0x118   :  { %v981_v60 = vsel %vm980_vm6, %v955_v29, %v957_v52 }
 0x119   :  { %1005 = vst [vmem:[#allocation2 + $0xc0] sm:$0xc0] %v981_v60  ;;  %1566 = vrot.lane.b32.xlu1 %v9573_v49, %s8867_s17  ;;  %1564 = vrot.lane.b32.xlu0 %v9381_v34, %s8867_s17  ;;  %v7008_v60 = vld [vmem:[#allocation2 + $0x10] sm:$0xff] }
 0x11b   :  { %v961_v28 = vpop.permute.xlu1 %960  ;;  %v959_v13 = vpop.permute.xlu0 %958 }
 0x11c   :  { %v982_v4 = vsel %vm980_vm6, %v957_v52, %v959_v13  ;;  %v983_v18 = vsel %vm980_vm6, %v959_v13, %v961_v28 }
 0x11d   :  { %1006 = vst [vmem:[#allocation2 + $0xc8] sm:$0xc0] %v982_v4  ;;  %1007 = vst [vmem:[#allocation2 + $0xd0] sm:$0xc0] %v983_v18  ;;  %1570 = vrot.lane.b32.xlu1 %v9582_v61, %s8867_s17  ;;  %1568 = vrot.lane.b32.xlu0 %v9392_v41, %s8867_s17 }
 0x11f   :  { %v965_v19 = vpop.permute.xlu1 %964  ;;  %v963_v6 = vpop.permute.xlu0 %962 }
 0x120   :  { %v984_v1 = vsel %vm980_vm6, %v961_v28, %v963_v6  ;;  %v985_v7 = vsel %vm980_vm6, %v963_v6, %v965_v19  ;;  %v7030_v15 = vld [vmem:[#allocation2 + $0xc0] sm:$0xff]  ;;  %v1654_v6 = vcombine.high %v9482_v38, %v9482_v38 }
 0x121   :  { %1008 = vst [vmem:[#allocation2 + $0xd8] sm:$0xc0] %v984_v1  ;;  %1009 = vst [vmem:[#allocation2 + $0xe0] sm:$0xc0] %v985_v7  ;;  %1574 = vrot.lane.b32.xlu1 %v9592_v32, %s8867_s17  ;;  %1572 = vrot.lane.b32.xlu0 %v9417_v59, %s8867_s17  ;;  %v8601_v14 = vpack.c.bf16 %v7030_v15, %v7006_v11 }
 0x123   :  { %v969_v9 = vpop.permute.xlu1 %968  ;;  %v967_v12 = vpop.permute.xlu0 %966 }
 0x124   :  { %v986_v16 = vsel %vm980_vm6, %v965_v19, %v967_v12  ;;  %v987_v17 = vsel %vm980_vm6, %v967_v12, %v969_v9  ;;  %v7031_v25 = vld [vmem:[#allocation2 + $0xc8] sm:$0xff]  ;;  %v7032_v44 = vld [vmem:[#allocation2 + $0xd0] sm:$0xff] }
 0x125   :  { %1010 = vst [vmem:[#allocation2 + $0xe8] sm:$0xc0] %v986_v16  ;;  %1011 = vst [vmem:[#allocation2 + $0xf0] sm:$0xc0] %v987_v17  ;;  %1681 = vrot.lane.b32.xlu1 %v9439_v62, %s8868_s22  ;;  %1576 = vrot.lane.b32.xlu0 %v9448_v33, %s8867_s17  ;;  %v8599_v21 = vpack.c.bf16 %v7031_v25, %v7007_v40  ;;  %v8613_v28 = vpack.c.bf16 %v7032_v44, %v7008_v60 }
 0x126   :  { %v1671_v40 = vcombine.high %v9508_v37, %v9508_v37  ;;  %v8789_v25 = vld [vmem:[%s12353_s0 + $0x1c] ss:$0 sps:$4 sm:$0x33]  }
 0x127   :  { %v973_v39 = vpop.permute.xlu1 %972  ;;  %v971_v53 = vpop.permute.xlu0 %970  ;;  %8600 = vmatprep.subr.bf16.mxu0 %v8599_v21 }
 0x128   :  { %v988_v45 = vsel %vm980_vm6, %v969_v9, %v971_v53  ;;  %v989_v46 = vsel %vm980_vm6, %v971_v53, %v973_v39  ;;  %8602 = vmatpush1.bf16.msra.mxu0 %v8601_v14  ;;  %v7033_v52 = vld [vmem:[#allocation2 + $0xd8] sm:$0xff] }
 0x129   :  { %1012 = vst [vmem:[#allocation2 + $0xf8] sm:$0xc0] %v988_v45  ;;  %1013 = vst [vmem:[#allocation2 + $0x100] sm:$0xc0] %v989_v46  ;;  %1685 = vrot.lane.b32.xlu1 %v9332_v22, %s8868_s22  ;;  %1683 = vrot.lane.b32.xlu0 %v1637_v26, %s8868_s22  ;;  %v8611_v29 = vpack.c.bf16 %v7033_v52, %v7009_v20 }
 0x12b   :  { %v977_v13 = vpop.permute.xlu1 %976  ;;  %v975_v4 = vpop.permute.xlu0 %974  ;;  %8612 = vmatprep.subr.bf16.mxu1 %v8611_v29 }
 0x12c   :  { %v990_v18 = vsel %vm980_vm6, %v973_v39, %v975_v4  ;;  %v991_v19 = vsel %vm980_vm6, %v975_v4, %v977_v13  ;;  %8614 = vmatpush1.bf16.msra.mxu1 %v8613_v28  ;;  %v1680_v39 = vrot.slane %v8789_v25, %v8921_v8 }
 0x12d   :  { %1014 = vst [vmem:[#allocation2 + $0x108] sm:$0xc0] %v990_v18  ;;  %1015 = vst [vmem:[#allocation2 + $0x110] sm:$0xc0] %v991_v19  ;;  %1689 = vrot.lane.b32.xlu1 %v9482_v38, %s8868_s22  ;;  %1687 = vrot.lane.b32.xlu0 %v9543_v43, %s8868_s22 }
 0x12f   :  { %v1084_v1 = vpop.permute.xlu1 %1083  ;;  %v979_v7 = vpop.permute.xlu0 %978 }
 0x130   :  { %v992_v9 = vsel %vm980_vm6, %v977_v13, %v979_v7 }
 0x131   :  { %1016 = vst [vmem:[#allocation2 + $0x118] sm:$0xc0] %v992_v9  ;;  %1693 = vrot.lane.b32.xlu1 %v9366_v24, %s8868_s22  ;;  %1691 = vrot.lane.b32.xlu0 %v1654_v6, %s8868_s22 }
 0x133   :  { %v1088_v12 = vpop.permute.xlu1 %1087  ;;  %v1086_v15 = vpop.permute.xlu0 %1085 }
 0x134   :  { %v1110_v16 = vsel %vm1109_vm7, %v1084_v1, %v1086_v15  ;;  %v1111_v17 = vsel %vm1109_vm7, %v1086_v15, %v1088_v12 }
 0x135   :  { %1134 = vst [vmem:[#allocation2 + $0x180] sm:$0x3] %v1110_v16  ;;  %1135 = vst [vmem:[#allocation2 + $0x188] sm:$0x3] %v1111_v17  ;;  %1697 = vrot.lane.b32.xlu1 %v9508_v37, %s8868_s22  ;;  %1695 = vrot.lane.b32.xlu0 %v9563_v42, %s8868_s22 }
 0x137   :  { %v1092_v21 = vpop.permute.xlu1 %1091  ;;  %v1090_v11 = vpop.permute.xlu0 %1089 }
 0x138   :  { %v1112_v26 = vsel %vm1109_vm7, %v1088_v12, %v1090_v11  ;;  %v1113_v14 = vsel %vm1109_vm7, %v1090_v11, %v1092_v21 }
 0x139   :  { %1136 = vst [vmem:[#allocation2 + $0x190] sm:$0x3] %v1112_v26  ;;  %1137 = vst [vmem:[#allocation2 + $0x198] sm:$0x3] %v1113_v14  ;;  %1701 = vrot.lane.b32.xlu1 %v9392_v41, %s8868_s22  ;;  %1699 = vrot.lane.b32.xlu0 %v1671_v40, %s8868_s22 }
 0x13b   :  { %v1096_v53 = vpop.permute.xlu1 %1095  ;;  %v1094_v44 = vpop.permute.xlu0 %1093 }
 0x13c   :  { %v1114_v45 = vsel %vm1109_vm7, %v1092_v21, %v1094_v44  ;;  %v1115_v46 = vsel %vm1109_vm7, %v1094_v44, %v1096_v53 }
 0x13d   :  { %1138 = vst [vmem:[#allocation2 + $0x1a0] sm:$0x3] %v1114_v45  ;;  %1139 = vst [vmem:[#allocation2 + $0x1a8] sm:$0x3] %v1115_v46  ;;  %1705 = vrot.lane.b32.xlu1 %v1680_v39, %s8868_s22  ;;  %1703 = vrot.lane.b32.xlu0 %v9582_v61, %s8868_s22 }
 0x13f   :  { %v1100_v20 = vpop.permute.xlu1 %1099  ;;  %v1098_v52 = vpop.permute.xlu0 %1097 }
 0x140   :  { %v1116_v29 = vsel %vm1109_vm7, %v1096_v53, %v1098_v52  ;;  %v1117_v60 = vsel %vm1109_vm7, %v1098_v52, %v1100_v20 }
 0x141   :  { %1140 = vst [vmem:[#allocation2 + $0x1b0] sm:$0x3] %v1116_v29  ;;  %1141 = vst [vmem:[#allocation2 + $0x1b8] sm:$0x3] %v1117_v60  ;;  %1812 = vrot.lane.b32.xlu1 %v9332_v22, %s8869_s23  ;;  %1810 = vrot.lane.b32.xlu0 %v9344_v23, %s8869_s23 }
 0x143   :  { %v1104_v28 = vpop.permute.xlu1 %1103  ;;  %v1102_v13 = vpop.permute.xlu0 %1101 }
 0x144   :  { %v1118_v4 = vsel %vm1109_vm7, %v1100_v20, %v1102_v13  ;;  %v1119_v18 = vsel %vm1109_vm7, %v1102_v13, %v1104_v28 }
 0x145   :  { %1142 = vst [vmem:[#allocation2 + $0x1c0] sm:$0x3] %v1118_v4  ;;  %1143 = vst [vmem:[#allocation2 + $0x1c8] sm:$0x3] %v1119_v18  ;;  %1816 = vrot.lane.b32.xlu1 %v9347_v36, %s8869_s23  ;;  %1814 = vrot.lane.b32.xlu0 %v9362_v2, %s8869_s23 }
 0x147   :  { %v1108_v19 = vpop.permute.xlu1 %1107  ;;  %v1106_v6 = vpop.permute.xlu0 %1105 }
 0x148   :  { %v1120_v1 = vsel %vm1109_vm7, %v1104_v28, %v1106_v6  ;;  %v1121_v7 = vsel %vm1109_vm7, %v1106_v6, %v1108_v19 }
 0x149   :  { %1144 = vst [vmem:[#allocation2 + $0x1d0] sm:$0x3] %v1120_v1  ;;  %1145 = vst [vmem:[#allocation2 + $0x1d8] sm:$0x3] %v1121_v7  ;;  %1820 = vrot.lane.b32.xlu1 %v9366_v24, %s8869_s23  ;;  %1818 = vrot.lane.b32.xlu0 %v9378_v30, %s8869_s23 }
 0x14b   :  { %v1297_v9 = vpop.permute.xlu1 %1296  ;;  %v1295_v12 = vpop.permute.xlu0 %1294 }
 0x14c   :  { %v1320_v15 = vsel %vm199_vm0, %v1295_v12, %v1297_v9 }
 0x14d   :  { %1344 = vst [vmem:[#allocation2 + $0x180] sm:$0x30] %v1320_v15  ;;  %1824 = vrot.lane.b32.xlu1 %v9381_v34, %s8869_s23  ;;  %1822 = vrot.lane.b32.xlu0 %v9400_v31, %s8869_s23 }
 0x14f   :  { %v1301_v2 = vpop.permute.xlu1 %1300  ;;  %v1299_v16 = vpop.permute.xlu0 %1298 }
 0x150   :  { %v1321_v17 = vsel %vm199_vm0, %v1297_v9, %v1299_v16  ;;  %v1322_v40 = vsel %vm199_vm0, %v1299_v16, %v1301_v2 }
 0x151   :  { %1345 = vst [vmem:[#allocation2 + $0x188] sm:$0x30] %v1321_v17  ;;  %1346 = vst [vmem:[#allocation2 + $0x190] sm:$0x30] %v1322_v40  ;;  %1828 = vrot.lane.b32.xlu1 %v9392_v41, %s8869_s23  ;;  %1826 = vrot.lane.b32.xlu0 %v9410_v50, %s8869_s23 }
 0x153   :  { %v1305_v25 = vpop.permute.xlu1 %1304  ;;  %v1303_v21 = vpop.permute.xlu0 %1302 }
 0x154   :  { %v1323_v11 = vsel %vm199_vm0, %v1301_v2, %v1303_v21  ;;  %v1324_v31 = vsel %vm199_vm0, %v1303_v21, %v1305_v25 }
 0x155   :  { %1347 = vst [vmem:[#allocation2 + $0x198] sm:$0x30] %v1323_v11  ;;  %1348 = vst [vmem:[#allocation2 + $0x1a0] sm:$0x30] %v1324_v31  ;;  %1832 = vrot.lane.b32.xlu1 %v9417_v59, %s8869_s23  ;;  %1830 = vrot.lane.b32.xlu0 %v9436_v10, %s8869_s23 }
 0x157   :  { %v1309_v26 = vpop.permute.xlu1 %1308  ;;  %v1307_v14 = vpop.permute.xlu0 %1306 }
 0x158   :  { %v1325_v39 = vsel %vm199_vm0, %v1305_v25, %v1307_v14  ;;  %v1326_v53 = vsel %vm199_vm0, %v1307_v14, %v1309_v26 }
 0x159   :  { %1349 = vst [vmem:[#allocation2 + $0x1a8] sm:$0x30] %v1325_v39  ;;  %1350 = vst [vmem:[#allocation2 + $0x1b0] sm:$0x30] %v1326_v53  ;;  %1940 = vrot.lane.b32.xlu1 %v9465_v0, %s8870_s26  ;;  %1834 = vrot.lane.b32.xlu0 %v9469_v5, %s8869_s23 }
 0x15b   :  { %v1313_v44 = vpop.permute.xlu1 %1312  ;;  %v1311_v45 = vpop.permute.xlu0 %1310 }
 0x15c   :  { %v1327_v46 = vsel %vm199_vm0, %v1309_v26, %v1311_v45  ;;  %v1328_v10 = vsel %vm199_vm0, %v1311_v45, %v1313_v44 }
 0x15d   :  { %1351 = vst [vmem:[#allocation2 + $0x1b8] sm:$0x30] %v1327_v46  ;;  %1352 = vst [vmem:[#allocation2 + $0x1c0] sm:$0x30] %v1328_v10  ;;  %1944 = vrot.lane.b32.xlu1 %v9344_v23, %s8870_s26  ;;  %1942 = vrot.lane.b32.xlu0 %v9439_v62, %s8870_s26 }
 0x15e   :  { %v8790_v62 = vld [vmem:[%s12353_s0 + $0x1c] ss:$0 sps:$4 sm:$0x33]  }
 0x15f   :  { %v1317_v20 = vpop.permute.xlu1 %1316  ;;  %v1315_v52 = vpop.permute.xlu0 %1314 }
 0x160   :  { %v1329_v0 = vsel %vm199_vm0, %v1313_v44, %v1315_v52  ;;  %v1330_v5 = vsel %vm199_vm0, %v1315_v52, %v1317_v20 }
 0x161   :  { %1353 = vst [vmem:[#allocation2 + $0x1c8] sm:$0x30] %v1329_v0  ;;  %1354 = vst [vmem:[#allocation2 + $0x1d0] sm:$0x30] %v1330_v5  ;;  %1948 = vrot.lane.b32.xlu1 %v9493_v27, %s8870_s26  ;;  %1946 = vrot.lane.b32.xlu0 %v9332_v22, %s8870_s26 }
 0x163   :  { %v1425_v29 = vpop.permute.xlu1 %1424  ;;  %v1319_v60 = vpop.permute.xlu0 %1318 }
 0x164   :  { %v1331_v23 = vsel %vm199_vm0, %v1317_v20, %v1319_v60 }
 0x165   :  { %1355 = vst [vmem:[#allocation2 + $0x1d8] sm:$0x30] %v1331_v23  ;;  %1952 = vrot.lane.b32.xlu1 %v9378_v30, %s8870_s26  ;;  %1950 = vrot.lane.b32.xlu0 %v9482_v38, %s8870_s26  ;;  %v1938_v30 = vrot.slane %v8790_v62, %v8921_v8 }
 0x167   :  { %v1429_v28 = vpop.permute.xlu1 %1428  ;;  %v1427_v27 = vpop.permute.xlu0 %1426 }
 0x168   :  { %v1450_v13 = vsel %vm329_vm1, %v1425_v29, %v1427_v27  ;;  %v1451_v4 = vsel %vm329_vm1, %v1427_v27, %v1429_v28 }
 0x169   :  { %1474 = vst [vmem:[#allocation2 + $0x180] sm:$0xc0] %v1450_v13  ;;  %1475 = vst [vmem:[#allocation2 + $0x188] sm:$0xc0] %v1451_v4  ;;  %1956 = vrot.lane.b32.xlu1 %v9518_v56, %s8870_s26  ;;  %1954 = vrot.lane.b32.xlu0 %v9366_v24, %s8870_s26  ;;  %v1939_v56 = vcombine.low %v1938_v30, %v1938_v30 }
 0x16b   :  { %v1433_v38 = vpop.permute.xlu1 %1432  ;;  %v1431_v18 = vpop.permute.xlu0 %1430 }
 0x16c   :  { %v1452_v19 = vsel %vm329_vm1, %v1429_v28, %v1431_v18  ;;  %v1453_v6 = vsel %vm329_vm1, %v1431_v18, %v1433_v38  ;;  %v9797_v18 = vcombine.low %v9078_v48, %v9078_v48 }
 0x16d   :  { %1476 = vst [vmem:[#allocation2 + $0x190] sm:$0xc0] %v1452_v19  ;;  %1477 = vst [vmem:[#allocation2 + $0x198] sm:$0xc0] %v1453_v6  ;;  %1960 = vrot.lane.b32.xlu1 %v9410_v50, %s8870_s26  ;;  %1958 = vrot.lane.b32.xlu0 %v9508_v37, %s8870_s26 }
 0x16e   :  { %2328 = vst [vmem:[#allocation2 + $0x300] sm:$0x30] %v9797_v18 }
 0x16f   :  { %v1437_v1 = vpop.permute.xlu1 %1436  ;;  %v1435_v7 = vpop.permute.xlu0 %1434 }
 0x170   :  { %v1454_v9 = vsel %vm329_vm1, %v1433_v38, %v1435_v7  ;;  %v1455_v12 = vsel %vm329_vm1, %v1435_v7, %v1437_v1 }
 0x171   :  { %1478 = vst [vmem:[#allocation2 + $0x1a0] sm:$0xc0] %v1454_v9  ;;  %1479 = vst [vmem:[#allocation2 + $0x1a8] sm:$0xc0] %v1455_v12  ;;  %1964 = vrot.lane.b32.xlu1 %v1939_v56, %s8870_s26  ;;  %1962 = vrot.lane.b32.xlu0 %v9392_v41, %s8870_s26 }
 0x172   :  { %v8794_v9 = vld [vmem:[%s12353_s0 + $0x1c] ss:$0 sps:$4 sm:$0x33]  }
 0x173   :  { %v1441_v15 = vpop.permute.xlu1 %1440  ;;  %v1439_v2 = vpop.permute.xlu0 %1438 }
 0x174   :  { %v1456_v50 = vsel %vm329_vm1, %v1437_v1, %v1439_v2  ;;  %v1457_v37 = vsel %vm329_vm1, %v1439_v2, %v1441_v15  ;;  %v9812_v2 = vcombine.low %v9087_v51, %v9087_v51 }
 0x175   :  { %1480 = vst [vmem:[#allocation2 + $0x1b0] sm:$0xc0] %v1456_v50  ;;  %1481 = vst [vmem:[#allocation2 + $0x1b8] sm:$0xc0] %v1457_v37  ;;  %2070 = vrot.lane.b32.xlu1 %v9543_v43, %s8871_s27  ;;  %2068 = vrot.lane.b32.xlu0 %v9332_v22, %s8871_s27 }
 0x176   :  { %2330 = vst [vmem:[#allocation2 + $0x310] sm:$0x30] %v9812_v2 }
 0x177   :  { %v1445_v16 = vpop.permute.xlu1 %1444  ;;  %v1443_v17 = vpop.permute.xlu0 %1442 }
 0x178   :  { %v1458_v40 = vsel %vm329_vm1, %v1441_v15, %v1443_v17  ;;  %v1459_v25 = vsel %vm329_vm1, %v1443_v17, %v1445_v16  ;;  %v2196_v17 = vrot.slane %v8794_v9, %v8921_v8 }
 0x179   :  { %1482 = vst [vmem:[#allocation2 + $0x1c0] sm:$0xc0] %v1458_v40  ;;  %1483 = vst [vmem:[#allocation2 + $0x1c8] sm:$0xc0] %v1459_v25  ;;  %2074 = vrot.lane.b32.xlu1 %v9553_v47, %s8871_s27  ;;  %2072 = vrot.lane.b32.xlu0 %v9347_v36, %s8871_s27  ;;  %v9826_v25 = vld [vmem:[%s12353_s0 + $0x10] sm:$0xff] }
 0x17b   :  { %v1449_v21 = vpop.permute.xlu1 %1448  ;;  %v1447_v11 = vpop.permute.xlu0 %1446 }
 0x17c   :  { %v1460_v43 = vsel %vm329_vm1, %v1445_v16, %v1447_v11  ;;  %v1461_v22 = vsel %vm329_vm1, %v1447_v11, %v1449_v21 }
 0x17d   :  { %1484 = vst [vmem:[#allocation2 + $0x1d0] sm:$0xc0] %v1460_v43  ;;  %1485 = vst [vmem:[#allocation2 + $0x1d8] sm:$0xc0] %v1461_v22  ;;  %2078 = vrot.lane.b32.xlu1 %v9563_v42, %s8871_s27  ;;  %2076 = vrot.lane.b32.xlu0 %v9366_v24, %s8871_s27  ;;  %v9830_v43 = vcombine.low %v9101_v54, %v9101_v54 }
 0x17f   :  { %v1555_v31 = vpop.permute.xlu1 %1554  ;;  %v1553_v26 = vpop.permute.xlu0 %1552  ;;  %2332 = vst [vmem:[#allocation2 + $0x320] sm:$0x30] %v9830_v43 }
 0x180   :  { %v1578_v47 = vsel %vm460_vm2, %v1553_v26, %v1555_v31 }
 0x181   :  { %1602 = vst [vmem:[#allocation2 + $0x240] sm:$0x3] %v1578_v47  ;;  %2082 = vrot.lane.b32.xlu1 %v9573_v49, %s8871_s27  ;;  %2080 = vrot.lane.b32.xlu0 %v9381_v34, %s8871_s27 }
 0x183   :  { %v1559_v36 = vpop.permute.xlu1 %1558  ;;  %v1557_v14 = vpop.permute.xlu0 %1556 }
 0x184   :  { %v1579_v39 = vsel %vm460_vm2, %v1555_v31, %v1557_v14  ;;  %v1580_v42 = vsel %vm460_vm2, %v1557_v14, %v1559_v36 }
 0x185   :  { %1603 = vst [vmem:[#allocation2 + $0x248] sm:$0x3] %v1579_v39  ;;  %1604 = vst [vmem:[#allocation2 + $0x250] sm:$0x3] %v1580_v42  ;;  %2086 = vrot.lane.b32.xlu1 %v9582_v61, %s8871_s27  ;;  %2084 = vrot.lane.b32.xlu0 %v9392_v41, %s8871_s27  ;;  %v2131_v61 = vld [vmem:[%s12353_s0 + $0xc] sm:$0xff]  ;;  %v9850_v42 = vcombine.low %v9115_v58, %v9115_v58 }
 0x187   :  { %v1563_v24 = vpop.permute.xlu1 %1562  ;;  %v1561_v53 = vpop.permute.xlu0 %1560  ;;  %2334 = vst [vmem:[#allocation2 + $0x330] sm:$0x30] %v9850_v42 }
 0x188   :  { %v1581_v49 = vsel %vm460_vm2, %v1559_v36, %v1561_v53  ;;  %v1582_v34 = vsel %vm460_vm2, %v1561_v53, %v1563_v24  ;;  %v2365_v36 = vcombine.low %v9826_v25, %v9826_v25 }
 0x189   :  { %1605 = vst [vmem:[#allocation2 + $0x258] sm:$0x3] %v1581_v49  ;;  %1606 = vst [vmem:[#allocation2 + $0x260] sm:$0x3] %v1582_v34  ;;  %2090 = vrot.lane.b32.xlu1 %v9592_v32, %s8871_s27  ;;  %2088 = vrot.lane.b32.xlu0 %v9417_v59, %s8871_s27  ;;  %v2155_v32 = vcombine.low %v2131_v61, %v2131_v61  ;;  %v9869_v34 = vld [vmem:[%s12353_s0 + $0x18] sm:$0xff] }
 0x18a   :  { %v9863_v49 = vrot.slane %v2365_v36, %v8921_v8 }
 0x18b   :  { %v1567_v44 = vpop.permute.xlu1 %1566  ;;  %v1565_v41 = vpop.permute.xlu0 %1564 }
 0x18c   :  { %v1583_v45 = vsel %vm460_vm2, %v1563_v24, %v1565_v41  ;;  %v1584_v46 = vsel %vm460_vm2, %v1565_v41, %v1567_v44  ;;  %v2261_v41 = vld [vmem:[%s12353_s0 + $0x18] sm:$0xff] }
 0x18d   :  { %1607 = vst [vmem:[#allocation2 + $0x268] sm:$0x3] %v1583_v45  ;;  %1608 = vst [vmem:[#allocation2 + $0x270] sm:$0x3] %v1584_v46  ;;  %2197 = vrot.lane.b32.xlu1 %v9422_v55, %s8872_s8  ;;  %2092 = vrot.lane.b32.xlu0 %v9448_v33, %s8871_s27  ;;  %v2162_v55 = vrot.slane %v2155_v32, %v8921_v8  ;;  %v2132_v33 = vld [vmem:[%s12353_s0 + $0x14] sm:$0xff]  ;;  %v2306_v32 = vrot.slane %v2261_v41, %v8921_v8 }
 0x18e   :  { %v2172_v23 = vcombine.low %v2132_v33, %v2132_v33  ;;  %v2186_v1 = vrot.slane %v2132_v33, %v8921_v8  ;;  %8385 = vst.sshfl [vmem:[#allocation2 + $0x348] sm:$0xc pattern:$0x76325410] %v2261_v41 }
 0x18f   :  { %v1571_v59 = vpop.permute.xlu1 %1570  ;;  %v1569_v10 = vpop.permute.xlu0 %1568 }
 0x190   :  { %v1585_v20 = vsel %vm460_vm2, %v1567_v44, %v1569_v10  ;;  %v1586_v52 = vsel %vm460_vm2, %v1569_v10, %v1571_v59  ;;  %v2179_v13 = vrot.slane %v2172_v23, %v8921_v8  ;;  %v2188_v40 = vcombine.high %v2186_v1, %v2186_v1 }
 0x191   :  { %1609 = vst [vmem:[#allocation2 + $0x278] sm:$0x3] %v1585_v20  ;;  %1610 = vst [vmem:[#allocation2 + $0x280] sm:$0x3] %v1586_v52  ;;  %2201 = vrot.lane.b32.xlu1 %v9442_v63, %s8872_s8  ;;  %2199 = vrot.lane.b32.xlu0 %v9426_v35, %s8872_s8  ;;  %v2169_v35 = vrot.slane %v2131_v61, %v8921_v8  ;;  %v2170_v63 = vcombine.high %v2162_v55, %v2162_v55 }
 0x192   :  { %v2187_v7 = vcombine.high %v2179_v13, %v2179_v13  ;;  %v9887_v10 = vrot.slane %v9826_v25, %v8921_v8  ;;  %v2382_v20 = vcombine.low %v9869_v34, %v9869_v34  ;;  %v2314_v52 = vcombine.low %v2306_v32, %v2306_v32 }
 0x193   :  { %v1575_v0 = vpop.permute.xlu1 %1574  ;;  %v1573_v5 = vpop.permute.xlu0 %1572  ;;  %v2171_v4 = vcombine.high %v2169_v35, %v2169_v35 }
 0x194   :  { %v1587_v29 = vsel %vm460_vm2, %v1571_v59, %v1573_v5  ;;  %v1588_v60 = vsel %vm460_vm2, %v1573_v5, %v1575_v0  ;;  %v9883_v59 = vcombine.low %v9863_v49, %v9863_v49  ;;  %2336 = vst [vmem:[#allocation2 + $0x340] sm:$0x30] %v2314_v52 }
 0x195   :  { %1611 = vst [vmem:[#allocation2 + $0x288] sm:$0x3] %v1587_v29  ;;  %1612 = vst [vmem:[#allocation2 + $0x290] sm:$0x3] %v1588_v60  ;;  %2205 = vrot.lane.b32.xlu1 %v2162_v55, %s8872_s8  ;;  %2203 = vrot.lane.b32.xlu0 %v9452_v3, %s8872_s8  ;;  %v9793_v3 = vld [vmem:[%s12353_s0 + $0x8] sm:$0xff]  ;;  %v2299_v55 = vcombine.high %v2261_v41, %v2261_v41 }
 0x196   :  { %v2348_v56 = vcombine.low %v9793_v3, %v9793_v3  ;;  %v9842_v47 = vrot.slane %v9793_v3, %v8921_v8 }
 0x197   :  { %v1682_v62 = vpop.permute.xlu1 %1681  ;;  %v1577_v28 = vpop.permute.xlu0 %1576  ;;  %v2313_v60 = vrot.slane %v2299_v55, %v8921_v8  ;;  %8386 = vst.sshfl [vmem:[#allocation2 + $0x358] sm:$0xc pattern:$0x76325410] %v2299_v55 }
 0x198   :  { %v1589_v27 = vsel %vm460_vm2, %v1575_v0, %v1577_v28  ;;  %v9817_v16 = vrot.slane %v2348_v56, %v8921_v8  ;;  %v9860_v57 = vcombine.low %v9842_v47, %v9842_v47  ;;  %v9950_v36 = vcombine.high %v9842_v47, %v9842_v47 }
 0x199   :  { %1613 = vst [vmem:[#allocation2 + $0x298] sm:$0x3] %v1589_v27  ;;  %2209 = vrot.lane.b32.xlu1 %v2169_v35, %s8872_s8  ;;  %2207 = vrot.lane.b32.xlu0 %v2170_v63, %s8872_s8  ;;  %v9900_v35 = vcombine.low %v9887_v10, %v9887_v10  ;;  %v9903_v63 = vrot.slane %v2382_v20, %v8921_v8 }
 0x19a   :  { %v9836_v26 = vcombine.low %v9817_v16, %v9817_v16  ;;  %v2315_v23 = vcombine.low %v2313_v60, %v2313_v60 }
 0x19b   :  { %v1686_v30 = vpop.permute.xlu1 %1685  ;;  %v1684_v38 = vpop.permute.xlu0 %1683 }
 0x19c   :  { %v1707_v19 = vsel %vm589_vm3, %v1682_v62, %v1684_v38  ;;  %v1708_v6 = vsel %vm589_vm3, %v1684_v38, %v1686_v30  ;;  %2338 = vst [vmem:[#allocation2 + $0x350] sm:$0x30] %v2315_v23 }
 0x19d   :  { %1731 = vst [vmem:[#allocation2 + $0x240] sm:$0xc] %v1707_v19  ;;  %1732 = vst [vmem:[#allocation2 + $0x248] sm:$0xc] %v1708_v6  ;;  %2213 = vrot.lane.b32.xlu1 %v2179_v13, %s8872_s8  ;;  %2211 = vrot.lane.b32.xlu0 %v2171_v4, %s8872_s8  ;;  %v9912_v13 = vcombine.low %v9903_v63, %v9903_v63  ;;  %v9916_v4 = vrot.slane %v9869_v34, %v8921_v8 }
 0x19f   :  { %v1690_v12 = vpop.permute.xlu1 %1689  ;;  %v1688_v15 = vpop.permute.xlu0 %1687 }
 0x1a0   :  { %v1709_v50 = vsel %vm589_vm3, %v1686_v30, %v1688_v15  ;;  %v1710_v37 = vsel %vm589_vm3, %v1688_v15, %v1690_v12  ;;  %v8798_v30 = vld [vmem:[%s12353_s0 + $0x20] ss:$0 sps:$4 sm:$0x33]  }
 0x1a1   :  { %1733 = vst [vmem:[#allocation2 + $0x250] sm:$0xc] %v1709_v50  ;;  %1734 = vst [vmem:[#allocation2 + $0x258] sm:$0xc] %v1710_v37  ;;  %2217 = vrot.lane.b32.xlu1 %v2186_v1, %s8872_s8  ;;  %2215 = vrot.lane.b32.xlu0 %v2187_v7, %s8872_s8  ;;  %v9929_v1 = vcombine.low %v9916_v4, %v9916_v4  ;;  %v2406_v7 = vrot.slane %v8798_v30, %v8921_v8 }
 0x1a3   :  { %v1694_v21 = vpop.permute.xlu1 %1693  ;;  %v1692_v11 = vpop.permute.xlu0 %1691  ;;  %v2407_v37 = vcombine.low %v2406_v7, %v2406_v7 }
 0x1a4   :  { %v1711_v22 = vsel %vm589_vm3, %v1690_v12, %v1692_v11  ;;  %v1712_v31 = vsel %vm589_vm3, %v1692_v11, %v1694_v21 }
 0x1a5   :  { %1735 = vst [vmem:[#allocation2 + $0x260] sm:$0xc] %v1711_v22  ;;  %1736 = vst [vmem:[#allocation2 + $0x268] sm:$0xc] %v1712_v31  ;;  %2221 = vrot.lane.b32.xlu1 %v2196_v17, %s8872_s8  ;;  %2219 = vrot.lane.b32.xlu0 %v2188_v40, %s8872_s8  ;;  %v2478_v17 = vcombine.high %v9793_v3, %v9793_v3 }
 0x1a7   :  { %v1698_v14 = vpop.permute.xlu1 %1697  ;;  %v1696_v39 = vpop.permute.xlu0 %1695  ;;  %v9946_v31 = vrot.slane %v2478_v17, %v8921_v8 }
 0x1a8   :  { %v1713_v24 = vsel %vm589_vm3, %v1694_v21, %v1696_v39  ;;  %v1714_v53 = vsel %vm589_vm3, %v1696_v39, %v1698_v14 }
 0x1a9   :  { %1737 = vst [vmem:[#allocation2 + $0x270] sm:$0xc] %v1713_v24  ;;  %1738 = vst [vmem:[#allocation2 + $0x278] sm:$0xc] %v1714_v53  ;;  %2410 = vrot.lane.b32.xlu1 %v9817_v16, %s8865_s30  ;;  %2408 = vrot.lane.b32.xlu0 %v9836_v26, %s8865_s30  ;;  %v9960_v53 = vcombine.high %v9946_v31, %v9946_v31 }
 0x1ab   :  { %v1702_v61 = vpop.permute.xlu1 %1701  ;;  %v1700_v44 = vpop.permute.xlu0 %1699 }
 0x1ac   :  { %v1715_v45 = vsel %vm589_vm3, %v1698_v14, %v1700_v44  ;;  %v1716_v46 = vsel %vm589_vm3, %v1700_v44, %v1702_v61 }
 0x1ad   :  { %1739 = vst [vmem:[#allocation2 + $0x280] sm:$0xc] %v1715_v45  ;;  %1740 = vst [vmem:[#allocation2 + $0x288] sm:$0xc] %v1716_v46  ;;  %2414 = vrot.lane.b32.xlu1 %v9842_v47, %s8865_s30  ;;  %2412 = vrot.lane.b32.xlu0 %v9860_v57, %s8865_s30 }
 0x1af   :  { %v1706_v33 = vpop.permute.xlu1 %1705  ;;  %v1704_v0 = vpop.permute.xlu0 %1703 }
 0x1b0   :  { %v1717_v5 = vsel %vm589_vm3, %v1702_v61, %v1704_v0  ;;  %v1718_v29 = vsel %vm589_vm3, %v1704_v0, %v1706_v33  ;;  %v2495_v61 = vcombine.high %v9826_v25, %v9826_v25  ;;  %v9975_v25 = vcombine.high %v9887_v10, %v9887_v10 }
 0x1b1   :  { %1741 = vst [vmem:[#allocation2 + $0x290] sm:$0xc] %v1717_v5  ;;  %1742 = vst [vmem:[#allocation2 + $0x298] sm:$0xc] %v1718_v29  ;;  %2418 = vrot.lane.b32.xlu1 %v9863_v49, %s8865_s30  ;;  %2416 = vrot.lane.b32.xlu0 %v9883_v59, %s8865_s30  ;;  %v2512_v0 = vcombine.high %v9869_v34, %v9869_v34  ;;  %v9999_v34 = vcombine.high %v9916_v4, %v9916_v4 }
 0x1b2   :  { %v9971_v32 = vrot.slane %v2495_v61, %v8921_v8 }
 0x1b3   :  { %v1813_v62 = vpop.permute.xlu1 %1812  ;;  %v1811_v28 = vpop.permute.xlu0 %1810 }
 0x1b4   :  { %v1836_v27 = vsel %vm719_vm4, %v1811_v28, %v1813_v62  ;;  %v9984_v33 = vcombine.high %v9971_v32, %v9971_v32 }
 0x1b5   :  { %1860 = vst [vmem:[#allocation2 + $0x240] sm:$0x30] %v1836_v27  ;;  %2422 = vrot.lane.b32.xlu1 %v9887_v10, %s8865_s30  ;;  %2420 = vrot.lane.b32.xlu0 %v9900_v35, %s8865_s30 }
 0x1b7   :  { %v1817_v38 = vpop.permute.xlu1 %1816  ;;  %v1815_v19 = vpop.permute.xlu0 %1814 }
 0x1b8   :  { %v1837_v6 = vsel %vm719_vm4, %v1813_v62, %v1815_v19  ;;  %v1838_v56 = vsel %vm719_vm4, %v1815_v19, %v1817_v38  ;;  %v9995_v62 = vrot.slane %v2512_v0, %v8921_v8 }
 0x1b9   :  { %1861 = vst [vmem:[#allocation2 + $0x248] sm:$0x30] %v1837_v6  ;;  %1862 = vst [vmem:[#allocation2 + $0x250] sm:$0x30] %v1838_v56  ;;  %2426 = vrot.lane.b32.xlu1 %v9903_v63, %s8865_s30  ;;  %2424 = vrot.lane.b32.xlu0 %v9912_v13, %s8865_s30 }
 0x1ba   :  { %v10009_v19 = vcombine.high %v9995_v62, %v9995_v62  ;;  %v10014_v6 = vld.sshfl [vmem:[%s12353_s0 + $0x20] sm:$0x3 pattern:$0x76325410] }
 0x1bb   :  { %v1821_v9 = vpop.permute.xlu1 %1820  ;;  %v1819_v12 = vpop.permute.xlu0 %1818 }
 0x1bc   :  { %v1839_v15 = vsel %vm719_vm4, %v1817_v38, %v1819_v12  ;;  %v1840_v50 = vsel %vm719_vm4, %v1819_v12, %v1821_v9 }
 0x1bd   :  { %1863 = vst [vmem:[#allocation2 + $0x258] sm:$0x30] %v1839_v15  ;;  %1864 = vst [vmem:[#allocation2 + $0x260] sm:$0x30] %v1840_v50  ;;  %2430 = vrot.lane.b32.xlu1 %v9916_v4, %s8865_s30  ;;  %2428 = vrot.lane.b32.xlu0 %v9929_v1, %s8865_s30 }
 0x1bf   :  { %v1825_v40 = vpop.permute.xlu1 %1824  ;;  %v1823_v21 = vpop.permute.xlu0 %1822 }
 0x1c0   :  { %v1841_v11 = vsel %vm719_vm4, %v1821_v9, %v1823_v21  ;;  %v1842_v22 = vsel %vm719_vm4, %v1823_v21, %v1825_v40  ;;  %v7055_v9 = vld [vmem:[#allocation2 + $0x188] sm:$0xff] }
 0x1c1   :  { %1865 = vst [vmem:[#allocation2 + $0x268] sm:$0x30] %v1841_v11  ;;  %1866 = vst [vmem:[#allocation2 + $0x270] sm:$0x30] %v1842_v22  ;;  %2536 = vrot.lane.b32.xlu1 %v9842_v47, %s8866_s10  ;;  %2432 = vrot.lane.b32.xlu0 %v2407_v37, %s8865_s30  ;;  %v7054_v37 = vld [vmem:[#allocation2 + $0x180] sm:$0xff]  ;;  %v10024_v11 = vcombine.high %v9817_v16, %v9817_v16 }
 0x1c3   :  { %v1829_v3 = vpop.permute.xlu1 %1828  ;;  %v1827_v14 = vpop.permute.xlu0 %1826 }
 0x1c4   :  { %v1843_v39 = vsel %vm719_vm4, %v1825_v40, %v1827_v14  ;;  %v1844_v24 = vsel %vm719_vm4, %v1827_v14, %v1829_v3  ;;  %v7057_v14 = vld [vmem:[#allocation2 + $0x198] sm:$0xff] }
 0x1c5   :  { %1867 = vst [vmem:[#allocation2 + $0x278] sm:$0x30] %v1843_v39  ;;  %1868 = vst [vmem:[#allocation2 + $0x280] sm:$0x30] %v1844_v24  ;;  %2540 = vrot.lane.b32.xlu1 %v9946_v31, %s8866_s10  ;;  %2538 = vrot.lane.b32.xlu0 %v9950_v36, %s8866_s10 }
 0x1c7   :  { %v1833_v44 = vpop.permute.xlu1 %1832  ;;  %v1831_v41 = vpop.permute.xlu0 %1830 }
 0x1c8   :  { %v1845_v45 = vsel %vm719_vm4, %v1829_v3, %v1831_v41  ;;  %v1846_v46 = vsel %vm719_vm4, %v1831_v41, %v1833_v44 }
 0x1c9   :  { %1869 = vst [vmem:[#allocation2 + $0x288] sm:$0x30] %v1845_v45  ;;  %1870 = vst [vmem:[#allocation2 + $0x290] sm:$0x30] %v1846_v46  ;;  %2544 = vrot.lane.b32.xlu1 %v9887_v10, %s8866_s10  ;;  %2542 = vrot.lane.b32.xlu0 %v9960_v53, %s8866_s10 }
 0x1cb   :  { %v1941_v20 = vpop.permute.xlu1 %1940  ;;  %v1835_v52 = vpop.permute.xlu0 %1834 }
 0x1cc   :  { %v1847_v55 = vsel %vm719_vm4, %v1833_v44, %v1835_v52  ;;  %v7056_v44 = vld [vmem:[#allocation2 + $0x190] sm:$0xff] }
 0x1cd   :  { %1871 = vst [vmem:[#allocation2 + $0x298] sm:$0x30] %v1847_v55  ;;  %2548 = vrot.lane.b32.xlu1 %v9971_v32, %s8866_s10  ;;  %2546 = vrot.lane.b32.xlu0 %v9975_v25, %s8866_s10 }
 0x1cf   :  { %v1945_v5 = vpop.permute.xlu1 %1944  ;;  %v1943_v29 = vpop.permute.xlu0 %1942 }
 0x1d0   :  { %v1966_v60 = vsel %vm849_vm5, %v1941_v20, %v1943_v29  ;;  %v1967_v23 = vsel %vm849_vm5, %v1943_v29, %v1945_v5 }
 0x1d1   :  { %1990 = vst [vmem:[#allocation2 + $0x240] sm:$0xc0] %v1966_v60  ;;  %1991 = vst [vmem:[#allocation2 + $0x248] sm:$0xc0] %v1967_v23  ;;  %2552 = vrot.lane.b32.xlu1 %v9916_v4, %s8866_s10  ;;  %2550 = vrot.lane.b32.xlu0 %v9984_v33, %s8866_s10 }
 0x1d3   :  { %v1949_v28 = vpop.permute.xlu1 %1948  ;;  %v1947_v27 = vpop.permute.xlu0 %1946 }
 0x1d4   :  { %v1968_v30 = vsel %vm849_vm5, %v1945_v5, %v1947_v27  ;;  %v1969_v38 = vsel %vm849_vm5, %v1947_v27, %v1949_v28  ;;  %v10040_v5 = vcombine.high %v9863_v49, %v9863_v49 }
 0x1d5   :  { %1992 = vst [vmem:[#allocation2 + $0x250] sm:$0xc0] %v1968_v30  ;;  %1993 = vst [vmem:[#allocation2 + $0x258] sm:$0xc0] %v1969_v38  ;;  %2556 = vrot.lane.b32.xlu1 %v9995_v62, %s8866_s10  ;;  %2554 = vrot.lane.b32.xlu0 %v9999_v34, %s8866_s10 }
 0x1d7   :  { %v1953_v56 = vpop.permute.xlu1 %1952  ;;  %v1951_v7 = vpop.permute.xlu0 %1950 }
 0x1d8   :  { %v1970_v12 = vsel %vm849_vm5, %v1949_v28, %v1951_v7  ;;  %v1971_v15 = vsel %vm849_vm5, %v1951_v7, %v1953_v56  ;;  %v7079_v50 = vld [vmem:[#allocation2 + $0x248] sm:$0xff]  ;;  %v7078_v17 = vld [vmem:[#allocation2 + $0x240] sm:$0xff] }
 0x1d9   :  { %1994 = vst [vmem:[#allocation2 + $0x260] sm:$0xc0] %v1970_v12  ;;  %1995 = vst [vmem:[#allocation2 + $0x268] sm:$0xc0] %v1971_v15  ;;  %2560 = vrot.lane.b32.xlu1 %v10014_v6, %s8866_s10  ;;  %2558 = vrot.lane.b32.xlu0 %v10009_v19, %s8866_s10  ;;  %v8603_v40 = vpack.c.bf16 %v7079_v50, %v7055_v9  ;;  %v8605_v21 = vpack.c.bf16 %v7078_v17, %v7054_v37 }
 0x1da   :  { %v8802_v50 = vld [vmem:[%s12353_s0 + $0x20] ss:$0 sps:$4 sm:$0x33]  }
 0x1db   :  { %v1957_v22 = vpop.permute.xlu1 %1956  ;;  %v1955_v3 = vpop.permute.xlu0 %1954  ;;  %8604 = vmatprep.subr.bf16.mxu0 %v8603_v40 }
 0x1dc   :  { %v1972_v39 = vsel %vm849_vm5, %v1953_v56, %v1955_v3  ;;  %v1973_v24 = vsel %vm849_vm5, %v1955_v3, %v1957_v22  ;;  %8606 = vmatpush1.bf16.msra.mxu0 %v8605_v21  ;;  %v7081_v61 = vld [vmem:[#allocation2 + $0x258] sm:$0xff]  ;;  %v7080_v41 = vld [vmem:[#allocation2 + $0x250] sm:$0xff]  ;;  %v10055_v56 = vcombine.high %v9903_v63, %v9903_v63 }
 0x1dd   :  { %1996 = vst [vmem:[#allocation2 + $0x270] sm:$0xc0] %v1972_v39  ;;  %1997 = vst [vmem:[#allocation2 + $0x278] sm:$0xc0] %v1973_v24  ;;  %2667 = vrot.lane.b32.xlu1 %v10024_v11, %s8867_s17  ;;  %2665 = vrot.lane.b32.xlu0 %v9817_v16, %s8867_s17  ;;  %v8615_v45 = vpack.c.bf16 %v7081_v61, %v7057_v14  ;;  %v8617_v46 = vpack.c.bf16 %v7080_v41, %v7056_v44 }
 0x1de   :  { %v2751_v61 = vcombine.low %v9946_v31, %v9946_v31 }
 0x1df   :  { %v1961_v20 = vpop.permute.xlu1 %1960  ;;  %v1959_v52 = vpop.permute.xlu0 %1958  ;;  %8616 = vmatprep.subr.bf16.mxu1 %v8615_v45 }
 0x1e0   :  { %v1974_v55 = vsel %vm849_vm5, %v1957_v22, %v1959_v52  ;;  %v1975_v0 = vsel %vm849_vm5, %v1959_v52, %v1961_v20  ;;  %8618 = vmatpush1.bf16.msra.mxu1 %v8617_v46  ;;  %v2664_v22 = vrot.slane %v8802_v50, %v8921_v8 }
 0x1e1   :  { %1998 = vst [vmem:[#allocation2 + $0x280] sm:$0xc0] %v1974_v55  ;;  %1999 = vst [vmem:[#allocation2 + $0x288] sm:$0xc0] %v1975_v0  ;;  %2671 = vrot.lane.b32.xlu1 %v9950_v36, %s8867_s17  ;;  %2669 = vrot.lane.b32.xlu0 %v9842_v47, %s8867_s17 }
 0x1e3   :  { %v1965_v29 = vpop.permute.xlu1 %1964  ;;  %v1963_v60 = vpop.permute.xlu0 %1962 }
 0x1e4   :  { %v1976_v23 = vsel %vm849_vm5, %v1961_v20, %v1963_v60  ;;  %v1977_v28 = vsel %vm849_vm5, %v1963_v60, %v1965_v29  ;;  %v2768_v29 = vcombine.low %v9971_v32, %v9971_v32 }
 0x1e5   :  { %2000 = vst [vmem:[#allocation2 + $0x290] sm:$0xc0] %v1976_v23  ;;  %2001 = vst [vmem:[#allocation2 + $0x298] sm:$0xc0] %v1977_v28  ;;  %2675 = vrot.lane.b32.xlu1 %v10040_v5, %s8867_s17  ;;  %2673 = vrot.lane.b32.xlu0 %v9863_v49, %s8867_s17 }
 0x1e7   :  { %v2071_v27 = vpop.permute.xlu1 %2070  ;;  %v2069_v30 = vpop.permute.xlu0 %2068 }
 0x1e8   :  { %v2094_v38 = vsel %vm980_vm6, %v2069_v30, %v2071_v27 }
 0x1e9   :  { %2118 = vst [vmem:[#allocation2 + $0x300] sm:$0x3] %v2094_v38  ;;  %2679 = vrot.lane.b32.xlu1 %v9975_v25, %s8867_s17  ;;  %2677 = vrot.lane.b32.xlu0 %v9887_v10, %s8867_s17 }
 0x1eb   :  { %v2075_v7 = vpop.permute.xlu1 %2074  ;;  %v2073_v9 = vpop.permute.xlu0 %2072 }
 0x1ec   :  { %v2095_v12 = vsel %vm980_vm6, %v2071_v27, %v2073_v9  ;;  %v2096_v15 = vsel %vm980_vm6, %v2073_v9, %v2075_v7  ;;  %v2785_v9 = vcombine.low %v9995_v62, %v9995_v62 }
 0x1ed   :  { %2119 = vst [vmem:[#allocation2 + $0x308] sm:$0x3] %v2095_v12  ;;  %2120 = vst [vmem:[#allocation2 + $0x310] sm:$0x3] %v2096_v15  ;;  %2683 = vrot.lane.b32.xlu1 %v10055_v56, %s8867_s17  ;;  %2681 = vrot.lane.b32.xlu0 %v9903_v63, %s8867_s17 }
 0x1ef   :  { %v2079_v37 = vpop.permute.xlu1 %2078  ;;  %v2077_v17 = vpop.permute.xlu0 %2076 }
 0x1f0   :  { %v2097_v40 = vsel %vm980_vm6, %v2075_v7, %v2077_v17  ;;  %v2098_v21 = vsel %vm980_vm6, %v2077_v17, %v2079_v37  ;;  %v10112_v17 = vcombine.low %v10014_v6, %v10014_v6 }
 0x1f1   :  { %2121 = vst [vmem:[#allocation2 + $0x318] sm:$0x3] %v2097_v40  ;;  %2122 = vst [vmem:[#allocation2 + $0x320] sm:$0x3] %v2098_v21  ;;  %2687 = vrot.lane.b32.xlu1 %v9999_v34, %s8867_s17  ;;  %2685 = vrot.lane.b32.xlu0 %v9916_v4, %s8867_s17 }
 0x1f3   :  { %v2083_v3 = vpop.permute.xlu1 %2082  ;;  %v2081_v14 = vpop.permute.xlu0 %2080 }
 0x1f4   :  { %v2099_v39 = vsel %vm980_vm6, %v2079_v37, %v2081_v14  ;;  %v2100_v24 = vsel %vm980_vm6, %v2081_v14, %v2083_v3 }
 0x1f5   :  { %2123 = vst [vmem:[#allocation2 + $0x328] sm:$0x3] %v2099_v39  ;;  %2124 = vst [vmem:[#allocation2 + $0x330] sm:$0x3] %v2100_v24  ;;  %2794 = vrot.lane.b32.xlu1 %v9860_v57, %s8868_s22  ;;  %2689 = vrot.lane.b32.xlu0 %v2664_v22, %s8867_s17 }
 0x1f7   :  { %v2087_v44 = vpop.permute.xlu1 %2086  ;;  %v2085_v41 = vpop.permute.xlu0 %2084 }
 0x1f8   :  { %v2101_v45 = vsel %vm980_vm6, %v2083_v3, %v2085_v41  ;;  %v2102_v46 = vsel %vm980_vm6, %v2085_v41, %v2087_v44 }
 0x1f9   :  { %2125 = vst [vmem:[#allocation2 + $0x338] sm:$0x3] %v2101_v45  ;;  %2126 = vst [vmem:[#allocation2 + $0x340] sm:$0x3] %v2102_v46  ;;  %2798 = vrot.lane.b32.xlu1 %v2751_v61, %s8868_s22  ;;  %2796 = vrot.lane.b32.xlu0 %v9842_v47, %s8868_s22 }
 0x1fb   :  { %v2091_v20 = vpop.permute.xlu1 %2090  ;;  %v2089_v52 = vpop.permute.xlu0 %2088 }
 0x1fc   :  { %v2103_v55 = vsel %vm980_vm6, %v2087_v44, %v2089_v52  ;;  %v2104_v0 = vsel %vm980_vm6, %v2089_v52, %v2091_v20 }
 0x1fd   :  { %2127 = vst [vmem:[#allocation2 + $0x348] sm:$0x3] %v2103_v55  ;;  %2128 = vst [vmem:[#allocation2 + $0x350] sm:$0x3] %v2104_v0  ;;  %2802 = vrot.lane.b32.xlu1 %v9900_v35, %s8868_s22  ;;  %2800 = vrot.lane.b32.xlu0 %v9946_v31, %s8868_s22 }
 0x1ff   :  { %v2198_v60 = vpop.permute.xlu1 %2197  ;;  %v2093_v23 = vpop.permute.xlu0 %2092 }
 0x200   :  { %v2105_v28 = vsel %vm980_vm6, %v2091_v20, %v2093_v23 }
 0x201   :  { %2129 = vst [vmem:[#allocation2 + $0x358] sm:$0x3] %v2105_v28  ;;  %2806 = vrot.lane.b32.xlu1 %v2768_v29, %s8868_s22  ;;  %2804 = vrot.lane.b32.xlu0 %v9887_v10, %s8868_s22 }
 0x203   :  { %v2202_v27 = vpop.permute.xlu1 %2201  ;;  %v2200_v30 = vpop.permute.xlu0 %2199 }
 0x204   :  { %v2223_v38 = vsel %vm1109_vm7, %v2198_v60, %v2200_v30  ;;  %v2224_v7 = vsel %vm1109_vm7, %v2200_v30, %v2202_v27 }
 0x205   :  { %2247 = vst [vmem:[#allocation2 + $0x300] sm:$0xc] %v2223_v38  ;;  %2248 = vst [vmem:[#allocation2 + $0x308] sm:$0xc] %v2224_v7  ;;  %2810 = vrot.lane.b32.xlu1 %v9929_v1, %s8868_s22  ;;  %2808 = vrot.lane.b32.xlu0 %v9971_v32, %s8868_s22 }
 0x207   :  { %v2206_v12 = vpop.permute.xlu1 %2205  ;;  %v2204_v15 = vpop.permute.xlu0 %2203 }
 0x208   :  { %v2225_v50 = vsel %vm1109_vm7, %v2202_v27, %v2204_v15  ;;  %v2226_v37 = vsel %vm1109_vm7, %v2204_v15, %v2206_v12 }
 0x209   :  { %2249 = vst [vmem:[#allocation2 + $0x310] sm:$0xc] %v2225_v50  ;;  %2250 = vst [vmem:[#allocation2 + $0x318] sm:$0xc] %v2226_v37  ;;  %2814 = vrot.lane.b32.xlu1 %v2785_v9, %s8868_s22  ;;  %2812 = vrot.lane.b32.xlu0 %v9916_v4, %s8868_s22 }
 0x20b   :  { %v2210_v40 = vpop.permute.xlu1 %2209  ;;  %v2208_v21 = vpop.permute.xlu0 %2207 }
 0x20c   :  { %v2227_v22 = vsel %vm1109_vm7, %v2206_v12, %v2208_v21  ;;  %v2228_v3 = vsel %vm1109_vm7, %v2208_v21, %v2210_v40 }
 0x20d   :  { %2251 = vst [vmem:[#allocation2 + $0x320] sm:$0xc] %v2227_v22  ;;  %2252 = vst [vmem:[#allocation2 + $0x328] sm:$0xc] %v2228_v3  ;;  %2818 = vrot.lane.b32.xlu1 %v10112_v17, %s8868_s22  ;;  %2816 = vrot.lane.b32.xlu0 %v9995_v62, %s8868_s22 }
 0x20f   :  { %v2214_v14 = vpop.permute.xlu1 %2213  ;;  %v2212_v39 = vpop.permute.xlu0 %2211 }
 0x210   :  { %v2229_v24 = vsel %vm1109_vm7, %v2210_v40, %v2212_v39  ;;  %v2230_v61 = vsel %vm1109_vm7, %v2212_v39, %v2214_v14 }
 0x211   :  { %2253 = vst [vmem:[#allocation2 + $0x330] sm:$0xc] %v2229_v24  ;;  %2254 = vst [vmem:[#allocation2 + $0x338] sm:$0xc] %v2230_v61  ;;  %2926 = vrot.lane.b32.xlu1 %v9817_v16, %s8869_s23  ;;  %2924 = vrot.lane.b32.xlu0 %v9836_v26, %s8869_s23 }
 0x213   :  { %v2218_v44 = vpop.permute.xlu1 %2217  ;;  %v2216_v41 = vpop.permute.xlu0 %2215 }
 0x214   :  { %v2231_v45 = vsel %vm1109_vm7, %v2214_v14, %v2216_v41  ;;  %v2232_v46 = vsel %vm1109_vm7, %v2216_v41, %v2218_v44 }
 0x215   :  { %2255 = vst [vmem:[#allocation2 + $0x340] sm:$0xc] %v2231_v45  ;;  %2256 = vst [vmem:[#allocation2 + $0x348] sm:$0xc] %v2232_v46  ;;  %2930 = vrot.lane.b32.xlu1 %v9842_v47, %s8869_s23  ;;  %2928 = vrot.lane.b32.xlu0 %v9860_v57, %s8869_s23 }
 0x216   :  { %v8803_v57 = vld [vmem:[%s12353_s0 + $0x20] ss:$0 sps:$4 sm:$0x33]  }
 0x217   :  { %v2222_v20 = vpop.permute.xlu1 %2221  ;;  %v2220_v52 = vpop.permute.xlu0 %2219 }
 0x218   :  { %v2233_v55 = vsel %vm1109_vm7, %v2218_v44, %v2220_v52  ;;  %v2234_v26 = vsel %vm1109_vm7, %v2220_v52, %v2222_v20 }
 0x219   :  { %2257 = vst [vmem:[#allocation2 + $0x350] sm:$0xc] %v2233_v55  ;;  %2258 = vst [vmem:[#allocation2 + $0x358] sm:$0xc] %v2234_v26  ;;  %2934 = vrot.lane.b32.xlu1 %v9863_v49, %s8869_s23  ;;  %2932 = vrot.lane.b32.xlu0 %v9883_v59, %s8869_s23 }
 0x21b   :  { %v2411_v0 = vpop.permute.xlu1 %2410  ;;  %v2409_v29 = vpop.permute.xlu0 %2408 }
 0x21c   :  { %v2434_v60 = vsel %vm199_vm0, %v2409_v29, %v2411_v0 }
 0x21d   :  { %2458 = vst [vmem:[#allocation2 + $0x300] sm:$0xc0] %v2434_v60  ;;  %2938 = vrot.lane.b32.xlu1 %v9887_v10, %s8869_s23  ;;  %2936 = vrot.lane.b32.xlu0 %v9900_v35, %s8869_s23  ;;  %v2922_v35 = vrot.slane %v8803_v57, %v8921_v8 }
 0x21f   :  { %v2415_v23 = vpop.permute.xlu1 %2414  ;;  %v2413_v28 = vpop.permute.xlu0 %2412  ;;  %v2923_v12 = vcombine.low %v2922_v35, %v2922_v35 }
 0x220   :  { %v2435_v27 = vsel %vm199_vm0, %v2411_v0, %v2413_v28  ;;  %v2436_v59 = vsel %vm199_vm0, %v2413_v28, %v2415_v23 }
 0x221   :  { %2459 = vst [vmem:[#allocation2 + $0x308] sm:$0xc0] %v2435_v27  ;;  %2460 = vst [vmem:[#allocation2 + $0x310] sm:$0xc0] %v2436_v59  ;;  %2942 = vrot.lane.b32.xlu1 %v9903_v63, %s8869_s23  ;;  %2940 = vrot.lane.b32.xlu0 %v9912_v13, %s8869_s23 }
 0x223   :  { %v2419_v30 = vpop.permute.xlu1 %2418  ;;  %v2417_v38 = vpop.permute.xlu0 %2416 }
 0x224   :  { %v2437_v7 = vsel %vm199_vm0, %v2415_v23, %v2417_v38  ;;  %v2438_v9 = vsel %vm199_vm0, %v2417_v38, %v2419_v30 }
 0x225   :  { %2461 = vst [vmem:[#allocation2 + $0x318] sm:$0xc0] %v2437_v7  ;;  %2462 = vst [vmem:[#allocation2 + $0x320] sm:$0xc0] %v2438_v9  ;;  %2946 = vrot.lane.b32.xlu1 %v9916_v4, %s8869_s23  ;;  %2944 = vrot.lane.b32.xlu0 %v9929_v1, %s8869_s23 }
 0x227   :  { %v2423_v15 = vpop.permute.xlu1 %2422  ;;  %v2421_v50 = vpop.permute.xlu0 %2420 }
 0x228   :  { %v2439_v13 = vsel %vm199_vm0, %v2419_v30, %v2421_v50  ;;  %v2440_v37 = vsel %vm199_vm0, %v2421_v50, %v2423_v15 }
 0x229   :  { %2463 = vst [vmem:[#allocation2 + $0x328] sm:$0xc0] %v2439_v13  ;;  %2464 = vst [vmem:[#allocation2 + $0x330] sm:$0xc0] %v2440_v37  ;;  %3052 = vrot.lane.b32.xlu1 %v9842_v47, %s8870_s26  ;;  %2948 = vrot.lane.b32.xlu0 %v2923_v12, %s8869_s23 }
 0x22b   :  { %v2427_v40 = vpop.permute.xlu1 %2426  ;;  %v2425_v21 = vpop.permute.xlu0 %2424 }
 0x22c   :  { %v2441_v22 = vsel %vm199_vm0, %v2423_v15, %v2425_v21  ;;  %v2442_v1 = vsel %vm199_vm0, %v2425_v21, %v2427_v40 }
 0x22d   :  { %2465 = vst [vmem:[#allocation2 + $0x338] sm:$0xc0] %v2441_v22  ;;  %2466 = vst [vmem:[#allocation2 + $0x340] sm:$0xc0] %v2442_v1  ;;  %3056 = vrot.lane.b32.xlu1 %v9946_v31, %s8870_s26  ;;  %3054 = vrot.lane.b32.xlu0 %v9950_v36, %s8870_s26  ;;  %v8873_v22 = vmov 0.0  }
 0x22e   :  { %7342 = vmatprep.mubr.f32.mxu0 %v8873_v22  ;;  %7413 = vmatprep.mubr.f32.mxu1 %v8873_v22 }
 0x22f   :  { %v2431_v3 = vpop.permute.xlu1 %2430  ;;  %v2429_v14 = vpop.permute.xlu0 %2428 }
 0x230   :  { %v2443_v39 = vsel %vm199_vm0, %v2427_v40, %v2429_v14  ;;  %v2444_v24 = vsel %vm199_vm0, %v2429_v14, %v2431_v3 }
 0x231   :  { %2467 = vst [vmem:[#allocation2 + $0x348] sm:$0xc0] %v2443_v39  ;;  %2468 = vst [vmem:[#allocation2 + $0x350] sm:$0xc0] %v2444_v24  ;;  %3060 = vrot.lane.b32.xlu1 %v9887_v10, %s8870_s26  ;;  %3058 = vrot.lane.b32.xlu0 %v9960_v53, %s8870_s26 }
 0x233   :  { %v2537_v61 = vpop.permute.xlu1 %2536  ;;  %v2433_v44 = vpop.permute.xlu0 %2432 }
 0x234   :  { %v2445_v31 = vsel %vm199_vm0, %v2431_v3, %v2433_v44 }
 0x235   :  { %2469 = vst [vmem:[#allocation2 + $0x358] sm:$0xc0] %v2445_v31  ;;  %3064 = vrot.lane.b32.xlu1 %v9971_v32, %s8870_s26  ;;  %3062 = vrot.lane.b32.xlu0 %v9975_v25, %s8870_s26 }
 0x237   :  { %v2541_v41 = vpop.permute.xlu1 %2540  ;;  %v2539_v45 = vpop.permute.xlu0 %2538 }
 0x238   :  { %v2562_v46 = vsel %vm329_vm1, %v2537_v61, %v2539_v45  ;;  %v2563_v20 = vsel %vm329_vm1, %v2539_v45, %v2541_v41 }
 0x239   :  { %2586 = vst [vmem:[#allocation2 + $0x3c0] sm:$0x3] %v2562_v46  ;;  %2587 = vst [vmem:[#allocation2 + $0x3c8] sm:$0x3] %v2563_v20  ;;  %3068 = vrot.lane.b32.xlu1 %v9916_v4, %s8870_s26  ;;  %3066 = vrot.lane.b32.xlu0 %v9984_v33, %s8870_s26 }
 0x23b   :  { %v2545_v53 = vpop.permute.xlu1 %2544  ;;  %v2543_v52 = vpop.permute.xlu0 %2542 }
 0x23c   :  { %v2564_v32 = vsel %vm329_vm1, %v2541_v41, %v2543_v52  ;;  %v2565_v55 = vsel %vm329_vm1, %v2543_v52, %v2545_v53 }
 0x23d   :  { %2588 = vst [vmem:[#allocation2 + $0x3d0] sm:$0x3] %v2564_v32  ;;  %2589 = vst [vmem:[#allocation2 + $0x3d8] sm:$0x3] %v2565_v55  ;;  %3072 = vrot.lane.b32.xlu1 %v9995_v62, %s8870_s26  ;;  %3070 = vrot.lane.b32.xlu0 %v9999_v34, %s8870_s26 }
 0x23f   :  { %v2549_v26 = vpop.permute.xlu1 %2548  ;;  %v2547_v0 = vpop.permute.xlu0 %2546 }
 0x240   :  { %v2566_v29 = vsel %vm329_vm1, %v2545_v53, %v2547_v0  ;;  %v2567_v33 = vsel %vm329_vm1, %v2547_v0, %v2549_v26 }
 0x241   :  { %2590 = vst [vmem:[#allocation2 + $0x3e0] sm:$0x3] %v2566_v29  ;;  %2591 = vst [vmem:[#allocation2 + $0x3e8] sm:$0x3] %v2567_v33  ;;  %3076 = vrot.lane.b32.xlu1 %v10014_v6, %s8870_s26  ;;  %3074 = vrot.lane.b32.xlu0 %v10009_v19, %s8870_s26 }
 0x243   :  { %v2553_v60 = vpop.permute.xlu1 %2552  ;;  %v2551_v57 = vpop.permute.xlu0 %2550 }
 0x244   :  { %v2568_v62 = vsel %vm329_vm1, %v2549_v26, %v2551_v57  ;;  %v2569_v23 = vsel %vm329_vm1, %v2551_v57, %v2553_v60 }
 0x245   :  { %2592 = vst [vmem:[#allocation2 + $0x3f0] sm:$0x3] %v2568_v62  ;;  %2593 = vst [vmem:[#allocation2 + $0x3f8] sm:$0x3] %v2569_v23  ;;  %3183 = vrot.lane.b32.xlu1 %v10024_v11, %s8871_s27  ;;  %3181 = vrot.lane.b32.xlu0 %v9817_v16, %s8871_s27 }
 0x247   :  { %v2557_v28 = vpop.permute.xlu1 %2556  ;;  %v2555_v27 = vpop.permute.xlu0 %2554 }
 0x248   :  { %v2570_v6 = vsel %vm329_vm1, %v2553_v60, %v2555_v27  ;;  %v2571_v19 = vsel %vm329_vm1, %v2555_v27, %v2557_v28 }
 0x249   :  { %2594 = vst [vmem:[#allocation2 + $0x400] sm:$0x3] %v2570_v6  ;;  %2595 = vst [vmem:[#allocation2 + $0x408] sm:$0x3] %v2571_v19  ;;  %3187 = vrot.lane.b32.xlu1 %v9950_v36, %s8871_s27  ;;  %3185 = vrot.lane.b32.xlu0 %v9842_v47, %s8871_s27 }
 0x24b   :  { %v2561_v59 = vpop.permute.xlu1 %2560  ;;  %v2559_v35 = vpop.permute.xlu0 %2558 }
 0x24c   :  { %v2572_v11 = vsel %vm329_vm1, %v2557_v28, %v2559_v35  ;;  %v2573_v16 = vsel %vm329_vm1, %v2559_v35, %v2561_v59 }
 0x24d   :  { %2596 = vst [vmem:[#allocation2 + $0x410] sm:$0x3] %v2572_v11  ;;  %2597 = vst [vmem:[#allocation2 + $0x418] sm:$0x3] %v2573_v16  ;;  %3191 = vrot.lane.b32.xlu1 %v10040_v5, %s8871_s27  ;;  %3189 = vrot.lane.b32.xlu0 %v9863_v49, %s8871_s27  ;;  %v3397_v11 = vld [vmem:[%s12354_s3 + $0x8] sm:$0xf] }
 0x24e   :  { %v8804_v49 = vld [vmem:[%s12353_s0 + $0x20] ss:$0 sps:$4 sm:$0x33]  }
 0x24f   :  { %v2668_v30 = vpop.permute.xlu1 %2667  ;;  %v2666_v38 = vpop.permute.xlu0 %2665 }
 0x250   :  { %v2691_v36 = vsel %vm460_vm2, %v2666_v38, %v2668_v30 }
 0x251   :  { %2715 = vst [vmem:[#allocation2 + $0x3c0] sm:$0xc] %v2691_v36  ;;  %3195 = vrot.lane.b32.xlu1 %v9975_v25, %s8871_s27  ;;  %3193 = vrot.lane.b32.xlu0 %v9887_v10, %s8871_s27 }
 0x253   :  { %v2672_v47 = vpop.permute.xlu1 %2671  ;;  %v2670_v7 = vpop.permute.xlu0 %2669 }
 0x254   :  { %v2692_v9 = vsel %vm460_vm2, %v2668_v30, %v2670_v7  ;;  %v2693_v5 = vsel %vm460_vm2, %v2670_v7, %v2672_v47 }
 0x255   :  { %2716 = vst [vmem:[#allocation2 + $0x3c8] sm:$0xc] %v2692_v9  ;;  %2717 = vst [vmem:[#allocation2 + $0x3d0] sm:$0xc] %v2693_v5  ;;  %3199 = vrot.lane.b32.xlu1 %v10055_v56, %s8871_s27  ;;  %3197 = vrot.lane.b32.xlu0 %v9903_v63, %s8871_s27  ;;  %v3180_v63 = vrot.slane %v8804_v49, %v8921_v8  ;;  %v8811_v5 = vld [vmem:[%s12354_s3 + $0x8] ss:$0 sps:$4 sm:$0xff]  }
 0x257   :  { %v2676_v25 = vpop.permute.xlu1 %2675  ;;  %v2674_v10 = vpop.permute.xlu0 %2673 }
 0x258   :  { %v2694_v12 = vsel %vm460_vm2, %v2672_v47, %v2674_v10  ;;  %v2695_v15 = vsel %vm460_vm2, %v2674_v10, %v2676_v25 }
 0x259   :  { %2718 = vst [vmem:[#allocation2 + $0x3d8] sm:$0xc] %v2694_v12  ;;  %2719 = vst [vmem:[#allocation2 + $0x3e0] sm:$0xc] %v2695_v15  ;;  %3203 = vrot.lane.b32.xlu1 %v9999_v34, %s8871_s27  ;;  %3201 = vrot.lane.b32.xlu0 %v9916_v4, %s8871_s27  ;;  %v3432_v15 = vld [vmem:[%s12354_s3 + $0x8] sm:$0xf] }
 0x25b   :  { %v2680_v56 = vpop.permute.xlu1 %2679  ;;  %v2678_v50 = vpop.permute.xlu0 %2677 }
 0x25c   :  { %v2696_v13 = vsel %vm460_vm2, %v2676_v25, %v2678_v50  ;;  %v2697_v37 = vsel %vm460_vm2, %v2678_v50, %v2680_v56 }
 0x25d   :  { %2720 = vst [vmem:[#allocation2 + $0x3e8] sm:$0xc] %v2696_v13  ;;  %2721 = vst [vmem:[#allocation2 + $0x3f0] sm:$0xc] %v2697_v37  ;;  %3310 = vrot.lane.b32.xlu1 %v9797_v18, %s8872_s8  ;;  %3205 = vrot.lane.b32.xlu0 %v3180_v63, %s8871_s27  ;;  %v3245_v18 = vld [vmem:[%s12353_s0 + $0x18] sm:$0xff] }
 0x25f   :  { %v2684_v40 = vpop.permute.xlu1 %2683  ;;  %v2682_v34 = vpop.permute.xlu0 %2681 }
 0x260   :  { %v2698_v21 = vsel %vm460_vm2, %v2680_v56, %v2682_v34  ;;  %v2699_v4 = vsel %vm460_vm2, %v2682_v34, %v2684_v40 }
 0x261   :  { %2722 = vst [vmem:[#allocation2 + $0x3f8] sm:$0xc] %v2698_v21  ;;  %2723 = vst [vmem:[#allocation2 + $0x400] sm:$0xc] %v2699_v4  ;;  %3314 = vrot.lane.b32.xlu1 %v9812_v2, %s8872_s8  ;;  %3312 = vrot.lane.b32.xlu0 %v9078_v48, %s8872_s8  ;;  %v3292_v48 = vrot.slane %v3245_v18, %v8921_v8  ;;  %v3285_v2 = vcombine.high %v3245_v18, %v3245_v18  ;;  %v7103_v18 = vld [vmem:[#allocation2 + $0x308] sm:$0xff] }
 0x263   :  { %v2688_v1 = vpop.permute.xlu1 %2687  ;;  %v2686_v3 = vpop.permute.xlu0 %2685  ;;  %v3300_v31 = vcombine.low %v3292_v48, %v3292_v48 }
 0x264   :  { %v2700_v14 = vsel %vm460_vm2, %v2684_v40, %v2686_v3  ;;  %v2701_v39 = vsel %vm460_vm2, %v2686_v3, %v2688_v1 }
 0x265   :  { %2724 = vst [vmem:[#allocation2 + $0x408] sm:$0xc] %v2700_v14  ;;  %2725 = vst [vmem:[#allocation2 + $0x410] sm:$0xc] %v2701_v39  ;;  %3318 = vrot.lane.b32.xlu1 %v9830_v43, %s8872_s8  ;;  %3316 = vrot.lane.b32.xlu0 %v9087_v51, %s8872_s8  ;;  %v3299_v43 = vrot.slane %v3285_v2, %v8921_v8  ;;  %v7102_v14 = vld [vmem:[#allocation2 + $0x300] sm:$0xff] }
 0x266   :  { %v8812_v39 = vld [vmem:[%s12354_s3 + $0x8] ss:$0 sps:$4 sm:$0xff]  }
 0x267   :  { %v2795_v24 = vpop.permute.xlu1 %2794  ;;  %v2690_v61 = vpop.permute.xlu0 %2689 }
 0x268   :  { %v2702_v44 = vsel %vm460_vm2, %v2688_v1, %v2690_v61 }
 0x269   :  { %2726 = vst [vmem:[#allocation2 + $0x418] sm:$0xc] %v2702_v44  ;;  %3322 = vrot.lane.b32.xlu1 %v9850_v42, %s8872_s8  ;;  %3320 = vrot.lane.b32.xlu0 %v9101_v54, %s8872_s8  ;;  %v3301_v42 = vcombine.low %v3299_v43, %v3299_v43  ;;  %v3372_v54 = vld [vmem:[%s12354_s3] sm:$0xff] }
 0x26a   :  { %3376 = vst [vmem:[#allocation3] sm:$0xf] %v3372_v54  ;;  %v3374_v55 = vcombine.high %v3372_v54, %v3372_v54 }
 0x26b   :  { %v2799_v41 = vpop.permute.xlu1 %2798  ;;  %v2797_v45 = vpop.permute.xlu0 %2796 }
 0x26c   :  { %v2820_v51 = vsel %vm589_vm3, %v2795_v24, %v2797_v45  ;;  %v2821_v46 = vsel %vm589_vm3, %v2797_v45, %v2799_v41  ;;  %3377 = vst [vmem:[#allocation3 + $0x8] sm:$0xf] %v3374_v55 }
 0x26d   :  { %2844 = vst [vmem:[#allocation2 + $0x3c0] sm:$0x30] %v2820_v51  ;;  %2845 = vst [vmem:[#allocation2 + $0x3c8] sm:$0x30] %v2821_v46  ;;  %3326 = vrot.lane.b32.xlu1 %v3300_v31, %s8872_s8  ;;  %3324 = vrot.lane.b32.xlu0 %v9115_v58, %s8872_s8  ;;  %v10282_v58 = vld [vmem:[%s12354_s3] sm:$0xff]  ;;  %v7104_v51 = vld [vmem:[#allocation2 + $0x310] sm:$0xff] }
 0x26e   :  { %v10291_v60 = vcombine.low %v10282_v58, %v10282_v58  ;;  %v10306_v35 = vcombine.high %v10282_v58, %v10282_v58 }
 0x26f   :  { %v2803_v20 = vpop.permute.xlu1 %2802  ;;  %v2801_v53 = vpop.permute.xlu0 %2800 }
 0x270   :  { %v2822_v52 = vsel %vm589_vm3, %v2799_v41, %v2801_v53  ;;  %v2823_v32 = vsel %vm589_vm3, %v2801_v53, %v2803_v20 }
 0x271   :  { %2846 = vst [vmem:[#allocation2 + $0x3d0] sm:$0x30] %v2822_v52  ;;  %2847 = vst [vmem:[#allocation2 + $0x3d8] sm:$0x30] %v2823_v32  ;;  %3330 = vrot.lane.b32.xlu1 %v3301_v42, %s8872_s8  ;;  %3328 = vrot.lane.b32.xlu0 %v3292_v48, %s8872_s8  ;;  %v3467_v42 = vld [vmem:[%s12354_s3 + $0x8] sm:$0xf] }
 0x272   :  { %v10365_v32 = vld [vmem:[%s12353_s0 + $0x22] sm:$0xff] }
 0x273   :  { %v2807_v26 = vpop.permute.xlu1 %2806  ;;  %v2805_v0 = vpop.permute.xlu0 %2804 }
 0x274   :  { %v2824_v29 = vsel %vm589_vm3, %v2803_v20, %v2805_v0  ;;  %v2825_v33 = vsel %vm589_vm3, %v2805_v0, %v2807_v26 }
 0x275   :  { %2848 = vst [vmem:[#allocation2 + $0x3e0] sm:$0x30] %v2824_v29  ;;  %2849 = vst [vmem:[#allocation2 + $0x3e8] sm:$0x30] %v2825_v33  ;;  %3334 = vrot.lane.b32.xlu1 %v10112_v17, %s8872_s8  ;;  %3332 = vrot.lane.b32.xlu0 %v3299_v43, %s8872_s8  ;;  %v8810_v17 = vld [vmem:[%s12354_s3 + $0x8] ss:$0 sps:$4 sm:$0xff]   ;;  %v3608_v33 = vcombine.low %v10365_v32, %v10365_v32 }
 0x276   :  { %v7105_v43 = vld [vmem:[#allocation2 + $0x318] sm:$0xff]  ;;  %v8813_v29 = vld [vmem:[%s12354_s3 + $0x8] ss:$0 sps:$4 sm:$0xff]  }
 0x277   :  { %v2811_v57 = vpop.permute.xlu1 %2810  ;;  %v2809_v62 = vpop.permute.xlu0 %2808 }
 0x278   :  { %v2826_v23 = vsel %vm589_vm3, %v2807_v26, %v2809_v62  ;;  %v2827_v28 = vsel %vm589_vm3, %v2809_v62, %v2811_v57 }
 0x279   :  { %2850 = vst [vmem:[#allocation2 + $0x3f0] sm:$0x30] %v2826_v23  ;;  %2851 = vst [vmem:[#allocation2 + $0x3f8] sm:$0x30] %v2827_v28  ;;  %3386 = vrot.lane.b32.xlu1 %v10282_v58, %s8865_s30  ;;  %3384 = vrot.lane.b32.xlu0 %v10291_v60, %s8865_s30 }
 0x27b   :  { %v2815_v27 = vpop.permute.xlu1 %2814  ;;  %v2813_v6 = vpop.permute.xlu0 %2812 }
 0x27c   :  { %v2828_v19 = vsel %vm589_vm3, %v2811_v57, %v2813_v6  ;;  %v2829_v59 = vsel %vm589_vm3, %v2813_v6, %v2815_v27 }
 0x27d   :  { %2852 = vst [vmem:[#allocation2 + $0x400] sm:$0x30] %v2828_v19  ;;  %2853 = vst [vmem:[#allocation2 + $0x408] sm:$0x30] %v2829_v59  ;;  %3401 = vrot.lane.b32.xlu1 %v10282_v58, %s8866_s10  ;;  %3388 = vrot.lane.b32.xlu0 %v8810_v17, %s8865_s30  ;;  %v3502_v17 = vld [vmem:[%s12354_s3 + $0x8] sm:$0xf] }
 0x27f   :  { %v2819_v16 = vpop.permute.xlu1 %2818  ;;  %v2817_v30 = vpop.permute.xlu0 %2816 }
 0x280   :  { %v2830_v38 = vsel %vm589_vm3, %v2815_v27, %v2817_v30  ;;  %v2831_v36 = vsel %vm589_vm3, %v2817_v30, %v2819_v16  ;;  %v10391_v27 = vld [vmem:[%s12353_s0 + $0x2a] sm:$0xff]  ;;  %v10404_v16 = vrot.slane %v10365_v32, %v8921_v8 }
 0x281   :  { %2854 = vst [vmem:[#allocation2 + $0x410] sm:$0x30] %v2830_v38  ;;  %2855 = vst [vmem:[#allocation2 + $0x418] sm:$0x30] %v2831_v36  ;;  %3405 = vrot.lane.b32.xlu1 %v3397_v11, %s8866_s10  ;;  %3403 = vrot.lane.b32.xlu0 %v10306_v35, %s8866_s10  ;;  %v3625_v30 = vcombine.low %v10391_v27, %v10391_v27 }
 0x283   :  { %v2927_v47 = vpop.permute.xlu1 %2926  ;;  %v2925_v7 = vpop.permute.xlu0 %2924 }
 0x284   :  { %v2950_v9 = vsel %vm719_vm4, %v2925_v7, %v2927_v47 }
 0x285   :  { %2974 = vst [vmem:[#allocation2 + $0x3c0] sm:$0xc0] %v2950_v9  ;;  %3421 = vrot.lane.b32.xlu1 %v10282_v58, %s8867_s17  ;;  %3419 = vrot.lane.b32.xlu0 %v10291_v60, %s8867_s17  ;;  %v10422_v9 = vcombine.high %v10404_v16, %v10404_v16 }
 0x287   :  { %v2931_v49 = vpop.permute.xlu1 %2930  ;;  %v2929_v25 = vpop.permute.xlu0 %2928 }
 0x288   :  { %v2951_v10 = vsel %vm719_vm4, %v2927_v47, %v2929_v25  ;;  %v2952_v12 = vsel %vm719_vm4, %v2929_v25, %v2931_v49  ;;  %v10411_v47 = vld [vmem:[%s12353_s0 + $0x22] sm:$0xff] }
 0x289   :  { %2975 = vst [vmem:[#allocation2 + $0x3c8] sm:$0xc0] %v2951_v10  ;;  %2976 = vst [vmem:[#allocation2 + $0x3d0] sm:$0xc0] %v2952_v12  ;;  %3436 = vrot.lane.b32.xlu1 %v10282_v58, %s8868_s22  ;;  %3423 = vrot.lane.b32.xlu0 %v8811_v5, %s8867_s17  ;;  %v10425_v5 = vrot.slane %v3625_v30, %v8921_v8  ;;  %v10434_v25 = vcombine.high %v10411_v47, %v10411_v47 }
 0x28a   :  { %8394 = vst.sshfl [vmem:[#allocation2 + $0x60] sm:$0x3 pattern:$0x76325410] %v10411_v47 }
 0x28b   :  { %v2935_v63 = vpop.permute.xlu1 %2934  ;;  %v2933_v56 = vpop.permute.xlu0 %2932  ;;  %8395 = vst.sshfl [vmem:[#allocation2 + $0x70] sm:$0x3 pattern:$0x76325410] %v10434_v25 }
 0x28c   :  { %v2953_v50 = vsel %vm719_vm4, %v2931_v49, %v2933_v56  ;;  %v2954_v13 = vsel %vm719_vm4, %v2933_v56, %v2935_v63  ;;  %v7126_v34 = vld [vmem:[#allocation2 + $0x3c0] sm:$0xff]  ;;  %v10430_v49 = vld [vmem:[%s12353_s0 + $0x32] sm:$0xff]  ;;  %v10445_v56 = vcombine.high %v10425_v5, %v10425_v5 }
 0x28d   :  { %2977 = vst [vmem:[#allocation2 + $0x3d8] sm:$0xc0] %v2953_v50  ;;  %2978 = vst [vmem:[#allocation2 + $0x3e0] sm:$0xc0] %v2954_v13  ;;  %3440 = vrot.lane.b32.xlu1 %v3432_v15, %s8868_s22  ;;  %3438 = vrot.lane.b32.xlu0 %v10306_v35, %s8868_s22  ;;  %v8609_v48 = vpack.c.bf16 %v7126_v34, %v7102_v14  ;;  %v10449_v50 = vrot.slane %v10391_v27, %v8921_v8 }
 0x28e   :  { %v3642_v13 = vcombine.low %v10430_v49, %v10430_v49  ;;  %v3771_v30 = vcombine.high %v10430_v49, %v10430_v49 }
 0x28f   :  { %v2939_v37 = vpop.permute.xlu1 %2938  ;;  %v2937_v40 = vpop.permute.xlu0 %2936 }
 0x290   :  { %v2955_v21 = vsel %vm719_vm4, %v2935_v63, %v2937_v40  ;;  %v2956_v4 = vsel %vm719_vm4, %v2937_v40, %v2939_v37  ;;  %v7127_v1 = vld [vmem:[#allocation2 + $0x3c8] sm:$0xff]  ;;  %v7128_v61 = vld [vmem:[#allocation2 + $0x3d0] sm:$0xff] }
 0x291   :  { %2979 = vst [vmem:[#allocation2 + $0x3e8] sm:$0xc0] %v2955_v21  ;;  %2980 = vst [vmem:[#allocation2 + $0x3f0] sm:$0xc0] %v2956_v4  ;;  %3456 = vrot.lane.b32.xlu1 %v10282_v58, %s8869_s23  ;;  %3454 = vrot.lane.b32.xlu0 %v10291_v60, %s8869_s23  ;;  %v8607_v3 = vpack.c.bf16 %v7127_v1, %v7103_v18  ;;  %v8621_v46 = vpack.c.bf16 %v7128_v61, %v7104_v51 }
 0x292   :  { %v10461_v4 = vcombine.high %v10449_v50, %v10449_v50  ;;  %v10464_v18 = vrot.slane %v3642_v13, %v8921_v8 }
 0x293   :  { %v2943_v2 = vpop.permute.xlu1 %2942  ;;  %v2941_v24 = vpop.permute.xlu0 %2940  ;;  %8608 = vmatprep.subr.bf16.mxu0 %v8607_v3 }
 0x294   :  { %v2957_v44 = vsel %vm719_vm4, %v2939_v37, %v2941_v24  ;;  %v2958_v31 = vsel %vm719_vm4, %v2941_v24, %v2943_v2  ;;  %8610 = vmatpush1.bf16.msra.mxu0 %v8609_v48  ;;  %v7129_v41 = vld [vmem:[#allocation2 + $0x3d8] sm:$0xff]  ;;  %v10474_v48 = vcombine.high %v10464_v18, %v10464_v18 }
 0x295   :  { %2981 = vst [vmem:[#allocation2 + $0x3f8] sm:$0xc0] %v2957_v44  ;;  %2982 = vst [vmem:[#allocation2 + $0x400] sm:$0xc0] %v2958_v31  ;;  %3471 = vrot.lane.b32.xlu1 %v10282_v58, %s8870_s26  ;;  %3458 = vrot.lane.b32.xlu0 %v8812_v39, %s8869_s23  ;;  %v8619_v45 = vpack.c.bf16 %v7129_v41, %v7105_v43  ;;  %v3737_v41 = vcombine.high %v10365_v32, %v10365_v32 }
 0x296   :  { %v8817_v43 = vld [vmem:[%s12353_s0 + $0x3a] ss:$0 sps:$4 sm:$0x33]  }
 0x297   :  { %v2947_v20 = vpop.permute.xlu1 %2946  ;;  %v2945_v53 = vpop.permute.xlu0 %2944  ;;  %8620 = vmatprep.subr.bf16.mxu1 %v8619_v45 }
 0x298   :  { %v2959_v54 = vsel %vm719_vm4, %v2943_v2, %v2945_v53  ;;  %v2960_v52 = vsel %vm719_vm4, %v2945_v53, %v2947_v20  ;;  %8622 = vmatpush1.bf16.msra.mxu1 %v8621_v46  ;;  %v10478_v2 = vrot.slane %v10430_v49, %v8921_v8  ;;  %v3666_v53 = vrot.slane %v8817_v43, %v8921_v8 }
 0x299   :  { %2983 = vst [vmem:[#allocation2 + $0x408] sm:$0xc0] %v2959_v54  ;;  %2984 = vst [vmem:[#allocation2 + $0x410] sm:$0xc0] %v2960_v52  ;;  %3475 = vrot.lane.b32.xlu1 %v3467_v42, %s8870_s26  ;;  %3473 = vrot.lane.b32.xlu0 %v10306_v35, %s8870_s26  ;;  %v10506_v54 = vrot.slane %v3737_v41, %v8921_v8  ;;  %v10584_v41 = vrot.slane %v10434_v25, %v8921_v8 }
 0x29a   :  { %v10487_v31 = vcombine.high %v10478_v2, %v10478_v2 }
 0x29b   :  { %v3053_v55 = vpop.permute.xlu1 %3052  ;;  %v2949_v26 = vpop.permute.xlu0 %2948 }
 0x29c   :  { %v2961_v0 = vsel %vm719_vm4, %v2947_v20, %v2949_v26  ;;  %v10502_v20 = vcombine.low %v10404_v16, %v10404_v16 }
 0x29d   :  { %2985 = vst [vmem:[#allocation2 + $0x418] sm:$0xc0] %v2961_v0  ;;  %3491 = vrot.lane.b32.xlu1 %v10282_v58, %s8871_s27  ;;  %3489 = vrot.lane.b32.xlu0 %v10291_v60, %s8871_s27  ;;  %v10383_v60 = vrot.slane %v3608_v33, %v8921_v8  ;;  %v3753_v0 = vcombine.low %v10506_v54, %v10506_v54 }
 0x29f   :  { %v3057_v57 = vpop.permute.xlu1 %3056  ;;  %v3055_v62 = vpop.permute.xlu0 %3054  ;;  %v10400_v11 = vcombine.high %v10383_v60, %v10383_v60 }
 0x2a0   :  { %v3078_v23 = vsel %vm849_vm5, %v3053_v55, %v3055_v62  ;;  %v3079_v28 = vsel %vm849_vm5, %v3055_v62, %v3057_v57 }
 0x2a1   :  { %3102 = vst [vmem:[#allocation2 + $0x480] sm:$0x3] %v3078_v23  ;;  %3103 = vst [vmem:[#allocation2 + $0x488] sm:$0x3] %v3079_v28  ;;  %3506 = vrot.lane.b32.xlu1 %v10282_v58, %s8872_s8  ;;  %3493 = vrot.lane.b32.xlu0 %v8813_v29, %s8871_s27  ;;  %v3754_v29 = vcombine.high %v10391_v27, %v10391_v27  ;;  %v10524_v28 = vcombine.low %v10449_v50, %v10449_v50 }
 0x2a3   :  { %v3061_v6 = vpop.permute.xlu1 %3060  ;;  %v3059_v19 = vpop.permute.xlu0 %3058 }
 0x2a4   :  { %v3080_v59 = vsel %vm849_vm5, %v3057_v57, %v3059_v19  ;;  %v3081_v58 = vsel %vm849_vm5, %v3059_v19, %v3061_v6 }
 0x2a5   :  { %3104 = vst [vmem:[#allocation2 + $0x490] sm:$0x3] %v3080_v59  ;;  %3105 = vst [vmem:[#allocation2 + $0x498] sm:$0x3] %v3081_v58  ;;  %3510 = vrot.lane.b32.xlu1 %v3502_v17, %s8872_s8  ;;  %3508 = vrot.lane.b32.xlu0 %v10306_v35, %s8872_s8  ;;  %v10527_v17 = vrot.slane %v3754_v29, %v8921_v8 }
 0x2a7   :  { %v3065_v38 = vpop.permute.xlu1 %3064  ;;  %v3063_v36 = vpop.permute.xlu0 %3062  ;;  %v3770_v58 = vcombine.low %v10527_v17, %v10527_v17 }
 0x2a8   :  { %v3082_v35 = vsel %vm849_vm5, %v3061_v6, %v3063_v36  ;;  %v3083_v7 = vsel %vm849_vm5, %v3063_v36, %v3065_v38 }
 0x2a9   :  { %3106 = vst [vmem:[#allocation2 + $0x4a0] sm:$0x3] %v3082_v35  ;;  %3107 = vst [vmem:[#allocation2 + $0x4a8] sm:$0x3] %v3083_v7  ;;  %3669 = vrot.lane.b32.xlu1 %v10400_v11, %s8865_s30  ;;  %3667 = vrot.lane.b32.xlu0 %v10383_v60, %s8865_s30 }
 0x2ab   :  { %v3069_v10 = vpop.permute.xlu1 %3068  ;;  %v3067_v12 = vpop.permute.xlu0 %3066 }
 0x2ac   :  { %v3084_v15 = vsel %vm849_vm5, %v3065_v38, %v3067_v12  ;;  %v3085_v63 = vsel %vm849_vm5, %v3067_v12, %v3069_v10  ;;  %v10549_v12 = vrot.slane %v3771_v30, %v8921_v8 }
 0x2ad   :  { %3108 = vst [vmem:[#allocation2 + $0x4b0] sm:$0x3] %v3084_v15  ;;  %3109 = vst [vmem:[#allocation2 + $0x4b8] sm:$0x3] %v3085_v63  ;;  %3673 = vrot.lane.b32.xlu1 %v10422_v9, %s8865_s30  ;;  %3671 = vrot.lane.b32.xlu0 %v10404_v16, %s8865_s30 }
 0x2ae   :  { %v3787_v13 = vcombine.low %v10549_v12, %v10549_v12 }
 0x2af   :  { %v3073_v37 = vpop.permute.xlu1 %3072  ;;  %v3071_v40 = vpop.permute.xlu0 %3070 }
 0x2b0   :  { %v3086_v34 = vsel %vm849_vm5, %v3069_v10, %v3071_v40  ;;  %v3087_v21 = vsel %vm849_vm5, %v3071_v40, %v3073_v37  ;;  %v10546_v10 = vcombine.low %v10478_v2, %v10478_v2 }
 0x2b1   :  { %3110 = vst [vmem:[#allocation2 + $0x4c0] sm:$0x3] %v3086_v34  ;;  %3111 = vst [vmem:[#allocation2 + $0x4c8] sm:$0x3] %v3087_v21  ;;  %3677 = vrot.lane.b32.xlu1 %v10445_v56, %s8865_s30  ;;  %3675 = vrot.lane.b32.xlu0 %v10425_v5, %s8865_s30 }
 0x2b3   :  { %v3077_v1 = vpop.permute.xlu1 %3076  ;;  %v3075_v3 = vpop.permute.xlu0 %3074 }
 0x2b4   :  { %v3088_v14 = vsel %vm849_vm5, %v3073_v37, %v3075_v3  ;;  %v3089_v39 = vsel %vm849_vm5, %v3075_v3, %v3077_v1  ;;  %v10561_v37 = vld.sshfl [vmem:[%s12353_s0 + $0x3a] sm:$0x3 pattern:$0x76325410]  ;;  %v10567_v3 = vrot.slane %v10411_v47, %v8921_v8 }
 0x2b5   :  { %3112 = vst [vmem:[#allocation2 + $0x4d0] sm:$0x3] %v3088_v14  ;;  %3113 = vst [vmem:[#allocation2 + $0x4d8] sm:$0x3] %v3089_v39  ;;  %3681 = vrot.lane.b32.xlu1 %v10461_v4, %s8865_s30  ;;  %3679 = vrot.lane.b32.xlu0 %v10449_v50, %s8865_s30  ;;  %v10574_v14 = vcombine.low %v10561_v37, %v10561_v37 }
 0x2b6   :  { %v10578_v39 = vcombine.high %v10567_v3, %v10567_v3 }
 0x2b7   :  { %v3184_v24 = vpop.permute.xlu1 %3183  ;;  %v3182_v61 = vpop.permute.xlu0 %3181 }
 0x2b8   :  { %v3207_v44 = vsel %vm980_vm6, %v3182_v61, %v3184_v24  ;;  %3589 = vst [vmem:[#allocation2 + $0x68] sm:$0x3] %v10578_v39 }
 0x2b9   :  { %3231 = vst [vmem:[#allocation2 + $0x480] sm:$0xc] %v3207_v44  ;;  %3685 = vrot.lane.b32.xlu1 %v10474_v48, %s8865_s30  ;;  %3683 = vrot.lane.b32.xlu0 %v10464_v18, %s8865_s30 }
 0x2bb   :  { %v3188_v45 = vpop.permute.xlu1 %3187  ;;  %v3186_v51 = vpop.permute.xlu0 %3185 }
 0x2bc   :  { %v3208_v46 = vsel %vm980_vm6, %v3184_v24, %v3186_v51  ;;  %v3209_v42 = vsel %vm980_vm6, %v3186_v51, %v3188_v45  ;;  %v10595_v51 = vcombine.high %v10584_v41, %v10584_v41 }
 0x2bd   :  { %3232 = vst [vmem:[#allocation2 + $0x488] sm:$0xc] %v3208_v46  ;;  %3233 = vst [vmem:[#allocation2 + $0x490] sm:$0xc] %v3209_v42  ;;  %3689 = vrot.lane.b32.xlu1 %v10487_v31, %s8865_s30  ;;  %3687 = vrot.lane.b32.xlu0 %v10478_v2, %s8865_s30  ;;  %v7035_v42 = vld [vmem:[#allocation2 + $0xe8] sm:$0xff] }
 0x2be   :  { %3591 = vst [vmem:[#allocation2 + $0x78] sm:$0x3] %v10595_v51 }
 0x2bf   :  { %v3192_v52 = vpop.permute.xlu1 %3191  ;;  %v3190_v32 = vpop.permute.xlu0 %3189 }
 0x2c0   :  { %v3210_v55 = vsel %vm980_vm6, %v3188_v45, %v3190_v32  ;;  %v3211_v26 = vsel %vm980_vm6, %v3190_v32, %v3192_v52  ;;  %v3881_v45 = vcombine.low %v10383_v60, %v10383_v60 }
 0x2c1   :  { %3234 = vst [vmem:[#allocation2 + $0x498] sm:$0xc] %v3210_v55  ;;  %3235 = vst [vmem:[#allocation2 + $0x4a0] sm:$0xc] %v3211_v26  ;;  %3796 = vrot.lane.b32.xlu1 %v10502_v20, %s8866_s10  ;;  %3691 = vrot.lane.b32.xlu0 %v3666_v53, %s8865_s30  ;;  %v8392_v53 = vld [vmem:[%s12353_s0 + $0x2a] sm:$0xff] }
 0x2c2   :  { %8396 = vst.sshfl [vmem:[#allocation2 + $0x80] sm:$0x3 pattern:$0x76325410] %v8392_v53  ;;  %v3549_v29 = vrot.slane %v8392_v53, %v8921_v8 }
 0x2c3   :  { %v3196_v33 = vpop.permute.xlu1 %3195  ;;  %v3194_v57 = vpop.permute.xlu0 %3193 }
 0x2c4   :  { %v3212_v62 = vsel %vm980_vm6, %v3192_v52, %v3194_v57  ;;  %v3213_v23 = vsel %vm980_vm6, %v3194_v57, %v3196_v33  ;;  %v10610_v57 = vld [vmem:[%s12355_s1] sm:$0xff] }
 0x2c5   :  { %3236 = vst [vmem:[#allocation2 + $0x4a8] sm:$0xc] %v3212_v62  ;;  %3237 = vst [vmem:[#allocation2 + $0x4b0] sm:$0xc] %v3213_v23  ;;  %3800 = vrot.lane.b32.xlu1 %v3753_v0, %s8866_s10  ;;  %3798 = vrot.lane.b32.xlu0 %v10404_v16, %s8866_s10  ;;  %v7034_v0 = vld [vmem:[#allocation2 + $0xe0] sm:$0xff] }
 0x2c6   :  { %v7010_v23 = vld [vmem:[#allocation2 + $0x20] sm:$0xff] }
 0x2c7   :  { %v3200_v27 = vpop.permute.xlu1 %3199  ;;  %v3198_v6 = vpop.permute.xlu0 %3197  ;;  %v8625_v30 = vpack.c.bf16 %v7034_v0, %v7010_v23  ;;  %v7107_v0 = vld [vmem:[#allocation2 + $0x328] sm:$0xff] }
 0x2c8   :  { %v3214_v19 = vsel %vm980_vm6, %v3196_v33, %v3198_v6  ;;  %v3215_v59 = vsel %vm980_vm6, %v3198_v6, %v3200_v27  ;;  %v7011_v33 = vld [vmem:[#allocation2 + $0x28] sm:$0xff]  ;;  %v3542_v6 = vcombine.high %v8392_v53, %v8392_v53 }
 0x2c9   :  { %3238 = vst [vmem:[#allocation2 + $0x4b8] sm:$0xc] %v3214_v19  ;;  %3239 = vst [vmem:[#allocation2 + $0x4c0] sm:$0xc] %v3215_v59  ;;  %3804 = vrot.lane.b32.xlu1 %v10524_v28, %s8866_s10  ;;  %3802 = vrot.lane.b32.xlu0 %v10506_v54, %s8866_s10  ;;  %v8623_v62 = vpack.c.bf16 %v7035_v42, %v7011_v33  ;;  %v3557_v19 = vcombine.high %v3549_v29, %v3549_v29  ;;  %v7130_v29 = vld [vmem:[#allocation2 + $0x3e0] sm:$0xff]  ;;  %v7084_v33 = vld [vmem:[#allocation2 + $0x270] sm:$0xff] }
 0x2ca   :  { %8397 = vst.sshfl [vmem:[#allocation2 + $0x90] sm:$0x3 pattern:$0x76325410] %v3542_v6 }
 0x2cb   :  { %v3204_v38 = vpop.permute.xlu1 %3203  ;;  %v3202_v36 = vpop.permute.xlu0 %3201  ;;  %3593 = vst [vmem:[#allocation2 + $0x88] sm:$0x3] %v3557_v19  ;;  %v7060_v19 = vld [vmem:[#allocation2 + $0x1b0] sm:$0xff] }
 0x2cc   :  { %v3216_v35 = vsel %vm980_vm6, %v3200_v27, %v3202_v36  ;;  %v3217_v7 = vsel %vm980_vm6, %v3202_v36, %v3204_v38  ;;  %v7083_v27 = vld [vmem:[#allocation2 + $0x268] sm:$0xff]  ;;  %v7037_v36 = vld [vmem:[#allocation2 + $0xf8] sm:$0xff] }
 0x2cd   :  { %3240 = vst [vmem:[#allocation2 + $0x4c8] sm:$0xc] %v3216_v35  ;;  %3241 = vst [vmem:[#allocation2 + $0x4d0] sm:$0xc] %v3217_v7  ;;  %3808 = vrot.lane.b32.xlu1 %v3770_v58, %s8866_s10  ;;  %3806 = vrot.lane.b32.xlu0 %v10449_v50, %s8866_s10  ;;  %v7036_v35 = vld [vmem:[#allocation2 + $0xf0] sm:$0xff] }
 0x2cf   :  { %v3311_v49 = vpop.permute.xlu1 %3310  ;;  %v3206_v15 = vpop.permute.xlu0 %3205 }
 0x2d0   :  { %v3218_v63 = vsel %vm980_vm6, %v3204_v38, %v3206_v15  ;;  %v7059_v38 = vld [vmem:[#allocation2 + $0x1a8] sm:$0xff] }
 0x2d1   :  { %3242 = vst [vmem:[#allocation2 + $0x4d8] sm:$0xc] %v3218_v63  ;;  %3812 = vrot.lane.b32.xlu1 %v10546_v10, %s8866_s10  ;;  %3810 = vrot.lane.b32.xlu0 %v10527_v17, %s8866_s10 }
 0x2d3   :  { %v3315_v40 = vpop.permute.xlu1 %3314  ;;  %v3313_v34 = vpop.permute.xlu0 %3312 }
 0x2d4   :  { %v3336_v21 = vsel %vm1109_vm7, %v3311_v49, %v3313_v34  ;;  %v3337_v1 = vsel %vm1109_vm7, %v3313_v34, %v3315_v40  ;;  %v8627_v34 = vpack.c.bf16 %v7083_v27, %v7059_v38 }
 0x2d5   :  { %3360 = vst [vmem:[#allocation2 + $0x480] sm:$0x30] %v3336_v21  ;;  %3361 = vst [vmem:[#allocation2 + $0x488] sm:$0x30] %v3337_v1  ;;  %3816 = vrot.lane.b32.xlu1 %v3787_v13, %s8866_s10  ;;  %3814 = vrot.lane.b32.xlu0 %v10478_v2, %s8866_s10  ;;  %v7082_v13 = vld [vmem:[#allocation2 + $0x260] sm:$0xff]  ;;  %v7013_v21 = vld [vmem:[#allocation2 + $0x38] sm:$0xff] }
 0x2d6   :  { %v7012_v1 = vld [vmem:[#allocation2 + $0x30] sm:$0xff] }
 0x2d7   :  { %v3319_v24 = vpop.permute.xlu1 %3318  ;;  %v3317_v61 = vpop.permute.xlu0 %3316 }
 0x2d8   :  { %v3338_v44 = vsel %vm1109_vm7, %v3315_v40, %v3317_v61  ;;  %v3339_v43 = vsel %vm1109_vm7, %v3317_v61, %v3319_v24  ;;  %v3556_v40 = vrot.slane %v3542_v6, %v8921_v8  ;;  %v7058_v61 = vld [vmem:[#allocation2 + $0x1a0] sm:$0xff] }
 0x2d9   :  { %3362 = vst [vmem:[#allocation2 + $0x490] sm:$0x30] %v3338_v44  ;;  %3363 = vst [vmem:[#allocation2 + $0x498] sm:$0x30] %v3339_v43  ;;  %3820 = vrot.lane.b32.xlu1 %v10574_v14, %s8866_s10  ;;  %3818 = vrot.lane.b32.xlu0 %v10549_v12, %s8866_s10  ;;  %v3898_v44 = vcombine.low %v10425_v5, %v10425_v5  ;;  %v7131_v43 = vld [vmem:[#allocation2 + $0x3e8] sm:$0xff]  ;;  %v8629_v53 = vpack.c.bf16 %v7082_v13, %v7058_v61  ;;  %v7106_v6 = vld [vmem:[#allocation2 + $0x320] sm:$0xff] }
 0x2da   :  { %v8631_v23 = vpack.c.bf16 %v7131_v43, %v7107_v0  ;;  %v7132_v13 = vld [vmem:[#allocation2 + $0x3f0] sm:$0xff]  ;;  %v7039_v61 = vld [vmem:[#allocation2 + $0x108] sm:$0xff]  ;;  %v7041_v0 = vld [vmem:[#allocation2 + $0x118] sm:$0xff] }
 0x2db   :  { %v3323_v46 = vpop.permute.xlu1 %3322  ;;  %v3321_v25 = vpop.permute.xlu0 %3320 }
 0x2dc   :  { %v3340_v52 = vsel %vm1109_vm7, %v3319_v24, %v3321_v25  ;;  %v3341_v32 = vsel %vm1109_vm7, %v3321_v25, %v3323_v46  ;;  %v7151_v55 = vld [vmem:[#allocation2 + $0x488] sm:$0x3f]  ;;  %v7150_v26 = vld [vmem:[#allocation2 + $0x480] sm:$0x3f]  ;;  %v8635_v24 = vpack.c.bf16 %v7037_v36, %v7013_v21 }
 0x2dd   :  { %3364 = vst [vmem:[#allocation2 + $0x4a0] sm:$0x30] %v3340_v52  ;;  %3365 = vst [vmem:[#allocation2 + $0x4a8] sm:$0x30] %v3341_v32  ;;  %3928 = vrot.lane.b32.xlu1 %v10383_v60, %s8867_s17  ;;  %3926 = vrot.lane.b32.xlu0 %v3881_v45, %s8867_s17  ;;  %v7085_v45 = vld [vmem:[#allocation2 + $0x278] sm:$0xff]  ;;  %v8637_v52 = vpack.c.bf16 %v7036_v35, %v7012_v1  ;;  %v8633_v35 = vpack.c.bf16 %v7130_v29, %v7106_v6  ;;  %v7108_v1 = vld [vmem:[#allocation2 + $0x330] sm:$0xff] }
 0x2de   :  { %8543 = vmatprep.subr.msk.mxu0 %vm7205_vm8, %v7151_v55  ;;  %v7061_v32 = vld [vmem:[#allocation2 + $0x1b8] sm:$0xff] }
 0x2df   :  { %8544 = vmatpush1.msk.msra.mxu0 %vm7205_vm8, %v7150_v26  ;;  %v3327_v59 = vpop.permute.xlu1 %3326  ;;  %v3325_v58 = vpop.permute.xlu0 %3324  ;;  %v8639_v27 = vpack.c.bf16 %v7085_v45, %v7061_v32  ;;  %v7017_v6 = vld [vmem:[#allocation2 + $0x58] sm:$0xff] }
 0x2e0   :  { %v3342_v7 = vsel %vm1109_vm7, %v3323_v46, %v3325_v58  ;;  %v3343_v49 = vsel %vm1109_vm7, %v3325_v58, %v3327_v59  ;;  %8624 = vmatprep.subr.bf16.mxu0 %v8623_v62  ;;  %8545 = vmatmul.mubr.msk.f32.vlgmr.msra.gmra.mrb[0].mxu0 %vm7201_vm9, %v10610_v57  ;;  %v7153_v15 = vld [vmem:[#allocation2 + $0x498] sm:$0x3f]  ;;  %v7152_v63 = vld [vmem:[#allocation2 + $0x490] sm:$0x3f]  ;;  %v3558_v46 = vcombine.high %v3556_v40, %v3556_v40 }
 0x2e1   :  { %3366 = vst [vmem:[#allocation2 + $0x4b0] sm:$0x30] %v3342_v7  ;;  %3367 = vst [vmem:[#allocation2 + $0x4b8] sm:$0x30] %v3343_v49  ;;  %8626 = vmatpush1.bf16.msra.mxu0 %v8625_v30  ;;  %3932 = vrot.lane.b32.xlu1 %v10404_v16, %s8867_s17  ;;  %v8641_v7 = vpack.c.bf16 %v7084_v33, %v7060_v19  ;;  %v7040_v19 = vld [vmem:[#allocation2 + $0x110] sm:$0xff] }
 0x2e2   :  { %3930 = vrot.lane.b32.xlu0 %v10502_v20, %s8867_s17  ;;  %8546 = vmatprep.subr.msk.mxu1 %vm7205_vm8, %v7153_v15  ;;  %v8482_v20 = vld [vmem:[%s12353_s0 + $0x32] sm:$0xff]  ;;  %3595 = vst [vmem:[#allocation2 + $0x98] sm:$0x3] %v3558_v46  ;;  %v8645_v46 = vpack.c.bf16 %v7132_v13, %v7108_v1 }
 0x2e3   :  { %8628 = vmatprep.subr.bf16.mxu0 %v8627_v34  ;;  %8547 = vmatpush1.msk.msra.mxu1 %vm7205_vm8, %v7152_v63  ;;  %v3331_v25 = vpop.permute.xlu1 %3330  ;;  %v3329_v42 = vpop.permute.xlu0 %3328  ;;  %8486 = vst.sshfl [vmem:[#allocation2 + $0x388] sm:$0xc pattern:$0x76325410] %v8482_v20  ;;  %v10635_v62 = vrot.slane %v8482_v20, %v8921_v8  ;;  %v5768_v58 = vcombine.high %v8482_v20, %v8482_v20  ;;  %v7109_v63 = vld [vmem:[#allocation2 + $0x338] sm:$0xff] }
 0x2e4   :  { %v3344_v55 = vsel %vm1109_vm7, %v3327_v59, %v3329_v42  ;;  %v3345_v26 = vsel %vm1109_vm7, %v3329_v42, %v3331_v25  ;;  %8636 = vmatprep.subr.bf16.mxu1 %v8635_v24  ;;  %8548 = vmatmul.mubr.msk.f32.vlgmr.msra.gmra.mrb[0].mxu1 %vm7201_vm9, %v10610_v57  ;;  %8398 = vst.sshfl [vmem:[#allocation2 + $0xa0] sm:$0x3 pattern:$0x76325410] %v8482_v20  ;;  %v7133_v59 = vld [vmem:[#allocation2 + $0x3f8] sm:$0xff]  ;;  %v7087_v20 = vld [vmem:[#allocation2 + $0x288] sm:$0xff] }
 0x2e5   :  { %3368 = vst [vmem:[#allocation2 + $0x4c0] sm:$0x30] %v3344_v55  ;;  %3369 = vst [vmem:[#allocation2 + $0x4c8] sm:$0x30] %v3345_v26  ;;  %8630 = vmatpush1.bf16.msra.mxu0 %v8629_v53  ;;  %8638 = vmatpush1.bf16.msra.mxu1 %v8637_v52  ;;  %v3574_v30 = vcombine.high %v10635_v62, %v10635_v62  ;;  %v10647_v40 = vrot.slane %v5768_v58, %v8921_v8  ;;  %v7155_v21 = vld [vmem:[#allocation2 + $0x4a8] sm:$0x3f] }
 0x2e6   :  { %3936 = vrot.lane.b32.xlu1 %v10425_v5, %s8867_s17  ;;  %3934 = vrot.lane.b32.xlu0 %v3898_v44, %s8867_s17  ;;  %8487 = vst.sshfl [vmem:[#allocation2 + $0x398] sm:$0xc pattern:$0x76325410] %v5768_v58  ;;  %v8643_v34 = vpack.c.bf16 %v7133_v59, %v7109_v63  ;;  %v3915_v24 = vcombine.low %v10464_v18, %v10464_v18  ;;  %v7154_v42 = vld [vmem:[#allocation2 + $0x4a0] sm:$0x3f] }
 0x2e7   :  { %8632 = vmatprep.subr.bf16.mxu0 %v8631_v23  ;;  %8640 = vmatprep.subr.bf16.mxu1 %v8639_v27  ;;  %v3335_v38 = vpop.permute.xlu1 %3334  ;;  %v3333_v36 = vpop.permute.xlu0 %3332  ;;  %3597 = vst [vmem:[#allocation2 + $0xa8] sm:$0x3] %v3574_v30  ;;  %8399 = vst.sshfl [vmem:[#allocation2 + $0xb0] sm:$0x3 pattern:$0x76325410] %v5768_v58  ;;  %v3575_v44 = vcombine.high %v10647_v40, %v10647_v40 }
 0x2e8   :  { %v3346_v49 = vsel %vm1109_vm7, %v3331_v25, %v3333_v36  ;;  %v3347_v15 = vsel %vm1109_vm7, %v3333_v36, %v3335_v38  ;;  %7484 = vmatprep.mubr.f32.mxu0 %v8873_v22  ;;  %7555 = vmatprep.mubr.f32.mxu1 %v8873_v22  ;;  %v8823_v25 = vld [vmem:[%s12353_s0 + $0x3a] ss:$0 sps:$4 sm:$0x33]   ;;  %v7015_v53 = vld [vmem:[#allocation2 + $0x48] sm:$0xff]  ;;  %v7038_v52 = vld [vmem:[#allocation2 + $0x100] sm:$0xff] }
 0x2e9   :  { %3370 = vst [vmem:[#allocation2 + $0x4d0] sm:$0x30] %v3346_v49  ;;  %3371 = vst [vmem:[#allocation2 + $0x4d8] sm:$0x30] %v3347_v15  ;;  %8634 = vmatpush1.bf16.msra.mxu0 %v8633_v35  ;;  %8642 = vmatpush1.bf16.msra.mxu1 %v8641_v7  ;;  %v8647_v32 = vpack.c.bf16 %v7039_v61, %v7015_v53  ;;  %v7157_v55 = vld [vmem:[#allocation2 + $0x4b8] sm:$0x3f]  ;;  %v3924_v59 = vrot.slane %v8823_v25, %v8921_v8 }
 0x2ea   :  { %3940 = vrot.lane.b32.xlu1 %v10449_v50, %s8867_s17  ;;  %3938 = vrot.lane.b32.xlu0 %v10524_v28, %s8867_s17  ;;  %3599 = vst [vmem:[#allocation2 + $0xb8] sm:$0x3] %v3575_v44  ;;  %v7014_v26 = vld [vmem:[#allocation2 + $0x40] sm:$0xff]  ;;  %v7063_v27 = vld [vmem:[#allocation2 + $0x1c8] sm:$0xff]  ;;  %v7156_v38 = vld [vmem:[#allocation2 + $0x4b0] sm:$0x3f]  ;;  %v8659_v7 = vpack.c.bf16 %v7041_v0, %v7017_v6 }
 0x2eb   :  { %8549 = vmatprep.subr.msk.mxu0 %vm7205_vm8, %v7155_v21  ;;  %8644 = vmatprep.subr.bf16.mxu1 %v8643_v34  ;;  %v3387_v43 = vpop.permute.xlu1 %3386  ;;  %v3385_v45 = vpop.permute.xlu0 %3384  ;;  %v8649_v29 = vpack.c.bf16 %v7038_v52, %v7014_v26  ;;  %v8651_v30 = vpack.c.bf16 %v7087_v20, %v7063_v27  ;;  %v7086_v36 = vld [vmem:[#allocation2 + $0x280] sm:$0xff]  ;;  %v7089_v35 = vld [vmem:[#allocation2 + $0x298] sm:$0xff]  ;;  %v7016_v49 = vld [vmem:[#allocation2 + $0x50] sm:$0xff] }
 0x2ec   :  { %v3390_v28 = vsel %vm199_vm0, %v3385_v45, %v3387_v43  ;;  %v7135_v15 = vld [vmem:[#allocation2 + $0x408] sm:$0xff]  ;;  %v7062_v63 = vld [vmem:[#allocation2 + $0x1c0] sm:$0xff]  ;;  %v8661_v13 = vpack.c.bf16 %v7040_v19, %v7016_v49  ;;  %v7065_v34 = vld [vmem:[#allocation2 + $0x1d8] sm:$0xff] }
 0x2ed   :  { %3394 = vst [vmem:[#allocation3] sm:$0xf0] %v3390_v28  ;;  %8550 = vmatpush1.msk.msra.mxu0 %vm7205_vm8, %v7154_v42  ;;  %8646 = vmatpush1.bf16.msra.mxu1 %v8645_v46  ;;  %v8653_v21 = vpack.c.bf16 %v7086_v36, %v7062_v63  ;;  %v7111_v61 = vld [vmem:[#allocation2 + $0x348] sm:$0xff]  ;;  %v8663_v44 = vpack.c.bf16 %v7089_v35, %v7065_v34  ;;  %v7134_v28 = vld [vmem:[#allocation2 + $0x400] sm:$0xff]  ;;  %v7088_v42 = vld [vmem:[#allocation2 + $0x290] sm:$0xff] }
 0x2ee   :  { %3944 = vrot.lane.b32.xlu1 %v10464_v18, %s8867_s17  ;;  %3942 = vrot.lane.b32.xlu0 %v3915_v24, %s8867_s17  ;;  %v8655_v25 = vpack.c.bf16 %v7135_v15, %v7111_v61  ;;  %v7110_v53 = vld [vmem:[#allocation2 + $0x340] sm:$0xff]  ;;  %v7064_v52 = vld [vmem:[#allocation2 + $0x1d0] sm:$0xff]  ;;  %v7113_v0 = vld [vmem:[#allocation2 + $0x358] sm:$0xff] }
 0x2ef   :  { %8552 = vmatprep.subr.msk.mxu1 %vm7205_vm8, %v7157_v55  ;;  %8648 = vmatprep.subr.bf16.mxu0 %v8647_v32  ;;  %v3402_v33 = vpop.permute.xlu1 %3401  ;;  %v3389_v23 = vpop.permute.xlu0 %3388  ;;  %v8657_v32 = vpack.c.bf16 %v7134_v28, %v7110_v53  ;;  %v8665_v20 = vpack.c.bf16 %v7088_v42, %v7064_v52  ;;  %v7159_v27 = vld [vmem:[#allocation2 + $0x4c8] sm:$0x3f]  ;;  %v7112_v6 = vld [vmem:[#allocation2 + $0x350] sm:$0xff] }
 0x2f0   :  { %8551 = vmatmul.mubr.msk.f32.vlgmr.msra.gmra.mrb[2].mxu0 %vm7201_vm9, %v10610_v57  ;;  %v3391_v58 = vsel %vm199_vm0, %v3387_v43, %v3389_v23  ;;  %v3925_v43 = vcombine.low %v3924_v59, %v3924_v59  ;;  %v7136_v23 = vld [vmem:[#allocation2 + $0x410] sm:$0xff]  ;;  %v7161_v35 = vld [vmem:[#allocation2 + $0x4d8] sm:$0x3f] }
 0x2f1   :  { %8650 = vmatpush1.bf16.msra.mxu0 %v8649_v29  ;;  %3395 = vst [vmem:[#allocation3 + $0x8] sm:$0xf0] %v3391_v58  ;;  %8553 = vmatpush1.msk.msra.mxu1 %vm7205_vm8, %v7156_v38  ;;  %v8669_v19 = vpack.c.bf16 %v7136_v23, %v7112_v6  ;;  %v7158_v38 = vld [vmem:[#allocation2 + $0x4c0] sm:$0x3f]  ;;  %v7160_v49 = vld [vmem:[#allocation2 + $0x4d0] sm:$0x3f] }
 0x2f2   :  { %8652 = vmatprep.subr.bf16.mxu0 %v8651_v30  ;;  %3948 = vrot.lane.b32.xlu1 %v10478_v2, %s8867_s17  ;;  %v4012_v30 = vcombine.high %v10506_v54, %v10506_v54 }
 0x2f3   :  { %3946 = vrot.lane.b32.xlu0 %v10546_v10, %s8867_s17  ;;  %8660 = vmatprep.subr.bf16.mxu1 %v8659_v7  ;;  %v3406_v1 = vpop.permute.xlu1 %3405  ;;  %v3404_v24 = vpop.permute.xlu0 %3403  ;;  %v7137_v10 = vld [vmem:[#allocation2 + $0x418] sm:$0xff] }
 0x2f4   :  { %8554 = vmatmul.mubr.msk.f32.vlgmr.msra.gmra.mrb[2].mxu1 %vm7201_vm9, %v10610_v57  ;;  %v3407_v45 = vsel %vm329_vm1, %v3402_v33, %v3404_v24  ;;  %v3408_v46 = vsel %vm329_vm1, %v3404_v24, %v3406_v1  ;;  %7626 = vmatprep.mubr.f32.mxu0 %v8873_v22  ;;  %v8667_v33 = vpack.c.bf16 %v7137_v10, %v7113_v0 }
 0x2f5   :  { %8654 = vmatpush1.bf16.msra.mxu0 %v8653_v21  ;;  %8662 = vmatpush1.bf16.msra.mxu1 %v8661_v13  ;;  %3411 = vst [vmem:[#allocation3 + $0x20] sm:$0xf] %v3407_v45  ;;  %3412 = vst [vmem:[#allocation3 + $0x28] sm:$0xf] %v3408_v46  ;;  %v4029_v21 = vcombine.high %v10527_v17, %v10527_v17 }
 0x2f6   :  { %8656 = vmatprep.subr.bf16.mxu0 %v8655_v25  ;;  %8664 = vmatprep.subr.bf16.mxu1 %v8663_v44 }
 0x2f7   :  { %4054 = vrot.lane.b32.xlu1 %v10404_v16, %s8868_s22  ;;  %3950 = vrot.lane.b32.xlu0 %v3925_v43, %s8867_s17  ;;  %v3422_v55 = vpop.permute.xlu1 %3421  ;;  %v3420_v26 = vpop.permute.xlu0 %3419  ;;  %v4046_v43 = vcombine.high %v10549_v12, %v10549_v12 }
 0x2f8   :  { %v3425_v29 = vsel %vm460_vm2, %v3420_v26, %v3422_v55  ;;  %7697 = vmatprep.mubr.f32.mxu1 %v8873_v22 }
 0x2f9   :  { %8658 = vmatpush1.bf16.msra.mxu0 %v8657_v32  ;;  %8666 = vmatpush1.bf16.msra.mxu1 %v8665_v20  ;;  %3429 = vst [vmem:[#allocation3 + $0x20] sm:$0xf0] %v3425_v29 }
 0x2fa   :  { %8555 = vmatprep.subr.msk.mxu0 %vm7205_vm8, %v7159_v27  ;;  %8668 = vmatprep.subr.bf16.mxu1 %v8667_v33  ;;  %v10768_v33 = vcombine.low %v10567_v3, %v10567_v3 }
 0x2fb   :  { %4058 = vrot.lane.b32.xlu1 %v10506_v54, %s8868_s22  ;;  %4056 = vrot.lane.b32.xlu0 %v10422_v9, %s8868_s22  ;;  %v3437_v59 = vpop.permute.xlu1 %3436  ;;  %v3424_v58 = vpop.permute.xlu0 %3423 }
 0x2fc   :  { %v3426_v36 = vsel %vm460_vm2, %v3422_v55, %v3424_v58 }
 0x2fd   :  { %8556 = vmatpush1.msk.msra.mxu0 %vm7205_vm8, %v7158_v38  ;;  %8670 = vmatpush1.bf16.msra.mxu1 %v8669_v19  ;;  %3430 = vst [vmem:[#allocation3 + $0x28] sm:$0xf0] %v3426_v36  ;;  %v10776_v19 = vld [vmem:[%s12353_s0 + $0x2a] sm:$0xff] }
 0x2fe   :  { %8558 = vmatprep.subr.msk.mxu1 %vm7205_vm8, %v7161_v35  ;;  %8557 = vmatmul.mubr.msk.f32.vlgmr.msra.gmra.mrb[4].mxu0 %vm7201_vm9, %v10610_v57  ;;  %v10785_v58 = vrot.slane %v10776_v19, %v8921_v8 }
 0x2ff   :  { %4062 = vrot.lane.b32.xlu1 %v10449_v50, %s8868_s22  ;;  %4060 = vrot.lane.b32.xlu0 %v4012_v30, %s8868_s22  ;;  %v3441_v7 = vpop.permute.xlu1 %3440  ;;  %v3439_v54 = vpop.permute.xlu0 %3438  ;;  %v4270_v30 = vcombine.high %v10776_v19, %v10776_v19 }
 0x300   :  { %v3442_v15 = vsel %vm589_vm3, %v3437_v59, %v3439_v54  ;;  %v3443_v63 = vsel %vm589_vm3, %v3439_v54, %v3441_v7  ;;  %7768 = vmatprep.mubr.f32.mxu0 %v8873_v22  ;;  %v4269_v59 = vcombine.low %v10584_v41, %v10584_v41  ;;  %v10796_v54 = vcombine.low %v10785_v58, %v10785_v58 }
 0x301   :  { %8559 = vmatpush1.msk.msra.mxu1 %vm7205_vm8, %v7160_v49  ;;  %3446 = vst [vmem:[#allocation3 + $0x40] sm:$0xf] %v3442_v15  ;;  %3447 = vst [vmem:[#allocation3 + $0x48] sm:$0xf] %v3443_v63  ;;  %v10799_v49 = vrot.slane %v4270_v30, %v8921_v8 }
 0x302   :  { %8560 = vmatmul.mubr.msk.f32.vlgmr.msra.gmra.mrb[4].mxu1 %vm7201_vm9, %v10610_v57 }
 0x303   :  { %4066 = vrot.lane.b32.xlu1 %v10527_v17, %s8868_s22  ;;  %4064 = vrot.lane.b32.xlu0 %v10461_v4, %s8868_s22  ;;  %v3457_v13 = vpop.permute.xlu1 %3456  ;;  %v3455_v34 = vpop.permute.xlu0 %3454 }
 0x304   :  { %v3460_v1 = vsel %vm719_vm4, %v3455_v34, %v3457_v13  ;;  %7839 = vmatprep.mubr.f32.mxu1 %v8873_v22 }
 0x305   :  { %3464 = vst [vmem:[#allocation3 + $0x40] sm:$0xf0] %v3460_v1  ;;  %v4286_v1 = vcombine.low %v10799_v49, %v10799_v49 }
 0x307   :  { %4070 = vrot.lane.b32.xlu1 %v10478_v2, %s8868_s22  ;;  %4068 = vrot.lane.b32.xlu0 %v4029_v21, %s8868_s22  ;;  %v3472_v57 = vpop.permute.xlu1 %3471  ;;  %v3459_v24 = vpop.permute.xlu0 %3458 }
 0x308   :  { %v3461_v61 = vsel %vm719_vm4, %v3457_v13, %v3459_v24  ;;  %v10806_v13 = vld [vmem:[%s12353_s0 + $0x32] sm:$0xff] }
 0x309   :  { %3465 = vst [vmem:[#allocation3 + $0x48] sm:$0xf0] %v3461_v61  ;;  %v4287_v24 = vcombine.high %v10806_v13, %v10806_v13 }
 0x30b   :  { %4074 = vrot.lane.b32.xlu1 %v10549_v12, %s8868_s22  ;;  %4072 = vrot.lane.b32.xlu0 %v10487_v31, %s8868_s22  ;;  %v3476_v17 = vpop.permute.xlu1 %3475  ;;  %v3474_v44 = vpop.permute.xlu0 %3473 }
 0x30c   :  { %v3477_v45 = vsel %vm849_vm5, %v3472_v57, %v3474_v44  ;;  %v3478_v46 = vsel %vm849_vm5, %v3474_v44, %v3476_v17  ;;  %v10816_v57 = vrot.slane %v10806_v13, %v8921_v8 }
 0x30d   :  { %3481 = vst [vmem:[#allocation3 + $0x60] sm:$0xf] %v3477_v45  ;;  %3482 = vst [vmem:[#allocation3 + $0x68] sm:$0xf] %v3478_v46  ;;  %v10829_v45 = vrot.slane %v4287_v24, %v8921_v8 }
 0x30f   :  { %4078 = vrot.lane.b32.xlu1 %v10561_v37, %s8868_s22  ;;  %4076 = vrot.lane.b32.xlu0 %v4046_v43, %s8868_s22  ;;  %v3492_v25 = vpop.permute.xlu1 %3491  ;;  %v3490_v28 = vpop.permute.xlu0 %3489  ;;  %v10826_v43 = vcombine.low %v10816_v57, %v10816_v57 }
 0x310   :  { %v3495_v42 = vsel %vm980_vm6, %v3490_v28, %v3492_v25 }
 0x311   :  { %3499 = vst [vmem:[#allocation3 + $0x60] sm:$0xf0] %v3495_v42 }
 0x313   :  { %4185 = vrot.lane.b32.xlu1 %v10400_v11, %s8869_s23  ;;  %4183 = vrot.lane.b32.xlu0 %v10383_v60, %s8869_s23  ;;  %v3507_v12 = vpop.permute.xlu1 %3506  ;;  %v3494_v10 = vpop.permute.xlu0 %3493 }
 0x314   :  { %v3496_v53 = vsel %vm980_vm6, %v3492_v25, %v3494_v10  ;;  %v4382_v10 = vcombine.low %v10411_v47, %v10411_v47 }
 0x315   :  { %3500 = vst [vmem:[#allocation3 + $0x68] sm:$0xf0] %v3496_v53 }
 0x317   :  { %4189 = vrot.lane.b32.xlu1 %v10422_v9, %s8869_s23  ;;  %4187 = vrot.lane.b32.xlu0 %v10404_v16, %s8869_s23  ;;  %v3511_v37 = vpop.permute.xlu1 %3510  ;;  %v3509_v52 = vpop.permute.xlu0 %3508 }
 0x318   :  { %v3512_v32 = vsel %vm1109_vm7, %v3507_v12, %v3509_v52  ;;  %v3513_v11 = vsel %vm1109_vm7, %v3509_v52, %v3511_v37  ;;  %v4303_v12 = vcombine.low %v10829_v45, %v10829_v45 }
 0x319   :  { %3516 = vst [vmem:[#allocation3 + $0x80] sm:$0xf] %v3512_v32  ;;  %3517 = vst [vmem:[#allocation3 + $0x88] sm:$0xf] %v3513_v11  ;;  %v4389_v11 = vrot.slane %v4382_v10, %v8921_v8 }
 0x31b   :  { %4193 = vrot.lane.b32.xlu1 %v10445_v56, %s8869_s23  ;;  %4191 = vrot.lane.b32.xlu0 %v10425_v5, %s8869_s23  ;;  %v3670_v60 = vpop.permute.xlu1 %3669  ;;  %v3668_v20 = vpop.permute.xlu0 %3667 }
 0x31c   :  { %v3693_v9 = vsel %vm199_vm0, %v3668_v20, %v3670_v60 }
 0x31d   :  { %3717 = vst [vmem:[#allocation2 + $0x60] sm:$0xc] %v3693_v9 }
 0x31f   :  { %4197 = vrot.lane.b32.xlu1 %v10461_v4, %s8869_s23  ;;  %4195 = vrot.lane.b32.xlu0 %v10449_v50, %s8869_s23  ;;  %v3674_v16 = vpop.permute.xlu1 %3673  ;;  %v3672_v55 = vpop.permute.xlu0 %3671  ;;  %v8824_v50 = vld [vmem:[%s12353_s0 + $0x3a] ss:$0 sps:$4 sm:$0x33]  }
 0x320   :  { %v3694_v26 = vsel %vm199_vm0, %v3670_v60, %v3672_v55  ;;  %v3695_v56 = vsel %vm199_vm0, %v3672_v55, %v3674_v16  ;;  %v4182_v23 = vrot.slane %v8824_v50, %v8921_v8  ;;  %v4399_v55 = vcombine.low %v10776_v19, %v10776_v19 }
 0x321   :  { %3718 = vst [vmem:[#allocation2 + $0x68] sm:$0xc] %v3694_v26  ;;  %3719 = vst [vmem:[#allocation2 + $0x70] sm:$0xc] %v3695_v56 }
 0x323   :  { %4201 = vrot.lane.b32.xlu1 %v10474_v48, %s8869_s23  ;;  %4199 = vrot.lane.b32.xlu0 %v10464_v18, %s8869_s23  ;;  %v3678_v5 = vpop.permute.xlu1 %3677  ;;  %v3676_v0 = vpop.permute.xlu0 %3675 }
 0x324   :  { %v3696_v4 = vsel %vm199_vm0, %v3674_v16, %v3676_v0  ;;  %v3697_v29 = vsel %vm199_vm0, %v3676_v0, %v3678_v5  ;;  %v4397_v16 = vcombine.low %v4389_v11, %v4389_v11  ;;  %v4406_v0 = vrot.slane %v4399_v55, %v8921_v8 }
 0x325   :  { %3720 = vst [vmem:[#allocation2 + $0x78] sm:$0xc] %v3696_v4  ;;  %3721 = vst [vmem:[#allocation2 + $0x80] sm:$0xc] %v3697_v29 }
 0x327   :  { %4205 = vrot.lane.b32.xlu1 %v10487_v31, %s8869_s23  ;;  %4203 = vrot.lane.b32.xlu0 %v10478_v2, %s8869_s23  ;;  %v3682_v48 = vpop.permute.xlu1 %3681  ;;  %v3680_v18 = vpop.permute.xlu0 %3679 }
 0x328   :  { %v3698_v27 = vsel %vm199_vm0, %v3678_v5, %v3680_v18  ;;  %v3699_v6 = vsel %vm199_vm0, %v3680_v18, %v3682_v48  ;;  %v4414_v18 = vcombine.low %v4406_v0, %v4406_v0 }
 0x329   :  { %3722 = vst [vmem:[#allocation2 + $0x88] sm:$0xc] %v3698_v27  ;;  %3723 = vst [vmem:[#allocation2 + $0x90] sm:$0xc] %v3699_v6 }
 0x32b   :  { %4312 = vrot.lane.b32.xlu1 %v10768_v33, %s8870_s26  ;;  %4207 = vrot.lane.b32.xlu0 %v4182_v23, %s8869_s23  ;;  %v3686_v2 = vpop.permute.xlu1 %3685  ;;  %v3684_v31 = vpop.permute.xlu0 %3683  ;;  %v4416_v23 = vcombine.low %v10806_v13, %v10806_v13 }
 0x32c   :  { %v3700_v38 = vsel %vm199_vm0, %v3682_v48, %v3684_v31  ;;  %v3701_v36 = vsel %vm199_vm0, %v3684_v31, %v3686_v2 }
 0x32d   :  { %3724 = vst [vmem:[#allocation2 + $0x98] sm:$0xc] %v3700_v38  ;;  %3725 = vst [vmem:[#allocation2 + $0xa0] sm:$0xc] %v3701_v36 }
 0x32e   :  { %v8831_v38 = vld [vmem:[%s12353_s0 + $0x3a] ss:$0 sps:$4 sm:$0x33]  }
 0x32f   :  { %4316 = vrot.lane.b32.xlu1 %v4269_v59, %s8870_s26  ;;  %4314 = vrot.lane.b32.xlu0 %v10567_v3, %s8870_s26  ;;  %v3690_v35 = vpop.permute.xlu1 %3689  ;;  %v3688_v7 = vpop.permute.xlu0 %3687 }
 0x330   :  { %v3702_v15 = vsel %vm199_vm0, %v3686_v2, %v3688_v7  ;;  %v3703_v63 = vsel %vm199_vm0, %v3688_v7, %v3690_v35 }
 0x331   :  { %3726 = vst [vmem:[#allocation2 + $0xa8] sm:$0xc] %v3702_v15  ;;  %3727 = vst [vmem:[#allocation2 + $0xb0] sm:$0xc] %v3703_v63  ;;  %v4440_v15 = vrot.slane %v8831_v38, %v8921_v8 }
 0x333   :  { %4320 = vrot.lane.b32.xlu1 %v10796_v54, %s8870_s26  ;;  %4318 = vrot.lane.b32.xlu0 %v10584_v41, %s8870_s26  ;;  %v3797_v34 = vpop.permute.xlu1 %3796  ;;  %v3692_v21 = vpop.permute.xlu0 %3691 }
 0x334   :  { %v3704_v61 = vsel %vm199_vm0, %v3690_v35, %v3692_v21  ;;  %v4441_v21 = vcombine.low %v4440_v15, %v4440_v15 }
 0x335   :  { %3728 = vst [vmem:[#allocation2 + $0xb8] sm:$0xc] %v3704_v61 }
 0x337   :  { %4324 = vrot.lane.b32.xlu1 %v4286_v1, %s8870_s26  ;;  %4322 = vrot.lane.b32.xlu0 %v10785_v58, %s8870_s26  ;;  %v3801_v17 = vpop.permute.xlu1 %3800  ;;  %v3799_v44 = vpop.permute.xlu0 %3798 }
 0x338   :  { %v3822_v46 = vsel %vm329_vm1, %v3797_v34, %v3799_v44  ;;  %v3823_v25 = vsel %vm329_vm1, %v3799_v44, %v3801_v17 }
 0x339   :  { %3846 = vst [vmem:[#allocation2 + $0x60] sm:$0x30] %v3822_v46  ;;  %3847 = vst [vmem:[#allocation2 + $0x68] sm:$0x30] %v3823_v25 }
 0x33b   :  { %4328 = vrot.lane.b32.xlu1 %v10826_v43, %s8870_s26  ;;  %4326 = vrot.lane.b32.xlu0 %v10799_v49, %s8870_s26  ;;  %v3805_v28 = vpop.permute.xlu1 %3804  ;;  %v3803_v42 = vpop.permute.xlu0 %3802 }
 0x33c   :  { %v3824_v53 = vsel %vm329_vm1, %v3801_v17, %v3803_v42  ;;  %v3825_v37 = vsel %vm329_vm1, %v3803_v42, %v3805_v28 }
 0x33d   :  { %3848 = vst [vmem:[#allocation2 + $0x70] sm:$0x30] %v3824_v53  ;;  %3849 = vst [vmem:[#allocation2 + $0x78] sm:$0x30] %v3825_v37  ;;  %v4545_v37 = vcombine.high %v10799_v49, %v10799_v49 }
 0x33f   :  { %4332 = vrot.lane.b32.xlu1 %v4303_v12, %s8870_s26  ;;  %4330 = vrot.lane.b32.xlu0 %v10816_v57, %s8870_s26  ;;  %v3809_v52 = vpop.permute.xlu1 %3808  ;;  %v3807_v32 = vpop.permute.xlu0 %3806 }
 0x340   :  { %v3826_v60 = vsel %vm329_vm1, %v3805_v28, %v3807_v32  ;;  %v3827_v20 = vsel %vm329_vm1, %v3807_v32, %v3809_v52 }
 0x341   :  { %3850 = vst [vmem:[#allocation2 + $0x80] sm:$0x30] %v3826_v60  ;;  %3851 = vst [vmem:[#allocation2 + $0x88] sm:$0x30] %v3827_v20 }
 0x343   :  { %4336 = vrot.lane.b32.xlu1 %v10574_v14, %s8870_s26  ;;  %4334 = vrot.lane.b32.xlu0 %v10829_v45, %s8870_s26  ;;  %v3813_v47 = vpop.permute.xlu1 %3812  ;;  %v3811_v9 = vpop.permute.xlu0 %3810 }
 0x344   :  { %v3828_v26 = vsel %vm329_vm1, %v3809_v52, %v3811_v9  ;;  %v3829_v56 = vsel %vm329_vm1, %v3811_v9, %v3813_v47 }
 0x345   :  { %3852 = vst [vmem:[#allocation2 + $0x90] sm:$0x30] %v3828_v26  ;;  %3853 = vst [vmem:[#allocation2 + $0x98] sm:$0x30] %v3829_v56 }
 0x346   :  { %v8435_v26 = vld.sshfl [vmem:[%s12353_s0 + $0x3a] sm:$0x3 pattern:$0x76325410] }
 0x347   :  { %4444 = vrot.lane.b32.xlu1 %v4389_v11, %s8871_s27  ;;  %4442 = vrot.lane.b32.xlu0 %v4397_v16, %s8871_s27  ;;  %v3817_v14 = vpop.permute.xlu1 %3816  ;;  %v3815_v5 = vpop.permute.xlu0 %3814 }
 0x348   :  { %v3830_v50 = vsel %vm329_vm1, %v3813_v47, %v3815_v5  ;;  %v3831_v4 = vsel %vm329_vm1, %v3815_v5, %v3817_v14 }
 0x349   :  { %3854 = vst [vmem:[#allocation2 + $0xa0] sm:$0x30] %v3830_v50  ;;  %3855 = vst [vmem:[#allocation2 + $0xa8] sm:$0x30] %v3831_v4  ;;  %v10959_v4 = vld [vmem:[%s12353_s0 + $0x2e] sm:$0xff] }
 0x34b   :  { %4448 = vrot.lane.b32.xlu1 %v10567_v3, %s8871_s27  ;;  %4446 = vrot.lane.b32.xlu0 %v10768_v33, %s8871_s27  ;;  %v3821_v29 = vpop.permute.xlu1 %3820  ;;  %v3819_v48 = vpop.permute.xlu0 %3818  ;;  %v4423_v33 = vrot.slane %v4416_v23, %v8921_v8 }
 0x34c   :  { %v3832_v27 = vsel %vm329_vm1, %v3817_v14, %v3819_v48  ;;  %v3833_v6 = vsel %vm329_vm1, %v3819_v48, %v3821_v29 }
 0x34d   :  { %3856 = vst [vmem:[#allocation2 + $0xb0] sm:$0x30] %v3832_v27  ;;  %3857 = vst [vmem:[#allocation2 + $0xb8] sm:$0x30] %v3833_v6  ;;  %v4431_v30 = vcombine.low %v4423_v33, %v4423_v33  ;;  %v10973_v6 = vrot.slane %v10959_v4, %v8921_v8 }
 0x34f   :  { %4452 = vrot.lane.b32.xlu1 %v4406_v0, %s8871_s27  ;;  %4450 = vrot.lane.b32.xlu0 %v4414_v18, %s8871_s27  ;;  %v3929_v19 = vpop.permute.xlu1 %3928  ;;  %v3927_v2 = vpop.permute.xlu0 %3926 }
 0x350   :  { %v3952_v31 = vsel %vm460_vm2, %v3927_v2, %v3929_v19 }
 0x351   :  { %3976 = vst [vmem:[#allocation2 + $0x60] sm:$0xc0] %v3952_v31 }
 0x353   :  { %4456 = vrot.lane.b32.xlu1 %v10785_v58, %s8871_s27  ;;  %4454 = vrot.lane.b32.xlu0 %v10796_v54, %s8871_s27  ;;  %v3933_v59 = vpop.permute.xlu1 %3932 }
 0x354   :  { %v3931_v36 = vpop.permute.xlu0 %3930 }
 0x355   :  { %v3953_v35 = vsel %vm460_vm2, %v3929_v19, %v3931_v36  ;;  %v3954_v7 = vsel %vm460_vm2, %v3931_v36, %v3933_v59  ;;  %v4738_v19 = vcombine.high %v10959_v4, %v10959_v4  ;;  %v10993_v36 = vld [vmem:[%s12353_s0 + $0x36] sm:$0xff] }
 0x356   :  { %3977 = vst [vmem:[#allocation2 + $0x68] sm:$0xc0] %v3953_v35  ;;  %3978 = vst [vmem:[#allocation2 + $0x70] sm:$0xc0] %v3954_v7 }
 0x357   :  { %4460 = vrot.lane.b32.xlu1 %v4423_v33, %s8871_s27  ;;  %4458 = vrot.lane.b32.xlu0 %v4431_v30, %s8871_s27  ;;  %v10985_v30 = vcombine.low %v10973_v6, %v10973_v6  ;;  %v10988_v38 = vrot.slane %v4738_v19, %v8921_v8 }
 0x358   :  { %v3937_v54 = vpop.permute.xlu1 %3936  ;;  %v3935_v63 = vpop.permute.xlu0 %3934 }
 0x359   :  { %v3955_v13 = vsel %vm460_vm2, %v3933_v59, %v3935_v63  ;;  %v3956_v34 = vsel %vm460_vm2, %v3935_v63, %v3937_v54  ;;  %v11003_v63 = vcombine.low %v10988_v38, %v10988_v38 }
 0x35a   :  { %3979 = vst [vmem:[#allocation2 + $0x78] sm:$0xc0] %v3955_v13  ;;  %3980 = vst [vmem:[#allocation2 + $0x80] sm:$0xc0] %v3956_v34  ;;  %v11007_v13 = vrot.slane %v10993_v36, %v8921_v8  ;;  %v4755_v34 = vcombine.high %v10993_v36, %v10993_v36 }
 0x35b   :  { %4464 = vrot.lane.b32.xlu1 %v10816_v57, %s8871_s27  ;;  %4462 = vrot.lane.b32.xlu0 %v10826_v43, %s8871_s27 }
 0x35c   :  { %v3941_v1 = vpop.permute.xlu1 %3940  ;;  %v3939_v24 = vpop.permute.xlu0 %3938 }
 0x35d   :  { %v3957_v61 = vsel %vm460_vm2, %v3937_v54, %v3939_v24  ;;  %v3958_v17 = vsel %vm460_vm2, %v3939_v24, %v3941_v1  ;;  %v8436_v24 = vld [vmem:[%s12353_s0 + $0x26] sm:$0xff] }
 0x35e   :  { %3981 = vst [vmem:[#allocation2 + $0x88] sm:$0xc0] %v3957_v61  ;;  %3982 = vst [vmem:[#allocation2 + $0x90] sm:$0xc0] %v3958_v17 }
 0x35f   :  { %4570 = vrot.lane.b32.xlu1 %v10567_v3, %s8872_s8  ;;  %4466 = vrot.lane.b32.xlu0 %v4441_v21, %s8871_s27  ;;  %8440 = vst.sshfl [vmem:[#allocation2 + $0x1f0] sm:$0x30 pattern:$0x76325410] %v8436_v24 }
 0x360   :  { %v3945_v44 = vpop.permute.xlu1 %3944  ;;  %v3943_v46 = vpop.permute.xlu0 %3942 }
 0x361   :  { %v3959_v25 = vsel %vm460_vm2, %v3941_v1, %v3943_v46  ;;  %v3960_v43 = vsel %vm460_vm2, %v3943_v46, %v3945_v44  ;;  %v11023_v46 = vcombine.low %v11007_v13, %v11007_v13 }
 0x362   :  { %3983 = vst [vmem:[#allocation2 + $0x98] sm:$0xc0] %v3959_v25  ;;  %3984 = vst [vmem:[#allocation2 + $0xa0] sm:$0xc0] %v3960_v43  ;;  %v11026_v25 = vrot.slane %v4755_v34, %v8921_v8 }
 0x363   :  { %4574 = vrot.lane.b32.xlu1 %v10584_v41, %s8872_s8  ;;  %4572 = vrot.lane.b32.xlu0 %v10578_v39, %s8872_s8  ;;  %v4544_v41 = vcombine.high %v10785_v58, %v10785_v58 }
 0x364   :  { %v3949_v28 = vpop.permute.xlu1 %3948 }
 0x365   :  { %v3947_v42 = vpop.permute.xlu0 %3946 }
 0x366   :  { %v3961_v3 = vsel %vm460_vm2, %v3945_v44, %v3947_v42  ;;  %v3962_v12 = vsel %vm460_vm2, %v3947_v42, %v3949_v28  ;;  %v4638_v44 = vcombine.low %v8436_v24, %v8436_v24 }
 0x367   :  { %3985 = vst [vmem:[#allocation2 + $0xa8] sm:$0xc0] %v3961_v3  ;;  %3986 = vst [vmem:[#allocation2 + $0xb0] sm:$0xc0] %v3962_v12  ;;  %4578 = vrot.lane.b32.xlu1 %v10785_v58, %s8872_s8  ;;  %4576 = vrot.lane.b32.xlu0 %v10595_v51, %s8872_s8  ;;  %v4561_v58 = vcombine.high %v10816_v57, %v10816_v57 }
 0x368   :  { %v4645_v43 = vrot.slane %v4638_v44, %v8921_v8  ;;  %8439 = vst.sshfl [vmem:[#allocation2 + $0x1e0] sm:$0x30 pattern:$0x76325410] %v4638_v44 }
 0x369   :  { %v4055_v10 = vpop.permute.xlu1 %4054  ;;  %v3951_v53 = vpop.permute.xlu0 %3950 }
 0x36a   :  { %v3963_v39 = vsel %vm460_vm2, %v3949_v28, %v3951_v53  ;;  %v11040_v53 = vcombine.low %v11026_v25, %v11026_v25 }
 0x36b   :  { %3987 = vst [vmem:[#allocation2 + $0xb8] sm:$0xc0] %v3963_v39  ;;  %4582 = vrot.lane.b32.xlu1 %v10799_v49, %s8872_s8  ;;  %4580 = vrot.lane.b32.xlu0 %v4544_v41, %s8872_s8  ;;  %v10927_v49 = vld [vmem:[%s12353_s0 + $0x26] sm:$0xff] }
 0x36c   :  { %v10938_v16 = vrot.slane %v10927_v49, %v8921_v8  ;;  %v4721_v55 = vcombine.high %v10927_v49, %v10927_v49  ;;  %v4850_v17 = vcombine.low %v10927_v49, %v10927_v49  ;;  %v11045_v39 = vld.sshfl [vmem:[%s12353_s0 + $0x3e] sm:$0x3 pattern:$0x76325410] }
 0x36d   :  { %v4059_v52 = vpop.permute.xlu1 %4058  ;;  %v4057_v32 = vpop.permute.xlu0 %4056 }
 0x36e   :  { %v4080_v51 = vsel %vm589_vm3, %v4055_v10, %v4057_v32  ;;  %v4081_v11 = vsel %vm589_vm3, %v4057_v32, %v4059_v52  ;;  %v10954_v50 = vrot.slane %v4721_v55, %v8921_v8  ;;  %v11032_v41 = vrot.slane %v4850_v17, %v8921_v8 }
 0x36f   :  { %4104 = vst [vmem:[#allocation2 + $0x120] sm:$0x3] %v4080_v51  ;;  %4105 = vst [vmem:[#allocation2 + $0x128] sm:$0x3] %v4081_v11  ;;  %4586 = vrot.lane.b32.xlu1 %v10816_v57, %s8872_s8  ;;  %4584 = vrot.lane.b32.xlu0 %v4545_v37, %s8872_s8  ;;  %v4562_v57 = vcombine.high %v10829_v45, %v10829_v45  ;;  %v4653_v10 = vcombine.high %v4645_v43, %v4645_v43  ;;  %v8437_v51 = vld [vmem:[%s12353_s0 + $0x2e] sm:$0xff] }
 0x370   :  { %v10969_v27 = vcombine.low %v10954_v50, %v10954_v50  ;;  %v4652_v37 = vrot.slane %v8436_v24, %v8921_v8  ;;  %v11055_v49 = vcombine.low %v11032_v41, %v11032_v41  ;;  %8442 = vst.sshfl [vmem:[#allocation2 + $0x210] sm:$0x30 pattern:$0x76325410] %v8437_v51 }
 0x371   :  { %v4063_v60 = vpop.permute.xlu1 %4062  ;;  %v4061_v20 = vpop.permute.xlu0 %4060  ;;  %4702 = vst [vmem:[#allocation2 + $0x1e8] sm:$0xc] %v4653_v10 }
 0x372   :  { %v4082_v47 = vsel %vm589_vm3, %v4059_v52, %v4061_v20  ;;  %v4083_v9 = vsel %vm589_vm3, %v4061_v20, %v4063_v60  ;;  %v11063_v20 = vcombine.low %v11045_v39, %v11045_v39 }
 0x373   :  { %4106 = vst [vmem:[#allocation2 + $0x130] sm:$0x3] %v4082_v47  ;;  %4107 = vst [vmem:[#allocation2 + $0x138] sm:$0x3] %v4083_v9  ;;  %4590 = vrot.lane.b32.xlu1 %v10829_v45, %s8872_s8  ;;  %4588 = vrot.lane.b32.xlu0 %v4561_v58, %s8872_s8  ;;  %v10951_v45 = vcombine.low %v10938_v16, %v10938_v16  ;;  %v4867_v47 = vcombine.low %v10959_v4, %v10959_v4 }
 0x374   :  { %v4655_v9 = vcombine.low %v8437_v51, %v8437_v51 }
 0x375   :  { %v4067_v56 = vpop.permute.xlu1 %4066  ;;  %v4065_v14 = vpop.permute.xlu0 %4064 }
 0x376   :  { %v4084_v5 = vsel %vm589_vm3, %v4063_v60, %v4065_v14  ;;  %v4085_v0 = vsel %vm589_vm3, %v4065_v14, %v4067_v56  ;;  %v4654_v60 = vcombine.high %v4652_v37, %v4652_v37  ;;  %8441 = vst.sshfl [vmem:[#allocation2 + $0x200] sm:$0x30 pattern:$0x76325410] %v4655_v9 }
 0x377   :  { %4108 = vst [vmem:[#allocation2 + $0x140] sm:$0x3] %v4084_v5  ;;  %4109 = vst [vmem:[#allocation2 + $0x148] sm:$0x3] %v4085_v0  ;;  %4594 = vrot.lane.b32.xlu1 %v8435_v26, %s8872_s8  ;;  %4592 = vrot.lane.b32.xlu0 %v4562_v57, %s8872_s8  ;;  %v4662_v26 = vrot.slane %v4655_v9, %v8921_v8  ;;  %v11075_v5 = vrot.slane %v4867_v47, %v8921_v8  ;;  %v11080_v0 = vld [vmem:[%s12353_s0 + $0x2a] sm:$0xff] }
 0x378   :  { %4704 = vst [vmem:[#allocation2 + $0x1f8] sm:$0xc] %v4654_v60  ;;  %8484 = vst.sshfl [vmem:[#allocation2 + $0x368] sm:$0xc pattern:$0x76325410] %v11080_v0 }
 0x379   :  { %v4071_v29 = vpop.permute.xlu1 %4070  ;;  %v4069_v48 = vpop.permute.xlu0 %4068  ;;  %v4670_v4 = vcombine.high %v4662_v26, %v4662_v26 }
 0x37a   :  { %v4086_v18 = vsel %vm589_vm3, %v4067_v56, %v4069_v48  ;;  %v4087_v23 = vsel %vm589_vm3, %v4069_v48, %v4071_v29 }
 0x37b   :  { %4110 = vst [vmem:[#allocation2 + $0x150] sm:$0x3] %v4086_v18  ;;  %4111 = vst [vmem:[#allocation2 + $0x158] sm:$0x3] %v4087_v23  ;;  %4782 = vrot.lane.b32.xlu1 %v10938_v16, %s8865_s30  ;;  %4780 = vrot.lane.b32.xlu0 %v10951_v45, %s8865_s30  ;;  %v8438_v23 = vld [vmem:[%s12353_s0 + $0x36] sm:$0xff] }
 0x37c   :  { %4706 = vst [vmem:[#allocation2 + $0x208] sm:$0xc] %v4670_v4  ;;  %8444 = vst.sshfl [vmem:[#allocation2 + $0x230] sm:$0x30 pattern:$0x76325410] %v8438_v23  ;;  %v4686_v17 = vrot.slane %v8438_v23, %v8921_v8  ;;  %v11153_v4 = vcombine.high %v10938_v16, %v10938_v16 }
 0x37d   :  { %v4075_v2 = vpop.permute.xlu1 %4074  ;;  %v4073_v33 = vpop.permute.xlu0 %4072 }
 0x37e   :  { %v4088_v31 = vsel %vm589_vm3, %v4071_v29, %v4073_v33  ;;  %v4089_v59 = vsel %vm589_vm3, %v4073_v33, %v4075_v2  ;;  %v4669_v29 = vrot.slane %v8437_v51, %v8921_v8  ;;  %v4688_v10 = vcombine.high %v4686_v17, %v4686_v17 }
 0x37f   :  { %4112 = vst [vmem:[#allocation2 + $0x160] sm:$0x3] %v4088_v31  ;;  %4113 = vst [vmem:[#allocation2 + $0x168] sm:$0x3] %v4089_v59  ;;  %4786 = vrot.lane.b32.xlu1 %v10954_v50, %s8865_s30  ;;  %4784 = vrot.lane.b32.xlu0 %v10969_v27, %s8865_s30  ;;  %v11095_v31 = vcombine.low %v11075_v5, %v11075_v5  ;;  %v4884_v59 = vcombine.low %v10993_v36, %v10993_v36 }
 0x380   :  { %v4671_v33 = vcombine.high %v4669_v29, %v4669_v29  ;;  %4712 = vst [vmem:[#allocation2 + $0x238] sm:$0xc] %v4688_v10 }
 0x381   :  { %v4079_v35 = vpop.permute.xlu1 %4078  ;;  %v4077_v7 = vpop.permute.xlu0 %4076  ;;  %v11115_v36 = vrot.slane %v4884_v59, %v8921_v8 }
 0x382   :  { %v4090_v15 = vsel %vm589_vm3, %v4075_v2, %v4077_v7  ;;  %v4091_v54 = vsel %vm589_vm3, %v4077_v7, %v4079_v35  ;;  %v4672_v35 = vcombine.low %v8438_v23, %v8438_v23  ;;  %v11101_v7 = vrot.slane %v11080_v0, %v8921_v8  ;;  %4708 = vst [vmem:[#allocation2 + $0x218] sm:$0xc] %v4671_v33 }
 0x383   :  { %4114 = vst [vmem:[#allocation2 + $0x170] sm:$0x3] %v4090_v15  ;;  %4115 = vst [vmem:[#allocation2 + $0x178] sm:$0x3] %v4091_v54  ;;  %4790 = vrot.lane.b32.xlu1 %v10973_v6, %s8865_s30  ;;  %4788 = vrot.lane.b32.xlu0 %v10985_v30, %s8865_s30 }
 0x384   :  { %v4679_v34 = vrot.slane %v4672_v35, %v8921_v8  ;;  %8443 = vst.sshfl [vmem:[#allocation2 + $0x220] sm:$0x30 pattern:$0x76325410] %v4672_v35  ;;  %v11108_v24 = vcombine.low %v11101_v7, %v11101_v7 }
 0x385   :  { %v4186_v21 = vpop.permute.xlu1 %4185  ;;  %v4184_v1 = vpop.permute.xlu0 %4183 }
 0x386   :  { %v4209_v61 = vsel %vm719_vm4, %v4184_v1, %v4186_v21  ;;  %5814 = vst [vmem:[#allocation2 + $0x360] sm:$0x30] %v11108_v24 }
 0x387   :  { %4233 = vst [vmem:[#allocation2 + $0x120] sm:$0xc] %v4209_v61  ;;  %4794 = vrot.lane.b32.xlu1 %v10988_v38, %s8865_s30  ;;  %4792 = vrot.lane.b32.xlu0 %v11003_v63, %s8865_s30  ;;  %v4687_v61 = vcombine.high %v4679_v34, %v4679_v34 }
 0x389   :  { %v4190_v28 = vpop.permute.xlu1 %4189  ;;  %v4188_v42 = vpop.permute.xlu0 %4187  ;;  %4710 = vst [vmem:[#allocation2 + $0x228] sm:$0xc] %v4687_v61  ;;  %v5013_v61 = vcombine.high %v10988_v38, %v10988_v38 }
 0x38a   :  { %v4210_v3 = vsel %vm719_vm4, %v4186_v21, %v4188_v42  ;;  %v4211_v12 = vsel %vm719_vm4, %v4188_v42, %v4190_v28  ;;  %v11122_v42 = vcombine.high %v11080_v0, %v11080_v0 }
 0x38b   :  { %4234 = vst [vmem:[#allocation2 + $0x128] sm:$0xc] %v4210_v3  ;;  %4235 = vst [vmem:[#allocation2 + $0x130] sm:$0xc] %v4211_v12  ;;  %4798 = vrot.lane.b32.xlu1 %v11007_v13, %s8865_s30  ;;  %4796 = vrot.lane.b32.xlu0 %v11023_v46, %s8865_s30  ;;  %v4899_v3 = vcombine.low %v11115_v36, %v11115_v36 }
 0x38c   :  { %v8838_v12 = vld [vmem:[%s12353_s0 + $0x3e] ss:$0 sps:$4 sm:$0x33]  }
 0x38d   :  { %v4194_v52 = vpop.permute.xlu1 %4193  ;;  %v4192_v32 = vpop.permute.xlu0 %4191  ;;  %8485 = vst.sshfl [vmem:[#allocation2 + $0x378] sm:$0xc pattern:$0x76325410] %v11122_v42 }
 0x38e   :  { %v4212_v11 = vsel %vm719_vm4, %v4190_v28, %v4192_v32  ;;  %v4213_v58 = vsel %vm719_vm4, %v4192_v32, %v4194_v52 }
 0x38f   :  { %4236 = vst [vmem:[#allocation2 + $0x138] sm:$0xc] %v4212_v11  ;;  %4237 = vst [vmem:[#allocation2 + $0x140] sm:$0xc] %v4213_v58  ;;  %4802 = vrot.lane.b32.xlu1 %v11026_v25, %s8865_s30  ;;  %4800 = vrot.lane.b32.xlu0 %v11040_v53, %s8865_s30  ;;  %v4908_v11 = vrot.slane %v8838_v12, %v8921_v8 }
 0x391   :  { %v4198_v57 = vpop.permute.xlu1 %4197  ;;  %v4196_v55 = vpop.permute.xlu0 %4195 }
 0x392   :  { %v4214_v56 = vsel %vm719_vm4, %v4194_v52, %v4196_v55  ;;  %v4215_v14 = vsel %vm719_vm4, %v4196_v55, %v4198_v57 }
 0x393   :  { %4238 = vst [vmem:[#allocation2 + $0x148] sm:$0xc] %v4214_v56  ;;  %4239 = vst [vmem:[#allocation2 + $0x150] sm:$0xc] %v4215_v14  ;;  %4910 = vrot.lane.b32.xlu1 %v11055_v49, %s8866_s10  ;;  %4804 = vrot.lane.b32.xlu0 %v11063_v20, %s8865_s30 }
 0x395   :  { %v4202_v48 = vpop.permute.xlu1 %4201  ;;  %v4200_v18 = vpop.permute.xlu0 %4199 }
 0x396   :  { %v4216_v19 = vsel %vm719_vm4, %v4198_v57, %v4200_v18  ;;  %v4217_v2 = vsel %vm719_vm4, %v4200_v18, %v4202_v48  ;;  %v4909_v57 = vcombine.low %v4908_v11, %v4908_v11 }
 0x397   :  { %4240 = vst [vmem:[#allocation2 + $0x158] sm:$0xc] %v4216_v19  ;;  %4241 = vst [vmem:[#allocation2 + $0x160] sm:$0xc] %v4217_v2  ;;  %4914 = vrot.lane.b32.xlu1 %v10951_v45, %s8866_s10  ;;  %4912 = vrot.lane.b32.xlu0 %v11032_v41, %s8866_s10  ;;  %v11163_v19 = vcombine.high %v10954_v50, %v10954_v50 }
 0x399   :  { %v4206_v15 = vpop.permute.xlu1 %4205  ;;  %v4204_v54 = vpop.permute.xlu0 %4203 }
 0x39a   :  { %v4218_v21 = vsel %vm719_vm4, %v4202_v48, %v4204_v54  ;;  %v4219_v1 = vsel %vm719_vm4, %v4204_v54, %v4206_v15 }
 0x39b   :  { %4242 = vst [vmem:[#allocation2 + $0x168] sm:$0xc] %v4218_v21  ;;  %4243 = vst [vmem:[#allocation2 + $0x170] sm:$0xc] %v4219_v1  ;;  %4918 = vrot.lane.b32.xlu1 %v11095_v31, %s8866_s10  ;;  %4916 = vrot.lane.b32.xlu0 %v10938_v16, %s8866_s10 }
 0x39d   :  { %v4313_v44 = vpop.permute.xlu1 %4312  ;;  %v4208_v43 = vpop.permute.xlu0 %4207 }
 0x39e   :  { %v4220_v28 = vsel %vm719_vm4, %v4206_v15, %v4208_v43  ;;  %v11173_v15 = vcombine.high %v10973_v6, %v10973_v6 }
 0x39f   :  { %4244 = vst [vmem:[#allocation2 + $0x178] sm:$0xc] %v4220_v28  ;;  %4922 = vrot.lane.b32.xlu1 %v10985_v30, %s8866_s10  ;;  %4920 = vrot.lane.b32.xlu0 %v11075_v5, %s8866_s10  ;;  %v11189_v28 = vcombine.high %v11007_v13, %v11007_v13 }
 0x3a1   :  { %v4317_v37 = vpop.permute.xlu1 %4316  ;;  %v4315_v52 = vpop.permute.xlu0 %4314 }
 0x3a2   :  { %v4338_v32 = vsel %vm849_vm5, %v4313_v44, %v4315_v52  ;;  %v4339_v51 = vsel %vm849_vm5, %v4315_v52, %v4317_v37  ;;  %v5030_v52 = vcombine.high %v11026_v25, %v11026_v25 }
 0x3a3   :  { %4362 = vst [vmem:[#allocation2 + $0x120] sm:$0x30] %v4338_v32  ;;  %4363 = vst [vmem:[#allocation2 + $0x128] sm:$0x30] %v4339_v51  ;;  %4926 = vrot.lane.b32.xlu1 %v4899_v3, %s8866_s10  ;;  %4924 = vrot.lane.b32.xlu0 %v10973_v6, %s8866_s10 }
 0x3a5   :  { %v4321_v58 = vpop.permute.xlu1 %4320  ;;  %v4319_v60 = vpop.permute.xlu0 %4318 }
 0x3a6   :  { %v4340_v47 = vsel %vm849_vm5, %v4317_v37, %v4319_v60  ;;  %v4341_v9 = vsel %vm849_vm5, %v4319_v60, %v4321_v58 }
 0x3a7   :  { %4364 = vst [vmem:[#allocation2 + $0x130] sm:$0x30] %v4340_v47  ;;  %4365 = vst [vmem:[#allocation2 + $0x138] sm:$0x30] %v4341_v9  ;;  %4930 = vrot.lane.b32.xlu1 %v11023_v46, %s8866_s10  ;;  %4928 = vrot.lane.b32.xlu0 %v11115_v36, %s8866_s10 }
 0x3a9   :  { %v4325_v55 = vpop.permute.xlu1 %4324  ;;  %v4323_v26 = vpop.permute.xlu0 %4322 }
 0x3aa   :  { %v4342_v56 = vsel %vm849_vm5, %v4321_v58, %v4323_v26  ;;  %v4343_v14 = vsel %vm849_vm5, %v4323_v26, %v4325_v55  ;;  %v7019_v26 = vld [vmem:[#allocation2 + $0x68] sm:$0xff] }
 0x3ab   :  { %4366 = vst [vmem:[#allocation2 + $0x140] sm:$0x30] %v4342_v56  ;;  %4367 = vst [vmem:[#allocation2 + $0x148] sm:$0x30] %v4343_v14  ;;  %4934 = vrot.lane.b32.xlu1 %v4909_v57, %s8866_s10  ;;  %4932 = vrot.lane.b32.xlu0 %v11007_v13, %s8866_s10 }
 0x3ad   :  { %v4329_v29 = vpop.permute.xlu1 %4328  ;;  %v4327_v48 = vpop.permute.xlu0 %4326 }
 0x3ae   :  { %v4344_v18 = vsel %vm849_vm5, %v4325_v55, %v4327_v48  ;;  %v4345_v23 = vsel %vm849_vm5, %v4327_v48, %v4329_v29  ;;  %v11212_v48 = vcombine.high %v11032_v41, %v11032_v41 }
 0x3af   :  { %4368 = vst [vmem:[#allocation2 + $0x150] sm:$0x30] %v4344_v18  ;;  %4369 = vst [vmem:[#allocation2 + $0x158] sm:$0x30] %v4345_v23  ;;  %5040 = vrot.lane.b32.xlu1 %v11153_v4, %s8867_s17  ;;  %5038 = vrot.lane.b32.xlu0 %v10938_v16, %s8867_s17 }
 0x3b1   :  { %v4333_v2 = vpop.permute.xlu1 %4332  ;;  %v4331_v33 = vpop.permute.xlu0 %4330 }
 0x3b2   :  { %v4346_v59 = vsel %vm849_vm5, %v4329_v29, %v4331_v33  ;;  %v4347_v35 = vsel %vm849_vm5, %v4331_v33, %v4333_v2  ;;  %v7018_v29 = vld [vmem:[#allocation2 + $0x60] sm:$0xff] }
 0x3b3   :  { %4370 = vst [vmem:[#allocation2 + $0x160] sm:$0x30] %v4346_v59  ;;  %4371 = vst [vmem:[#allocation2 + $0x168] sm:$0x30] %v4347_v35  ;;  %5044 = vrot.lane.b32.xlu1 %v11163_v19, %s8867_s17  ;;  %5042 = vrot.lane.b32.xlu0 %v10954_v50, %s8867_s17 }
 0x3b5   :  { %v4337_v54 = vpop.permute.xlu1 %4336  ;;  %v4335_v34 = vpop.permute.xlu0 %4334 }
 0x3b6   :  { %v4348_v21 = vsel %vm849_vm5, %v4333_v2, %v4335_v34  ;;  %v4349_v1 = vsel %vm849_vm5, %v4335_v34, %v4337_v54  ;;  %v7021_v54 = vld [vmem:[#allocation2 + $0x78] sm:$0xff] }
 0x3b7   :  { %4372 = vst [vmem:[#allocation2 + $0x170] sm:$0x30] %v4348_v21  ;;  %4373 = vst [vmem:[#allocation2 + $0x178] sm:$0x30] %v4349_v1  ;;  %5048 = vrot.lane.b32.xlu1 %v11173_v15, %s8867_s17  ;;  %5046 = vrot.lane.b32.xlu0 %v10973_v6, %s8867_s17  ;;  %v7020_v21 = vld [vmem:[#allocation2 + $0x70] sm:$0xff] }
 0x3b9   :  { %v4445_v17 = vpop.permute.xlu1 %4444  ;;  %v4443_v44 = vpop.permute.xlu0 %4442 }
 0x3ba   :  { %v4468_v43 = vsel %vm980_vm6, %v4443_v44, %v4445_v17 }
 0x3bb   :  { %4492 = vst [vmem:[#allocation2 + $0x120] sm:$0xc0] %v4468_v43  ;;  %5052 = vrot.lane.b32.xlu1 %v5013_v61, %s8867_s17  ;;  %5050 = vrot.lane.b32.xlu0 %v10988_v38, %s8867_s17 }
 0x3bd   :  { %v4449_v3 = vpop.permute.xlu1 %4448  ;;  %v4447_v12 = vpop.permute.xlu0 %4446 }
 0x3be   :  { %v4469_v10 = vsel %vm980_vm6, %v4445_v17, %v4447_v12  ;;  %v4470_v37 = vsel %vm980_vm6, %v4447_v12, %v4449_v3 }
 0x3bf   :  { %4493 = vst [vmem:[#allocation2 + $0x128] sm:$0xc0] %v4469_v10  ;;  %4494 = vst [vmem:[#allocation2 + $0x130] sm:$0xc0] %v4470_v37  ;;  %5056 = vrot.lane.b32.xlu1 %v11189_v28, %s8867_s17  ;;  %5054 = vrot.lane.b32.xlu0 %v11007_v13, %s8867_s17 }
 0x3c1   :  { %v4453_v32 = vpop.permute.xlu1 %4452  ;;  %v4451_v51 = vpop.permute.xlu0 %4450 }
 0x3c2   :  { %v4471_v11 = vsel %vm980_vm6, %v4449_v3, %v4451_v51  ;;  %v4472_v58 = vsel %vm980_vm6, %v4451_v51, %v4453_v32  ;;  %v7042_v9 = vld [vmem:[#allocation2 + $0x120] sm:$0xff]  ;;  %v11228_v3 = vcombine.high %v11075_v5, %v11075_v5 }
 0x3c3   :  { %4495 = vst [vmem:[#allocation2 + $0x138] sm:$0xc0] %v4471_v11  ;;  %4496 = vst [vmem:[#allocation2 + $0x140] sm:$0xc0] %v4472_v58  ;;  %5060 = vrot.lane.b32.xlu1 %v5030_v52, %s8867_s17  ;;  %5058 = vrot.lane.b32.xlu0 %v11026_v25, %s8867_s17  ;;  %v8673_v18 = vpack.c.bf16 %v7042_v9, %v7018_v29  ;;  %v5157_v58 = vcombine.high %v11115_v36, %v11115_v36 }
 0x3c5   :  { %v4457_v60 = vpop.permute.xlu1 %4456  ;;  %v4455_v47 = vpop.permute.xlu0 %4454 }
 0x3c6   :  { %v4473_v57 = vsel %vm980_vm6, %v4453_v32, %v4455_v47  ;;  %v4474_v55 = vsel %vm980_vm6, %v4455_v47, %v4457_v60  ;;  %v7043_v56 = vld [vmem:[#allocation2 + $0x128] sm:$0xff]  ;;  %v7044_v33 = vld [vmem:[#allocation2 + $0x130] sm:$0xff] }
 0x3c7   :  { %4497 = vst [vmem:[#allocation2 + $0x148] sm:$0xc0] %v4473_v57  ;;  %4498 = vst [vmem:[#allocation2 + $0x150] sm:$0xc0] %v4474_v55  ;;  %5167 = vrot.lane.b32.xlu1 %v11032_v41, %s8868_s22  ;;  %5062 = vrot.lane.b32.xlu0 %v11045_v39, %s8867_s17  ;;  %v8671_v14 = vpack.c.bf16 %v7043_v56, %v7019_v26  ;;  %v8685_v1 = vpack.c.bf16 %v7044_v33, %v7020_v21 }
 0x3c9   :  { %v4461_v23 = vpop.permute.xlu1 %4460  ;;  %v4459_v2 = vpop.permute.xlu0 %4458  ;;  %8672 = vmatprep.subr.bf16.mxu0 %v8671_v14 }
 0x3ca   :  { %v4475_v59 = vsel %vm980_vm6, %v4457_v60, %v4459_v2  ;;  %v4476_v35 = vsel %vm980_vm6, %v4459_v2, %v4461_v23  ;;  %8674 = vmatpush1.bf16.msra.mxu0 %v8673_v18  ;;  %v7045_v34 = vld [vmem:[#allocation2 + $0x138] sm:$0xff] }
 0x3cb   :  { %4499 = vst [vmem:[#allocation2 + $0x158] sm:$0xc0] %v4475_v59  ;;  %4500 = vst [vmem:[#allocation2 + $0x160] sm:$0xc0] %v4476_v35  ;;  %5171 = vrot.lane.b32.xlu1 %v10938_v16, %s8868_s22  ;;  %5169 = vrot.lane.b32.xlu0 %v11212_v48, %s8868_s22  ;;  %v8683_v39 = vpack.c.bf16 %v7045_v34, %v7021_v54 }
 0x3cc   :  { %v8839_v60 = vld [vmem:[%s12353_s0 + $0x3e] ss:$0 sps:$4 sm:$0x33]  }
 0x3cd   :  { %v4465_v61 = vpop.permute.xlu1 %4464  ;;  %v4463_v17 = vpop.permute.xlu0 %4462  ;;  %8684 = vmatprep.subr.bf16.mxu1 %v8683_v39  ;;  %v5166_v26 = vrot.slane %v8839_v60, %v8921_v8 }
 0x3ce   :  { %v4477_v44 = vsel %vm980_vm6, %v4461_v23, %v4463_v17  ;;  %v4478_v43 = vsel %vm980_vm6, %v4463_v17, %v4465_v61  ;;  %8686 = vmatpush1.bf16.msra.mxu1 %v8685_v1 }
 0x3cf   :  { %4501 = vst [vmem:[#allocation2 + $0x168] sm:$0xc0] %v4477_v44  ;;  %4502 = vst [vmem:[#allocation2 + $0x170] sm:$0xc0] %v4478_v43  ;;  %5175 = vrot.lane.b32.xlu1 %v11075_v5, %s8868_s22  ;;  %5173 = vrot.lane.b32.xlu0 %v11153_v4, %s8868_s22 }
 0x3d1   :  { %v4571_v12 = vpop.permute.xlu1 %4570  ;;  %v4467_v10 = vpop.permute.xlu0 %4466 }
 0x3d2   :  { %v4479_v37 = vsel %vm980_vm6, %v4465_v61, %v4467_v10 }
 0x3d3   :  { %4503 = vst [vmem:[#allocation2 + $0x178] sm:$0xc0] %v4479_v37  ;;  %5179 = vrot.lane.b32.xlu1 %v10973_v6, %s8868_s22  ;;  %5177 = vrot.lane.b32.xlu0 %v11228_v3, %s8868_s22 }
 0x3d5   :  { %v4575_v52 = vpop.permute.xlu1 %4574  ;;  %v4573_v32 = vpop.permute.xlu0 %4572 }
 0x3d6   :  { %v4596_v51 = vsel %vm1109_vm7, %v4571_v12, %v4573_v32  ;;  %v4597_v11 = vsel %vm1109_vm7, %v4573_v32, %v4575_v52 }
 0x3d7   :  { %4620 = vst [vmem:[#allocation2 + $0x1e0] sm:$0x3] %v4596_v51  ;;  %4621 = vst [vmem:[#allocation2 + $0x1e8] sm:$0x3] %v4597_v11  ;;  %5183 = vrot.lane.b32.xlu1 %v11115_v36, %s8868_s22  ;;  %5181 = vrot.lane.b32.xlu0 %v11173_v15, %s8868_s22 }
 0x3d9   :  { %v4579_v47 = vpop.permute.xlu1 %4578  ;;  %v4577_v9 = vpop.permute.xlu0 %4576 }
 0x3da   :  { %v4598_v57 = vsel %vm1109_vm7, %v4575_v52, %v4577_v9  ;;  %v4599_v55 = vsel %vm1109_vm7, %v4577_v9, %v4579_v47 }
 0x3db   :  { %4622 = vst [vmem:[#allocation2 + $0x1f0] sm:$0x3] %v4598_v57  ;;  %4623 = vst [vmem:[#allocation2 + $0x1f8] sm:$0x3] %v4599_v55  ;;  %5187 = vrot.lane.b32.xlu1 %v11007_v13, %s8868_s22  ;;  %5185 = vrot.lane.b32.xlu0 %v5157_v58, %s8868_s22 }
 0x3dd   :  { %v4583_v36 = vpop.permute.xlu1 %4582  ;;  %v4581_v56 = vpop.permute.xlu0 %4580 }
 0x3de   :  { %v4600_v14 = vsel %vm1109_vm7, %v4579_v47, %v4581_v56  ;;  %v4601_v29 = vsel %vm1109_vm7, %v4581_v56, %v4583_v36 }
 0x3df   :  { %4624 = vst [vmem:[#allocation2 + $0x200] sm:$0x3] %v4600_v14  ;;  %4625 = vst [vmem:[#allocation2 + $0x208] sm:$0x3] %v4601_v29  ;;  %5191 = vrot.lane.b32.xlu1 %v5166_v26, %s8868_s22  ;;  %5189 = vrot.lane.b32.xlu0 %v11189_v28, %s8868_s22  ;;  %v11323_v14 = vrot.slane %v11122_v42, %v8921_v8  ;;  %v11340_v42 = vld [vmem:[%s12353_s0 + $0x32] sm:$0xff] }
 0x3e1   :  { %v4587_v18 = vpop.permute.xlu1 %4586  ;;  %v4585_v23 = vpop.permute.xlu0 %4584 }
 0x3e2   :  { %v4602_v2 = vsel %vm1109_vm7, %v4583_v36, %v4585_v23  ;;  %v4603_v33 = vsel %vm1109_vm7, %v4585_v23, %v4587_v18 }
 0x3e3   :  { %4626 = vst [vmem:[#allocation2 + $0x210] sm:$0x3] %v4602_v2  ;;  %4627 = vst [vmem:[#allocation2 + $0x218] sm:$0x3] %v4603_v33  ;;  %5298 = vrot.lane.b32.xlu1 %v10938_v16, %s8869_s23  ;;  %5296 = vrot.lane.b32.xlu0 %v10951_v45, %s8869_s23  ;;  %v5851_v33 = vcombine.low %v11340_v42, %v11340_v42 }
 0x3e5   :  { %v4591_v59 = vpop.permute.xlu1 %4590  ;;  %v4589_v35 = vpop.permute.xlu0 %4588 }
 0x3e6   :  { %v4604_v54 = vsel %vm1109_vm7, %v4587_v18, %v4589_v35  ;;  %v4605_v28 = vsel %vm1109_vm7, %v4589_v35, %v4591_v59 }
 0x3e7   :  { %4628 = vst [vmem:[#allocation2 + $0x220] sm:$0x3] %v4604_v54  ;;  %4629 = vst [vmem:[#allocation2 + $0x228] sm:$0x3] %v4605_v28  ;;  %5302 = vrot.lane.b32.xlu1 %v10954_v50, %s8869_s23  ;;  %5300 = vrot.lane.b32.xlu0 %v10969_v27, %s8869_s23 }
 0x3e9   :  { %v4595_v34 = vpop.permute.xlu1 %4594  ;;  %v4593_v39 = vpop.permute.xlu0 %4592 }
 0x3ea   :  { %v4606_v21 = vsel %vm1109_vm7, %v4591_v59, %v4593_v39  ;;  %v4607_v1 = vsel %vm1109_vm7, %v4593_v39, %v4595_v34 }
 0x3eb   :  { %4630 = vst [vmem:[#allocation2 + $0x230] sm:$0x3] %v4606_v21  ;;  %4631 = vst [vmem:[#allocation2 + $0x238] sm:$0x3] %v4607_v1  ;;  %5306 = vrot.lane.b32.xlu1 %v10973_v6, %s8869_s23  ;;  %5304 = vrot.lane.b32.xlu0 %v10985_v30, %s8869_s23 }
 0x3ed   :  { %v4783_v61 = vpop.permute.xlu1 %4782  ;;  %v4781_v17 = vpop.permute.xlu0 %4780 }
 0x3ee   :  { %v4806_v44 = vsel %vm199_vm0, %v4781_v17, %v4783_v61 }
 0x3ef   :  { %4830 = vst [vmem:[#allocation2 + $0x1e0] sm:$0x30] %v4806_v44  ;;  %5310 = vrot.lane.b32.xlu1 %v10988_v38, %s8869_s23  ;;  %5308 = vrot.lane.b32.xlu0 %v11003_v63, %s8869_s23 }
 0x3f1   :  { %v4787_v27 = vpop.permute.xlu1 %4786  ;;  %v4785_v43 = vpop.permute.xlu0 %4784 }
 0x3f2   :  { %v4807_v12 = vsel %vm199_vm0, %v4783_v61, %v4785_v43  ;;  %v4808_v10 = vsel %vm199_vm0, %v4785_v43, %v4787_v27 }
 0x3f3   :  { %4831 = vst [vmem:[#allocation2 + $0x1e8] sm:$0x30] %v4807_v12  ;;  %4832 = vst [vmem:[#allocation2 + $0x1f0] sm:$0x30] %v4808_v10  ;;  %5314 = vrot.lane.b32.xlu1 %v11007_v13, %s8869_s23  ;;  %5312 = vrot.lane.b32.xlu0 %v11023_v46, %s8869_s23  ;;  %v11385_v12 = vcombine.high %v11323_v14, %v11323_v14 }
 0x3f5   :  { %v4791_v30 = vpop.permute.xlu1 %4790  ;;  %v4789_v37 = vpop.permute.xlu0 %4788 }
 0x3f6   :  { %v4809_v38 = vsel %vm199_vm0, %v4787_v27, %v4789_v37  ;;  %v4810_v63 = vsel %vm199_vm0, %v4789_v37, %v4791_v30 }
 0x3f7   :  { %4833 = vst [vmem:[#allocation2 + $0x1f8] sm:$0x30] %v4809_v38  ;;  %4834 = vst [vmem:[#allocation2 + $0x200] sm:$0x30] %v4810_v63  ;;  %5318 = vrot.lane.b32.xlu1 %v11026_v25, %s8869_s23  ;;  %5316 = vrot.lane.b32.xlu0 %v11040_v53, %s8869_s23  ;;  %v11398_v63 = vrot.slane %v11340_v42, %v8921_v8 }
 0x3f9   :  { %v4795_v52 = vpop.permute.xlu1 %4794  ;;  %v4793_v32 = vpop.permute.xlu0 %4792 }
 0x3fa   :  { %v4811_v13 = vsel %vm199_vm0, %v4791_v30, %v4793_v32  ;;  %v4812_v46 = vsel %vm199_vm0, %v4793_v32, %v4795_v52 }
 0x3fb   :  { %4835 = vst [vmem:[#allocation2 + $0x208] sm:$0x30] %v4811_v13  ;;  %4836 = vst [vmem:[#allocation2 + $0x210] sm:$0x30] %v4812_v46  ;;  %5426 = vrot.lane.b32.xlu1 %v11055_v49, %s8870_s26  ;;  %5320 = vrot.lane.b32.xlu0 %v11063_v20, %s8869_s23 }
 0x3fd   :  { %v4799_v51 = vpop.permute.xlu1 %4798  ;;  %v4797_v11 = vpop.permute.xlu0 %4796 }
 0x3fe   :  { %v4813_v25 = vsel %vm199_vm0, %v4795_v52, %v4797_v11  ;;  %v4814_v53 = vsel %vm199_vm0, %v4797_v11, %v4799_v51 }
 0x3ff   :  { %4837 = vst [vmem:[#allocation2 + $0x218] sm:$0x30] %v4813_v25  ;;  %4838 = vst [vmem:[#allocation2 + $0x220] sm:$0x30] %v4814_v53  ;;  %5430 = vrot.lane.b32.xlu1 %v10951_v45, %s8870_s26  ;;  %5428 = vrot.lane.b32.xlu0 %v11032_v41, %s8870_s26 }
 0x401   :  { %v4803_v58 = vpop.permute.xlu1 %4802  ;;  %v4801_v60 = vpop.permute.xlu0 %4800 }
 0x402   :  { %v4815_v49 = vsel %vm199_vm0, %v4799_v51, %v4801_v60  ;;  %v4816_v20 = vsel %vm199_vm0, %v4801_v60, %v4803_v58 }
 0x403   :  { %4839 = vst [vmem:[#allocation2 + $0x228] sm:$0x30] %v4815_v49  ;;  %4840 = vst [vmem:[#allocation2 + $0x230] sm:$0x30] %v4816_v20  ;;  %5434 = vrot.lane.b32.xlu1 %v11095_v31, %s8870_s26  ;;  %5432 = vrot.lane.b32.xlu0 %v10938_v16, %s8870_s26 }
 0x405   :  { %v4911_v47 = vpop.permute.xlu1 %4910  ;;  %v4805_v9 = vpop.permute.xlu0 %4804 }
 0x406   :  { %v4817_v45 = vsel %vm199_vm0, %v4803_v58, %v4805_v9 }
 0x407   :  { %4841 = vst [vmem:[#allocation2 + $0x238] sm:$0x30] %v4817_v45  ;;  %5556 = vrot.lane.b32.xlu1 %v11153_v4, %s8871_s27  ;;  %5436 = vrot.lane.b32.xlu0 %v11075_v5, %s8870_s26 }
 0x409   :  { %v4915_v57 = vpop.permute.xlu1 %4914  ;;  %v4913_v55 = vpop.permute.xlu0 %4912 }
 0x40a   :  { %v4936_v26 = vsel %vm329_vm1, %v4911_v47, %v4913_v55  ;;  %v4937_v31 = vsel %vm329_vm1, %v4913_v55, %v4915_v57  ;;  %v11426_v55 = vcombine.low %v11398_v63, %v11398_v63 }
 0x40b   :  { %4960 = vst [vmem:[#allocation2 + $0x1e0] sm:$0xc0] %v4936_v26  ;;  %4961 = vst [vmem:[#allocation2 + $0x1e8] sm:$0xc0] %v4937_v31  ;;  %5560 = vrot.lane.b32.xlu1 %v11163_v19, %s8871_s27  ;;  %5558 = vrot.lane.b32.xlu0 %v10954_v50, %s8871_s27  ;;  %v5834_v50 = vcombine.low %v11080_v0, %v11080_v0  ;;  %v11335_v19 = vcombine.low %v11323_v14, %v11323_v14 }
 0x40d   :  { %v4919_v36 = vpop.permute.xlu1 %4918  ;;  %v4917_v56 = vpop.permute.xlu0 %4916  ;;  %5816 = vst [vmem:[#allocation2 + $0x370] sm:$0x30] %v11335_v19  ;;  %v11350_v0 = vrot.slane %v5834_v50, %v8921_v8 }
 0x40e   :  { %v4938_v29 = vsel %vm329_vm1, %v4915_v57, %v4917_v56  ;;  %v4939_v18 = vsel %vm329_vm1, %v4917_v56, %v4919_v36 }
 0x40f   :  { %4962 = vst [vmem:[#allocation2 + $0x1f0] sm:$0xc0] %v4938_v29  ;;  %4963 = vst [vmem:[#allocation2 + $0x1f8] sm:$0xc0] %v4939_v18  ;;  %5685 = vrot.lane.b32.xlu1 %v11212_v48, %s8872_s8  ;;  %5562 = vrot.lane.b32.xlu0 %v10973_v6, %s8871_s27  ;;  %v11394_v38 = vcombine.high %v11350_v0, %v11350_v0 }
 0x411   :  { %v4923_v23 = vpop.permute.xlu1 %4922  ;;  %v4921_v2 = vpop.permute.xlu0 %4920 }
 0x412   :  { %v4940_v48 = vsel %vm329_vm1, %v4919_v36, %v4921_v2  ;;  %v4941_v6 = vsel %vm329_vm1, %v4921_v2, %v4923_v23 }
 0x413   :  { %4964 = vst [vmem:[#allocation2 + $0x200] sm:$0xc0] %v4940_v48  ;;  %4965 = vst [vmem:[#allocation2 + $0x208] sm:$0xc0] %v4941_v6  ;;  %5689 = vrot.lane.b32.xlu1 %v11153_v4, %s8872_s8  ;;  %5687 = vrot.lane.b32.xlu0 %v10938_v16, %s8872_s8  ;;  %v11361_v4 = vrot.slane %v5851_v33, %v8921_v8  ;;  %v5849_v33 = vcombine.low %v11350_v0, %v11350_v0 }
 0x415   :  { %v4927_v59 = vpop.permute.xlu1 %4926  ;;  %v4925_v35 = vpop.permute.xlu0 %4924  ;;  %v11375_v61 = vcombine.low %v11361_v4, %v11361_v4 }
 0x416   :  { %v4942_v54 = vsel %vm329_vm1, %v4923_v23, %v4925_v35  ;;  %v4943_v28 = vsel %vm329_vm1, %v4925_v35, %v4927_v59 }
 0x417   :  { %4966 = vst [vmem:[#allocation2 + $0x210] sm:$0xc0] %v4942_v54  ;;  %4967 = vst [vmem:[#allocation2 + $0x218] sm:$0xc0] %v4943_v28  ;;  %5896 = vrot.lane.b32.xlu1 %v11350_v0, %s8865_s30  ;;  %5691 = vrot.lane.b32.xlu0 %v11075_v5, %s8872_s8  ;;  %v11371_v5 = vcombine.high %v11101_v7, %v11101_v7 }
 0x419   :  { %v4931_v34 = vpop.permute.xlu1 %4930  ;;  %v4929_v39 = vpop.permute.xlu0 %4928 }
 0x41a   :  { %v4944_v21 = vsel %vm329_vm1, %v4927_v59, %v4929_v39  ;;  %v4945_v1 = vsel %vm329_vm1, %v4929_v39, %v4931_v34 }
 0x41b   :  { %4968 = vst [vmem:[#allocation2 + $0x220] sm:$0xc0] %v4944_v21  ;;  %4969 = vst [vmem:[#allocation2 + $0x228] sm:$0xc0] %v4945_v1  ;;  %5900 = vrot.lane.b32.xlu1 %v11101_v7, %s8865_s30  ;;  %5898 = vrot.lane.b32.xlu0 %v11108_v24, %s8865_s30 }
 0x41d   :  { %v4935_v17 = vpop.permute.xlu1 %4934  ;;  %v4933_v44 = vpop.permute.xlu0 %4932 }
 0x41e   :  { %v4946_v27 = vsel %vm329_vm1, %v4931_v34, %v4933_v44  ;;  %v4947_v43 = vsel %vm329_vm1, %v4933_v44, %v4935_v17 }
 0x41f   :  { %4970 = vst [vmem:[#allocation2 + $0x230] sm:$0xc0] %v4946_v27  ;;  %4971 = vst [vmem:[#allocation2 + $0x238] sm:$0xc0] %v4947_v43  ;;  %6024 = vrot.lane.b32.xlu1 %v11371_v5, %s8866_s10  ;;  %5902 = vrot.lane.b32.xlu0 %v11375_v61, %s8865_s30 }
 0x421   :  { %v5041_v10 = vpop.permute.xlu1 %5040  ;;  %v5039_v30 = vpop.permute.xlu0 %5038 }
 0x422   :  { %v5064_v37 = vsel %vm460_vm2, %v5039_v30, %v5041_v10 }
 0x423   :  { %5088 = vst [vmem:[#allocation2 + $0x2a0] sm:$0x3] %v5064_v37  ;;  %6028 = vrot.lane.b32.xlu1 %v11385_v12, %s8866_s10  ;;  %6026 = vrot.lane.b32.xlu0 %v11323_v14, %s8866_s10 }
 0x425   :  { %v5045_v52 = vpop.permute.xlu1 %5044  ;;  %v5043_v32 = vpop.permute.xlu0 %5042 }
 0x426   :  { %v5065_v13 = vsel %vm460_vm2, %v5041_v10, %v5043_v32  ;;  %v5066_v46 = vsel %vm460_vm2, %v5043_v32, %v5045_v52 }
 0x427   :  { %5089 = vst [vmem:[#allocation2 + $0x2a8] sm:$0x3] %v5065_v13  ;;  %5090 = vst [vmem:[#allocation2 + $0x2b0] sm:$0x3] %v5066_v46  ;;  %6153 = vrot.lane.b32.xlu1 %v11394_v38, %s8867_s17  ;;  %6030 = vrot.lane.b32.xlu0 %v11398_v63, %s8866_s10 }
 0x429   :  { %v5049_v51 = vpop.permute.xlu1 %5048  ;;  %v5047_v11 = vpop.permute.xlu0 %5046 }
 0x42a   :  { %v5067_v25 = vsel %vm460_vm2, %v5045_v52, %v5047_v11  ;;  %v5068_v53 = vsel %vm460_vm2, %v5047_v11, %v5049_v51 }
 0x42b   :  { %5091 = vst [vmem:[#allocation2 + $0x2b8] sm:$0x3] %v5067_v25  ;;  %5092 = vst [vmem:[#allocation2 + $0x2c0] sm:$0x3] %v5068_v53  ;;  %6157 = vrot.lane.b32.xlu1 %v11371_v5, %s8867_s17  ;;  %6155 = vrot.lane.b32.xlu0 %v11101_v7, %s8867_s17 }
 0x42d   :  { %v5053_v58 = vpop.permute.xlu1 %5052  ;;  %v5051_v60 = vpop.permute.xlu0 %5050 }
 0x42e   :  { %v5069_v49 = vsel %vm460_vm2, %v5049_v51, %v5051_v60  ;;  %v5070_v20 = vsel %vm460_vm2, %v5051_v60, %v5053_v58 }
 0x42f   :  { %5093 = vst [vmem:[#allocation2 + $0x2c8] sm:$0x3] %v5069_v49  ;;  %5094 = vst [vmem:[#allocation2 + $0x2d0] sm:$0x3] %v5070_v20  ;;  %6282 = vrot.lane.b32.xlu1 %v11101_v7, %s8868_s22  ;;  %6159 = vrot.lane.b32.xlu0 %v11361_v4, %s8867_s17  ;;  %v11495_v20 = vld [vmem:[%s12353_s0 + $0x36] sm:$0xff] }
 0x431   :  { %v5057_v47 = vpop.permute.xlu1 %5056  ;;  %v5055_v9 = vpop.permute.xlu0 %5054 }
 0x432   :  { %v5071_v45 = vsel %vm460_vm2, %v5053_v58, %v5055_v9  ;;  %v5072_v57 = vsel %vm460_vm2, %v5055_v9, %v5057_v47 }
 0x433   :  { %5095 = vst [vmem:[#allocation2 + $0x2d8] sm:$0x3] %v5071_v45  ;;  %5096 = vst [vmem:[#allocation2 + $0x2e0] sm:$0x3] %v5072_v57  ;;  %6286 = vrot.lane.b32.xlu1 %v11323_v14, %s8868_s22  ;;  %6284 = vrot.lane.b32.xlu0 %v11335_v19, %s8868_s22 }
 0x435   :  { %v5061_v26 = vpop.permute.xlu1 %5060  ;;  %v5059_v31 = vpop.permute.xlu0 %5058 }
 0x436   :  { %v5073_v36 = vsel %vm460_vm2, %v5057_v47, %v5059_v31  ;;  %v5074_v56 = vsel %vm460_vm2, %v5059_v31, %v5061_v26 }
 0x437   :  { %5097 = vst [vmem:[#allocation2 + $0x2e8] sm:$0x3] %v5073_v36  ;;  %5098 = vst [vmem:[#allocation2 + $0x2f0] sm:$0x3] %v5074_v56  ;;  %6412 = vrot.lane.b32.xlu1 %v11350_v0, %s8869_s23  ;;  %6288 = vrot.lane.b32.xlu0 %v11426_v55, %s8868_s22 }
 0x439   :  { %v5168_v29 = vpop.permute.xlu1 %5167  ;;  %v5063_v18 = vpop.permute.xlu0 %5062 }
 0x43a   :  { %v5075_v50 = vsel %vm460_vm2, %v5061_v26, %v5063_v18  ;;  %v5400_v26 = vcombine.low %v11495_v20, %v11495_v20 }
 0x43b   :  { %5099 = vst [vmem:[#allocation2 + $0x2f8] sm:$0x3] %v5075_v50  ;;  %6416 = vrot.lane.b32.xlu1 %v11101_v7, %s8869_s23  ;;  %6414 = vrot.lane.b32.xlu0 %v11108_v24, %s8869_s23 }
 0x43c   :  { %v11520_v18 = vrot.slane %v5400_v26, %v8921_v8 }
 0x43d   :  { %v5172_v23 = vpop.permute.xlu1 %5171  ;;  %v5170_v2 = vpop.permute.xlu0 %5169 }
 0x43e   :  { %v5193_v48 = vsel %vm589_vm3, %v5168_v29, %v5170_v2  ;;  %v5194_v6 = vsel %vm589_vm3, %v5170_v2, %v5172_v23 }
 0x43f   :  { %5217 = vst [vmem:[#allocation2 + $0x2a0] sm:$0xc] %v5193_v48  ;;  %5218 = vst [vmem:[#allocation2 + $0x2a8] sm:$0xc] %v5194_v6  ;;  %5554 = vrot.lane.b32.xlu1 %v10938_v16, %s8871_s27  ;;  %6418 = vrot.lane.b32.xlu0 %v11375_v61, %s8869_s23 }
 0x441   :  { %v5176_v59 = vpop.permute.xlu1 %5175  ;;  %v5174_v35 = vpop.permute.xlu0 %5173 }
 0x442   :  { %v5195_v54 = vsel %vm589_vm3, %v5172_v23, %v5174_v35  ;;  %v5196_v28 = vsel %vm589_vm3, %v5174_v35, %v5176_v59 }
 0x443   :  { %5219 = vst [vmem:[#allocation2 + $0x2b0] sm:$0xc] %v5195_v54  ;;  %5220 = vst [vmem:[#allocation2 + $0x2b8] sm:$0xc] %v5196_v28  ;;  %5894 = vrot.lane.b32.xlu1 %v5849_v33, %s8865_s30  ;;  %5683 = vrot.lane.b32.xlu0 %v11032_v41, %s8872_s8 }
 0x445   :  { %v5180_v16 = vpop.permute.xlu1 %5179  ;;  %v5178_v34 = vpop.permute.xlu0 %5177 }
 0x446   :  { %v5197_v39 = vsel %vm589_vm3, %v5176_v59, %v5178_v34  ;;  %v5198_v21 = vsel %vm589_vm3, %v5178_v34, %v5180_v16  ;;  %v11541_v34 = vrot.slane %v11495_v20, %v8921_v8 }
 0x447   :  { %5221 = vst [vmem:[#allocation2 + $0x2c0] sm:$0xc] %v5197_v39  ;;  %5222 = vst [vmem:[#allocation2 + $0x2c8] sm:$0xc] %v5198_v21  ;;  %6151 = vrot.lane.b32.xlu1 %v11350_v0, %s8867_s17  ;;  %6022 = vrot.lane.b32.xlu0 %v11101_v7, %s8866_s10 }
 0x449   :  { %v5184_v1 = vpop.permute.xlu1 %5183  ;;  %v5182_v61 = vpop.permute.xlu0 %5181 }
 0x44a   :  { %v5199_v17 = vsel %vm589_vm3, %v5180_v16, %v5182_v61  ;;  %v5200_v41 = vsel %vm589_vm3, %v5182_v61, %v5184_v1 }
 0x44b   :  { %5223 = vst [vmem:[#allocation2 + $0x2d0] sm:$0xc] %v5199_v17  ;;  %5224 = vst [vmem:[#allocation2 + $0x2d8] sm:$0xc] %v5200_v41  ;;  %6410 = vrot.lane.b32.xlu1 %v5849_v33, %s8869_s23  ;;  %6280 = vrot.lane.b32.xlu0 %v11108_v24, %s8868_s22  ;;  %v5783_v41 = vcombine.low %v10635_v62, %v10635_v62 }
 0x44d   :  { %v5188_v44 = vpop.permute.xlu1 %5187  ;;  %v5186_v27 = vpop.permute.xlu0 %5185  ;;  %5818 = vst [vmem:[#allocation2 + $0x380] sm:$0x30] %v5783_v41 }
 0x44e   :  { %v5201_v43 = vsel %vm589_vm3, %v5184_v1, %v5186_v27  ;;  %v5202_v10 = vsel %vm589_vm3, %v5186_v27, %v5188_v44 }
 0x44f   :  { %5225 = vst [vmem:[#allocation2 + $0x2e0] sm:$0xc] %v5201_v43  ;;  %5226 = vst [vmem:[#allocation2 + $0x2e8] sm:$0xc] %v5202_v10  ;;  %6542 = vrot.lane.b32.xlu1 %v11323_v14, %s8870_s26  ;;  %6540 = vrot.lane.b32.xlu0 %v11371_v5, %s8870_s26  ;;  %v7067_v43 = vld [vmem:[#allocation2 + $0x1e8] sm:$0xff] }
 0x451   :  { %v5192_v30 = vpop.permute.xlu1 %5191  ;;  %v5190_v37 = vpop.permute.xlu0 %5189 }
 0x452   :  { %v5203_v52 = vsel %vm589_vm3, %v5188_v44, %v5190_v37  ;;  %v5204_v32 = vsel %vm589_vm3, %v5190_v37, %v5192_v30  ;;  %v7066_v30 = vld [vmem:[#allocation2 + $0x1e0] sm:$0xff] }
 0x453   :  { %5227 = vst [vmem:[#allocation2 + $0x2f0] sm:$0xc] %v5203_v52  ;;  %5228 = vst [vmem:[#allocation2 + $0x2f8] sm:$0xc] %v5204_v32  ;;  %6546 = vrot.lane.b32.xlu1 %v11398_v63, %s8870_s26  ;;  %6544 = vrot.lane.b32.xlu0 %v11385_v12, %s8870_s26  ;;  %v5784_v32 = vcombine.low %v10647_v40, %v10647_v40 }
 0x455   :  { %v5299_v13 = vpop.permute.xlu1 %5298  ;;  %v5297_v46 = vpop.permute.xlu0 %5296  ;;  %5820 = vst [vmem:[#allocation2 + $0x390] sm:$0x30] %v5784_v32 }
 0x456   :  { %v5322_v51 = vsel %vm719_vm4, %v5297_v46, %v5299_v13 }
 0x457   :  { %5346 = vst [vmem:[#allocation2 + $0x2a0] sm:$0x30] %v5322_v51  ;;  %6671 = vrot.lane.b32.xlu1 %v11101_v7, %s8871_s27  ;;  %6669 = vrot.lane.b32.xlu0 %v11394_v38, %s8871_s27 }
 0x459   :  { %v5303_v11 = vpop.permute.xlu1 %5302  ;;  %v5301_v25 = vpop.permute.xlu0 %5300 }
 0x45a   :  { %v5323_v53 = vsel %vm719_vm4, %v5299_v13, %v5301_v25  ;;  %v5324_v58 = vsel %vm719_vm4, %v5301_v25, %v5303_v11 }
 0x45b   :  { %5347 = vst [vmem:[#allocation2 + $0x2a8] sm:$0x30] %v5323_v53  ;;  %5348 = vst [vmem:[#allocation2 + $0x2b0] sm:$0x30] %v5324_v58  ;;  %6675 = vrot.lane.b32.xlu1 %v11361_v4, %s8871_s27  ;;  %6673 = vrot.lane.b32.xlu0 %v11371_v5, %s8871_s27  ;;  %v7069_v53 = vld [vmem:[#allocation2 + $0x1f8] sm:$0xff] }
 0x45d   :  { %v5307_v12 = vpop.permute.xlu1 %5306  ;;  %v5305_v60 = vpop.permute.xlu0 %5304 }
 0x45e   :  { %v5325_v49 = vsel %vm719_vm4, %v5303_v11, %v5305_v60  ;;  %v5326_v38 = vsel %vm719_vm4, %v5305_v60, %v5307_v12  ;;  %v7068_v60 = vld [vmem:[#allocation2 + $0x1f0] sm:$0xff] }
 0x45f   :  { %5349 = vst [vmem:[#allocation2 + $0x2b8] sm:$0x30] %v5325_v49  ;;  %5350 = vst [vmem:[#allocation2 + $0x2c0] sm:$0x30] %v5326_v38  ;;  %6800 = vrot.lane.b32.xlu1 %v11335_v19, %s8872_s8  ;;  %6798 = vrot.lane.b32.xlu0 %v11101_v7, %s8872_s8  ;;  %v8862_v19 = vld [vmem:[%s12353_s0 + $0x2e] sm:$0xff] }
 0x460   :  { %v11507_v57 = vrot.slane %v8862_v19, %v8921_v8 }
 0x461   :  { %v5311_v5 = vpop.permute.xlu1 %5310  ;;  %v5309_v47 = vpop.permute.xlu0 %5308 }
 0x462   :  { %v5327_v9 = vsel %vm719_vm4, %v5307_v12, %v5309_v47  ;;  %v5328_v45 = vsel %vm719_vm4, %v5309_v47, %v5311_v5  ;;  %v5657_v52 = vcombine.high %v11507_v57, %v11507_v57 }
 0x463   :  { %5351 = vst [vmem:[#allocation2 + $0x2c8] sm:$0x30] %v5327_v9  ;;  %5352 = vst [vmem:[#allocation2 + $0x2d0] sm:$0x30] %v5328_v45  ;;  %6804 = vrot.lane.b32.xlu1 %v11426_v55, %s8872_s8  ;;  %6802 = vrot.lane.b32.xlu0 %v11323_v14, %s8872_s8  ;;  %v5399_v14 = vcombine.low %v11507_v57, %v11507_v57 }
 0x465   :  { %v5315_v31 = vpop.permute.xlu1 %5314  ;;  %v5313_v36 = vpop.permute.xlu0 %5312 }
 0x466   :  { %v5329_v56 = vsel %vm719_vm4, %v5311_v5, %v5313_v36  ;;  %v5330_v29 = vsel %vm719_vm4, %v5313_v36, %v5315_v31 }
 0x467   :  { %5353 = vst [vmem:[#allocation2 + $0x2d8] sm:$0x30] %v5329_v56  ;;  %5354 = vst [vmem:[#allocation2 + $0x2e0] sm:$0x30] %v5330_v29  ;;  %6667 = vrot.lane.b32.xlu1 %v11350_v0, %s8871_s27  ;;  %6538 = vrot.lane.b32.xlu0 %v11101_v7, %s8870_s26  ;;  %v5415_v7 = vcombine.low %v11520_v18, %v11520_v18  ;;  %v5513_v0 = vcombine.high %v8862_v19, %v8862_v19 }
 0x469   :  { %v5319_v50 = vpop.permute.xlu1 %5318  ;;  %v5317_v23 = vpop.permute.xlu0 %5316  ;;  %v5527_v35 = vrot.slane %v5513_v0, %v8921_v8 }
 0x46a   :  { %v5331_v2 = vsel %vm719_vm4, %v5315_v31, %v5317_v23  ;;  %v5332_v48 = vsel %vm719_vm4, %v5317_v23, %v5319_v50 }
 0x46b   :  { %5355 = vst [vmem:[#allocation2 + $0x2e8] sm:$0x30] %v5331_v2  ;;  %5356 = vst [vmem:[#allocation2 + $0x2f0] sm:$0x30] %v5332_v48  ;;  %5438 = vrot.lane.b32.xlu1 %v5399_v14, %s8870_s26  ;;  %6796 = vrot.lane.b32.xlu0 %v11108_v24, %s8872_s8  ;;  %v5529_v39 = vcombine.high %v5527_v35, %v5527_v35 }
 0x46d   :  { %v5427_v6 = vpop.permute.xlu1 %5426  ;;  %v5321_v33 = vpop.permute.xlu0 %5320 }
 0x46e   :  { %v5333_v59 = vsel %vm719_vm4, %v5319_v50, %v5321_v33 }
 0x46f   :  { %5357 = vst [vmem:[#allocation2 + $0x2f8] sm:$0x30] %v5333_v59  ;;  %5442 = vrot.lane.b32.xlu1 %v5415_v7, %s8870_s26  ;;  %5440 = vrot.lane.b32.xlu0 %v11507_v57, %s8870_s26  ;;  %v11637_v59 = vcombine.high %v11361_v4, %v11361_v4 }
 0x471   :  { %v5431_v54 = vpop.permute.xlu1 %5430  ;;  %v5429_v28 = vpop.permute.xlu0 %5428 }
 0x472   :  { %v5452_v24 = vsel %vm849_vm5, %v5427_v6, %v5429_v28  ;;  %v5453_v16 = vsel %vm849_vm5, %v5429_v28, %v5431_v54 }
 0x473   :  { %5476 = vst [vmem:[#allocation2 + $0x2a0] sm:$0xc0] %v5452_v24  ;;  %5477 = vst [vmem:[#allocation2 + $0x2a8] sm:$0xc0] %v5453_v16  ;;  %5566 = vrot.lane.b32.xlu1 %v5527_v35, %s8871_s27  ;;  %5564 = vrot.lane.b32.xlu0 %v11173_v15, %s8871_s27  ;;  %v11553_v15 = vld [vmem:[%s12353_s0 + $0x3a] sm:$0xff] }
 0x474   :  { %v5868_v51 = vcombine.low %v11553_v15, %v11553_v15  ;;  %v11622_v2 = vrot.slane %v11553_v15, %v8921_v8 }
 0x475   :  { %v5435_v21 = vpop.permute.xlu1 %5434  ;;  %v5433_v1 = vpop.permute.xlu0 %5432 }
 0x476   :  { %v5454_v61 = vsel %vm849_vm5, %v5431_v54, %v5433_v1  ;;  %v5455_v17 = vsel %vm849_vm5, %v5433_v1, %v5435_v21  ;;  %v11578_v5 = vrot.slane %v5868_v51, %v8921_v8 }
 0x477   :  { %5478 = vst [vmem:[#allocation2 + $0x2b0] sm:$0xc0] %v5454_v61  ;;  %5479 = vst [vmem:[#allocation2 + $0x2b8] sm:$0xc0] %v5455_v17  ;;  %5570 = vrot.lane.b32.xlu1 %v11541_v34, %s8871_s27  ;;  %5568 = vrot.lane.b32.xlu0 %v5529_v39, %s8871_s27 }
 0x478   :  { %v11592_v19 = vcombine.low %v11578_v5, %v11578_v5 }
 0x479   :  { %v11555_v44 = vpop.permute.xlu1 %5556  ;;  %v11557_v27 = vpop.permute.xlu0 %5436 }
 0x47a   :  { %v5456_v62 = vsel %vm849_vm5, %v5435_v21, %v11557_v27  ;;  %v7091_v10 = vld [vmem:[#allocation2 + $0x2a8] sm:$0xff]  ;;  %v7090_v37 = vld [vmem:[#allocation2 + $0x2a0] sm:$0xff] }
 0x47b   :  { %5480 = vst [vmem:[#allocation2 + $0x2c0] sm:$0xc0] %v5456_v62  ;;  %5695 = vrot.lane.b32.xlu1 %v11507_v57, %s8872_s8  ;;  %5693 = vrot.lane.b32.xlu0 %v11228_v3, %s8872_s8  ;;  %v8675_v13 = vpack.c.bf16 %v7091_v10, %v7067_v43  ;;  %v8677_v46 = vpack.c.bf16 %v7090_v37, %v7066_v30  ;;  %v11677_v62 = vld [vmem:[%s12354_s3 + $0xc] sm:$0xff] }
 0x47c   :  { %v5981_v57 = vcombine.high %v11340_v42, %v11340_v42  ;;  %v11608_v42 = vcombine.high %v11398_v63, %v11398_v63  ;;  %v11672_v43 = vcombine.low %v11622_v2, %v11622_v2  ;;  %6863 = vst [vmem:[#allocation3 + $0x10] sm:$0xf] %v11677_v62  ;;  %v11685_v32 = vcombine.high %v11677_v62, %v11677_v62 }
 0x47d   :  { %v5561_v11 = vpop.permute.xlu1 %5560  ;;  %v5559_v25 = vpop.permute.xlu0 %5558  ;;  %8676 = vmatprep.subr.bf16.mxu0 %v8675_v13 }
 0x47e   :  { %v5581_v40 = vsel %vm980_vm6, %v11555_v44, %v5559_v25  ;;  %v5582_v58 = vsel %vm980_vm6, %v5559_v25, %v5561_v11  ;;  %8678 = vmatpush1.bf16.msra.mxu0 %v8677_v46  ;;  %v7093_v12 = vld [vmem:[#allocation2 + $0x2b8] sm:$0xff]  ;;  %v7092_v49 = vld [vmem:[#allocation2 + $0x2b0] sm:$0xff]  ;;  %v11604_v29 = vrot.slane %v5981_v57, %v8921_v8  ;;  %6864 = vst [vmem:[#allocation3 + $0x18] sm:$0xf] %v11685_v32 }
 0x47f   :  { %5605 = vst [vmem:[#allocation2 + $0x368] sm:$0x3] %v5581_v40  ;;  %5606 = vst [vmem:[#allocation2 + $0x370] sm:$0x3] %v5582_v58  ;;  %5699 = vrot.lane.b32.xlu1 %v11520_v18, %s8872_s8  ;;  %5697 = vrot.lane.b32.xlu0 %v5657_v52, %s8872_s8  ;;  %v8687_v3 = vpack.c.bf16 %v7093_v12, %v7069_v53  ;;  %v8689_v38 = vpack.c.bf16 %v7092_v49, %v7068_v60 }
 0x480   :  { %v11626_v48 = vcombine.high %v11604_v29, %v11604_v29  ;;  %v11658_v1 = vcombine.low %v11604_v29, %v11604_v29 }
 0x481   :  { %v11580_v47 = vpop.permute.xlu1 %5685  ;;  %v11582_v9 = vpop.permute.xlu0 %5562  ;;  %8688 = vmatprep.subr.bf16.mxu1 %v8687_v3 }
 0x482   :  { %v5583_v45 = vsel %vm980_vm6, %v5561_v11, %v11582_v9  ;;  %8690 = vmatpush1.bf16.msra.mxu1 %v8689_v38 }
 0x483   :  { %5607 = vst [vmem:[#allocation2 + $0x378] sm:$0x3] %v5583_v45  ;;  %5906 = vrot.lane.b32.xlu1 %v11426_v55, %s8865_s30  ;;  %5904 = vrot.lane.b32.xlu0 %v11361_v4, %s8865_s30 }
 0x485   :  { %v5690_v26 = vpop.permute.xlu1 %5689  ;;  %v5688_v31 = vpop.permute.xlu0 %5687 }
 0x486   :  { %v5710_v36 = vsel %vm1109_vm7, %v11580_v47, %v5688_v31  ;;  %v5711_v56 = vsel %vm1109_vm7, %v5688_v31, %v5690_v26 }
 0x487   :  { %5734 = vst [vmem:[#allocation2 + $0x368] sm:$0xc] %v5710_v36  ;;  %5735 = vst [vmem:[#allocation2 + $0x370] sm:$0xc] %v5711_v56  ;;  %5910 = vrot.lane.b32.xlu1 %v11592_v19, %s8865_s30  ;;  %5908 = vrot.lane.b32.xlu0 %v11398_v63, %s8865_s30 }
 0x489   :  { %v11610_v14 = vpop.permute.xlu1 %5896  ;;  %v11612_v50 = vpop.permute.xlu0 %5691 }
 0x48a   :  { %v5712_v23 = vsel %vm1109_vm7, %v5690_v26, %v11612_v50 }
 0x48b   :  { %5736 = vst [vmem:[#allocation2 + $0x378] sm:$0xc] %v5712_v23  ;;  %6034 = vrot.lane.b32.xlu1 %v11604_v29, %s8866_s10  ;;  %6032 = vrot.lane.b32.xlu0 %v11608_v42, %s8866_s10 }
 0x48d   :  { %v5901_v7 = vpop.permute.xlu1 %5900  ;;  %v5899_v0 = vpop.permute.xlu0 %5898 }
 0x48e   :  { %v5921_v6 = vsel %vm199_vm0, %v11610_v14, %v5899_v0  ;;  %v5922_v33 = vsel %vm199_vm0, %v5899_v0, %v5901_v7 }
 0x48f   :  { %5945 = vst [vmem:[#allocation2 + $0x368] sm:$0xc0] %v5921_v6  ;;  %5946 = vst [vmem:[#allocation2 + $0x370] sm:$0xc0] %v5922_v33  ;;  %6038 = vrot.lane.b32.xlu1 %v11622_v2, %s8866_s10  ;;  %6036 = vrot.lane.b32.xlu0 %v11626_v48, %s8866_s10 }
 0x491   :  { %v11639_v35 = vpop.permute.xlu1 %6024  ;;  %v11641_v54 = vpop.permute.xlu0 %5902 }
 0x492   :  { %v5923_v28 = vsel %vm199_vm0, %v5901_v7, %v11641_v54 }
 0x493   :  { %5947 = vst [vmem:[#allocation2 + $0x378] sm:$0xc0] %v5923_v28  ;;  %6163 = vrot.lane.b32.xlu1 %v11398_v63, %s8867_s17  ;;  %6161 = vrot.lane.b32.xlu0 %v11637_v59, %s8867_s17 }
 0x495   :  { %v6029_v24 = vpop.permute.xlu1 %6028  ;;  %v6027_v16 = vpop.permute.xlu0 %6026 }
 0x496   :  { %v6049_v39 = vsel %vm329_vm1, %v11639_v35, %v6027_v16  ;;  %v6050_v21 = vsel %vm329_vm1, %v6027_v16, %v6029_v24  ;;  %v7116_v28 = vld [vmem:[#allocation2 + $0x370] sm:$0xff] }
 0x497   :  { %6073 = vst [vmem:[#allocation2 + $0x428] sm:$0x3] %v6049_v39  ;;  %6074 = vst [vmem:[#allocation2 + $0x430] sm:$0x3] %v6050_v21  ;;  %6167 = vrot.lane.b32.xlu1 %v11578_v5, %s8867_s17  ;;  %6165 = vrot.lane.b32.xlu0 %v11608_v42, %s8867_s17 }
 0x499   :  { %v11660_v61 = vpop.permute.xlu1 %6153  ;;  %v11662_v17 = vpop.permute.xlu0 %6030 }
 0x49a   :  { %v6051_v41 = vsel %vm329_vm1, %v6029_v24, %v11662_v17  ;;  %v7117_v33 = vld [vmem:[#allocation2 + $0x378] sm:$0xff] }
 0x49b   :  { %6075 = vst [vmem:[#allocation2 + $0x438] sm:$0x3] %v6051_v41  ;;  %6292 = vrot.lane.b32.xlu1 %v11658_v1, %s8868_s22  ;;  %6290 = vrot.lane.b32.xlu0 %v11398_v63, %s8868_s22  ;;  %v8846_v24 = vld [vmem:[%s12353_s0 + $0x3e] ss:$0 sps:$4 sm:$0x33]  }
 0x49d   :  { %v6158_v10 = vpop.permute.xlu1 %6157  ;;  %v6156_v30 = vpop.permute.xlu0 %6155 }
 0x49e   :  { %v6178_v37 = vsel %vm460_vm2, %v11660_v61, %v6156_v30  ;;  %v6179_v52 = vsel %vm460_vm2, %v6156_v30, %v6158_v10 }
 0x49f   :  { %6202 = vst [vmem:[#allocation2 + $0x428] sm:$0xc] %v6178_v37  ;;  %6203 = vst [vmem:[#allocation2 + $0x430] sm:$0xc] %v6179_v52  ;;  %6296 = vrot.lane.b32.xlu1 %v11672_v43, %s8868_s22  ;;  %6294 = vrot.lane.b32.xlu0 %v11604_v29, %s8868_s22 }
 0x4a1   :  { %v11692_v13 = vpop.permute.xlu1 %6282  ;;  %v11694_v46 = vpop.permute.xlu0 %6159 }
 0x4a2   :  { %v6180_v51 = vsel %vm460_vm2, %v6158_v10, %v11694_v46 }
 0x4a3   :  { %6204 = vst [vmem:[#allocation2 + $0x438] sm:$0xc] %v6180_v51  ;;  %6422 = vrot.lane.b32.xlu1 %v11426_v55, %s8869_s23  ;;  %6420 = vrot.lane.b32.xlu0 %v11361_v4, %s8869_s23 }
 0x4a5   :  { %v6287_v11 = vpop.permute.xlu1 %6286  ;;  %v6285_v25 = vpop.permute.xlu0 %6284 }
 0x4a6   :  { %v6307_v53 = vsel %vm589_vm3, %v11692_v13, %v6285_v25  ;;  %v6308_v40 = vsel %vm589_vm3, %v6285_v25, %v6287_v11 }
 0x4a7   :  { %6331 = vst [vmem:[#allocation2 + $0x428] sm:$0x30] %v6307_v53  ;;  %6332 = vst [vmem:[#allocation2 + $0x430] sm:$0x30] %v6308_v40  ;;  %6426 = vrot.lane.b32.xlu1 %v11592_v19, %s8869_s23  ;;  %6424 = vrot.lane.b32.xlu0 %v11398_v63, %s8869_s23 }
 0x4a9   :  { %v6413_v58 = vpop.permute.xlu1 %6412  ;;  %v11709_v55 = vpop.permute.xlu0 %6288 }
 0x4aa   :  { %v6309_v4 = vsel %vm589_vm3, %v6287_v11, %v11709_v55 }
 0x4ab   :  { %6333 = vst [vmem:[#allocation2 + $0x438] sm:$0x30] %v6309_v4  ;;  %6550 = vrot.lane.b32.xlu1 %v11604_v29, %s8870_s26  ;;  %6548 = vrot.lane.b32.xlu0 %v11608_v42, %s8870_s26 }
 0x4ad   :  { %v6417_v12 = vpop.permute.xlu1 %6416  ;;  %v6415_v60 = vpop.permute.xlu0 %6414 }
 0x4ae   :  { %v6437_v49 = vsel %vm719_vm4, %v6413_v58, %v6415_v60  ;;  %v6438_v3 = vsel %vm719_vm4, %v6415_v60, %v6417_v12 }
 0x4af   :  { %6461 = vst [vmem:[#allocation2 + $0x428] sm:$0xc0] %v6437_v49  ;;  %6462 = vst [vmem:[#allocation2 + $0x430] sm:$0xc0] %v6438_v3  ;;  %6554 = vrot.lane.b32.xlu1 %v11622_v2, %s8870_s26  ;;  %6552 = vrot.lane.b32.xlu0 %v11626_v48, %s8870_s26  ;;  %v8483_v3 = vld [vmem:[%s12353_s0 + $0x3a] sm:$0xff] }
 0x4b0   :  { %8488 = vst.sshfl [vmem:[#allocation2 + $0x3a8] sm:$0xc pattern:$0x76325410] %v8483_v3 }
 0x4b1   :  { %v5555_v38 = vpop.permute.xlu1 %5554  ;;  %v11723_v45 = vpop.permute.xlu0 %6418 }
 0x4b2   :  { %v5580_v19 = vsel %vm980_vm6, %v5555_v38, %v11555_v44  ;;  %v6439_v57 = vsel %vm719_vm4, %v6417_v12, %v11723_v45  ;;  %v7115_v44 = vld [vmem:[#allocation2 + $0x368] sm:$0xff]  ;;  %v8476_v38 = vld.sshfl [vmem:[%s12353_s0 + $0x3e] sm:$0x3 pattern:$0x76325410] }
 0x4b3   :  { %5604 = vst [vmem:[#allocation2 + $0x360] sm:$0x3] %v5580_v19  ;;  %6463 = vst [vmem:[#allocation2 + $0x438] sm:$0xc0] %v6439_v57  ;;  %6679 = vrot.lane.b32.xlu1 %v11398_v63, %s8871_s27  ;;  %6677 = vrot.lane.b32.xlu0 %v11637_v59, %s8871_s27  ;;  %v5792_v19 = vrot.slane %v8483_v3, %v8921_v8 }
 0x4b5   :  { %v5895_v26 = vpop.permute.xlu1 %5894  ;;  %v5684_v31 = vpop.permute.xlu0 %5683 }
 0x4b6   :  { %v5920_v36 = vsel %vm199_vm0, %v5895_v26, %v11610_v14  ;;  %v5709_v56 = vsel %vm1109_vm7, %v5684_v31, %v11580_v47  ;;  %v7139_v23 = vld [vmem:[#allocation2 + $0x428] sm:$0xff]  ;;  %v7140_v6 = vld [vmem:[#allocation2 + $0x430] sm:$0xff] }
 0x4b7   :  { %5944 = vst [vmem:[#allocation2 + $0x360] sm:$0xc0] %v5920_v36  ;;  %5733 = vst [vmem:[#allocation2 + $0x360] sm:$0xc] %v5709_v56  ;;  %6683 = vrot.lane.b32.xlu1 %v11578_v5, %s8871_s27  ;;  %6681 = vrot.lane.b32.xlu0 %v11608_v42, %s8871_s27  ;;  %v8679_v48 = vpack.c.bf16 %v7139_v23, %v7115_v44  ;;  %v8693_v16 = vpack.c.bf16 %v7140_v6, %v7116_v28 }
 0x4b8   :  { %v5800_v56 = vcombine.low %v5792_v19, %v5792_v19  ;;  %v5785_v44 = vcombine.high %v8483_v3, %v8483_v3  ;;  %v5673_v23 = vcombine.high %v11520_v18, %v11520_v18  ;;  %v7047_v3 = vld [vmem:[#allocation2 + $0x148] sm:$0xff] }
 0x4b9   :  { %v6152_v7 = vpop.permute.xlu1 %6151  ;;  %v6023_v0 = vpop.permute.xlu0 %6022  ;;  %8680 = vmatprep.subr.bf16.mxu0 %v8679_v48  ;;  %v8847_v48 = vld [vmem:[%s12353_s0 + $0x3e] ss:$0 sps:$4 sm:$0x33]  }
 0x4ba   :  { %v6177_v14 = vsel %vm460_vm2, %v6152_v7, %v11660_v61  ;;  %v6048_v47 = vsel %vm329_vm1, %v6023_v0, %v11639_v35  ;;  %v7141_v59 = vld [vmem:[#allocation2 + $0x438] sm:$0xff]  ;;  %5822 = vst [vmem:[#allocation2 + $0x3a0] sm:$0x30] %v5800_v56  ;;  %v5799_v7 = vrot.slane %v5785_v44, %v8921_v8  ;;  %v7046_v56 = vld [vmem:[#allocation2 + $0x140] sm:$0xff] }
 0x4bb   :  { %6201 = vst [vmem:[#allocation2 + $0x420] sm:$0xc] %v6177_v14  ;;  %6072 = vst [vmem:[#allocation2 + $0x420] sm:$0x3] %v6048_v47  ;;  %6808 = vrot.lane.b32.xlu1 %v11658_v1, %s8872_s8  ;;  %6806 = vrot.lane.b32.xlu0 %v11398_v63, %s8872_s8  ;;  %v8691_v42 = vpack.c.bf16 %v7141_v59, %v7117_v33  ;;  %v5416_v63 = vcombine.low %v11541_v34, %v11541_v34 }
 0x4bc   :  { %v5424_v1 = vrot.slane %v8846_v24, %v8921_v8  ;;  %8489 = vst.sshfl [vmem:[#allocation2 + $0x3b8] sm:$0xc pattern:$0x76325410] %v5785_v44  ;;  %v5801_v47 = vcombine.low %v5799_v7, %v5799_v7 }
 0x4bd   :  { %v6411_v39 = vpop.permute.xlu1 %6410  ;;  %v6281_v21 = vpop.permute.xlu0 %6280  ;;  %8692 = vmatprep.subr.bf16.mxu1 %v8691_v42  ;;  %v8848_v33 = vld [vmem:[%s12353_s0 + $0x42] ss:$0 sps:$4 sm:$0x33]  }
 0x4be   :  { %v6436_v35 = vsel %vm719_vm4, %v6411_v39, %v6413_v58  ;;  %v6306_v61 = vsel %vm589_vm3, %v6281_v21, %v11692_v13  ;;  %8694 = vmatpush1.bf16.msra.mxu1 %v8693_v16  ;;  %v5425_v37 = vcombine.low %v5424_v1, %v5424_v1  ;;  %v7114_v25 = vld [vmem:[#allocation2 + $0x360] sm:$0xff]  ;;  %v5545_v58 = vcombine.high %v11541_v34, %v11541_v34 }
 0x4bf   :  { %6460 = vst [vmem:[#allocation2 + $0x420] sm:$0xc0] %v6436_v35  ;;  %6330 = vst [vmem:[#allocation2 + $0x420] sm:$0x30] %v6306_v61  ;;  %6812 = vrot.lane.b32.xlu1 %v11672_v43, %s8872_s8  ;;  %6810 = vrot.lane.b32.xlu0 %v11604_v29, %s8872_s8  ;;  %v5530_v29 = vcombine.high %v11495_v20, %v11495_v20  ;;  %v5998_v1 = vcombine.high %v11553_v15, %v11553_v15  ;;  %v7025_v15 = vld [vmem:[#allocation2 + $0x98] sm:$0xff] }
 0x4c0   :  { %5824 = vst [vmem:[#allocation2 + $0x3b0] sm:$0x30] %v5801_v47 }
 0x4c1   :  { %v6543_v41 = vpop.permute.xlu1 %6542  ;;  %v11762_v10 = vpop.permute.xlu0 %6540  ;;  %v5544_v20 = vrot.slane %v5530_v29, %v8921_v8 }
 0x4c2   :  { %v6565_v30 = vsel %vm849_vm5, %v11762_v10, %v6543_v41 }
 0x4c3   :  { %6589 = vst [vmem:[#allocation2 + $0x4e8] sm:$0x3] %v6565_v30  ;;  %5446 = vrot.lane.b32.xlu1 %v5416_v63, %s8870_s26  ;;  %5444 = vrot.lane.b32.xlu0 %v11520_v18, %s8870_s26  ;;  %v5546_v49 = vcombine.high %v5544_v20, %v5544_v20  ;;  %v5682_v18 = vrot.slane %v8847_v48, %v8921_v8 }
 0x4c5   :  { %v11771_v52 = vpop.permute.xlu1 %6546  ;;  %v6545_v13 = vpop.permute.xlu0 %6544 }
 0x4c6   :  { %v6566_v51 = vsel %vm849_vm5, %v6543_v41, %v6545_v13  ;;  %v6567_v11 = vsel %vm849_vm5, %v6545_v13, %v11771_v52  ;;  %v7138_v53 = vld [vmem:[#allocation2 + $0x420] sm:$0xff] }
 0x4c7   :  { %6590 = vst [vmem:[#allocation2 + $0x4f0] sm:$0x3] %v6566_v51  ;;  %6591 = vst [vmem:[#allocation2 + $0x4f8] sm:$0x3] %v6567_v11  ;;  %5450 = vrot.lane.b32.xlu1 %v5425_v37, %s8870_s26  ;;  %5448 = vrot.lane.b32.xlu0 %v11541_v34, %s8870_s26  ;;  %v8681_v40 = vpack.c.bf16 %v7138_v53, %v7114_v25  ;;  %v7049_v37 = vld [vmem:[#allocation2 + $0x158] sm:$0xff]  ;;  %v7048_v11 = vld [vmem:[#allocation2 + $0x150] sm:$0xff]  ;;  %v11838_v25 = vrot.slane %v5998_v1, %v8921_v8 }
 0x4c8   :  { %v8707_v53 = vpack.c.bf16 %v7049_v37, %v7025_v15 }
 0x4c9   :  { %v6672_v4 = vpop.permute.xlu1 %6671  ;;  %v6670_v12 = vpop.permute.xlu0 %6669  ;;  %8682 = vmatpush1.bf16.msra.mxu0 %v8681_v40  ;;  %v11843_v40 = vcombine.high %v11622_v2, %v11622_v2  ;;  %v11869_v19 = vcombine.high %v11838_v25, %v11838_v25 }
 0x4ca   :  { %v6694_v60 = vsel %vm980_vm6, %v6670_v12, %v6672_v4 }
 0x4cb   :  { %6718 = vst [vmem:[#allocation2 + $0x4e8] sm:$0xc] %v6694_v60  ;;  %5574 = vrot.lane.b32.xlu1 %v5544_v20, %s8871_s27  ;;  %5572 = vrot.lane.b32.xlu0 %v5545_v58, %s8871_s27 }
 0x4cd   :  { %v11792_v57 = vpop.permute.xlu1 %6675  ;;  %v6674_v26 = vpop.permute.xlu0 %6673 }
 0x4ce   :  { %v6695_v31 = vsel %vm980_vm6, %v6672_v4, %v6674_v26  ;;  %v6696_v36 = vsel %vm980_vm6, %v6674_v26, %v11792_v57 }
 0x4cf   :  { %6719 = vst [vmem:[#allocation2 + $0x4f0] sm:$0xc] %v6695_v31  ;;  %6720 = vst [vmem:[#allocation2 + $0x4f8] sm:$0xc] %v6696_v36  ;;  %5578 = vrot.lane.b32.xlu1 %v8476_v38, %s8871_s27  ;;  %5576 = vrot.lane.b32.xlu0 %v5546_v49, %s8871_s27  ;;  %v11854_v49 = vld [vmem:[%s12355_s1] sm:$0xff]  ;;  %v7023_v36 = vld [vmem:[#allocation2 + $0x88] sm:$0xff] }
 0x4d0   :  { %v11865_v38 = vld.sshfl [vmem:[%s12353_s0 + $0x42] sm:$0x3 pattern:$0x76325410]  ;;  %v8695_v7 = vpack.c.bf16 %v7047_v3, %v7023_v36 }
 0x4d1   :  { %v6801_v0 = vpop.permute.xlu1 %6800  ;;  %v6799_v6 = vpop.permute.xlu0 %6798 }
 0x4d2   :  { %v6823_v14 = vsel %vm1109_vm7, %v6799_v6, %v6801_v0 }
 0x4d3   :  { %6847 = vst [vmem:[#allocation2 + $0x4e8] sm:$0x30] %v6823_v14  ;;  %5703 = vrot.lane.b32.xlu1 %v11541_v34, %s8872_s8  ;;  %5701 = vrot.lane.b32.xlu0 %v5673_v23, %s8872_s8  ;;  %v5892_v34 = vrot.slane %v8848_v33, %v8921_v8  ;;  %v7022_v14 = vld [vmem:[#allocation2 + $0x80] sm:$0xff]  ;;  %v11885_v33 = vcombine.high %v11578_v5, %v11578_v5 }
 0x4d5   :  { %v11813_v59 = vpop.permute.xlu1 %6804  ;;  %v6803_v42 = vpop.permute.xlu0 %6802  ;;  %v5893_v63 = vcombine.low %v5892_v34, %v5892_v34  ;;  %v7073_v34 = vld [vmem:[#allocation2 + $0x218] sm:$0xff] }
 0x4d6   :  { %v6824_v28 = vsel %vm1109_vm7, %v6801_v0, %v6803_v42  ;;  %v6825_v24 = vsel %vm1109_vm7, %v6803_v42, %v11813_v59  ;;  %v7071_v0 = vld [vmem:[#allocation2 + $0x208] sm:$0xff] }
 0x4d7   :  { %6848 = vst [vmem:[#allocation2 + $0x4f0] sm:$0x30] %v6824_v28  ;;  %6849 = vst [vmem:[#allocation2 + $0x4f8] sm:$0x30] %v6825_v24  ;;  %5707 = vrot.lane.b32.xlu1 %v5682_v18, %s8872_s8  ;;  %5705 = vrot.lane.b32.xlu0 %v5545_v58, %s8872_s8  ;;  %v7094_v24 = vld [vmem:[#allocation2 + $0x2c0] sm:$0xff] }
 0x4d8   :  { %v8851_v18 = vld [vmem:[%s12353_s0 + $0x42] ss:$0 sps:$4 sm:$0x33]  }
 0x4d9   :  { %v6668_v16 = vpop.permute.xlu1 %6667  ;;  %v6539_v39 = vpop.permute.xlu0 %6538 }
 0x4da   :  { %v6693_v21 = vsel %vm980_vm6, %v6668_v16, %v6670_v12  ;;  %v6564_v35 = vsel %vm849_vm5, %v6539_v39, %v11762_v10  ;;  %v7163_v61 = vld [vmem:[#allocation2 + $0x4e8] sm:$0x3f] }
 0x4db   :  { %6717 = vst [vmem:[#allocation2 + $0x4e0] sm:$0xc] %v6693_v21  ;;  %6588 = vst [vmem:[#allocation2 + $0x4e0] sm:$0x3] %v6564_v35  ;;  %5914 = vrot.lane.b32.xlu1 %v11672_v43, %s8865_s30  ;;  %5912 = vrot.lane.b32.xlu0 %v11578_v5, %s8865_s30  ;;  %v7072_v35 = vld [vmem:[#allocation2 + $0x210] sm:$0xff] }
 0x4dc   :  { %8561 = vmatprep.subr.msk.mxu0 %vm7205_vm8, %v7163_v61 }
 0x4dd   :  { %v5439_v41 = vpop.permute.xlu1 %5438  ;;  %v6797_v30 = vpop.permute.xlu0 %6796 }
 0x4de   :  { %v5457_v10 = vsel %vm849_vm5, %v11557_v27, %v5439_v41  ;;  %v6822_v29 = vsel %vm1109_vm7, %v6797_v30, %v6799_v6  ;;  %v7165_v13 = vld [vmem:[#allocation2 + $0x4f8] sm:$0x3f]  ;;  %v7164_v51 = vld [vmem:[#allocation2 + $0x4f0] sm:$0x3f]  ;;  %v6150_v30 = vrot.slane %v8851_v18, %v8921_v8 }
 0x4df   :  { %5481 = vst [vmem:[#allocation2 + $0x2c8] sm:$0xc0] %v5457_v10  ;;  %6846 = vst [vmem:[#allocation2 + $0x4e0] sm:$0x30] %v6822_v29  ;;  %5918 = vrot.lane.b32.xlu1 %v5893_v63, %s8865_s30  ;;  %5916 = vrot.lane.b32.xlu0 %v11622_v2, %s8865_s30  ;;  %v7024_v27 = vld [vmem:[#allocation2 + $0x90] sm:$0xff]  ;;  %v7070_v63 = vld [vmem:[#allocation2 + $0x200] sm:$0xff] }
 0x4e0   :  { %8564 = vmatprep.subr.msk.mxu1 %vm7205_vm8, %v7165_v13  ;;  %v8709_v4 = vpack.c.bf16 %v7048_v11, %v7024_v27  ;;  %v8701_v37 = vpack.c.bf16 %v7094_v24, %v7070_v63  ;;  %v11906_v11 = vcombine.low %v11838_v25, %v11838_v25  ;;  %v8853_v24 = vld [vmem:[%s12353_s0 + $0x42] ss:$0 sps:$4 sm:$0x33]  }
 0x4e1   :  { %8565 = vmatpush1.msk.msra.mxu1 %vm7205_vm8, %v7164_v51  ;;  %v11846_v20 = vpop.permute.xlu1 %5442  ;;  %v5441_v58 = vpop.permute.xlu0 %5440 }
 0x4e2   :  { %v5458_v12 = vsel %vm849_vm5, %v5439_v41, %v5441_v58  ;;  %v5459_v60 = vsel %vm849_vm5, %v5441_v58, %v11846_v20  ;;  %8708 = vmatprep.subr.bf16.mxu1 %v8707_v53  ;;  %8566 = vmatmul.mubr.msk.f32.vlgmr.msra.gmra.mrb[6].mxu1 %vm7201_vm9, %v11854_v49  ;;  %v11919_v58 = vcombine.low %v11865_v38, %v11865_v38 }
 0x4e3   :  { %5482 = vst [vmem:[#allocation2 + $0x2d0] sm:$0xc0] %v5458_v12  ;;  %5483 = vst [vmem:[#allocation2 + $0x2d8] sm:$0xc0] %v5459_v60  ;;  %8710 = vmatpush1.bf16.msra.mxu1 %v8709_v4  ;;  %6042 = vrot.lane.b32.xlu1 %v11838_v25, %s8866_s10 }
 0x4e4   :  { %6040 = vrot.lane.b32.xlu0 %v11843_v40, %s8866_s10  ;;  %7981 = vmatprep.mubr.f32.mxu1 %v8873_v22  ;;  %v8852_v4 = vld [vmem:[%s12353_s0 + $0x42] ss:$0 sps:$4 sm:$0x33]  }
 0x4e5   :  { %v5567_v26 = vpop.permute.xlu1 %5566  ;;  %v5565_v31 = vpop.permute.xlu0 %5564 }
 0x4e6   :  { %v5584_v44 = vsel %vm980_vm6, %v11582_v9, %v5565_v31  ;;  %v5585_v23 = vsel %vm980_vm6, %v5565_v31, %v5567_v26  ;;  %v7162_v48 = vld [vmem:[#allocation2 + $0x4e0] sm:$0x3f]  ;;  %v7095_v6 = vld [vmem:[#allocation2 + $0x2c8] sm:$0xff]  ;;  %v8697_v9 = vpack.c.bf16 %v7046_v56, %v7022_v14  ;;  %v6408_v31 = vrot.slane %v8852_v4, %v8921_v8 }
 0x4e7   :  { %5608 = vst [vmem:[#allocation2 + $0x380] sm:$0x3] %v5584_v44  ;;  %5609 = vst [vmem:[#allocation2 + $0x388] sm:$0x3] %v5585_v23  ;;  %6046 = vrot.lane.b32.xlu1 %v11865_v38, %s8866_s10  ;;  %8562 = vmatpush1.msk.msra.mxu0 %vm7205_vm8, %v7162_v48  ;;  %v8699_v47 = vpack.c.bf16 %v7095_v6, %v7071_v0 }
 0x4e8   :  { %6044 = vrot.lane.b32.xlu0 %v11869_v19, %s8866_s10  ;;  %8696 = vmatprep.subr.bf16.mxu0 %v8695_v7  ;;  %v6409_v23 = vcombine.low %v6408_v31, %v6408_v31 }
 0x4e9   :  { %v11887_v42 = vpop.permute.xlu1 %5570  ;;  %v5569_v28 = vpop.permute.xlu0 %5568  ;;  %8563 = vmatmul.mubr.msk.f32.vlgmr.msra.gmra.mrb[6].mxu0 %vm7201_vm9, %v11854_v49 }
 0x4ea   :  { %v5586_v16 = vsel %vm980_vm6, %v5567_v26, %v5569_v28  ;;  %v5587_v39 = vsel %vm980_vm6, %v5569_v28, %v11887_v42  ;;  %8698 = vmatpush1.bf16.msra.mxu0 %v8697_v9  ;;  %v7097_v21 = vld [vmem:[#allocation2 + $0x2d8] sm:$0xff]  ;;  %v7096_v61 = vld [vmem:[#allocation2 + $0x2d0] sm:$0xff]  ;;  %7910 = vmatprep.mubr.f32.mxu0 %v8873_v22 }
 0x4eb   :  { %5610 = vst [vmem:[#allocation2 + $0x390] sm:$0x3] %v5586_v16  ;;  %5611 = vst [vmem:[#allocation2 + $0x398] sm:$0x3] %v5587_v39  ;;  %8700 = vmatprep.subr.bf16.mxu0 %v8699_v47  ;;  %6171 = vrot.lane.b32.xlu1 %v11622_v2, %s8867_s17  ;;  %v8711_v1 = vpack.c.bf16 %v7097_v21, %v7073_v34  ;;  %v8713_v41 = vpack.c.bf16 %v7096_v61, %v7072_v35 }
 0x4ec   :  { %6169 = vrot.lane.b32.xlu0 %v11885_v33, %s8867_s17 }
 0x4ed   :  { %v5696_v10 = vpop.permute.xlu1 %5695  ;;  %v5694_v29 = vpop.permute.xlu0 %5693  ;;  %8712 = vmatprep.subr.bf16.mxu1 %v8711_v1 }
 0x4ee   :  { %v5713_v13 = vsel %vm1109_vm7, %v11612_v50, %v5694_v29  ;;  %v5714_v51 = vsel %vm1109_vm7, %v5694_v29, %v5696_v10  ;;  %8702 = vmatpush1.bf16.msra.mxu0 %v8701_v37  ;;  %8714 = vmatpush1.bf16.msra.mxu1 %v8713_v41  ;;  %v8854_v37 = vld [vmem:[%s12354_s3 + $0x14] ss:$0 sps:$4 sm:$0xff]  }
 0x4ef   :  { %5737 = vst [vmem:[#allocation2 + $0x380] sm:$0xc] %v5713_v13  ;;  %5738 = vst [vmem:[#allocation2 + $0x388] sm:$0xc] %v5714_v51  ;;  %6175 = vrot.lane.b32.xlu1 %v6150_v30, %s8867_s17  ;;  %v8530_v13 = vld [vmem:[%s12354_s3 + $0x14] sm:$0xf] }
 0x4f0   :  { %6173 = vrot.lane.b32.xlu0 %v11843_v40, %s8867_s17 }
 0x4f1   :  { %v11910_v15 = vpop.permute.xlu1 %5699  ;;  %v5698_v53 = vpop.permute.xlu0 %5697 }
 0x4f2   :  { %v5715_v50 = vsel %vm1109_vm7, %v5696_v10, %v5698_v53  ;;  %v5716_v27 = vsel %vm1109_vm7, %v5698_v53, %v11910_v15 }
 0x4f3   :  { %5739 = vst [vmem:[#allocation2 + $0x390] sm:$0xc] %v5715_v50  ;;  %5740 = vst [vmem:[#allocation2 + $0x398] sm:$0xc] %v5716_v27  ;;  %6300 = vrot.lane.b32.xlu1 %v11906_v11, %s8868_s22 }
 0x4f4   :  { %6298 = vrot.lane.b32.xlu0 %v11622_v2, %s8868_s22 }
 0x4f5   :  { %v5907_v12 = vpop.permute.xlu1 %5906  ;;  %v5905_v60 = vpop.permute.xlu0 %5904 }
 0x4f6   :  { %v5924_v3 = vsel %vm199_vm0, %v11641_v54, %v5905_v60  ;;  %v5925_v26 = vsel %vm199_vm0, %v5905_v60, %v5907_v12 }
 0x4f7   :  { %5948 = vst [vmem:[#allocation2 + $0x380] sm:$0xc0] %v5924_v3  ;;  %5949 = vst [vmem:[#allocation2 + $0x388] sm:$0xc0] %v5925_v26  ;;  %6304 = vrot.lane.b32.xlu1 %v11919_v58, %s8868_s22  ;;  %v8857_v3 = vld [vmem:[%s12354_s3 + $0x14] ss:$0 sps:$4 sm:$0xff]  }
 0x4f8   :  { %6302 = vrot.lane.b32.xlu0 %v11838_v25, %s8868_s22 }
 0x4f9   :  { %v11934_v36 = vpop.permute.xlu1 %5910  ;;  %v5909_v56 = vpop.permute.xlu0 %5908 }
 0x4fa   :  { %v5926_v44 = vsel %vm199_vm0, %v5907_v12, %v5909_v56  ;;  %v5927_v54 = vsel %vm199_vm0, %v5909_v56, %v11934_v36 }
 0x4fb   :  { %5950 = vst [vmem:[#allocation2 + $0x390] sm:$0xc0] %v5926_v44  ;;  %5951 = vst [vmem:[#allocation2 + $0x398] sm:$0xc0] %v5927_v54  ;;  %6430 = vrot.lane.b32.xlu1 %v11672_v43, %s8869_s23 }
 0x4fc   :  { %6428 = vrot.lane.b32.xlu0 %v11578_v5, %s8869_s23 }
 0x4fd   :  { %v6035_v48 = vpop.permute.xlu1 %6034  ;;  %v6033_v7 = vpop.permute.xlu0 %6032 }
 0x4fe   :  { %v6052_v0 = vsel %vm329_vm1, %v11662_v17, %v6033_v7  ;;  %v6053_v6 = vsel %vm329_vm1, %v6033_v7, %v6035_v48 }
 0x4ff   :  { %6076 = vst [vmem:[#allocation2 + $0x440] sm:$0x3] %v6052_v0  ;;  %6077 = vst [vmem:[#allocation2 + $0x448] sm:$0x3] %v6053_v6  ;;  %6434 = vrot.lane.b32.xlu1 %v6409_v23, %s8869_s23  ;;  %v12031_v6 = vcombine.low %v11677_v62, %v11677_v62 }
 0x500   :  { %6432 = vrot.lane.b32.xlu0 %v11622_v2, %s8869_s23 }
 0x501   :  { %v11949_v14 = vpop.permute.xlu1 %6038  ;;  %v6037_v43 = vpop.permute.xlu0 %6036 }
 0x502   :  { %v6054_v47 = vsel %vm329_vm1, %v6035_v48, %v6037_v43  ;;  %v6055_v5 = vsel %vm329_vm1, %v6037_v43, %v11949_v14  ;;  %v7121_v31 = vld [vmem:[#allocation2 + $0x398] sm:$0xff]  ;;  %v7120_v23 = vld [vmem:[#allocation2 + $0x390] sm:$0xff] }
 0x503   :  { %6078 = vst [vmem:[#allocation2 + $0x450] sm:$0x3] %v6054_v47  ;;  %6079 = vst [vmem:[#allocation2 + $0x458] sm:$0x3] %v6055_v5  ;;  %6558 = vrot.lane.b32.xlu1 %v11838_v25, %s8870_s26 }
 0x504   :  { %6556 = vrot.lane.b32.xlu0 %v11843_v40, %s8870_s26 }
 0x505   :  { %v6164_v17 = vpop.permute.xlu1 %6163  ;;  %v6162_v18 = vpop.permute.xlu0 %6161 }
 0x506   :  { %v6181_v9 = vsel %vm460_vm2, %v11694_v46, %v6162_v18  ;;  %v6182_v28 = vsel %vm460_vm2, %v6162_v18, %v6164_v17 }
 0x507   :  { %6205 = vst [vmem:[#allocation2 + $0x440] sm:$0xc] %v6181_v9  ;;  %6206 = vst [vmem:[#allocation2 + $0x448] sm:$0xc] %v6182_v28  ;;  %6562 = vrot.lane.b32.xlu1 %v11865_v38, %s8870_s26  ;;  %v6666_v38 = vrot.slane %v8853_v24, %v8921_v8 }
 0x508   :  { %6560 = vrot.lane.b32.xlu0 %v11869_v19, %s8870_s26 }
 0x509   :  { %v11968_v34 = vpop.permute.xlu1 %6167  ;;  %v6166_v16 = vpop.permute.xlu0 %6165 }
 0x50a   :  { %v6183_v39 = vsel %vm460_vm2, %v6164_v17, %v6166_v16  ;;  %v6184_v46 = vsel %vm460_vm2, %v6166_v16, %v11968_v34 }
 0x50b   :  { %6207 = vst [vmem:[#allocation2 + $0x450] sm:$0xc] %v6183_v39  ;;  %6208 = vst [vmem:[#allocation2 + $0x458] sm:$0xc] %v6184_v46  ;;  %6687 = vrot.lane.b32.xlu1 %v11622_v2, %s8871_s27  ;;  %v8534_v39 = vld [vmem:[%s12354_s3 + $0x14] sm:$0xf] }
 0x50c   :  { %6685 = vrot.lane.b32.xlu0 %v11885_v33, %s8871_s27 }
 0x50d   :  { %v6293_v21 = vpop.permute.xlu1 %6292  ;;  %v6291_v19 = vpop.permute.xlu0 %6290 }
 0x50e   :  { %v6310_v35 = vsel %vm589_vm3, %v11709_v55, %v6291_v19  ;;  %v6311_v61 = vsel %vm589_vm3, %v6291_v19, %v6293_v21 }
 0x50f   :  { %6334 = vst [vmem:[#allocation2 + $0x440] sm:$0x30] %v6310_v35  ;;  %6335 = vst [vmem:[#allocation2 + $0x448] sm:$0x30] %v6311_v61  ;;  %6691 = vrot.lane.b32.xlu1 %v6666_v38, %s8871_s27 }
 0x510   :  { %6689 = vrot.lane.b32.xlu0 %v11843_v40, %s8871_s27 }
 0x511   :  { %v11984_v63 = vpop.permute.xlu1 %6296  ;;  %v6295_v8 = vpop.permute.xlu0 %6294 }
 0x512   :  { %v6312_v1 = vsel %vm589_vm3, %v6293_v21, %v6295_v8  ;;  %v6313_v33 = vsel %vm589_vm3, %v6295_v8, %v11984_v63  ;;  %v8858_v21 = vld [vmem:[%s12354_s3 + $0x14] ss:$0 sps:$4 sm:$0xff]   ;;  %v7051_v8 = vld [vmem:[#allocation2 + $0x168] sm:$0xff] }
 0x513   :  { %6336 = vst [vmem:[#allocation2 + $0x450] sm:$0x30] %v6312_v1  ;;  %6337 = vst [vmem:[#allocation2 + $0x458] sm:$0x30] %v6313_v33  ;;  %6816 = vrot.lane.b32.xlu1 %v11906_v11, %s8872_s8  ;;  %v7119_v11 = vld [vmem:[#allocation2 + $0x388] sm:$0xff] }
 0x514   :  { %6814 = vrot.lane.b32.xlu0 %v11622_v2, %s8872_s8 }
 0x515   :  { %v6423_v55 = vpop.permute.xlu1 %6422  ;;  %v6421_v41 = vpop.permute.xlu0 %6420 }
 0x516   :  { %v6440_v40 = vsel %vm719_vm4, %v11723_v45, %v6421_v41  ;;  %v6441_v30 = vsel %vm719_vm4, %v6421_v41, %v6423_v55  ;;  %v7050_v41 = vld [vmem:[#allocation2 + $0x160] sm:$0xff] }
 0x517   :  { %6464 = vst [vmem:[#allocation2 + $0x440] sm:$0xc0] %v6440_v40  ;;  %6465 = vst [vmem:[#allocation2 + $0x448] sm:$0xc0] %v6441_v30  ;;  %6820 = vrot.lane.b32.xlu1 %v11919_v58, %s8872_s8  ;;  %v7118_v58 = vld [vmem:[#allocation2 + $0x380] sm:$0xff] }
 0x518   :  { %6818 = vrot.lane.b32.xlu0 %v11838_v25, %s8872_s8 }
 0x519   :  { %v12003_v2 = vpop.permute.xlu1 %6426  ;;  %v6425_v10 = vpop.permute.xlu0 %6424 }
 0x51a   :  { %v6442_v29 = vsel %vm719_vm4, %v6423_v55, %v6425_v10  ;;  %v6443_v45 = vsel %vm719_vm4, %v6425_v10, %v12003_v2  ;;  %v8538_v55 = vld [vmem:[%s12354_s3 + $0x14] sm:$0xf] }
 0x51b   :  { %6466 = vst [vmem:[#allocation2 + $0x450] sm:$0xc0] %v6442_v29  ;;  %6467 = vst [vmem:[#allocation2 + $0x458] sm:$0xc0] %v6443_v45  ;;  %6875 = vrot.lane.b32.xlu1 %v8854_v37, %s8865_s30  ;;  %v7027_v29 = vld [vmem:[#allocation2 + $0xa8] sm:$0xff] }
 0x51c   :  { %6873 = vrot.lane.b32.xlu0 %v11677_v62, %s8865_s30  ;;  %v8719_v45 = vpack.c.bf16 %v7051_v8, %v7027_v29 }
 0x51d   :  { %v6551_v25 = vpop.permute.xlu1 %6550  ;;  %v6549_v51 = vpop.permute.xlu0 %6548 }
 0x51e   :  { %v6568_v53 = vsel %vm849_vm5, %v11771_v52, %v6549_v51  ;;  %v6569_v50 = vsel %vm849_vm5, %v6549_v51, %v6551_v25  ;;  %v7143_v27 = vld [vmem:[#allocation2 + $0x448] sm:$0xff]  ;;  %v7142_v4 = vld [vmem:[#allocation2 + $0x440] sm:$0xff]  ;;  %v7053_v51 = vld [vmem:[#allocation2 + $0x178] sm:$0xff] }
 0x51f   :  { %6592 = vst [vmem:[#allocation2 + $0x500] sm:$0x3] %v6568_v53  ;;  %6593 = vst [vmem:[#allocation2 + $0x508] sm:$0x3] %v6569_v50  ;;  %6892 = vrot.lane.b32.xlu1 %v8530_v13, %s8866_s10  ;;  %v8703_v12 = vpack.c.bf16 %v7143_v27, %v7119_v11  ;;  %v8705_v60 = vpack.c.bf16 %v7142_v4, %v7118_v58  ;;  %v7026_v13 = vld [vmem:[#allocation2 + $0xa0] sm:$0xff]  ;;  %v7052_v50 = vld [vmem:[#allocation2 + $0x170] sm:$0xff] }
 0x520   :  { %6890 = vrot.lane.b32.xlu0 %v11685_v32, %s8866_s10 }
 0x521   :  { %v12023_v26 = vpop.permute.xlu1 %6554  ;;  %v6553_v52 = vpop.permute.xlu0 %6552  ;;  %8704 = vmatprep.subr.bf16.mxu0 %v8703_v12 }
 0x522   :  { %v6570_v56 = vsel %vm849_vm5, %v6551_v25, %v6553_v52  ;;  %v6571_v44 = vsel %vm849_vm5, %v6553_v52, %v12023_v26  ;;  %8706 = vmatpush1.bf16.msra.mxu0 %v8705_v60  ;;  %v7145_v54 = vld [vmem:[#allocation2 + $0x458] sm:$0xff]  ;;  %v7144_v48 = vld [vmem:[#allocation2 + $0x450] sm:$0xff]  ;;  %v8721_v25 = vpack.c.bf16 %v7050_v41, %v7026_v13  ;;  %v7195_v41 = vld [vmem:[%s12356_s2] sm:$0xff] }
 0x523   :  { %6594 = vst [vmem:[#allocation2 + $0x510] sm:$0x3] %v6570_v56  ;;  %6595 = vst [vmem:[#allocation2 + $0x518] sm:$0x3] %v6571_v44  ;;  %6910 = vrot.lane.b32.xlu1 %v8857_v3, %s8867_s17  ;;  %v8715_v7 = vpack.c.bf16 %v7145_v54, %v7121_v31  ;;  %v8717_v0 = vpack.c.bf16 %v7144_v48, %v7120_v23  ;;  %v7029_v60 = vld [vmem:[#allocation2 + $0xb8] sm:$0xff]  ;;  %v7028_v52 = vld [vmem:[#allocation2 + $0xb0] sm:$0xff] }
 0x524   :  { %6908 = vrot.lane.b32.xlu0 %v11677_v62, %s8867_s17  ;;  %v8731_v3 = vpack.c.bf16 %v7053_v51, %v7029_v60  ;;  %v8733_v31 = vpack.c.bf16 %v7052_v50, %v7028_v52  ;;  %v7075_v54 = vld [vmem:[#allocation2 + $0x228] sm:$0xff] }
 0x525   :  { %v6680_v43 = vpop.permute.xlu1 %6679  ;;  %v6678_v47 = vpop.permute.xlu0 %6677  ;;  %8716 = vmatprep.subr.bf16.mxu1 %v8715_v7 }
 0x526   :  { %v6697_v5 = vsel %vm980_vm6, %v11792_v57, %v6678_v47  ;;  %v6698_v17 = vsel %vm980_vm6, %v6678_v47, %v6680_v43  ;;  %8718 = vmatpush1.bf16.msra.mxu1 %v8717_v0  ;;  %v7074_v0 = vld [vmem:[#allocation2 + $0x220] sm:$0xff] }
 0x527   :  { %6721 = vst [vmem:[#allocation2 + $0x500] sm:$0xc] %v6697_v5  ;;  %6722 = vst [vmem:[#allocation2 + $0x508] sm:$0xc] %v6698_v17  ;;  %6888 = vrot.lane.b32.xlu1 %v11677_v62, %s8866_s10 }
 0x528   :  { %6871 = vrot.lane.b32.xlu0 %v12031_v6, %s8865_s30 }
 0x529   :  { %v12042_v18 = vpop.permute.xlu1 %6683  ;;  %v6682_v9 = vpop.permute.xlu0 %6681 }
 0x52a   :  { %v6699_v28 = vsel %vm980_vm6, %v6680_v43, %v6682_v9  ;;  %v6700_v24 = vsel %vm980_vm6, %v6682_v9, %v12042_v18  ;;  %v7077_v9 = vld [vmem:[#allocation2 + $0x238] sm:$0xff] }
 0x52b   :  { %6723 = vst [vmem:[#allocation2 + $0x510] sm:$0xc] %v6699_v28  ;;  %6724 = vst [vmem:[#allocation2 + $0x518] sm:$0xc] %v6700_v24  ;;  %6925 = vrot.lane.b32.xlu1 %v11685_v32, %s8868_s22 }
 0x52c   :  { %6906 = vrot.lane.b32.xlu0 %v12031_v6, %s8867_s17 }
 0x52d   :  { %v6809_v57 = vpop.permute.xlu1 %6808  ;;  %v6807_v16 = vpop.permute.xlu0 %6806 }
 0x52e   :  { %v6826_v46 = vsel %vm1109_vm7, %v11813_v59, %v6807_v16  ;;  %v6827_v38 = vsel %vm1109_vm7, %v6807_v16, %v6809_v57  ;;  %v7076_v16 = vld [vmem:[#allocation2 + $0x230] sm:$0xff] }
 0x52f   :  { %6850 = vst [vmem:[#allocation2 + $0x500] sm:$0x30] %v6826_v46  ;;  %6851 = vst [vmem:[#allocation2 + $0x508] sm:$0x30] %v6827_v38  ;;  %6943 = vrot.lane.b32.xlu1 %v11677_v62, %s8869_s23 }
 0x530   :  { %6927 = vrot.lane.b32.xlu0 %v8534_v39, %s8868_s22 }
 0x531   :  { %v12063_v19 = vpop.permute.xlu1 %6812  ;;  %v6811_v35 = vpop.permute.xlu0 %6810 }
 0x532   :  { %v6828_v61 = vsel %vm1109_vm7, %v6809_v57, %v6811_v35  ;;  %v6829_v59 = vsel %vm1109_vm7, %v6811_v35, %v12063_v19 }
 0x533   :  { %6852 = vst [vmem:[#allocation2 + $0x510] sm:$0x30] %v6828_v61  ;;  %6853 = vst [vmem:[#allocation2 + $0x518] sm:$0x30] %v6829_v59  ;;  %6960 = vrot.lane.b32.xlu1 %v11685_v32, %s8870_s26  ;;  %v8542_v61 = vld [vmem:[%s12354_s3 + $0x14] sm:$0xf] }
 0x534   :  { %6945 = vrot.lane.b32.xlu0 %v8858_v21, %s8869_s23 }
 0x535   :  { %v5447_v1 = vpop.permute.xlu1 %5446  ;;  %v5445_v33 = vpop.permute.xlu0 %5444 }
 0x536   :  { %v5460_v40 = vsel %vm849_vm5, %v11846_v20, %v5445_v33  ;;  %v5461_v30 = vsel %vm849_vm5, %v5445_v33, %v5447_v1  ;;  %v7167_v37 = vld [vmem:[#allocation2 + $0x508] sm:$0x3f]  ;;  %v7166_v10 = vld [vmem:[#allocation2 + $0x500] sm:$0x3f]  ;;  %v8859_v20 = vld [vmem:[%s12354_s3 + $0x14] ss:$0 sps:$4 sm:$0xff]  }
 0x537   :  { %5484 = vst [vmem:[#allocation2 + $0x2e0] sm:$0xc0] %v5460_v40  ;;  %5485 = vst [vmem:[#allocation2 + $0x2e8] sm:$0xc0] %v5461_v30  ;;  %6978 = vrot.lane.b32.xlu1 %v11677_v62, %s8871_s27  ;;  %8567 = vmatprep.subr.msk.mxu0 %vm7205_vm8, %v7167_v37 }
 0x538   :  { %6962 = vrot.lane.b32.xlu0 %v8538_v55, %s8870_s26  ;;  %8568 = vmatpush1.msk.msra.mxu0 %vm7205_vm8, %v7166_v10 }
 0x539   :  { %v5451_v11 = vpop.permute.xlu1 %5450  ;;  %v5449_v53 = vpop.permute.xlu0 %5448  ;;  %8720 = vmatprep.subr.bf16.mxu0 %v8719_v45  ;;  %8569 = vmatmul.mubr.msk.f32.vlgmr.msra.gmra.mrb[8].mxu0 %vm7201_vm9, %v11854_v49 }
 0x53a   :  { %v5462_v27 = vsel %vm849_vm5, %v5447_v1, %v5449_v53  ;;  %v5463_v58 = vsel %vm849_vm5, %v5449_v53, %v5451_v11  ;;  %8722 = vmatpush1.bf16.msra.mxu0 %v8721_v25  ;;  %v7169_v4 = vld [vmem:[#allocation2 + $0x518] sm:$0x3f]  ;;  %v7168_v12 = vld [vmem:[#allocation2 + $0x510] sm:$0x3f]  ;;  %8052 = vmatprep.mubr.f32.mxu0 %v8873_v22  ;;  %v8874_v1 = vmov 0  }
 0x53b   :  { %5486 = vst [vmem:[#allocation2 + $0x2f0] sm:$0xc0] %v5462_v27  ;;  %5487 = vst [vmem:[#allocation2 + $0x2f8] sm:$0xc0] %v5463_v58  ;;  %6923 = vrot.lane.b32.xlu1 %v11677_v62, %s8868_s22  ;;  %8570 = vmatprep.subr.msk.mxu1 %vm7205_vm8, %v7169_v4 }
 0x53c   :  { %6980 = vrot.lane.b32.xlu0 %v8859_v20, %s8871_s27  ;;  %8571 = vmatpush1.msk.msra.mxu1 %vm7205_vm8, %v7168_v12 }
 0x53d   :  { %v5575_v56 = vpop.permute.xlu1 %5574  ;;  %v5573_v44 = vpop.permute.xlu0 %5572  ;;  %8732 = vmatprep.subr.bf16.mxu1 %v8731_v3  ;;  %8572 = vmatmul.mubr.msk.f32.vlgmr.msra.gmra.mrb[8].mxu1 %vm7201_vm9, %v11854_v49 }
 0x53e   :  { %v5588_v23 = vsel %vm980_vm6, %v11887_v42, %v5573_v44  ;;  %v5589_v48 = vsel %vm980_vm6, %v5573_v44, %v5575_v56  ;;  %8734 = vmatpush1.bf16.msra.mxu1 %v8733_v31  ;;  %v7099_v7 = vld [vmem:[#allocation2 + $0x2e8] sm:$0xff]  ;;  %v7098_v43 = vld [vmem:[#allocation2 + $0x2e0] sm:$0xff]  ;;  %8123 = vmatprep.mubr.f32.mxu1 %v8873_v22 }
 0x53f   :  { %5612 = vst [vmem:[#allocation2 + $0x3a0] sm:$0x3] %v5588_v23  ;;  %5613 = vst [vmem:[#allocation2 + $0x3a8] sm:$0x3] %v5589_v48  ;;  %6958 = vrot.lane.b32.xlu1 %v11677_v62, %s8870_s26  ;;  %v8723_v47 = vpack.c.bf16 %v7099_v7, %v7075_v54  ;;  %v8725_v5 = vpack.c.bf16 %v7098_v43, %v7074_v0  ;;  %8770 = vset.pattern.permute.xlu0 %v8874_v1 }
 0x540   :  { %6941 = vrot.lane.b32.xlu0 %v12031_v6, %s8869_s23  ;;  %8771 = vset.pattern.permute.xlu1 %v8874_v1 }
 0x541   :  { %v5579_v17 = vpop.permute.xlu1 %5578  ;;  %v5577_v42 = vpop.permute.xlu0 %5576  ;;  %8724 = vmatprep.subr.bf16.mxu0 %v8723_v47 }
 0x542   :  { %v5590_v28 = vsel %vm980_vm6, %v5575_v56, %v5577_v42  ;;  %v5591_v24 = vsel %vm980_vm6, %v5577_v42, %v5579_v17  ;;  %8726 = vmatpush1.bf16.msra.mxu0 %v8725_v5  ;;  %v7101_v57 = vld [vmem:[#allocation2 + $0x2f8] sm:$0xff]  ;;  %v7100_v39 = vld [vmem:[#allocation2 + $0x2f0] sm:$0xff] }
 0x543   :  { %5614 = vst [vmem:[#allocation2 + $0x3b0] sm:$0x3] %v5590_v28  ;;  %5615 = vst [vmem:[#allocation2 + $0x3b8] sm:$0x3] %v5591_v24  ;;  %6995 = vrot.lane.b32.xlu1 %v11685_v32, %s8872_s8  ;;  %v8735_v46 = vpack.c.bf16 %v7101_v57, %v7077_v9  ;;  %v8737_v38 = vpack.c.bf16 %v7100_v39, %v7076_v16  ;;  %v12119_v32 = vpop.f32.mrb[0].mxu0 }
 0x544   :  { %6976 = vrot.lane.b32.xlu0 %v12031_v6, %s8871_s27  ;;  %v12121_v6 = vpop.f32.mrb[0].mxu1  ;;  %v12135_v45 = vpop.f32.mrb[1].mxu0 }
 0x545   :  { %v5704_v21 = vpop.permute.xlu1 %5703  ;;  %v5702_v35 = vpop.permute.xlu0 %5701  ;;  %8736 = vmatprep.subr.bf16.mxu1 %v8735_v46 }
 0x546   :  { %v5717_v59 = vsel %vm1109_vm7, %v11910_v15, %v5702_v35  ;;  %v5718_v8 = vsel %vm1109_vm7, %v5702_v35, %v5704_v21  ;;  %8738 = vmatpush1.bf16.msra.mxu1 %v8737_v38  ;;  %v8154_v15 = vld [vmem:[%s12357_s5] sm:$0xff]  ;;  %v12137_v13 = vpop.f32.mrb[1].mxu1  ;;  %v12141_v53 = vpop.f32.mrb[2].mxu0 }
 0x547   :  { %5741 = vst [vmem:[#allocation2 + $0x3a0] sm:$0xc] %v5717_v59  ;;  %5742 = vst [vmem:[#allocation2 + $0x3a8] sm:$0xc] %v5718_v8  ;;  %6993 = vrot.lane.b32.xlu1 %v11677_v62, %s8872_s8  ;;  %v12143_v50 = vpop.f32.mrb[2].mxu1 }
 0x548   :  { %6997 = vrot.lane.b32.xlu0 %v8542_v61, %s8872_s8  ;;  %v12147_v27 = vpop.f32.mrb[3].mxu1 }
 0x549   :  { %v5708_v33 = vpop.permute.xlu1 %5707  ;;  %v5706_v55 = vpop.permute.xlu0 %5705 }
 0x54a   :  { %v5719_v62 = vsel %vm1109_vm7, %v5704_v21, %v5706_v55  ;;  %v5720_v40 = vsel %vm1109_vm7, %v5706_v55, %v5708_v33  ;;  %v12151_v4 = vpop.f32.mrb[4].mxu1 }
 0x54b   :  { %5743 = vst [vmem:[#allocation2 + $0x3b0] sm:$0xc] %v5719_v62  ;;  %5744 = vst [vmem:[#allocation2 + $0x3b8] sm:$0xc] %v5720_v40  ;;  %8157 = vperm.xlu1 %8771, %v8154_v15   ;;  %v12155_v52 = vpop.f32.mrb[5].mxu1 }
 0x54c   :  { %7198 = vperm.xlu0 %8770, %v7195_v41  }
 0x54d   :  { %v5915_v30 = vpop.permute.xlu1 %5914  ;;  %v5913_v37 = vpop.permute.xlu0 %5912 }
 0x54e   :  { %v5928_v10 = vsel %vm199_vm0, %v11934_v36, %v5913_v37  ;;  %v5929_v29 = vsel %vm199_vm0, %v5913_v37, %v5915_v30  ;;  %v12145_v36 = vpop.f32.mrb[3].mxu0 }
 0x54f   :  { %5952 = vst [vmem:[#allocation2 + $0x3a0] sm:$0xc0] %v5928_v10  ;;  %5953 = vst [vmem:[#allocation2 + $0x3a8] sm:$0xc0] %v5929_v29  ;;  %v12149_v58 = vpop.f32.mrb[4].mxu0 }
 0x550   :  { %v12153_v60 = vpop.f32.mrb[5].mxu0 }
 0x551   :  { %v5919_v25 = vpop.permute.xlu1 %5918  ;;  %v5917_v20 = vpop.permute.xlu0 %5916 }
 0x552   :  { %v5930_v51 = vsel %vm199_vm0, %v5915_v30, %v5917_v20  ;;  %v5931_v11 = vsel %vm199_vm0, %v5917_v20, %v5919_v25 }
 0x553   :  { %5954 = vst [vmem:[#allocation2 + $0x3b0] sm:$0xc0] %v5930_v51  ;;  %5955 = vst [vmem:[#allocation2 + $0x3b8] sm:$0xc0] %v5931_v11 }
 0x555   :  { %v6043_v12 = vpop.permute.xlu1 %6042 }
 0x556   :  { %v6041_v3 = vpop.permute.xlu0 %6040  ;;  %v7123_v55 = vld [vmem:[#allocation2 + $0x3a8] sm:$0xff]  ;;  %v7122_v40 = vld [vmem:[#allocation2 + $0x3a0] sm:$0xff] }
 0x557   :  { %v6056_v31 = vsel %vm329_vm1, %v11949_v14, %v6041_v3  ;;  %v6057_v56 = vsel %vm329_vm1, %v6041_v3, %v6043_v12 }
 0x558   :  { %6080 = vst [vmem:[#allocation2 + $0x460] sm:$0x3] %v6056_v31  ;;  %6081 = vst [vmem:[#allocation2 + $0x468] sm:$0x3] %v6057_v56 }
 0x559   :  { %v6047_v44 = vpop.permute.xlu1 %6046 }
 0x55a   :  { %v6045_v54 = vpop.permute.xlu0 %6044  ;;  %v7125_v20 = vld [vmem:[#allocation2 + $0x3b8] sm:$0xff] }
 0x55b   :  { %v6058_v23 = vsel %vm329_vm1, %v6043_v12, %v6045_v54  ;;  %v6059_v48 = vsel %vm329_vm1, %v6045_v54, %v6047_v44 }
 0x55c   :  { %6082 = vst [vmem:[#allocation2 + $0x470] sm:$0x3] %v6058_v23  ;;  %6083 = vst [vmem:[#allocation2 + $0x478] sm:$0x3] %v6059_v48 }
 0x55d   :  { %v6172_v7 = vpop.permute.xlu1 %6171 }
 0x55e   :  { %v6170_v0 = vpop.permute.xlu0 %6169 }
 0x55f   :  { %v6185_v43 = vsel %vm460_vm2, %v11968_v34, %v6170_v0  ;;  %v6186_v47 = vsel %vm460_vm2, %v6170_v0, %v6172_v7 }
 0x560   :  { %6209 = vst [vmem:[#allocation2 + $0x460] sm:$0xc] %v6185_v43  ;;  %6210 = vst [vmem:[#allocation2 + $0x468] sm:$0xc] %v6186_v47 }
 0x561   :  { %v6176_v14 = vpop.permute.xlu1 %6175 }
 0x562   :  { %v6174_v5 = vpop.permute.xlu0 %6173 }
 0x563   :  { %v6187_v17 = vsel %vm460_vm2, %v6172_v7, %v6174_v5  ;;  %v6188_v42 = vsel %vm460_vm2, %v6174_v5, %v6176_v14 }
 0x564   :  { %6211 = vst [vmem:[#allocation2 + $0x470] sm:$0xc] %v6187_v17  ;;  %6212 = vst [vmem:[#allocation2 + $0x478] sm:$0xc] %v6188_v42 }
 0x565   :  { %v6301_v9 = vpop.permute.xlu1 %6300 }
 0x566   :  { %v6299_v28 = vpop.permute.xlu0 %6298 }
 0x567   :  { %v6314_v24 = vsel %vm589_vm3, %v11984_v63, %v6299_v28  ;;  %v6315_v57 = vsel %vm589_vm3, %v6299_v28, %v6301_v9 }
 0x568   :  { %6338 = vst [vmem:[#allocation2 + $0x460] sm:$0x30] %v6314_v24  ;;  %6339 = vst [vmem:[#allocation2 + $0x468] sm:$0x30] %v6315_v57 }
 0x569   :  { %v6305_v34 = vpop.permute.xlu1 %6304 }
 0x56a   :  { %v6303_v16 = vpop.permute.xlu0 %6302 }
 0x56b   :  { %v6316_v39 = vsel %vm589_vm3, %v6301_v9, %v6303_v16  ;;  %v6317_v46 = vsel %vm589_vm3, %v6303_v16, %v6305_v34  ;;  %v7180_v34 = vld [vmem:[#allocation3 + $0x28] sm:$0xff] }
 0x56c   :  { %6340 = vst [vmem:[#allocation2 + $0x470] sm:$0x30] %v6316_v39  ;;  %6341 = vst [vmem:[#allocation2 + $0x478] sm:$0x30] %v6317_v46  ;;  %v7176_v39 = vld [vmem:[#allocation3 + $0x8] sm:$0xff]  ;;  %v7179_v46 = vld [vmem:[#allocation3 + $0x20] sm:$0xff] }
 0x56d   :  { %v6431_v38 = vpop.permute.xlu1 %6430 }
 0x56e   :  { %v6429_v21 = vpop.permute.xlu0 %6428 }
 0x56f   :  { %v6444_v35 = vsel %vm719_vm4, %v12003_v2, %v6429_v21  ;;  %v6445_v61 = vsel %vm719_vm4, %v6429_v21, %v6431_v38 }
 0x570   :  { %6468 = vst [vmem:[#allocation2 + $0x460] sm:$0xc0] %v6444_v35  ;;  %6469 = vst [vmem:[#allocation2 + $0x468] sm:$0xc0] %v6445_v61  ;;  %v7188_v35 = vld [vmem:[#allocation3 + $0x68] sm:$0xff]  ;;  %v8743_v61 = vpack.c.bf16 %v7180_v34, %v7176_v39 }
 0x571   :  { %v6435_v63 = vpop.permute.xlu1 %6434 }
 0x572   :  { %v6433_v59 = vpop.permute.xlu0 %6432 }
 0x573   :  { %v6446_v8 = vsel %vm719_vm4, %v6431_v38, %v6433_v59  ;;  %v6447_v1 = vsel %vm719_vm4, %v6433_v59, %v6435_v63  ;;  %v7175_v63 = vld [vmem:[#allocation3] sm:$0xff] }
 0x574   :  { %6470 = vst [vmem:[#allocation2 + $0x470] sm:$0xc0] %v6446_v8  ;;  %6471 = vst [vmem:[#allocation2 + $0x478] sm:$0xc0] %v6447_v1  ;;  %v8745_v8 = vpack.c.bf16 %v7179_v46, %v7175_v63  ;;  %v7184_v1 = vld [vmem:[#allocation3 + $0x48] sm:$0xff] }
 0x575   :  { %v6559_v15 = vpop.permute.xlu1 %6558 }
 0x576   :  { %v6557_v33 = vpop.permute.xlu0 %6556 }
 0x577   :  { %v6572_v41 = vsel %vm849_vm5, %v12023_v26, %v6557_v33  ;;  %v6573_v2 = vsel %vm849_vm5, %v6557_v33, %v6559_v15  ;;  %v7147_v62 = vld [vmem:[#allocation2 + $0x468] sm:$0xff]  ;;  %v7146_v30 = vld [vmem:[#allocation2 + $0x460] sm:$0xff]  ;;  %v7124_v26 = vld [vmem:[#allocation2 + $0x3b0] sm:$0xff]  ;;  %v8747_v33 = vpack.c.bf16 %v7188_v35, %v7184_v1 }
 0x578   :  { %6596 = vst [vmem:[#allocation2 + $0x520] sm:$0x3] %v6572_v41  ;;  %6597 = vst [vmem:[#allocation2 + $0x528] sm:$0x3] %v6573_v2  ;;  %v8727_v37 = vpack.c.bf16 %v7147_v62, %v7123_v55  ;;  %v8729_v10 = vpack.c.bf16 %v7146_v30, %v7122_v40  ;;  %v7187_v55 = vld [vmem:[#allocation3 + $0x60] sm:$0xff] }
 0x579   :  { %v6563_v29 = vpop.permute.xlu1 %6562  ;;  %v7183_v40 = vld [vmem:[#allocation3 + $0x40] sm:$0xff] }
 0x57a   :  { %v6561_v25 = vpop.permute.xlu0 %6560  ;;  %8728 = vmatprep.subr.bf16.mxu0 %v8727_v37  ;;  %v8749_v37 = vpack.c.bf16 %v7187_v55, %v7183_v40 }
 0x57b   :  { %v6574_v51 = vsel %vm849_vm5, %v6559_v15, %v6561_v25  ;;  %v6575_v11 = vsel %vm849_vm5, %v6561_v25, %v6563_v29  ;;  %8730 = vmatpush1.bf16.msra.mxu0 %v8729_v10  ;;  %v7149_v12 = vld [vmem:[#allocation2 + $0x478] sm:$0xff]  ;;  %v7148_v3 = vld [vmem:[#allocation2 + $0x470] sm:$0xff]  ;;  %v7192_v25 = vld [vmem:[#allocation3 + $0x88] sm:$0xf] }
 0x57c   :  { %6598 = vst [vmem:[#allocation2 + $0x530] sm:$0x3] %v6574_v51  ;;  %6599 = vst [vmem:[#allocation2 + $0x538] sm:$0x3] %v6575_v11  ;;  %v8739_v31 = vpack.c.bf16 %v7149_v12, %v7125_v20  ;;  %v8741_v56 = vpack.c.bf16 %v7148_v3, %v7124_v26  ;;  %v12209_v51 = vld [vmem:[%s12358_s4] sm:$0xff] }
 0x57d   :  { %v6688_v44 = vpop.permute.xlu1 %6687 }
 0x57e   :  { %v6686_v54 = vpop.permute.xlu0 %6685  ;;  %8740 = vmatprep.subr.bf16.mxu1 %v8739_v31 }
 0x57f   :  { %v6701_v23 = vsel %vm980_vm6, %v12042_v18, %v6686_v54  ;;  %v6702_v48 = vsel %vm980_vm6, %v6686_v54, %v6688_v44  ;;  %8742 = vmatpush1.bf16.msra.mxu1 %v8741_v56 }
 0x580   :  { %6725 = vst [vmem:[#allocation2 + $0x520] sm:$0xc] %v6701_v23  ;;  %6726 = vst [vmem:[#allocation2 + $0x528] sm:$0xc] %v6702_v48 }
 0x581   :  { %v6692_v7 = vpop.permute.xlu1 %6691 }
 0x582   :  { %v6690_v0 = vpop.permute.xlu0 %6689 }
 0x583   :  { %v6703_v43 = vsel %vm980_vm6, %v6688_v44, %v6690_v0  ;;  %v6704_v47 = vsel %vm980_vm6, %v6690_v0, %v6692_v7 }
 0x584   :  { %6727 = vst [vmem:[#allocation2 + $0x530] sm:$0xc] %v6703_v43  ;;  %6728 = vst [vmem:[#allocation2 + $0x538] sm:$0xc] %v6704_v47 }
 0x585   :  { %v6817_v14 = vpop.permute.xlu1 %6816 }
 0x586   :  { %v6815_v5 = vpop.permute.xlu0 %6814 }
 0x587   :  { %v6830_v17 = vsel %vm1109_vm7, %v12063_v19, %v6815_v5  ;;  %v6831_v18 = vsel %vm1109_vm7, %v6815_v5, %v6817_v14 }
 0x588   :  { %6854 = vst [vmem:[#allocation2 + $0x520] sm:$0x30] %v6830_v17  ;;  %6855 = vst [vmem:[#allocation2 + $0x528] sm:$0x30] %v6831_v18 }
 0x589   :  { %v6821_v42 = vpop.permute.xlu1 %6820 }
 0x58a   :  { %v6819_v9 = vpop.permute.xlu0 %6818 }
 0x58b   :  { %v6832_v28 = vsel %vm1109_vm7, %v6817_v14, %v6819_v9  ;;  %v6833_v24 = vsel %vm1109_vm7, %v6819_v9, %v6821_v42 }
 0x58c   :  { %6856 = vst [vmem:[#allocation2 + $0x530] sm:$0x30] %v6832_v28  ;;  %6857 = vst [vmem:[#allocation2 + $0x538] sm:$0x30] %v6833_v24 }
 0x58d   :  { %v6876_v57 = vpop.permute.xlu1 %6875 }
 0x58e   :  { %v6874_v16 = vpop.permute.xlu0 %6873 }
 0x58f   :  { %v6878_v38 = vsel %vm199_vm0, %v6874_v16, %v6876_v57  ;;  %v7171_v19 = vld [vmem:[#allocation2 + $0x528] sm:$0x3f]  ;;  %v7170_v21 = vld [vmem:[#allocation2 + $0x520] sm:$0x3f] }
 0x590   :  { %6882 = vst [vmem:[#allocation3 + $0x18] sm:$0xf0] %v6878_v38  ;;  %8573 = vmatprep.subr.msk.mxu0 %vm7205_vm8, %v7171_v19 }
 0x591   :  { %8574 = vmatpush1.msk.msra.mxu0 %vm7205_vm8, %v7170_v21  ;;  %v6893_v59 = vpop.permute.xlu1 %6892 }
 0x592   :  { %v6891_v15 = vpop.permute.xlu0 %6890  ;;  %8744 = vmatprep.subr.bf16.mxu0 %v8743_v61  ;;  %8575 = vmatmul.mubr.msk.f32.vlgmr.msra.gmra.mrb[10].mxu0 %vm7201_vm9, %v11854_v49 }
 0x593   :  { %v6895_v41 = vsel %vm329_vm1, %v6891_v15, %v6893_v59  ;;  %8746 = vmatpush1.bf16.msra.mxu0 %v8745_v8  ;;  %v7173_v2 = vld [vmem:[#allocation2 + $0x538] sm:$0x3f]  ;;  %v7172_v62 = vld [vmem:[#allocation2 + $0x530] sm:$0x3f]  ;;  %8241 = vmatprep.mubr.f32.mxu0 %v8873_v22 }
 0x594   :  { %6899 = vst [vmem:[#allocation3 + $0x38] sm:$0xf] %v6895_v41  ;;  %8576 = vmatprep.subr.msk.mxu1 %vm7205_vm8, %v7173_v2  ;;  %8748 = vmatprep.subr.bf16.mxu0 %v8747_v33 }
 0x595   :  { %8577 = vmatpush1.msk.msra.mxu1 %vm7205_vm8, %v7172_v62  ;;  %v6911_v30 = vpop.permute.xlu1 %6910 }
 0x596   :  { %v6909_v10 = vpop.permute.xlu0 %6908  ;;  %8578 = vmatmul.mubr.msk.f32.vlgmr.msra.gmra.mrb[10].mxu1 %vm7201_vm9, %v11854_v49  ;;  %v7191_v49 = vld [vmem:[#allocation3 + $0x80] sm:$0xf] }
 0x597   :  { %v6913_v29 = vsel %vm460_vm2, %v6909_v10, %v6911_v30  ;;  %8750 = vmatpush1.bf16.msra.mxu0 %v8749_v37  ;;  %8312 = vmatprep.mubr.f32.mxu1 %v8873_v22  ;;  %v7178_v56 = vld [vmem:[#allocation3 + $0x18] sm:$0xff] }
 0x598   :  { %6917 = vst [vmem:[#allocation3 + $0x38] sm:$0xf0] %v6913_v29  ;;  %8579 = vmatprep.subr.msk.mxu0 %vm8164_vm10, %v7192_v25 }
 0x599   :  { %v6889_v20 = vpop.permute.xlu1 %6888 }
 0x59a   :  { %v6894_v11 = vsel %vm329_vm1, %v6889_v20, %v6891_v15  ;;  %v6872_v12 = vpop.permute.xlu0 %6871 }
 0x59b   :  { %6898 = vst [vmem:[#allocation3 + $0x30] sm:$0xf] %v6894_v11  ;;  %v6877_v26 = vsel %vm199_vm0, %v6872_v12, %v6874_v16  ;;  %8580 = vmatpush1.msk.msra.mxu0 %vm8164_vm10, %v7191_v49 }
 0x59c   :  { %6881 = vst [vmem:[#allocation3 + $0x10] sm:$0xf0] %v6877_v26  ;;  %8581 = vmatmul.mubr.msk.f32.vlgmr.msra.gmra.mrb[12].mxu0 %vm8160_vm11, %v12209_v51 }
 0x59d   :  { %v6926_v22 = vpop.permute.xlu1 %6925 }
 0x59e   :  { %v6907_v3 = vpop.permute.xlu0 %6906 }
 0x59f   :  { %v6912_v31 = vsel %vm460_vm2, %v6907_v3, %v6909_v10  ;;  %v7182_v44 = vld [vmem:[#allocation3 + $0x38] sm:$0xff] }
 0x5a0   :  { %6916 = vst [vmem:[#allocation3 + $0x30] sm:$0xf0] %v6912_v31  ;;  %v8751_v54 = vpack.c.bf16 %v7182_v44, %v7178_v56 }
 0x5a1   :  { %v6944_v23 = vpop.permute.xlu1 %6943 }
 0x5a2   :  { %v6928_v48 = vpop.permute.xlu0 %6927  ;;  %8752 = vmatprep.subr.bf16.mxu1 %v8751_v54 }
 0x5a3   :  { %v6930_v7 = vsel %vm589_vm3, %v6926_v22, %v6928_v48  ;;  %v7177_v14 = vld [vmem:[#allocation3 + $0x10] sm:$0xff] }
 0x5a4   :  { %6934 = vst [vmem:[#allocation3 + $0x58] sm:$0xf] %v6930_v7 }
 0x5a5   :  { %v6961_v0 = vpop.permute.xlu1 %6960 }
 0x5a6   :  { %v6946_v43 = vpop.permute.xlu0 %6945 }
 0x5a7   :  { %v6948_v47 = vsel %vm719_vm4, %v6944_v23, %v6946_v43  ;;  %v7181_v5 = vld [vmem:[#allocation3 + $0x30] sm:$0xff] }
 0x5a8   :  { %6952 = vst [vmem:[#allocation3 + $0x58] sm:$0xf0] %v6948_v47  ;;  %v8753_v17 = vpack.c.bf16 %v7181_v5, %v7177_v14 }
 0x5a9   :  { %v6979_v18 = vpop.permute.xlu1 %6978 }
 0x5aa   :  { %v6963_v42 = vpop.permute.xlu0 %6962  ;;  %8754 = vmatpush1.bf16.msra.mxu1 %v8753_v17 }
 0x5ab   :  { %v6965_v9 = vsel %vm849_vm5, %v6961_v0, %v6963_v42 }
 0x5ac   :  { %6969 = vst [vmem:[#allocation3 + $0x78] sm:$0xf] %v6965_v9 }
 0x5ad   :  { %v6924_v28 = vpop.permute.xlu1 %6923 }
 0x5ae   :  { %v6929_v24 = vsel %vm589_vm3, %v6924_v28, %v6926_v22  ;;  %v6981_v57 = vpop.permute.xlu0 %6980 }
 0x5af   :  { %6933 = vst [vmem:[#allocation3 + $0x50] sm:$0xf] %v6929_v24  ;;  %v6983_v34 = vsel %vm980_vm6, %v6979_v18, %v6981_v57  ;;  %v7186_v59 = vld [vmem:[#allocation3 + $0x58] sm:$0xff] }
 0x5b0   :  { %6987 = vst [vmem:[#allocation3 + $0x78] sm:$0xf0] %v6983_v34 }
 0x5b1   :  { %v6959_v16 = vpop.permute.xlu1 %6958 }
 0x5b2   :  { %v6964_v39 = vsel %vm849_vm5, %v6959_v16, %v6961_v0  ;;  %v6942_v46 = vpop.permute.xlu0 %6941 }
 0x5b3   :  { %6968 = vst [vmem:[#allocation3 + $0x70] sm:$0xf] %v6964_v39  ;;  %v6947_v38 = vsel %vm719_vm4, %v6942_v46, %v6944_v23 }
 0x5b4   :  { %6951 = vst [vmem:[#allocation3 + $0x50] sm:$0xf0] %v6947_v38 }
 0x5b5   :  { %v6996_v19 = vpop.permute.xlu1 %6995  ;;  %v7841_v21 = vpop.f32.mrb[6].mxu1 }
 0x5b6   :  { %v6977_v35 = vpop.permute.xlu0 %6976  ;;  %v7843_v61 = vpop.f32.mrb[7].mxu1 }
 0x5b7   :  { %v6982_v63 = vsel %vm980_vm6, %v6977_v35, %v6979_v18  ;;  %v7190_v8 = vld [vmem:[#allocation3 + $0x78] sm:$0xff] }
 0x5b8   :  { %6986 = vst [vmem:[#allocation3 + $0x70] sm:$0xf0] %v6982_v63  ;;  %v8755_v1 = vpack.c.bf16 %v7190_v8, %v7186_v59 }
 0x5b9   :  { %v6994_v15 = vpop.permute.xlu1 %6993 }
 0x5ba   :  { %v6999_v33 = vsel %vm1109_vm7, %v6994_v15, %v6996_v19  ;;  %v6998_v55 = vpop.permute.xlu0 %6997  ;;  %8756 = vmatprep.subr.bf16.mxu1 %v8755_v1 }
 0x5bb   :  { %7003 = vst [vmem:[#allocation3 + $0x90] sm:$0xf] %v6999_v33  ;;  %v7000_v41 = vsel %vm1109_vm7, %v6996_v19, %v6998_v55  ;;  %v7185_v40 = vld [vmem:[#allocation3 + $0x50] sm:$0xff] }
 0x5bc   :  { %7004 = vst [vmem:[#allocation3 + $0x98] sm:$0xf] %v7000_v41  ;;  %v7770_v2 = vpop.f32.mrb[6].mxu0 }
 0x5bd   :  { %v7772_v62 = vpop.f32.mrb[7].mxu0 }
 0x5bf   :  { %v7189_v30 = vld [vmem:[#allocation3 + $0x70] sm:$0xff] }
 0x5c0   :  { %v8757_v37 = vpack.c.bf16 %v7189_v30, %v7185_v40 }
 0x5c2   :  { %8758 = vmatpush1.bf16.msra.mxu1 %v8757_v37  ;;  %v7193_v29 = vld [vmem:[#allocation3 + $0x90] sm:$0xf] }
 0x5c3   :  { %v7194_v10 = vld [vmem:[#allocation3 + $0x98] sm:$0xf] }
 0x5c4   :  { %8582 = vmatprep.subr.msk.mxu1 %vm8164_vm10, %v7194_v10 }
 0x5c6   :  { %8583 = vmatpush1.msk.msra.mxu1 %vm8164_vm10, %v7193_v29 }
 0x5c7   :  { %8584 = vmatmul.mubr.msk.f32.vlgmr.msra.gmra.mrb[12].mxu1 %vm8160_vm11, %v12209_v51 }
 0x5cb   :  { %v12231_v25 = vpop.permute.xlu0 %7198 }
 0x5cc   :  { %v7345_v20 = vadd.f32 %v12119_v32, %v12231_v25  ;;  %v7416_v11 = vadd.f32 %v12121_v6, %v12231_v25  ;;  %v7347_v12 = vadd.f32 %v12135_v45, %v12231_v25  ;;  %v7418_v49 = vadd.f32 %v12137_v13, %v12231_v25 }
 0x5cd   :  { %v7487_v26 = vadd.f32 %v12141_v53, %v12231_v25  ;;  %v7558_v51 = vadd.f32 %v12143_v50, %v12231_v25  ;;  %v7489_v22 = vadd.f32 %v12145_v36, %v12231_v25  ;;  %v7560_v32 = vadd.f32 %v12147_v27, %v12231_v25 }
 0x5ce   :  { %v8130_v3 = vmax.f32 %v7345_v20, 0.0  ;;  %v8132_v6 = vmax.f32 %v7416_v11, 0.0  ;;  %v8131_v31 = vmax.f32 %v7347_v12, 0.0  ;;  %v8133_v56 = vmax.f32 %v7418_v49, 0.0 }
 0x5cf   :  { %v8134_v45 = vmax.f32 %v7487_v26, 0.0  ;;  %v8136_v44 = vmax.f32 %v7558_v51, 0.0  ;;  %v8135_v54 = vmax.f32 %v7489_v22, 0.0  ;;  %v8137_v13 = vmax.f32 %v7560_v32, 0.0 }
 0x5d0   :  { %8323 = vst [vmem:[%s12359_s6] sm:$0xff] %v8130_v3  ;;  %8325 = vst [vmem:[%s12359_s6 + $0x10] sm:$0xff] %v8132_v6  ;;  %v7629_v53 = vadd.f32 %v12149_v58, %v12231_v25  ;;  %v7700_v50 = vadd.f32 %v12151_v4, %v12231_v25  ;;  %v7631_v36 = vadd.f32 %v12153_v60, %v12231_v25 }
 0x5d1   :  { %8324 = vst [vmem:[%s12359_s6 + $0x8] sm:$0xff] %v8131_v31  ;;  %8326 = vst [vmem:[%s12359_s6 + $0x18] sm:$0xff] %v8133_v56  ;;  %v7702_v27 = vadd.f32 %v12155_v52, %v12231_v25  ;;  %v7771_v58 = vadd.f32 %v7770_v2, %v12231_v25  ;;  %v7842_v4 = vadd.f32 %v7841_v21, %v12231_v25  ;;  %v8158_v2 = vpop.permute.xlu1 %8157 }
 0x5d2   :  { %8327 = vst [vmem:[%s12359_s6 + $0x20] sm:$0xff] %v8134_v45  ;;  %8329 = vst [vmem:[%s12359_s6 + $0x30] sm:$0xff] %v8136_v44  ;;  %v7773_v60 = vadd.f32 %v7772_v62, %v12231_v25  ;;  %v7844_v52 = vadd.f32 %v7843_v61, %v12231_v25  ;;  %v8138_v23 = vmax.f32 %v7629_v53, 0.0  ;;  %v8140_v48 = vmax.f32 %v7700_v50, 0.0 }
 0x5d3   :  { %8328 = vst [vmem:[%s12359_s6 + $0x28] sm:$0xff] %v8135_v54  ;;  %8330 = vst [vmem:[%s12359_s6 + $0x38] sm:$0xff] %v8137_v13  ;;  %v8139_v7 = vmax.f32 %v7631_v36, 0.0  ;;  %v8141_v0 = vmax.f32 %v7702_v27, 0.0  ;;  %v8142_v43 = vmax.f32 %v7771_v58, 0.0  ;;  %v8144_v47 = vmax.f32 %v7842_v4, 0.0 }
 0x5d4   :  { %v8143_v14 = vmax.f32 %v7773_v60, 0.0  ;;  %v8145_v5 = vmax.f32 %v7844_v52, 0.0  ;;  %8331 = vst [vmem:[%s12359_s6 + $0x40] sm:$0xff] %v8138_v23  ;;  %8333 = vst [vmem:[%s12359_s6 + $0x50] sm:$0xff] %v8140_v48 }
 0x5d5   :  { %8332 = vst [vmem:[%s12359_s6 + $0x48] sm:$0xff] %v8139_v7  ;;  %8334 = vst [vmem:[%s12359_s6 + $0x58] sm:$0xff] %v8141_v0 }
 0x5d6   :  { %8585 = vst [vmem:[%s12359_s6 + $0x60] sm:$0xff] %v8142_v43  ;;  %8587 = vst [vmem:[%s12359_s6 + $0x70] sm:$0xff] %v8144_v47 }
 0x5d7   :  { %8586 = vst [vmem:[%s12359_s6 + $0x68] sm:$0xff] %v8143_v14  ;;  %8588 = vst [vmem:[%s12359_s6 + $0x78] sm:$0xff] %v8145_v5 }
 0x60c   :  { %v7912_v17 = vpop.f32.mrb[8].mxu0 }
 0x60d   :  { %v7913_v18 = vadd.f32 %v7912_v17, %v12231_v25  ;;  %v7914_v42 = vpop.f32.mrb[9].mxu0 }
 0x60e   :  { %v7915_v9 = vadd.f32 %v7914_v42, %v12231_v25 }
 0x60f   :  { %v8146_v28 = vmax.f32 %v7913_v18, 0.0 }
 0x610   :  { %v7983_v24 = vpop.f32.mrb[8].mxu1  ;;  %v8147_v57 = vmax.f32 %v7915_v9, 0.0 }
 0x611   :  { %8589 = vst [vmem:[%s12359_s6 + $0x80] sm:$0xff] %v8146_v28  ;;  %v7984_v34 = vadd.f32 %v7983_v24, %v12231_v25  ;;  %v7985_v16 = vpop.f32.mrb[9].mxu1 }
 0x612   :  { %8590 = vst [vmem:[%s12359_s6 + $0x88] sm:$0xff] %v8147_v57  ;;  %v7986_v39 = vadd.f32 %v7985_v16, %v12231_v25 }
 0x613   :  { %v8148_v46 = vmax.f32 %v7984_v34, 0.0 }
 0x614   :  { %v8149_v38 = vmax.f32 %v7986_v39, 0.0 }
 0x615   :  { %8591 = vst [vmem:[%s12359_s6 + $0x90] sm:$0xff] %v8148_v46 }
 0x616   :  { %8592 = vst [vmem:[%s12359_s6 + $0x98] sm:$0xff] %v8149_v38 }
 0x665   :  { %v8054_v19 = vpop.f32.mrb[10].mxu0 }
 0x666   :  { %v8055_v21 = vadd.f32 %v8054_v19, %v12231_v25  ;;  %v8056_v35 = vpop.f32.mrb[11].mxu0 }
 0x667   :  { %v8057_v61 = vadd.f32 %v8056_v35, %v12231_v25 }
 0x668   :  { %v8150_v63 = vmax.f32 %v8055_v21, 0.0 }
 0x669   :  { %v8125_v59 = vpop.f32.mrb[10].mxu1  ;;  %v8151_v8 = vmax.f32 %v8057_v61, 0.0 }
 0x66a   :  { %8593 = vst [vmem:[%s12359_s6 + $0xa0] sm:$0xff] %v8150_v63  ;;  %v8126_v1 = vadd.f32 %v8125_v59, %v12231_v25  ;;  %v8127_v15 = vpop.f32.mrb[11].mxu1 }
 0x66b   :  { %8594 = vst [vmem:[%s12359_s6 + $0xa8] sm:$0xff] %v8151_v8  ;;  %v8128_v33 = vadd.f32 %v8127_v15, %v12231_v25 }
 0x66c   :  { %v8152_v55 = vmax.f32 %v8126_v1, 0.0 }
 0x66d   :  { %v8153_v41 = vmax.f32 %v8128_v33, 0.0 }
 0x66e   :  { %8595 = vst [vmem:[%s12359_s6 + $0xb0] sm:$0xff] %v8152_v55 }
 0x66f   :  { %8596 = vst [vmem:[%s12359_s6 + $0xb8] sm:$0xff] %v8153_v41  ;;  %v8243_v62 = vpop.f32.mrb[12].mxu0 }
 0x670   :  { %v8244_v40 = vadd.f32 %v8243_v62, %v8158_v2  ;;  %v8245_v30 = vpop.f32.mrb[13].mxu0 }
 0x671   :  { %v8246_v37 = vadd.f32 %v8245_v30, %v8158_v2 }
 0x672   :  { %v8319_v10 = vmax.f32 %v8244_v40, 0.0 }
 0x673   :  { %v8320_v29 = vmax.f32 %v8246_v37, 0.0 }
 0x674   :  { %8335 = vst [vmem:[%s12360_s7] sm:$0xff] %v8319_v10 }
 0x675   :  { %8336 = vst [vmem:[%s12360_s7 + $0x8] sm:$0xff] %v8320_v29 }
 0x69a   :  { %v8314_v25 = vpop.f32.mrb[12].mxu1 }
 0x69b   :  { %v8315_v20 = vadd.f32 %v8314_v25, %v8158_v2  ;;  %v8316_v11 = vpop.f32.mrb[13].mxu1 }
 0x69c   :  { %v8317_v12 = vadd.f32 %v8316_v11, %v8158_v2 }
 0x69d   :  { %v8321_v49 = vmax.f32 %v8315_v20, 0.0 }
 0x69e   :  { %v8322_v26 = vmax.f32 %v8317_v12, 0.0 }
 0x69f   :  { %8597 = vst [vmem:[%s12360_s7 + $0x10] sm:$0xff] %v8321_v49 }
 0x6a0   :  { %8598 = vst [vmem:[%s12360_s7 + $0x18] sm:$0xff] %v8322_v26 }

</bundles_post_ra>
